<compile_context>
chip_gen: v7x
topology: tpu7x:2x2x1
jax: 0.10.0
libtpu: 0.0.40
codegen_flags: <defaults>
</compile_context>

<pallas_src>
import jax
import jax.numpy as jnp
from jax.experimental import pallas as pl
from jax.experimental.pallas import tpu as pltpu

# Layer sizes of the autoencoder (encoder then decoder).
LAYER_DIMS = [784, 128, 64, 16, 64, 128, 784]


def _round_up(x, m):
    return ((x + m - 1) // m) * m


def autoencoder_kernel(x_ref,
                       w1, b1, w2, b2, w3, b3,
                       w4, b4, w5, b5, w6, b6,
                       out_ref):
    """One batch tile: 6 x (Linear -> ReLU). Weights resident, activations tiled."""
    h = x_ref[...]  # f32 (tile_b, 784)
    for w_ref, b_ref in ((w1, b1), (w2, b2), (w3, b3),
                         (w4, b4), (w5, b5), (w6, b6)):
        # bf16 operands, f32 accumulation on the MXU; bias + ReLU in f32 (VPU).
        h = jnp.dot(h.astype(jnp.bfloat16), w_ref[...],
                    preferred_element_type=jnp.float32) + b_ref[...]
        h = jnp.maximum(h, 0.0)
    out_ref[...] = h.astype(out_ref.dtype)  # (tile_b, 784), lane-dense store


def _pick_batch_tile(b_aligned, tile_b):
    """Sublane-aligned tile that divides the batch and gives >= 2 grid steps."""
    t = max(8, min(_round_up(tile_b, 8), b_aligned))
    # v7x: keep at least 2 grid steps so the "parallel" axis can shard across
    # both TensorCores (harmless on single-TC v5e/v6e).
    if b_aligned >= 16 and b_aligned // t < 2:
        t = _round_up(b_aligned // 2, 8)
    # Avoid computing / writing ghost rows: shrink until the tile divides the
    # 8-aligned batch (terminates at 8 since b_aligned % 8 == 0).
    while b_aligned % t:
        t -= 8
    return t


def autoencoder_forward(x, params, *, tile_b=512, out_dtype=jnp.float32):
    """x: (B, 784) float32. params: list of (W_t, b) with W_t: (in, out), b: (1, out)."""
    B, D = x.shape
    assert D == LAYER_DIMS[0]

    # Pad the batch only to the sublane multiple (usually a no-op).
    B_al = _round_up(B, 8)
    if B_al != B:
        # TODO(synk): a ragged tail tile would avoid even these <= 7 ghost rows.
        x = jnp.pad(x, ((0, B_al - B), (0, 0)))
    tile_b = _pick_batch_tile(B_al, tile_b)

    # Weights as bf16 MXU operands (tiny one-time conversion), biases in f32.
    flat_params = []
    for w, b in params:
        flat_params.extend([w.astype(jnp.bfloat16), b.astype(jnp.float32)])

    grid = (B_al // tile_b,)

    in_specs = [pl.BlockSpec((tile_b, D), lambda i: (i, 0))]
    for p in flat_params:
        # Constant block index -> DMA'd once, VMEM-resident across grid steps.
        in_specs.append(pl.BlockSpec(p.shape, lambda i: (0, 0)))

    out = pl.pallas_call(
        autoencoder_kernel,
        out_shape=jax.ShapeDtypeStruct((B_al, LAYER_DIMS[-1]), out_dtype),
        grid=grid,
        in_specs=in_specs,
        out_specs=pl.BlockSpec((tile_b, LAYER_DIMS[-1]), lambda i: (i, 0)),
        compiler_params=pltpu.CompilerParams(
            dimension_semantics=("parallel",)),
    )(x, *flat_params)

    if B_al != B:
        out = out[:B]
    return out


def init_params(key):
    """Deterministic init mimicking nn.Linear's kaiming-uniform style ranges."""
    params = []
    for li in range(len(LAYER_DIMS) - 1):
        fan_in, fan_out = LAYER_DIMS[li], LAYER_DIMS[li + 1]
        key, kw, kb = jax.random.split(key, 3)
        bound = 1.0 / jnp.sqrt(fan_in)
        # Stored pre-transposed: (in, out) so the kernel does x @ W.
        w_t = jax.random.uniform(kw, (fan_in, fan_out), jnp.float32, -bound, bound)
        b = jax.random.uniform(kb, (1, fan_out), jnp.float32, -bound, bound)
        params.append((w_t, b))
    return params


def reference_forward(x, params):
    """Full-f32 reference (HIGHEST matmul precision) matching the PyTorch module."""
    h = x
    for w, b in params:
        h = jnp.dot(h, w, precision=jax.lax.Precision.HIGHEST) + b
        h = jnp.maximum(h, 0.0)
    return h


if __name__ == "__main__":
    key = jax.random.PRNGKey(0)
    key, kx = jax.random.split(key)

    B = 1024  # two grid steps at tile_b=512 (exercises the parallel batch axis)
    x = jax.random.normal(kx, (B, 784), dtype=jnp.float32)
    params = init_params(key)

    out = autoencoder_forward(x, params)
    out = jax.block_until_ready(out)

    ref = reference_forward(x, params)
    assert out.shape == (B, 784), out.shape
    # bf16 MXU operands vs a true f32 reference: <~2% accumulated relative error
    # over 6 chained layers; final activations are O(1e-2), so this is safe.
    assert jnp.allclose(out, ref, atol=2e-2, rtol=2e-2), (
        "mismatch vs f32 reference: max abs err = "
        f"{jnp.max(jnp.abs(out - ref)):.3e}")

    print("KERNEL_OK")
</pallas_src>

<mosaic_0001>
module attributes {stable_mosaic.version = 11 : i64} {
  func.func @autoencoder_kernel(%arg0: i32, %arg1: memref<512x784xf32, #tpu.memory_space<vmem>>, %arg2: memref<784x128xbf16, #tpu.memory_space<vmem>>, %arg3: memref<1x128xf32, #tpu.memory_space<vmem>>, %arg4: memref<128x64xbf16, #tpu.memory_space<vmem>>, %arg5: memref<1x64xf32, #tpu.memory_space<vmem>>, %arg6: memref<64x16xbf16, #tpu.memory_space<vmem>>, %arg7: memref<1x16xf32, #tpu.memory_space<vmem>>, %arg8: memref<16x64xbf16, #tpu.memory_space<vmem>>, %arg9: memref<1x64xf32, #tpu.memory_space<vmem>>, %arg10: memref<64x128xbf16, #tpu.memory_space<vmem>>, %arg11: memref<1x128xf32, #tpu.memory_space<vmem>>, %arg12: memref<128x784xbf16, #tpu.memory_space<vmem>>, %arg13: memref<1x784xf32, #tpu.memory_space<vmem>>, %arg14: memref<512x784xf32, #tpu.memory_space<vmem>>) attributes {dimension_semantics = [#tpu.dimension_semantics<parallel>], iteration_bounds = array<i64: 2>, scalar_prefetch = 0 : i64, scratch_operands = 0 : i64, tpu.core_type = #tpu.core_type<tc>, window_params = [{transform_indices = @transform_0, window_bounds = array<i64: 512, 784>}, {pipeline_mode = #tpu.pipeline_mode<synchronous>, transform_indices = @transform_1, window_bounds = array<i64: 784, 128>}, {pipeline_mode = #tpu.pipeline_mode<synchronous>, transform_indices = @transform_2, window_bounds = array<i64: 1, 128>}, {pipeline_mode = #tpu.pipeline_mode<synchronous>, transform_indices = @transform_3, window_bounds = array<i64: 128, 64>}, {pipeline_mode = #tpu.pipeline_mode<synchronous>, transform_indices = @transform_4, window_bounds = array<i64: 1, 64>}, {pipeline_mode = #tpu.pipeline_mode<synchronous>, transform_indices = @transform_5, window_bounds = array<i64: 64, 16>}, {pipeline_mode = #tpu.pipeline_mode<synchronous>, transform_indices = @transform_6, window_bounds = array<i64: 1, 16>}, {pipeline_mode = #tpu.pipeline_mode<synchronous>, transform_indices = @transform_7, window_bounds = array<i64: 16, 64>}, {pipeline_mode = #tpu.pipeline_mode<synchronous>, transform_indices = @transform_8, window_bounds = array<i64: 1, 64>}, {pipeline_mode = #tpu.pipeline_mode<synchronous>, transform_indices = @transform_9, window_bounds = array<i64: 64, 128>}, {pipeline_mode = #tpu.pipeline_mode<synchronous>, transform_indices = @transform_10, window_bounds = array<i64: 1, 128>}, {pipeline_mode = #tpu.pipeline_mode<synchronous>, transform_indices = @transform_11, window_bounds = array<i64: 128, 784>}, {pipeline_mode = #tpu.pipeline_mode<synchronous>, transform_indices = @transform_12, window_bounds = array<i64: 1, 784>}, {transform_indices = @transform_13, window_bounds = array<i64: 512, 784>}]} {
    %c0 = arith.constant 0 : index
    %c0_0 = arith.constant 0 : index
    %0 = vector.load %arg1[%c0, %c0_0] : memref<512x784xf32, #tpu.memory_space<vmem>>, vector<512x784xf32>
    %1 = arith.truncf %0 : vector<512x784xf32> to vector<512x784xbf16>
    %c0_1 = arith.constant 0 : index
    %c0_2 = arith.constant 0 : index
    %2 = vector.load %arg2[%c0_1, %c0_2] : memref<784x128xbf16, #tpu.memory_space<vmem>>, vector<784x128xbf16>
    %cst = arith.constant dense<0.000000e+00> : vector<512x128xf32>
    %3 = tpu.matmul %1, %2, %cst {dimension_numbers = #tpu.dot_dimension_numbers<[1], [0], [0], [1], [0, 0, 1, 1], [], []>} : vector<512x784xbf16>, vector<784x128xbf16>, vector<512x128xf32> -> vector<512x128xf32>
    %c0_3 = arith.constant 0 : index
    %c0_4 = arith.constant 0 : index
    %4 = vector.load %arg3[%c0_3, %c0_4] : memref<1x128xf32, #tpu.memory_space<vmem>>, vector<1x128xf32>
    %5 = vector.broadcast %4 : vector<1x128xf32> to vector<512x128xf32>
    %6 = arith.addf %3, %5 : vector<512x128xf32>
    %cst_5 = arith.constant 0.000000e+00 : f32
    %7 = vector.broadcast %cst_5 : f32 to vector<512x128xf32>
    %8 = arith.maximumf %6, %7 : vector<512x128xf32>
    %9 = arith.truncf %8 : vector<512x128xf32> to vector<512x128xbf16>
    %c0_6 = arith.constant 0 : index
    %c0_7 = arith.constant 0 : index
    %10 = vector.load %arg4[%c0_6, %c0_7] : memref<128x64xbf16, #tpu.memory_space<vmem>>, vector<128x64xbf16>
    %cst_8 = arith.constant dense<0.000000e+00> : vector<512x64xf32>
    %11 = tpu.matmul %9, %10, %cst_8 {dimension_numbers = #tpu.dot_dimension_numbers<[1], [0], [0], [1], [0, 0, 1, 1], [], []>} : vector<512x128xbf16>, vector<128x64xbf16>, vector<512x64xf32> -> vector<512x64xf32>
    %c0_9 = arith.constant 0 : index
    %c0_10 = arith.constant 0 : index
    %12 = vector.load %arg5[%c0_9, %c0_10] : memref<1x64xf32, #tpu.memory_space<vmem>>, vector<1x64xf32>
    %13 = vector.broadcast %12 : vector<1x64xf32> to vector<512x64xf32>
    %14 = arith.addf %11, %13 : vector<512x64xf32>
    %cst_11 = arith.constant 0.000000e+00 : f32
    %15 = vector.broadcast %cst_11 : f32 to vector<512x64xf32>
    %16 = arith.maximumf %14, %15 : vector<512x64xf32>
    %17 = arith.truncf %16 : vector<512x64xf32> to vector<512x64xbf16>
    %c0_12 = arith.constant 0 : index
    %c0_13 = arith.constant 0 : index
    %18 = vector.load %arg6[%c0_12, %c0_13] : memref<64x16xbf16, #tpu.memory_space<vmem>>, vector<64x16xbf16>
    %cst_14 = arith.constant dense<0.000000e+00> : vector<512x16xf32>
    %19 = tpu.matmul %17, %18, %cst_14 {dimension_numbers = #tpu.dot_dimension_numbers<[1], [0], [0], [1], [0, 0, 1, 1], [], []>} : vector<512x64xbf16>, vector<64x16xbf16>, vector<512x16xf32> -> vector<512x16xf32>
    %c0_15 = arith.constant 0 : index
    %c0_16 = arith.constant 0 : index
    %20 = vector.load %arg7[%c0_15, %c0_16] : memref<1x16xf32, #tpu.memory_space<vmem>>, vector<1x16xf32>
    %21 = vector.broadcast %20 : vector<1x16xf32> to vector<512x16xf32>
    %22 = arith.addf %19, %21 : vector<512x16xf32>
    %cst_17 = arith.constant 0.000000e+00 : f32
    %23 = vector.broadcast %cst_17 : f32 to vector<512x16xf32>
    %24 = arith.maximumf %22, %23 : vector<512x16xf32>
    %25 = arith.truncf %24 : vector<512x16xf32> to vector<512x16xbf16>
    %c0_18 = arith.constant 0 : index
    %c0_19 = arith.constant 0 : index
    %26 = vector.load %arg8[%c0_18, %c0_19] : memref<16x64xbf16, #tpu.memory_space<vmem>>, vector<16x64xbf16>
    %cst_20 = arith.constant dense<0.000000e+00> : vector<512x64xf32>
    %27 = tpu.matmul %25, %26, %cst_20 {dimension_numbers = #tpu.dot_dimension_numbers<[1], [0], [0], [1], [0, 0, 1, 1], [], []>} : vector<512x16xbf16>, vector<16x64xbf16>, vector<512x64xf32> -> vector<512x64xf32>
    %c0_21 = arith.constant 0 : index
    %c0_22 = arith.constant 0 : index
    %28 = vector.load %arg9[%c0_21, %c0_22] : memref<1x64xf32, #tpu.memory_space<vmem>>, vector<1x64xf32>
    %29 = vector.broadcast %28 : vector<1x64xf32> to vector<512x64xf32>
    %30 = arith.addf %27, %29 : vector<512x64xf32>
    %cst_23 = arith.constant 0.000000e+00 : f32
    %31 = vector.broadcast %cst_23 : f32 to vector<512x64xf32>
    %32 = arith.maximumf %30, %31 : vector<512x64xf32>
    %33 = arith.truncf %32 : vector<512x64xf32> to vector<512x64xbf16>
    %c0_24 = arith.constant 0 : index
    %c0_25 = arith.constant 0 : index
    %34 = vector.load %arg10[%c0_24, %c0_25] : memref<64x128xbf16, #tpu.memory_space<vmem>>, vector<64x128xbf16>
    %cst_26 = arith.constant dense<0.000000e+00> : vector<512x128xf32>
    %35 = tpu.matmul %33, %34, %cst_26 {dimension_numbers = #tpu.dot_dimension_numbers<[1], [0], [0], [1], [0, 0, 1, 1], [], []>} : vector<512x64xbf16>, vector<64x128xbf16>, vector<512x128xf32> -> vector<512x128xf32>
    %c0_27 = arith.constant 0 : index
    %c0_28 = arith.constant 0 : index
    %36 = vector.load %arg11[%c0_27, %c0_28] : memref<1x128xf32, #tpu.memory_space<vmem>>, vector<1x128xf32>
    %37 = vector.broadcast %36 : vector<1x128xf32> to vector<512x128xf32>
    %38 = arith.addf %35, %37 : vector<512x128xf32>
    %cst_29 = arith.constant 0.000000e+00 : f32
    %39 = vector.broadcast %cst_29 : f32 to vector<512x128xf32>
    %40 = arith.maximumf %38, %39 : vector<512x128xf32>
    %41 = arith.truncf %40 : vector<512x128xf32> to vector<512x128xbf16>
    %c0_30 = arith.constant 0 : index
    %c0_31 = arith.constant 0 : index
    %42 = vector.load %arg12[%c0_30, %c0_31] : memref<128x784xbf16, #tpu.memory_space<vmem>>, vector<128x784xbf16>
    %cst_32 = arith.constant dense<0.000000e+00> : vector<512x784xf32>
    %43 = tpu.matmul %41, %42, %cst_32 {dimension_numbers = #tpu.dot_dimension_numbers<[1], [0], [0], [1], [0, 0, 1, 1], [], []>} : vector<512x128xbf16>, vector<128x784xbf16>, vector<512x784xf32> -> vector<512x784xf32>
    %c0_33 = arith.constant 0 : index
    %c0_34 = arith.constant 0 : index
    %44 = vector.load %arg13[%c0_33, %c0_34] : memref<1x784xf32, #tpu.memory_space<vmem>>, vector<1x784xf32>
    %45 = vector.broadcast %44 : vector<1x784xf32> to vector<512x784xf32>
    %46 = arith.addf %43, %45 : vector<512x784xf32>
    %cst_35 = arith.constant 0.000000e+00 : f32
    %47 = vector.broadcast %cst_35 : f32 to vector<512x784xf32>
    %48 = arith.maximumf %46, %47 : vector<512x784xf32>
    %c0_36 = arith.constant 0 : index
    %c0_37 = arith.constant 0 : index
    %49 = vector.load %arg14[%c0_36, %c0_37] : memref<512x784xf32, #tpu.memory_space<vmem>>, vector<512x784xf32>
    tpu.vector_store %arg14[%c0_36, %c0_37], %48 {strides = array<i32>} : memref<512x784xf32, #tpu.memory_space<vmem>>, vector<512x784xf32>,
    return
  }
  func.func @transform_0(%arg0: i32) -> (i32, i32) {
    %c0_i32 = arith.constant 0 : i32
    %c0_i32_0 = arith.constant 0 : i32
    return %arg0, %c0_i32 : i32, i32
  }
  func.func @transform_1(%arg0: i32) -> (i32, i32) {
    %c0_i32 = arith.constant 0 : i32
    %c0_i32_0 = arith.constant 0 : i32
    %c0_i32_1 = arith.constant 0 : i32
    return %c0_i32, %c0_i32_0 : i32, i32
  }
  func.func @transform_2(%arg0: i32) -> (i32, i32) {
    %c0_i32 = arith.constant 0 : i32
    %c0_i32_0 = arith.constant 0 : i32
    %c0_i32_1 = arith.constant 0 : i32
    return %c0_i32, %c0_i32_0 : i32, i32
  }
  func.func @transform_3(%arg0: i32) -> (i32, i32) {
    %c0_i32 = arith.constant 0 : i32
    %c0_i32_0 = arith.constant 0 : i32
    %c0_i32_1 = arith.constant 0 : i32
    return %c0_i32, %c0_i32_0 : i32, i32
  }
  func.func @transform_4(%arg0: i32) -> (i32, i32) {
    %c0_i32 = arith.constant 0 : i32
    %c0_i32_0 = arith.constant 0 : i32
    %c0_i32_1 = arith.constant 0 : i32
    return %c0_i32, %c0_i32_0 : i32, i32
  }
  func.func @transform_5(%arg0: i32) -> (i32, i32) {
    %c0_i32 = arith.constant 0 : i32
    %c0_i32_0 = arith.constant 0 : i32
    %c0_i32_1 = arith.constant 0 : i32
    return %c0_i32, %c0_i32_0 : i32, i32
  }
  func.func @transform_6(%arg0: i32) -> (i32, i32) {
    %c0_i32 = arith.constant 0 : i32
    %c0_i32_0 = arith.constant 0 : i32
    %c0_i32_1 = arith.constant 0 : i32
    return %c0_i32, %c0_i32_0 : i32, i32
  }
  func.func @transform_7(%arg0: i32) -> (i32, i32) {
    %c0_i32 = arith.constant 0 : i32
    %c0_i32_0 = arith.constant 0 : i32
    %c0_i32_1 = arith.constant 0 : i32
    return %c0_i32, %c0_i32_0 : i32, i32
  }
  func.func @transform_8(%arg0: i32) -> (i32, i32) {
    %c0_i32 = arith.constant 0 : i32
    %c0_i32_0 = arith.constant 0 : i32
    %c0_i32_1 = arith.constant 0 : i32
    return %c0_i32, %c0_i32_0 : i32, i32
  }
  func.func @transform_9(%arg0: i32) -> (i32, i32) {
    %c0_i32 = arith.constant 0 : i32
    %c0_i32_0 = arith.constant 0 : i32
    %c0_i32_1 = arith.constant 0 : i32
    return %c0_i32, %c0_i32_0 : i32, i32
  }
  func.func @transform_10(%arg0: i32) -> (i32, i32) {
    %c0_i32 = arith.constant 0 : i32
    %c0_i32_0 = arith.constant 0 : i32
    %c0_i32_1 = arith.constant 0 : i32
    return %c0_i32, %c0_i32_0 : i32, i32
  }
  func.func @transform_11(%arg0: i32) -> (i32, i32) {
    %c0_i32 = arith.constant 0 : i32
    %c0_i32_0 = arith.constant 0 : i32
    %c0_i32_1 = arith.constant 0 : i32
    return %c0_i32, %c0_i32_0 : i32, i32
  }
  func.func @transform_12(%arg0: i32) -> (i32, i32) {
    %c0_i32 = arith.constant 0 : i32
    %c0_i32_0 = arith.constant 0 : i32
    %c0_i32_1 = arith.constant 0 : i32
    return %c0_i32, %c0_i32_0 : i32, i32
  }
  func.func @transform_13(%arg0: i32) -> (i32, i32) {
    %c0_i32 = arith.constant 0 : i32
    %c0_i32_0 = arith.constant 0 : i32
    return %arg0, %c0_i32 : i32, i32
  }
}

</mosaic_0001>

<bundles_post_ra>
// kernel: tpu_custom_call.1
= control target key start
LH: loop header
LB: loop body
LE: loop exit
PB: predicated region body
PF: predicated region fallthrough
CT: control target
= control target key end

     0   :  { %s9046_s25 = smov 0   ;;  %s11926_s0 = inlined_call_operand.vmem [shape: f32[1024,784], index: 0, kind: input, shape index: {}]   ;;  %s11927_s1 = inlined_call_operand.vmem [shape: bf16[784,128], index: 1, kind: input, shape index: {}]   ;;  %s11928_s2 = inlined_call_operand.vmem [shape: f32[1,128], index: 2, kind: input, shape index: {}]   ;;  %s11929_s3 = inlined_call_operand.vmem [shape: bf16[128,64], index: 3, kind: input, shape index: {}]   ;;  %s11930_s4 = inlined_call_operand.vmem [shape: f32[1,64], index: 4, kind: input, shape index: {}]   ;;  %s11931_s5 = inlined_call_operand.vmem [shape: bf16[64,16], index: 5, kind: input, shape index: {}]   ;;  %s11932_s6 = inlined_call_operand.vmem [shape: f32[1,16], index: 6, kind: input, shape index: {}]   ;;  %s11933_s7 = inlined_call_operand.vmem [shape: bf16[16,64], index: 7, kind: input, shape index: {}]   ;;  %s11934_s8 = inlined_call_operand.vmem [shape: f32[1,64], index: 8, kind: input, shape index: {}]   ;;  %s11935_s9 = inlined_call_operand.vmem [shape: bf16[64,128], index: 9, kind: input, shape index: {}]   ;;  %s11936_s10 = inlined_call_operand.vmem [shape: f32[1,128], index: 10, kind: input, shape index: {}]   ;;  %s11937_s11 = inlined_call_operand.vmem [shape: bf16[128,784], index: 11, kind: input, shape index: {}]   ;;  %s11938_s12 = inlined_call_operand.vmem [shape: f32[1,784], index: 12, kind: input, shape index: {}]   ;;  %s11939_s13 = inlined_call_operand.vmem [shape: f32[1024,784], index: 13, kind: output, shape index: {}]  }
   0x1 LB: > { %s7554_s26 = sadd.s32 4294967295, %s8973_s25   ;;  %p7558_p0 = scmp.ge.s32.totalorder %s8973_s25, 1  ;;  %s8973_s25 = sphi %s9046_s25, %s23_s25  }
   0x2   : > { %p389_p1 = scmp.lt.s32.totalorder %s8973_s25, 3 }
   0x4   : > { %p390_p2 = pnand %p7558_p0, %p389_p1 }
   0x5   : > { %v8820_v0 = vld [vmem:[%s11927_s1] sm:$0xff] (!%p390_p2)   ;;  %v8975_v1 = vmov (!%p390_p2), 0   ;;  %s7559_s29 = sshll.u32 (!%p390_p2), %s7554_s26, 6  ;;  %v8821_v2 = vld [vmem:[%s11927_s1 + $0x8] sm:$0xff] (!%p390_p2)   ;;  %v8822_v3 = vld [vmem:[%s11927_s1 + $0x10] sm:$0xff] (!%p390_p2)   ;;  %vm1521_vm0 = vcmask (!%p390_p2), 130048  }
   0x6   : > { %393 = sbr.rel (%p390_p2) target bundleno = 2474 (0x9aa), region = 72  ;;  %1618 = vmatprep.subr.bf16.mxu0 (!%p390_p2), %v8975_v1  ;;  %p436_p3 = scmp.lt.s32.totalorder (!%p390_p2), %s7559_s29, 127  ;;  %v8823_v4 = vld [vmem:[%s11927_s1 + $0x18] sm:$0xff] (!%p390_p2)   ;;  %v8824_v5 = vld [vmem:[%s11927_s1 + $0x20] sm:$0xff] (!%p390_p2)   ;;  %v8825_v9 = vld [vmem:[%s11927_s1 + $0x28] sm:$0xff] (!%p390_p2)   ;;  %vm3365_vm1 = vcmask (!%p390_p2), 523264  }
   0x7   : > { %1619 = vmatpush1.bf16.msra.mxu0 (!%p390_p2), %v8820_v0  ;;  %v8826_v10 = vld [vmem:[%s11927_s1 + $0x30] sm:$0xff] (!%p390_p2)   ;;  %v8827_v11 = vld [vmem:[%s11927_s1 + $0x38] sm:$0xff] (!%p390_p2)   ;;  %v8828_v12 = vld [vmem:[%s11927_s1 + $0x40] sm:$0xff] (!%p390_p2)  }
   0x8   : > { %1620 = vmatprep.subr.bf16.mxu0 (!%p390_p2), %v8975_v1  ;;  %v8829_v13 = vld [vmem:[%s11927_s1 + $0x48] sm:$0xff] (!%p390_p2)   ;;  %v8830_v14 = vld [vmem:[%s11927_s1 + $0x50] sm:$0xff] (!%p390_p2)   ;;  %v8831_v15 = vld [vmem:[%s11927_s1 + $0x58] sm:$0xff] (!%p390_p2)  }
   0x9   : > { %v8832_v16 = vld [vmem:[%s11927_s1 + $0x60] sm:$0xff] (!%p390_p2)   ;;  %v8833_v17 = vld [vmem:[%s11927_s1 + $0x68] sm:$0xff] (!%p390_p2)   ;;  %v8834_v18 = vld [vmem:[%s11927_s1 + $0x70] sm:$0xff] (!%p390_p2)  }
   0xa   : > { %v8835_v19 = vld [vmem:[%s11927_s1 + $0x78] sm:$0xff] (!%p390_p2)   ;;  %v8836_v24 = vld [vmem:[%s11927_s1 + $0x80] sm:$0xff] (!%p390_p2)   ;;  %v8837_v31 = vld [vmem:[%s11927_s1 + $0x88] sm:$0xff] (!%p390_p2)  }
   0xb   : > { %1621 = vmatpush1.bf16.msra.mxu0 (!%p390_p2), %v8821_v2  ;;  %v8838_v32 = vld [vmem:[%s11927_s1 + $0x90] sm:$0xff] (!%p390_p2)   ;;  %v8839_v39 = vld [vmem:[%s11927_s1 + $0x98] sm:$0xff] (!%p390_p2)   ;;  %v8840_v40 = vld [vmem:[%s11927_s1 + $0xa0] sm:$0xff] (!%p390_p2)  }
   0xc   : > { %1622 = vmatprep.subr.bf16.mxu0 (!%p390_p2), %v8975_v1  ;;  %v8841_v47 = vld [vmem:[%s11927_s1 + $0xa8] sm:$0xff] (!%p390_p2)   ;;  %v8842_v48 = vld [vmem:[%s11927_s1 + $0xb0] sm:$0xff] (!%p390_p2)   ;;  %v8843_v55 = vld [vmem:[%s11927_s1 + $0xb8] sm:$0xff] (!%p390_p2)  }
   0xd   : > { %s11941_s29 = smov (!%p436_p3, %s7559_s29), 127  ;;  %v8844_v56 = vld [vmem:[%s11927_s1 + $0xc0] sm:$0xff]   ;;  %v8845_v63 = vld [vmem:[%s11927_s1 + $0xc8] sm:$0xff]   ;;  %v8846_v0 = vld [vmem:[%s11927_s1 + $0xd0] sm:$0xff]  }
   0xe   : > { %s8810_s17 = smul.u32 56, %s11941_s29 }
   0xf   : > { %1623 = vmatpush1.bf16.msra.mxu0 %v8822_v3 }
  0x10   : > { %1624 = vmatprep.subr.bf16.mxu0 %v8975_v1  ;;  %s9078_s22 = scalar_lea.vmem %s11926_s0, %s8810_s17 }
  0x11   : > { %v451_v6 = vld [vmem:[%s9078_s22 + $0x8] sm:$0xff]  ;;  %v458_v7 = vld [vmem:[%s9078_s22 + $0x40] sm:$0xff]  ;;  %v457_v21 = vld [vmem:[%s9078_s22 + $0x38] sm:$0xff] }
  0x12   : > { %v899_v8 = vpack.c.bf16 %v458_v7, %v451_v6  ;;  %v450_v20 = vld [vmem:[%s9078_s22] sm:$0xff]  ;;  %v465_v22 = vld [vmem:[%s9078_s22 + $0x78] sm:$0xff]  ;;  %v472_v23 = vld [vmem:[%s9078_s22 + $0xb0] sm:$0xff] }
  0x13   : > { %1625 = vmatpush1.bf16.msra.mxu0 %v8823_v4  ;;  %v898_v25 = vpack.c.bf16 %v457_v21, %v450_v20  ;;  %v906_v26 = vpack.c.bf16 %v472_v23, %v465_v22  ;;  %v464_v27 = vld [vmem:[%s9078_s22 + $0x70] sm:$0xff]  ;;  %v471_v28 = vld [vmem:[%s9078_s22 + $0xa8] sm:$0xff]  ;;  %v486_v30 = vld [vmem:[%s9078_s22 + $0x120] sm:$0xff] }
  0x14   : > { %1626 = vmatprep.subr.bf16.mxu0 %v8975_v1  ;;  %1650 = vmatprep.mubr.bf16.mxu0 %v899_v8  ;;  %v479_v29 = vld [vmem:[%s9078_s22 + $0xe8] sm:$0xff]  ;;  %v905_v33 = vpack.c.bf16 %v471_v28, %v464_v27  ;;  %v478_v35 = vld [vmem:[%s9078_s22 + $0xe0] sm:$0xff]  ;;  %v485_v36 = vld [vmem:[%s9078_s22 + $0x118] sm:$0xff] }
  0x15   : > { %v913_v34 = vpack.c.bf16 %v486_v30, %v479_v29  ;;  %v493_v37 = vld [vmem:[%s9078_s22 + $0x158] sm:$0xff]  ;;  %v500_v38 = vld [vmem:[%s9078_s22 + $0x190] sm:$0xff]  ;;  %v912_v41 = vpack.c.bf16 %v485_v36, %v478_v35  ;;  %v499_v44 = vld [vmem:[%s9078_s22 + $0x188] sm:$0xff] }
  0x16   : > { %v920_v42 = vpack.c.bf16 %v500_v38, %v493_v37  ;;  %v492_v43 = vld [vmem:[%s9078_s22 + $0x150] sm:$0xff]  ;;  %v507_v45 = vld [vmem:[%s9078_s22 + $0x1c8] sm:$0xff]  ;;  %v514_v46 = vld [vmem:[%s9078_s22 + $0x200] sm:$0xff] }
  0x17   : > { %1627 = vmatpush1.bf16.msra.mxu0 %v8824_v5  ;;  %v919_v49 = vpack.c.bf16 %v499_v44, %v492_v43  ;;  %v927_v50 = vpack.c.bf16 %v514_v46, %v507_v45  ;;  %v506_v51 = vld [vmem:[%s9078_s22 + $0x1c0] sm:$0xff]  ;;  %v513_v52 = vld [vmem:[%s9078_s22 + $0x1f8] sm:$0xff]  ;;  %v528_v54 = vld [vmem:[%s9078_s22 + $0x270] sm:$0xff] }
  0x18   : > { %1628 = vmatprep.subr.bf16.mxu0 %v8975_v1  ;;  %v521_v53 = vld [vmem:[%s9078_s22 + $0x238] sm:$0xff]  ;;  %v926_v57 = vpack.c.bf16 %v513_v52, %v506_v51  ;;  %v520_v59 = vld [vmem:[%s9078_s22 + $0x230] sm:$0xff]  ;;  %v527_v60 = vld [vmem:[%s9078_s22 + $0x268] sm:$0xff] }
  0x19   : > { %v934_v58 = vpack.c.bf16 %v528_v54, %v521_v53  ;;  %v535_v61 = vld [vmem:[%s9078_s22 + $0x2a8] sm:$0xff]  ;;  %v542_v62 = vld [vmem:[%s9078_s22 + $0x2e0] sm:$0xff]  ;;  %v933_v2 = vpack.c.bf16 %v527_v60, %v520_v59  ;;  %v541_v5 = vld [vmem:[%s9078_s22 + $0x2d8] sm:$0xff] }
  0x1a   : > { %v941_v3 = vpack.c.bf16 %v542_v62, %v535_v61  ;;  %v534_v4 = vld [vmem:[%s9078_s22 + $0x2a0] sm:$0xff]  ;;  %v549_v6 = vld [vmem:[%s9078_s22 + $0x318] sm:$0xff]  ;;  %v556_v7 = vld [vmem:[%s9078_s22 + $0x350] sm:$0xff] }
  0x1b   : > { %1629 = vmatpush1.bf16.msra.mxu0 %v8825_v9  ;;  %v940_v8 = vpack.c.bf16 %v541_v5, %v534_v4  ;;  %v948_v9 = vpack.c.bf16 %v556_v7, %v549_v6  ;;  %v584_v20 = vld [vmem:[%s9078_s22 + $0x430] sm:$0xff]  ;;  %v8848_v23 = vld [vmem:[%s11927_s1 + $0xe0] sm:$0xff]   ;;  %v8849_v36 = vld [vmem:[%s11927_s1 + $0xe8] sm:$0xff]  }
  0x1c   : > { %1630 = vmatprep.subr.bf16.mxu0 %v8975_v1  ;;  %v598_v27 = vld [vmem:[%s9078_s22 + $0x4a0] sm:$0xff]  ;;  %v604_v37 = vld [vmem:[%s9078_s22 + $0x4d0] sm:$0xff]  ;;  %v611_v38 = vld [vmem:[%s9078_s22 + $0x508] sm:$0xff] }
  0x1d   : > { %v590_v30 = vld [vmem:[%s9078_s22 + $0x460] sm:$0xff]  ;;  %v625_v44 = vld [vmem:[%s9078_s22 + $0x578] sm:$0xff]  ;;  %v640_v46 = vld [vmem:[%s9078_s22 + $0x5f0] sm:$0xff] }
  0x1e   : > { %v618_v43 = vld [vmem:[%s9078_s22 + $0x540] sm:$0xff]  ;;  %v633_v45 = vld [vmem:[%s9078_s22 + $0x5b8] sm:$0xff]  ;;  %v639_v51 = vld [vmem:[%s9078_s22 + $0x5e8] sm:$0xff] }
  0x1f   : > { %1631 = vmatpush1.bf16.msra.mxu0 %v8826_v10  ;;  %v8847_v10 = vld [vmem:[%s11927_s1 + $0xd8] sm:$0xff]   ;;  %v647_v52 = vld [vmem:[%s9078_s22 + $0x628] sm:$0xff]  ;;  %v654_v53 = vld [vmem:[%s9078_s22 + $0x660] sm:$0xff] }
  0x20   : > { %1632 = vmatprep.subr.bf16.mxu0 %v8975_v1  ;;  %v668_v59 = vld [vmem:[%s9078_s22 + $0x6d0] sm:$0xff]  ;;  %v8851_v62 = vld [vmem:[%s11927_s1 + $0xf8] sm:$0xff]   ;;  %v674_v6 = vld [vmem:[%s9078_s22 + $0x700] sm:$0xff] }
  0x21   : > { %v681_v7 = vld [vmem:[%s9078_s22 + $0x738] sm:$0xff] }
  0x23   : > { %1633 = vmatpush1.bf16.msra.mxu0 %v8827_v11  ;;  %v548_v11 = vld [vmem:[%s9078_s22 + $0x310] sm:$0xff] }
  0x24   : > { %1634 = vmatprep.subr.bf16.mxu0 %v8975_v1 }
  0x27   : > { %1635 = vmatpush1.bf16.msra.mxu0 %v8828_v12  ;;  %v555_v12 = vld [vmem:[%s9078_s22 + $0x348] sm:$0xff] }
  0x28   : > { %1636 = vmatprep.subr.bf16.mxu0 %v8975_v1 }
  0x2b   : > { %1637 = vmatpush1.bf16.msra.mxu0 %v8829_v13  ;;  %v563_v13 = vld [vmem:[%s9078_s22 + $0x388] sm:$0xff] }
  0x2c   : > { %1638 = vmatprep.subr.bf16.mxu0 %v8975_v1 }
  0x2f   : > { %1639 = vmatpush1.bf16.msra.mxu0 %v8830_v14  ;;  %v570_v14 = vld [vmem:[%s9078_s22 + $0x3c0] sm:$0xff] }
  0x30   : > { %1640 = vmatprep.subr.bf16.mxu0 %v8975_v1 }
  0x33   : > { %1641 = vmatpush1.bf16.msra.mxu0 %v8831_v15  ;;  %v947_v15 = vpack.c.bf16 %v555_v12, %v548_v11  ;;  %v688_v12 = vld [vmem:[%s9078_s22 + $0x770] sm:$0xff] }
  0x34   : > { %1642 = vmatprep.subr.bf16.mxu0 %v8975_v1 }
  0x37   : > { %1643 = vmatpush1.bf16.msra.mxu0 %v8832_v16  ;;  %v955_v16 = vpack.c.bf16 %v570_v14, %v563_v13  ;;  %v695_v13 = vld [vmem:[%s9078_s22 + $0x7a8] sm:$0xff] }
  0x38   : > { %1644 = vmatprep.subr.bf16.mxu0 %v8975_v1  ;;  %v703_v14 = vld [vmem:[%s9078_s22 + $0x7e8] sm:$0xff] }
  0x3b   : > { %1645 = vmatpush1.bf16.msra.mxu0 %v8833_v17  ;;  %v562_v17 = vld [vmem:[%s9078_s22 + $0x380] sm:$0xff] }
  0x3c   : > { %1646 = vmatprep.subr.bf16.mxu0 %v8975_v1 }
  0x3f   : > { %1647 = vmatpush1.bf16.msra.mxu0 %v8834_v18  ;;  %v569_v18 = vld [vmem:[%s9078_s22 + $0x3b8] sm:$0xff] }
  0x40   : > { %1648 = vmatprep.subr.bf16.mxu0 %v8975_v1  ;;  %v954_v21 = vpack.c.bf16 %v569_v18, %v562_v17  ;;  %v702_v18 = vld [vmem:[%s9078_s22 + $0x7e0] sm:$0xff] }
  0x43   : > { %1649 = vmatpush1.bf16.msra.mxu0 %v8835_v19  ;;  %v577_v19 = vld [vmem:[%s9078_s22 + $0x3f8] sm:$0xff] }
  0x44   : > { %1907 = vmatprep.subr.bf16.mxu0 %v8975_v1  ;;  %v962_v22 = vpack.c.bf16 %v584_v20, %v577_v19  ;;  %v709_v19 = vld [vmem:[%s9078_s22 + $0x818] sm:$0xff] }
  0x45   : > { %v717_v20 = vld [vmem:[%s9078_s22 + $0x858] sm:$0xff] }
  0x46   : > { %1651 = vmatmul.mubr.bf16.vlgmr.msra.gmra.mrb[0].mxu0 %v898_v25  ;;  %v583_v25 = vld [vmem:[%s9078_s22 + $0x428] sm:$0xff] }
  0x47   : > { %1908 = vmatpush1.bf16.msra.mxu0 %v8836_v24  ;;  %1658 = vmatprep.mubr.bf16.mxu0 %v906_v26  ;;  %v576_v24 = vld [vmem:[%s9078_s22 + $0x3f0] sm:$0xff]  ;;  %v591_v26 = vld [vmem:[%s9078_s22 + $0x468] sm:$0xff] }
  0x48   : > { %1909 = vmatprep.subr.bf16.mxu0 %v8975_v1  ;;  %v961_v28 = vpack.c.bf16 %v583_v25, %v576_v24  ;;  %v969_v29 = vpack.c.bf16 %v598_v27, %v591_v26  ;;  %v716_v24 = vld [vmem:[%s9078_s22 + $0x850] sm:$0xff]  ;;  %v723_v25 = vld [vmem:[%s9078_s22 + $0x888] sm:$0xff]  ;;  %v738_v27 = vld [vmem:[%s9078_s22 + $0x900] sm:$0xff] }
  0x49   : > { %v731_v26 = vld [vmem:[%s9078_s22 + $0x8c8] sm:$0xff] }
  0x4b   : > { %1910 = vmatpush1.bf16.msra.mxu0 %v8837_v31  ;;  %v597_v31 = vld [vmem:[%s9078_s22 + $0x498] sm:$0xff] }
  0x4c   : > { %1911 = vmatprep.subr.bf16.mxu0 %v8975_v1 }
  0x4e   : > { %1659 = vmatmul.mubr.bf16.gmra.mrb[4].mxu0 %v905_v33  ;;  %v612_v33 = vld [vmem:[%s9078_s22 + $0x510] sm:$0xff] }
  0x4f   : > { %1666 = vmatprep.mubr.bf16.mxu0 %v913_v34  ;;  %1912 = vmatpush1.bf16.msra.mxu0 %v8838_v32  ;;  %v605_v32 = vld [vmem:[%s9078_s22 + $0x4d8] sm:$0xff]  ;;  %v968_v34 = vpack.c.bf16 %v597_v31, %v590_v30  ;;  %v730_v30 = vld [vmem:[%s9078_s22 + $0x8c0] sm:$0xff] }
  0x50   : > { %1913 = vmatprep.subr.bf16.mxu0 %v8975_v1  ;;  %v976_v35 = vpack.c.bf16 %v612_v33, %v605_v32  ;;  %v737_v31 = vld [vmem:[%s9078_s22 + $0x8f8] sm:$0xff]  ;;  %v752_v33 = vld [vmem:[%s9078_s22 + $0x970] sm:$0xff] }
  0x51   : > { %v745_v32 = vld [vmem:[%s9078_s22 + $0x938] sm:$0xff] }
  0x53   : > { %1914 = vmatpush1.bf16.msra.mxu0 %v8839_v39  ;;  %v619_v39 = vld [vmem:[%s9078_s22 + $0x548] sm:$0xff] }
  0x54   : > { %1915 = vmatprep.subr.bf16.mxu0 %v8975_v1 }
  0x56   : > { %1667 = vmatmul.mubr.bf16.gmra.mrb[8].mxu0 %v912_v41  ;;  %v975_v41 = vpack.c.bf16 %v611_v38, %v604_v37  ;;  %v751_v37 = vld [vmem:[%s9078_s22 + $0x968] sm:$0xff] }
  0x57   : > { %1674 = vmatprep.mubr.bf16.mxu0 %v920_v42  ;;  %1916 = vmatpush1.bf16.msra.mxu0 %v8840_v40  ;;  %v626_v40 = vld [vmem:[%s9078_s22 + $0x580] sm:$0xff]  ;;  %v759_v38 = vld [vmem:[%s9078_s22 + $0x9a8] sm:$0xff] }
  0x58   : > { %1917 = vmatprep.subr.bf16.mxu0 %v8975_v1  ;;  %v983_v42 = vpack.c.bf16 %v626_v40, %v619_v39  ;;  %v766_v39 = vld [vmem:[%s9078_s22 + $0x9e0] sm:$0xff] }
  0x5b   : > { %1918 = vmatpush1.bf16.msra.mxu0 %v8841_v47  ;;  %v982_v47 = vpack.c.bf16 %v625_v44, %v618_v43  ;;  %v765_v43 = vld [vmem:[%s9078_s22 + $0x9d8] sm:$0xff] }
  0x5c   : > { %1919 = vmatprep.subr.bf16.mxu0 %v8975_v1  ;;  %v773_v44 = vld [vmem:[%s9078_s22 + $0xa18] sm:$0xff] }
  0x5e   : > { %1675 = vmatmul.mubr.bf16.gmra.mrb[12].mxu0 %v919_v49  ;;  %v8850_v49 = vld [vmem:[%s11927_s1 + $0xf0] sm:$0xff]  }
  0x5f   : > { %1682 = vmatprep.mubr.bf16.mxu0 %v927_v50  ;;  %1920 = vmatpush1.bf16.msra.mxu0 %v8842_v48  ;;  %v990_v48 = vpack.c.bf16 %v640_v46, %v633_v45  ;;  %v632_v50 = vld [vmem:[%s9078_s22 + $0x5b0] sm:$0xff] }
  0x60   : > { %1921 = vmatprep.subr.bf16.mxu0 %v8975_v1  ;;  %v989_v54 = vpack.c.bf16 %v639_v51, %v632_v50  ;;  %v780_v45 = vld [vmem:[%s9078_s22 + $0xa50] sm:$0xff]  ;;  %v787_v50 = vld [vmem:[%s9078_s22 + $0xa88] sm:$0xff]  ;;  %v794_v51 = vld [vmem:[%s9078_s22 + $0xac0] sm:$0xff] }
  0x63   : > { %1922 = vmatpush1.bf16.msra.mxu0 %v8843_v55  ;;  %v997_v55 = vpack.c.bf16 %v654_v53, %v647_v52  ;;  %v1067_v53 = vpack.c.bf16 %v794_v51, %v787_v50  ;;  %v488_v50 = vld [vmem:[%s9078_s22 + $0x130] sm:$0xff] }
  0x64   : > { %1923 = vmatprep.subr.bf16.mxu0 %v8975_v1 }
  0x66   : > { %1683 = vmatmul.mubr.bf16.gmra.mrb[16].mxu0 %v926_v57  ;;  %v653_v57 = vld [vmem:[%s9078_s22 + $0x658] sm:$0xff] }
  0x67   : > { %1690 = vmatprep.mubr.bf16.mxu0 %v934_v58  ;;  %1924 = vmatpush1.bf16.msra.mxu0 %v8844_v56  ;;  %v646_v56 = vld [vmem:[%s9078_s22 + $0x620] sm:$0xff]  ;;  %v661_v58 = vld [vmem:[%s9078_s22 + $0x698] sm:$0xff] }
  0x68   : > { %1925 = vmatprep.subr.bf16.mxu0 %v8975_v1  ;;  %v996_v60 = vpack.c.bf16 %v653_v57, %v646_v56  ;;  %v1004_v61 = vpack.c.bf16 %v668_v59, %v661_v58  ;;  %v801_v56 = vld [vmem:[%s9078_s22 + $0xaf8] sm:$0xff]  ;;  %v808_v57 = vld [vmem:[%s9078_s22 + $0xb30] sm:$0xff] }
  0x69   : > { %v1074_v59 = vpack.c.bf16 %v808_v57, %v801_v56  ;;  %v8855_v56 = vld [vmem:[%s11927_s1 + $0x118] sm:$0xff]   ;;  %v495_v57 = vld [vmem:[%s9078_s22 + $0x168] sm:$0xff] }
  0x6b   : > { %1926 = vmatpush1.bf16.msra.mxu0 %v8845_v63  ;;  %v660_v63 = vld [vmem:[%s9078_s22 + $0x690] sm:$0xff] }
  0x6c   : > { %1927 = vmatprep.subr.bf16.mxu0 %v8975_v1 }
  0x6e   : > { %1691 = vmatmul.mubr.bf16.gmra.mrb[20].mxu0 %v933_v2  ;;  %v675_v2 = vld [vmem:[%s9078_s22 + $0x708] sm:$0xff] }
  0x6f   : > { %1698 = vmatprep.mubr.bf16.mxu0 %v941_v3  ;;  %1928 = vmatpush1.bf16.msra.mxu0 %v8846_v0  ;;  %v667_v0 = vld [vmem:[%s9078_s22 + $0x6c8] sm:$0xff]  ;;  %v682_v3 = vld [vmem:[%s9078_s22 + $0x740] sm:$0xff] }
  0x70   : > { %1929 = vmatprep.subr.bf16.mxu0 %v8975_v1  ;;  %v1003_v4 = vpack.c.bf16 %v667_v0, %v660_v63  ;;  %v1011_v5 = vpack.c.bf16 %v682_v3, %v675_v2  ;;  %v822_v63 = vld [vmem:[%s9078_s22 + $0xba0] sm:$0xff] }
  0x71   : > { %v814_v3 = vld [vmem:[%s9078_s22 + $0xb60] sm:$0xff] }
  0x73   : > { %1930 = vmatpush1.bf16.msra.mxu0 %v8847_v10  ;;  %v1010_v10 = vpack.c.bf16 %v681_v7, %v674_v6  ;;  %v836_v6 = vld [vmem:[%s9078_s22 + $0xc10] sm:$0xff] }
  0x74   : > { %1931 = vmatprep.subr.bf16.mxu0 %v8975_v1 }
  0x76   : > { %1699 = vmatmul.mubr.bf16.gmra.mrb[24].mxu0 %v940_v8  ;;  %v689_v8 = vld [vmem:[%s9078_s22 + $0x778] sm:$0xff] }
  0x77   : > { %1706 = vmatprep.mubr.bf16.mxu0 %v948_v9  ;;  %1932 = vmatpush1.bf16.msra.mxu0 %v8848_v23  ;;  %v696_v9 = vld [vmem:[%s9078_s22 + $0x7b0] sm:$0xff] }
  0x78   : > { %1933 = vmatprep.subr.bf16.mxu0 %v8975_v1  ;;  %v1018_v11 = vpack.c.bf16 %v696_v9, %v689_v8  ;;  %v828_v9 = vld [vmem:[%s9078_s22 + $0xbd0] sm:$0xff] }
  0x7b   : > { %1934 = vmatpush1.bf16.msra.mxu0 %v8849_v36  ;;  %v744_v36 = vld [vmem:[%s9078_s22 + $0x930] sm:$0xff] }
  0x7c   : > { %1935 = vmatprep.subr.bf16.mxu0 %v8975_v1  ;;  %v1045_v40 = vpack.c.bf16 %v751_v37, %v744_v36  ;;  %v460_v36 = vld [vmem:[%s9078_s22 + $0x50] sm:$0xff] }
  0x7e   : > { %1707 = vmatmul.mubr.bf16.gmra.mrb[28].mxu0 %v947_v15  ;;  %v710_v15 = vld [vmem:[%s9078_s22 + $0x820] sm:$0xff] }
  0x7f   : > { %1714 = vmatprep.mubr.bf16.mxu0 %v955_v16  ;;  %1936 = vmatpush1.bf16.msra.mxu0 %v8850_v49  ;;  %v1017_v16 = vpack.c.bf16 %v695_v13, %v688_v12  ;;  %v1025_v17 = vpack.c.bf16 %v710_v15, %v703_v14  ;;  %v779_v49 = vld [vmem:[%s9078_s22 + $0xa48] sm:$0xff]  ;;  %v850_v12 = vld [vmem:[%s9078_s22 + $0xc80] sm:$0xff] }
  0x80   : > { %1937 = vmatprep.subr.bf16.mxu0 %v8975_v1  ;;  %v842_v15 = vld [vmem:[%s9078_s22 + $0xc40] sm:$0xff] }
  0x83   : > { %1938 = vmatpush1.bf16.msra.mxu0 %v8851_v62  ;;  %v815_v62 = vld [vmem:[%s9078_s22 + $0xb68] sm:$0xff] }
  0x84   : > { %2196 = vmatprep.subr.bf16.mxu0 %v8975_v1  ;;  %v1081_v2 = vpack.c.bf16 %v822_v63, %v815_v62  ;;  %v494_v62 = vld [vmem:[%s9078_s22 + $0x160] sm:$0xff]  ;;  %v501_v63 = vld [vmem:[%s9078_s22 + $0x198] sm:$0xff] }
  0x86   : > { %1715 = vmatmul.mubr.bf16.gmra.mrb[32].mxu0 %v954_v21  ;;  %v724_v21 = vld [vmem:[%s9078_s22 + $0x890] sm:$0xff] }
  0x87   : > { %1722 = vmatprep.mubr.bf16.mxu0 %v962_v22  ;;  %v1024_v22 = vpack.c.bf16 %v709_v19, %v702_v18  ;;  %v1032_v23 = vpack.c.bf16 %v724_v21, %v717_v20  ;;  %v864_v18 = vld [vmem:[%s9078_s22 + $0xcf0] sm:$0xff] }
  0x88   : > { %v856_v21 = vld [vmem:[%s9078_s22 + $0xcb0] sm:$0xff] }
  0x8e   : > { %1723 = vmatmul.mubr.bf16.gmra.mrb[36].mxu0 %v961_v28  ;;  %v1031_v28 = vpack.c.bf16 %v723_v25, %v716_v24  ;;  %v878_v24 = vld [vmem:[%s9078_s22 + $0xd60] sm:$0xff] }
  0x8f   : > { %1730 = vmatprep.mubr.bf16.mxu0 %v969_v29  ;;  %v1039_v29 = vpack.c.bf16 %v738_v27, %v731_v26  ;;  %v870_v27 = vld [vmem:[%s9078_s22 + $0xd20] sm:$0xff] }
  0x96   : > { %1731 = vmatmul.mubr.bf16.gmra.mrb[40].mxu0 %v968_v34  ;;  %v1038_v34 = vpack.c.bf16 %v737_v31, %v730_v30  ;;  %v892_v30 = vld [vmem:[%s9078_s22 + $0xdd0] sm:$0xff] }
  0x97   : > { %1738 = vmatprep.mubr.bf16.mxu0 %v976_v35  ;;  %v1046_v35 = vpack.c.bf16 %v752_v33, %v745_v32  ;;  %v884_v33 = vld [vmem:[%s9078_s22 + $0xd90] sm:$0xff] }
  0x9e   : > { %1739 = vmatmul.mubr.bf16.gmra.mrb[44].mxu0 %v975_v41  ;;  %v1053_v41 = vpack.c.bf16 %v766_v39, %v759_v38  ;;  %v452_v39 = vld [vmem:[%s9078_s22 + $0x10] sm:$0xff] }
  0x9f   : > { %1746 = vmatprep.mubr.bf16.mxu0 %v983_v42  ;;  %v758_v42 = vld [vmem:[%s9078_s22 + $0x9a0] sm:$0xff] }
  0xa0   : > { %v1052_v46 = vpack.c.bf16 %v765_v43, %v758_v42  ;;  %v474_v42 = vld [vmem:[%s9078_s22 + $0xc0] sm:$0xff] }
  0xa6   : > { %1747 = vmatmul.mubr.bf16.gmra.mrb[48].mxu0 %v982_v47  ;;  %v1060_v47 = vpack.c.bf16 %v780_v45, %v773_v44  ;;  %v8852_v44 = vld [vmem:[%s11927_s1 + $0x100] sm:$0xff]  }
  0xa7   : > { %1754 = vmatprep.mubr.bf16.mxu0 %v990_v48  ;;  %v772_v48 = vld [vmem:[%s9078_s22 + $0xa10] sm:$0xff] }
  0xa8   : > { %v1059_v52 = vpack.c.bf16 %v779_v49, %v772_v48  ;;  %v8853_v48 = vld [vmem:[%s11927_s1 + $0x108] sm:$0xff]   ;;  %v481_v49 = vld [vmem:[%s9078_s22 + $0xf8] sm:$0xff] }
  0xae   : > { %1755 = vmatmul.mubr.bf16.gmra.mrb[52].mxu0 %v989_v54  ;;  %v786_v54 = vld [vmem:[%s9078_s22 + $0xa80] sm:$0xff] }
  0xaf   : > { %1762 = vmatprep.mubr.bf16.mxu0 %v997_v55  ;;  %v793_v55 = vld [vmem:[%s9078_s22 + $0xab8] sm:$0xff] }
  0xb0   : > { %v1066_v58 = vpack.c.bf16 %v793_v55, %v786_v54  ;;  %v480_v54 = vld [vmem:[%s9078_s22 + $0xf0] sm:$0xff]  ;;  %v487_v55 = vld [vmem:[%s9078_s22 + $0x128] sm:$0xff] }
  0xb6   : > { %1763 = vmatmul.mubr.bf16.gmra.mrb[56].mxu0 %v996_v60  ;;  %v800_v60 = vld [vmem:[%s9078_s22 + $0xaf0] sm:$0xff] }
  0xb7   : > { %1770 = vmatprep.mubr.bf16.mxu0 %v1004_v61  ;;  %v807_v61 = vld [vmem:[%s9078_s22 + $0xb28] sm:$0xff] }
  0xb8   : > { %v1073_v0 = vpack.c.bf16 %v807_v61, %v800_v60  ;;  %v8856_v61 = vld [vmem:[%s11927_s1 + $0x120] sm:$0xff]  }
  0xbe   : > { %1771 = vmatmul.mubr.bf16.gmra.mrb[60].mxu0 %v1003_v4  ;;  %v821_v4 = vld [vmem:[%s9078_s22 + $0xb98] sm:$0xff] }
  0xbf   : > { %1778 = vmatprep.mubr.bf16.mxu0 %v1011_v5  ;;  %v829_v5 = vld [vmem:[%s9078_s22 + $0xbd8] sm:$0xff]  ;;  %v1080_v7 = vpack.c.bf16 %v821_v4, %v814_v3  ;;  %v516_v3 = vld [vmem:[%s9078_s22 + $0x210] sm:$0xff]  ;;  %v921_v4 = vpack.c.bf16 %v501_v63, %v494_v62  ;;  %v627_v63 = vld [vmem:[%s9078_s22 + $0x588] sm:$0xff] }
  0xc0   : > { %v1088_v8 = vpack.c.bf16 %v836_v6, %v829_v5  ;;  %v8858_v6 = vld [vmem:[%s11927_s1 + $0x130] sm:$0xff]  }
  0xc1   : > { %v620_v62 = vld [vmem:[%s9078_s22 + $0x550] sm:$0xff] }
  0xc6   : > { %1779 = vmatmul.mubr.bf16.gmra.mrb[64].mxu0 %v1010_v10  ;;  %v835_v10 = vld [vmem:[%s9078_s22 + $0xc08] sm:$0xff] }
  0xc7   : > { %1786 = vmatprep.mubr.bf16.mxu0 %v1018_v11  ;;  %v843_v11 = vld [vmem:[%s9078_s22 + $0xc48] sm:$0xff]  ;;  %v1087_v13 = vpack.c.bf16 %v835_v10, %v828_v9  ;;  %v8859_v9 = vld [vmem:[%s11927_s1 + $0x138] sm:$0xff]  }
  0xc8   : > { %v1095_v14 = vpack.c.bf16 %v850_v12, %v843_v11  ;;  %v523_v10 = vld [vmem:[%s9078_s22 + $0x248] sm:$0xff]  ;;  %v530_v11 = vld [vmem:[%s9078_s22 + $0x280] sm:$0xff] }
  0xce   : > { %1787 = vmatmul.mubr.bf16.gmra.mrb[68].mxu0 %v1017_v16  ;;  %v849_v16 = vld [vmem:[%s9078_s22 + $0xc78] sm:$0xff] }
  0xcf   : > { %1794 = vmatprep.mubr.bf16.mxu0 %v1025_v17  ;;  %v857_v17 = vld [vmem:[%s9078_s22 + $0xcb8] sm:$0xff]  ;;  %v1094_v19 = vpack.c.bf16 %v849_v16, %v842_v15  ;;  %v522_v15 = vld [vmem:[%s9078_s22 + $0x240] sm:$0xff] }
  0xd0   : > { %v1102_v20 = vpack.c.bf16 %v864_v18, %v857_v17  ;;  %v529_v16 = vld [vmem:[%s9078_s22 + $0x278] sm:$0xff]  ;;  %v8861_v17 = vld [vmem:[%s11927_s1 + $0x148] sm:$0xff]  }
  0xd1   : > { %v537_v18 = vld [vmem:[%s9078_s22 + $0x2b8] sm:$0xff] }
  0xd6   : > { %1795 = vmatmul.mubr.bf16.gmra.mrb[72].mxu0 %v1024_v22  ;;  %v863_v22 = vld [vmem:[%s9078_s22 + $0xce8] sm:$0xff] }
  0xd7   : > { %1802 = vmatprep.mubr.bf16.mxu0 %v1032_v23  ;;  %v871_v23 = vld [vmem:[%s9078_s22 + $0xd28] sm:$0xff]  ;;  %v1101_v25 = vpack.c.bf16 %v863_v22, %v856_v21  ;;  %v8862_v22 = vld [vmem:[%s11927_s1 + $0x150] sm:$0xff]  }
  0xd8   : > { %v1109_v26 = vpack.c.bf16 %v878_v24, %v871_v23  ;;  %v536_v23 = vld [vmem:[%s9078_s22 + $0x2b0] sm:$0xff]  ;;  %v543_v24 = vld [vmem:[%s9078_s22 + $0x2e8] sm:$0xff] }
  0xde   : > { %1803 = vmatmul.mubr.bf16.gmra.mrb[76].mxu0 %v1031_v28  ;;  %v877_v28 = vld [vmem:[%s9078_s22 + $0xd58] sm:$0xff] }
  0xdf   : > { %1810 = vmatprep.mubr.bf16.mxu0 %v1039_v29  ;;  %v885_v29 = vld [vmem:[%s9078_s22 + $0xd98] sm:$0xff]  ;;  %v1108_v31 = vpack.c.bf16 %v877_v28, %v870_v27  ;;  %v942_v27 = vpack.c.bf16 %v543_v24, %v536_v23 }
  0xe0   : > { %v1116_v32 = vpack.c.bf16 %v892_v30, %v885_v29  ;;  %v8863_v29 = vld [vmem:[%s11927_s1 + $0x158] sm:$0xff]   ;;  %v550_v30 = vld [vmem:[%s9078_s22 + $0x320] sm:$0xff] }
  0xe6   : > { %1811 = vmatmul.mubr.bf16.gmra.mrb[80].mxu0 %v1038_v34  ;;  %v891_v34 = vld [vmem:[%s9078_s22 + $0xdc8] sm:$0xff] }
  0xe7   : > { %1818 = vmatprep.mubr.bf16.mxu0 %v1046_v35  ;;  %v453_v35 = vld [vmem:[%s9078_s22 + $0x18] sm:$0xff]  ;;  %v1115_v37 = vpack.c.bf16 %v891_v34, %v884_v33  ;;  %v572_v33 = vld [vmem:[%s9078_s22 + $0x3d0] sm:$0xff] }
  0xe8   : > { %v901_v38 = vpack.c.bf16 %v460_v36, %v453_v35  ;;  %v564_v36 = vld [vmem:[%s9078_s22 + $0x390] sm:$0xff] }
  0xee   : > { %1819 = vmatmul.mubr.bf16.gmra.mrb[84].mxu0 %v1045_v40  ;;  %v459_v40 = vld [vmem:[%s9078_s22 + $0x48] sm:$0xff] }
  0xef   : > { %1826 = vmatprep.mubr.bf16.mxu0 %v1053_v41  ;;  %v467_v41 = vld [vmem:[%s9078_s22 + $0x88] sm:$0xff]  ;;  %v900_v43 = vpack.c.bf16 %v459_v40, %v452_v39  ;;  %v586_v39 = vld [vmem:[%s9078_s22 + $0x440] sm:$0xff] }
  0xf0   : > { %v908_v45 = vpack.c.bf16 %v474_v42, %v467_v41  ;;  %v8864_v42 = vld [vmem:[%s11927_s1 + $0x160] sm:$0xff]  }
  0xf6   : > { %1827 = vmatmul.mubr.bf16.gmra.mrb[88].mxu0 %v1052_v46  ;;  %v466_v46 = vld [vmem:[%s9078_s22 + $0x80] sm:$0xff] }
  0xf7   : > { %1834 = vmatprep.mubr.bf16.mxu0 %v1060_v47  ;;  %v473_v47 = vld [vmem:[%s9078_s22 + $0xb8] sm:$0xff] }
  0xf8   : > { %v907_v51 = vpack.c.bf16 %v473_v47, %v466_v46  ;;  %v600_v46 = vld [vmem:[%s9078_s22 + $0x4b0] sm:$0xff] }
  0xfe   : > { %1835 = vmatmul.mubr.bf16.gmra.mrb[92].mxu0 %v1059_v52  ;;  %v915_v52 = vpack.c.bf16 %v488_v50, %v481_v49  ;;  %v592_v49 = vld [vmem:[%s9078_s22 + $0x470] sm:$0xff]  ;;  %v599_v50 = vld [vmem:[%s9078_s22 + $0x4a8] sm:$0xff] }
  0xff   : > { %1842 = vmatprep.mubr.bf16.mxu0 %v1067_v53  ;;  %v8854_v53 = vld [vmem:[%s11927_s1 + $0x110] sm:$0xff]  }
 0x106   : > { %1843 = vmatmul.mubr.bf16.gmra.mrb[96].mxu0 %v1066_v58  ;;  %v502_v58 = vld [vmem:[%s9078_s22 + $0x1a0] sm:$0xff] }
 0x107   : > { %1850 = vmatprep.mubr.bf16.mxu0 %v1074_v59  ;;  %v914_v59 = vpack.c.bf16 %v487_v55, %v480_v54  ;;  %v922_v60 = vpack.c.bf16 %v502_v58, %v495_v57  ;;  %v8865_v55 = vld [vmem:[%s11927_s1 + $0x168] sm:$0xff]   ;;  %v613_v57 = vld [vmem:[%s9078_s22 + $0x518] sm:$0xff] }
 0x108   : > { %v621_v58 = vld [vmem:[%s9078_s22 + $0x558] sm:$0xff] }
 0x10e   : > { %1851 = vmatmul.mubr.bf16.gmra.mrb[100].mxu0 %v1073_v0  ;;  %v8857_v0 = vld [vmem:[%s11927_s1 + $0x128] sm:$0xff]  }
 0x10f   : > { %1858 = vmatprep.mubr.bf16.mxu0 %v1081_v2  ;;  %v509_v2 = vld [vmem:[%s9078_s22 + $0x1d8] sm:$0xff] }
 0x110   : > { %v929_v5 = vpack.c.bf16 %v516_v3, %v509_v2  ;;  %v642_v2 = vld [vmem:[%s9078_s22 + $0x600] sm:$0xff]  ;;  %v984_v3 = vpack.c.bf16 %v627_v63, %v620_v62  ;;  %v732_v62 = vld [vmem:[%s9078_s22 + $0x8d0] sm:$0xff]  ;;  %v739_v63 = vld [vmem:[%s9078_s22 + $0x908] sm:$0xff] }
 0x116   : > { %1859 = vmatmul.mubr.bf16.gmra.mrb[104].mxu0 %v1080_v7  ;;  %v508_v7 = vld [vmem:[%s9078_s22 + $0x1d0] sm:$0xff] }
 0x117   : > { %1866 = vmatprep.mubr.bf16.mxu0 %v1088_v8  ;;  %v515_v8 = vld [vmem:[%s9078_s22 + $0x208] sm:$0xff] }
 0x118   : > { %v928_v12 = vpack.c.bf16 %v515_v8, %v508_v7  ;;  %v641_v7 = vld [vmem:[%s9078_s22 + $0x5f8] sm:$0xff] }
 0x119   : > { %v649_v8 = vld [vmem:[%s9078_s22 + $0x638] sm:$0xff] }
 0x11e   : > { %1867 = vmatmul.mubr.bf16.gmra.mrb[108].mxu0 %v1087_v13  ;;  %v936_v13 = vpack.c.bf16 %v530_v11, %v523_v10 }
 0x11f   : > { %1874 = vmatprep.mubr.bf16.mxu0 %v1095_v14  ;;  %v8860_v14 = vld [vmem:[%s11927_s1 + $0x140] sm:$0xff]  }
 0x126   : > { %1875 = vmatmul.mubr.bf16.gmra.mrb[112].mxu0 %v1094_v19  ;;  %v544_v19 = vld [vmem:[%s9078_s22 + $0x2f0] sm:$0xff] }
 0x127   : > { %1882 = vmatprep.mubr.bf16.mxu0 %v1102_v20  ;;  %v935_v20 = vpack.c.bf16 %v529_v16, %v522_v15  ;;  %v943_v21 = vpack.c.bf16 %v544_v19, %v537_v18  ;;  %v670_v15 = vld [vmem:[%s9078_s22 + $0x6e0] sm:$0xff]  ;;  %v8867_v18 = vld [vmem:[%s11927_s1 + $0x178] sm:$0xff]  }
 0x128   : > { %v662_v19 = vld [vmem:[%s9078_s22 + $0x6a0] sm:$0xff] }
 0x12e   : > { %1883 = vmatmul.mubr.bf16.gmra.mrb[116].mxu0 %v1101_v25  ;;  %v551_v25 = vld [vmem:[%s9078_s22 + $0x328] sm:$0xff] }
 0x12f   : > { %1890 = vmatprep.mubr.bf16.mxu0 %v1109_v26  ;;  %v558_v26 = vld [vmem:[%s9078_s22 + $0x360] sm:$0xff] }
 0x130   : > { %v950_v28 = vpack.c.bf16 %v558_v26, %v551_v25  ;;  %v8868_v25 = vld [vmem:[%s11927_s1 + $0x180] sm:$0xff]   ;;  %v676_v26 = vld [vmem:[%s9078_s22 + $0x710] sm:$0xff] }
 0x131   : > { %8038 = vmatprep.subr.bf16.mxu1 %v8868_v25 }
 0x132   : > { %8039 = vmatpush3.bf16.msra.mxu1 %v8868_v25 }
 0x136   : > { %1891 = vmatmul.mubr.bf16.gmra.mrb[120].mxu0 %v1108_v31  ;;  %v557_v31 = vld [vmem:[%s9078_s22 + $0x358] sm:$0xff] }
 0x137   : > { %1898 = vmatprep.mubr.bf16.mxu0 %v1116_v32  ;;  %v565_v32 = vld [vmem:[%s9078_s22 + $0x398] sm:$0xff]  ;;  %v949_v34 = vpack.c.bf16 %v557_v31, %v550_v30 }
 0x138   : > { %v957_v35 = vpack.c.bf16 %v572_v33, %v565_v32  ;;  %v456_v32 = vld [vmem:[%s9078_s22 + $0x30] sm:$0xff]  ;;  %v463_v33 = vld [vmem:[%s9078_s22 + $0x68] sm:$0xff] }
 0x13e   : > { %1899 = vmatmul.mubr.bf16.gmra.mrb[124].mxu0 %v1115_v37  ;;  %v571_v37 = vld [vmem:[%s9078_s22 + $0x3c8] sm:$0xff] }
 0x13f   : > { %1939 = vmatprep.mubr.bf16.mxu0 %v901_v38  ;;  %v579_v38 = vld [vmem:[%s9078_s22 + $0x408] sm:$0xff]  ;;  %v956_v40 = vpack.c.bf16 %v571_v37, %v564_v36  ;;  %v477_v36 = vld [vmem:[%s9078_s22 + $0xd8] sm:$0xff] }
 0x140   : > { %v964_v41 = vpack.c.bf16 %v586_v39, %v579_v38  ;;  %v690_v38 = vld [vmem:[%s9078_s22 + $0x780] sm:$0xff]  ;;  %v697_v39 = vld [vmem:[%s9078_s22 + $0x7b8] sm:$0xff] }
 0x146   : > { %1940 = vmatmul.mubr.bf16.vlgmr.msra.gmra.mrb[0].mxu0 %v900_v43  ;;  %v578_v43 = vld [vmem:[%s9078_s22 + $0x400] sm:$0xff] }
 0x147   : > { %2197 = vmatpush1.bf16.msra.mxu0 %v8852_v44  ;;  %1947 = vmatprep.mubr.bf16.mxu0 %v908_v45  ;;  %v585_v44 = vld [vmem:[%s9078_s22 + $0x438] sm:$0xff] }
 0x148   : > { %2198 = vmatprep.subr.bf16.mxu0 %v8975_v1  ;;  %v593_v45 = vld [vmem:[%s9078_s22 + $0x478] sm:$0xff]  ;;  %v963_v47 = vpack.c.bf16 %v585_v44, %v578_v43  ;;  %v704_v44 = vld [vmem:[%s9078_s22 + $0x7f0] sm:$0xff] }
 0x14b   : > { %2199 = vmatpush1.bf16.msra.mxu0 %v8853_v48  ;;  %v971_v48 = vpack.c.bf16 %v600_v46, %v593_v45  ;;  %v711_v45 = vld [vmem:[%s9078_s22 + $0x828] sm:$0xff] }
 0x14c   : > { %2200 = vmatprep.subr.bf16.mxu0 %v8975_v1  ;;  %v719_v46 = vld [vmem:[%s9078_s22 + $0x868] sm:$0xff] }
 0x14e   : > { %1948 = vmatmul.mubr.bf16.gmra.mrb[4].mxu0 %v907_v51  ;;  %v607_v51 = vld [vmem:[%s9078_s22 + $0x4e8] sm:$0xff] }
 0x14f   : > { %1955 = vmatprep.mubr.bf16.mxu0 %v915_v52  ;;  %2201 = vmatpush1.bf16.msra.mxu0 %v8854_v53  ;;  %v614_v52 = vld [vmem:[%s9078_s22 + $0x520] sm:$0xff]  ;;  %v970_v53 = vpack.c.bf16 %v599_v50, %v592_v49  ;;  %v484_v50 = vld [vmem:[%s9078_s22 + $0x110] sm:$0xff] }
 0x150   : > { %2202 = vmatprep.subr.bf16.mxu0 %v8975_v1  ;;  %v978_v54 = vpack.c.bf16 %v614_v52, %v607_v51  ;;  %v491_v51 = vld [vmem:[%s9078_s22 + $0x148] sm:$0xff] }
 0x151   : > { %v918_v52 = vpack.c.bf16 %v491_v51, %v484_v50  ;;  %v824_v50 = vld [vmem:[%s9078_s22 + $0xbb0] sm:$0xff] }
 0x153   : > { %2203 = vmatpush1.bf16.msra.mxu0 %v8855_v56  ;;  %v606_v56 = vld [vmem:[%s9078_s22 + $0x4e0] sm:$0xff] }
 0x154   : > { %2204 = vmatprep.subr.bf16.mxu0 %v8975_v1 }
 0x156   : > { %1956 = vmatmul.mubr.bf16.gmra.mrb[8].mxu0 %v914_v59  ;;  %v628_v59 = vld [vmem:[%s9078_s22 + $0x590] sm:$0xff] }
 0x157   : > { %1963 = vmatprep.mubr.bf16.mxu0 %v922_v60  ;;  %2205 = vmatpush1.bf16.msra.mxu0 %v8856_v61  ;;  %v977_v60 = vpack.c.bf16 %v613_v57, %v606_v56  ;;  %v985_v61 = vpack.c.bf16 %v628_v59, %v621_v58  ;;  %v718_v56 = vld [vmem:[%s9078_s22 + $0x860] sm:$0xff]  ;;  %v725_v57 = vld [vmem:[%s9078_s22 + $0x898] sm:$0xff]  ;;  %v740_v59 = vld [vmem:[%s9078_s22 + $0x910] sm:$0xff] }
 0x158   : > { %2206 = vmatprep.subr.bf16.mxu0 %v8975_v1  ;;  %v733_v58 = vld [vmem:[%s9078_s22 + $0x8d8] sm:$0xff] }
 0x15b   : > { %2207 = vmatpush1.bf16.msra.mxu0 %v8857_v0  ;;  %v635_v0 = vld [vmem:[%s9078_s22 + $0x5c8] sm:$0xff] }
 0x15c   : > { %2208 = vmatprep.subr.bf16.mxu0 %v8975_v1 }
 0x15e   : > { %1964 = vmatmul.mubr.bf16.gmra.mrb[12].mxu0 %v921_v4  ;;  %v992_v4 = vpack.c.bf16 %v642_v2, %v635_v0  ;;  %v747_v0 = vld [vmem:[%s9078_s22 + $0x948] sm:$0xff]  ;;  %v754_v2 = vld [vmem:[%s9078_s22 + $0x980] sm:$0xff] }
 0x15f   : > { %1971 = vmatprep.mubr.bf16.mxu0 %v929_v5  ;;  %2209 = vmatpush1.bf16.msra.mxu0 %v8858_v6  ;;  %v8866_v5 = vld [vmem:[%s11927_s1 + $0x170] sm:$0xff]   ;;  %v634_v6 = vld [vmem:[%s9078_s22 + $0x5c0] sm:$0xff] }
 0x160   : > { %2210 = vmatprep.subr.bf16.mxu0 %v8975_v1  ;;  %v991_v10 = vpack.c.bf16 %v641_v7, %v634_v6  ;;  %v519_v6 = vld [vmem:[%s9078_s22 + $0x228] sm:$0xff] }
 0x163   : > { %2211 = vmatpush1.bf16.msra.mxu0 %v8859_v9  ;;  %v656_v9 = vld [vmem:[%s9078_s22 + $0x670] sm:$0xff] }
 0x164   : > { %2212 = vmatprep.subr.bf16.mxu0 %v8975_v1  ;;  %v999_v11 = vpack.c.bf16 %v656_v9, %v649_v8  ;;  %v526_v8 = vld [vmem:[%s9078_s22 + $0x260] sm:$0xff]  ;;  %v533_v9 = vld [vmem:[%s9078_s22 + $0x298] sm:$0xff] }
 0x166   : > { %1972 = vmatmul.mubr.bf16.gmra.mrb[16].mxu0 %v928_v12  ;;  %v648_v12 = vld [vmem:[%s9078_s22 + $0x630] sm:$0xff] }
 0x167   : > { %1979 = vmatprep.mubr.bf16.mxu0 %v936_v13  ;;  %2213 = vmatpush1.bf16.msra.mxu0 %v8860_v14  ;;  %v655_v13 = vld [vmem:[%s9078_s22 + $0x668] sm:$0xff] }
 0x168   : > { %2214 = vmatprep.subr.bf16.mxu0 %v8975_v1  ;;  %v663_v14 = vld [vmem:[%s9078_s22 + $0x6a8] sm:$0xff]  ;;  %v998_v16 = vpack.c.bf16 %v655_v13, %v648_v12  ;;  %v753_v12 = vld [vmem:[%s9078_s22 + $0x978] sm:$0xff] }
 0x169   : > { %v761_v13 = vld [vmem:[%s9078_s22 + $0x9b8] sm:$0xff] }
 0x16b   : > { %2215 = vmatpush1.bf16.msra.mxu0 %v8861_v17  ;;  %v1006_v17 = vpack.c.bf16 %v670_v15, %v663_v14  ;;  %v768_v14 = vld [vmem:[%s9078_s22 + $0x9f0] sm:$0xff] }
 0x16c   : > { %2216 = vmatprep.subr.bf16.mxu0 %v8975_v1 }
 0x16e   : > { %1980 = vmatmul.mubr.bf16.gmra.mrb[20].mxu0 %v935_v20  ;;  %v669_v20 = vld [vmem:[%s9078_s22 + $0x6d8] sm:$0xff] }
 0x16f   : > { %1987 = vmatprep.mubr.bf16.mxu0 %v943_v21  ;;  %2217 = vmatpush1.bf16.msra.mxu0 %v8862_v22  ;;  %v677_v21 = vld [vmem:[%s9078_s22 + $0x718] sm:$0xff]  ;;  %v684_v22 = vld [vmem:[%s9078_s22 + $0x750] sm:$0xff]  ;;  %v1005_v23 = vpack.c.bf16 %v669_v20, %v662_v19  ;;  %v775_v19 = vld [vmem:[%s9078_s22 + $0xa28] sm:$0xff] }
 0x170   : > { %2218 = vmatprep.subr.bf16.mxu0 %v8975_v1  ;;  %v1013_v24 = vpack.c.bf16 %v684_v22, %v677_v21  ;;  %v782_v20 = vld [vmem:[%s9078_s22 + $0xa60] sm:$0xff] }
 0x171   : > { %v1062_v22 = vpack.c.bf16 %v782_v20, %v775_v19  ;;  %v858_v20 = vld [vmem:[%s9078_s22 + $0xcc0] sm:$0xff] }
 0x173   : > { %2219 = vmatpush1.bf16.msra.mxu0 %v8863_v29  ;;  %v698_v29 = vld [vmem:[%s9078_s22 + $0x7c0] sm:$0xff] }
 0x174   : > { %2220 = vmatprep.subr.bf16.mxu0 %v8975_v1 }
 0x176   : > { %1988 = vmatmul.mubr.bf16.gmra.mrb[24].mxu0 %v942_v27  ;;  %v683_v27 = vld [vmem:[%s9078_s22 + $0x748] sm:$0xff] }
 0x177   : > { %1995 = vmatprep.mubr.bf16.mxu0 %v950_v28  ;;  %2221 = vmatpush1.bf16.msra.mxu0 %v8864_v42  ;;  %v691_v28 = vld [vmem:[%s9078_s22 + $0x788] sm:$0xff]  ;;  %v1012_v30 = vpack.c.bf16 %v683_v27, %v676_v26  ;;  %v1019_v42 = vpack.c.bf16 %v697_v39, %v690_v38  ;;  %v554_v26 = vld [vmem:[%s9078_s22 + $0x340] sm:$0xff]  ;;  %v561_v27 = vld [vmem:[%s9078_s22 + $0x378] sm:$0xff] }
 0x178   : > { %2222 = vmatprep.subr.bf16.mxu0 %v8975_v1  ;;  %v1020_v31 = vpack.c.bf16 %v698_v29, %v691_v28  ;;  %v953_v28 = vpack.c.bf16 %v561_v27, %v554_v26  ;;  %v774_v29 = vld [vmem:[%s9078_s22 + $0xa20] sm:$0xff]  ;;  %v872_v26 = vld [vmem:[%s9078_s22 + $0xd30] sm:$0xff]  ;;  %v879_v27 = vld [vmem:[%s9078_s22 + $0xd68] sm:$0xff] }
 0x179   : > { %v810_v38 = vld [vmem:[%s9078_s22 + $0xb40] sm:$0xff] }
 0x17b   : > { %2223 = vmatpush1.bf16.msra.mxu0 %v8865_v55 }
 0x17c   : > { %2224 = vmatprep.subr.bf16.mxu0 %v8975_v1 }
 0x17e   : > { %1996 = vmatmul.mubr.bf16.gmra.mrb[28].mxu0 %v949_v34  ;;  %v904_v34 = vpack.c.bf16 %v463_v33, %v456_v32  ;;  %v796_v32 = vld [vmem:[%s9078_s22 + $0xad0] sm:$0xff] }
 0x17f   : > { %2003 = vmatprep.mubr.bf16.mxu0 %v957_v35  ;;  %2225 = vmatpush1.bf16.msra.mxu0 %v8866_v5  ;;  %v470_v35 = vld [vmem:[%s9078_s22 + $0xa0] sm:$0xff]  ;;  %v512_v5 = vld [vmem:[%s9078_s22 + $0x1f0] sm:$0xff] }
 0x180   : > { %2226 = vmatprep.subr.bf16.mxu0 %v8975_v1  ;;  %v911_v37 = vpack.c.bf16 %v477_v36, %v470_v35  ;;  %8040 = vmatprep.mubr.msk.bf16.mxu1 %vm1521_vm0, %v904_v34  ;;  %v932_v7 = vpack.c.bf16 %v519_v6, %v512_v5  ;;  %v788_v35 = vld [vmem:[%s9078_s22 + $0xa90] sm:$0xff]  ;;  %v795_v36 = vld [vmem:[%s9078_s22 + $0xac8] sm:$0xff] }
 0x181   : > { %v1068_v39 = vpack.c.bf16 %v795_v36, %v788_v35  ;;  %v852_v5 = vld [vmem:[%s9078_s22 + $0xc90] sm:$0xff]  ;;  %v666_v35 = vld [vmem:[%s9078_s22 + $0x6c0] sm:$0xff]  ;;  %v673_v36 = vld [vmem:[%s9078_s22 + $0x6f8] sm:$0xff] }
 0x182   : > { %8041 = vmatmul.mubr.msk.bf16.vlgmr.msra.gmra.mrb[0].mxu1 %vm1521_vm0, %v911_v37  ;;  %v803_v37 = vld [vmem:[%s9078_s22 + $0xb08] sm:$0xff] }
 0x183   : > { %2227 = vmatpush1.bf16.msra.mxu0 %v8867_v18  ;;  %8044 = vmatprep.mubr.msk.bf16.mxu1 %vm1521_vm0, %v918_v52  ;;  %v767_v18 = vld [vmem:[%s9078_s22 + $0x9e8] sm:$0xff] }
 0x186   : > { %2004 = vmatmul.mubr.bf16.gmra.mrb[32].mxu0 %v956_v40  ;;  %v705_v40 = vld [vmem:[%s9078_s22 + $0x7f8] sm:$0xff] }
 0x187   : > { %2011 = vmatprep.mubr.bf16.mxu0 %v964_v41  ;;  %v712_v41 = vld [vmem:[%s9078_s22 + $0x830] sm:$0xff] }
 0x188   : > { %v1027_v43 = vpack.c.bf16 %v712_v41, %v705_v40  ;;  %v1076_v40 = vpack.c.bf16 %v810_v38, %v803_v37  ;;  %v568_v41 = vld [vmem:[%s9078_s22 + $0x3b0] sm:$0xff]  ;;  %v1009_v37 = vpack.c.bf16 %v673_v36, %v666_v35  ;;  %v886_v38 = vld [vmem:[%s9078_s22 + $0xda0] sm:$0xff] }
 0x189   : > { %v546_v35 = vld [vmem:[%s9078_s22 + $0x300] sm:$0xff] }
 0x18e   : > { %2012 = vmatmul.mubr.bf16.gmra.mrb[36].mxu0 %v963_v47  ;;  %v726_v47 = vld [vmem:[%s9078_s22 + $0x8a0] sm:$0xff] }
 0x18f   : > { %2019 = vmatprep.mubr.bf16.mxu0 %v971_v48  ;;  %v1026_v48 = vpack.c.bf16 %v711_v45, %v704_v44  ;;  %v1034_v49 = vpack.c.bf16 %v726_v47, %v719_v46  ;;  %v582_v44 = vld [vmem:[%s9078_s22 + $0x420] sm:$0xff]  ;;  %v589_v45 = vld [vmem:[%s9078_s22 + $0x458] sm:$0xff] }
 0x190   : > { %v967_v46 = vpack.c.bf16 %v589_v45, %v582_v44  ;;  %v802_v47 = vld [vmem:[%s9078_s22 + $0xb00] sm:$0xff]  ;;  %v461_v45 = vld [vmem:[%s9078_s22 + $0x58] sm:$0xff] }
 0x191   : > { %v454_v44 = vld [vmem:[%s9078_s22 + $0x20] sm:$0xff] }
 0x196   : > { %2020 = vmatmul.mubr.bf16.gmra.mrb[40].mxu0 %v970_v53  ;;  %v498_v53 = vld [vmem:[%s9078_s22 + $0x180] sm:$0xff] }
 0x197   : > { %2027 = vmatprep.mubr.bf16.mxu0 %v978_v54  ;;  %v505_v54 = vld [vmem:[%s9078_s22 + $0x1b8] sm:$0xff] }
 0x198   : > { %v925_v55 = vpack.c.bf16 %v505_v54, %v498_v53  ;;  %v816_v53 = vld [vmem:[%s9078_s22 + $0xb70] sm:$0xff]  ;;  %v823_v54 = vld [vmem:[%s9078_s22 + $0xba8] sm:$0xff] }
 0x19a   : > { %8045 = vmatmul.mubr.msk.bf16.gmra.mrb[4].mxu1 %vm1521_vm0, %v925_v55  ;;  %v831_v55 = vld [vmem:[%s9078_s22 + $0xbe8] sm:$0xff] }
 0x19b   : > { %8048 = vmatprep.mubr.msk.bf16.mxu1 %vm1521_vm0, %v932_v7 }
 0x19e   : > { %2028 = vmatmul.mubr.bf16.gmra.mrb[44].mxu0 %v977_v60  ;;  %v1033_v60 = vpack.c.bf16 %v725_v57, %v718_v56  ;;  %v838_v56 = vld [vmem:[%s9078_s22 + $0xc20] sm:$0xff]  ;;  %v1082_v57 = vpack.c.bf16 %v823_v54, %v816_v53  ;;  %v701_v54 = vld [vmem:[%s9078_s22 + $0x7d8] sm:$0xff] }
 0x19f   : > { %2035 = vmatprep.mubr.bf16.mxu0 %v985_v61  ;;  %v1041_v61 = vpack.c.bf16 %v740_v59, %v733_v58  ;;  %v1090_v58 = vpack.c.bf16 %v838_v56, %v831_v55  ;;  %v596_v59 = vld [vmem:[%s9078_s22 + $0x490] sm:$0xff]  ;;  %v694_v53 = vld [vmem:[%s9078_s22 + $0x7a0] sm:$0xff] }
 0x1a0   : > { %v1023_v55 = vpack.c.bf16 %v701_v54, %v694_v53  ;;  %v8869_v56 = vld [vmem:[%s11929_s3] sm:$0xff]   ;;  %v567_v53 = vld [vmem:[%s9078_s22 + $0x3a8] sm:$0xff] }
 0x1a1   : > { %8104 = vmatprep.subr.bf16.mxu1 %v8869_v56  ;;  %v574_v54 = vld [vmem:[%s9078_s22 + $0x3e0] sm:$0xff] }
 0x1a2   : > { %8105 = vmatpush3.bf16.msra.mxu1 %v8869_v56  ;;  %v959_v56 = vpack.c.bf16 %v574_v54, %v567_v53  ;;  %v8875_v53 = vld [vmem:[%s11929_s3 + $0x30] sm:$0xff]  }
 0x1a6   : > { %2036 = vmatmul.mubr.bf16.gmra.mrb[48].mxu0 %v984_v3  ;;  %v1040_v3 = vpack.c.bf16 %v739_v63, %v732_v62  ;;  %v610_v62 = vld [vmem:[%s9078_s22 + $0x500] sm:$0xff]  ;;  %v617_v63 = vld [vmem:[%s9078_s22 + $0x538] sm:$0xff] }
 0x1a7   : > { %2043 = vmatprep.mubr.bf16.mxu0 %v992_v4  ;;  %v1048_v4 = vpack.c.bf16 %v754_v2, %v747_v0  ;;  %v981_v0 = vpack.c.bf16 %v617_v63, %v610_v62  ;;  %v830_v2 = vld [vmem:[%s9078_s22 + $0xbe0] sm:$0xff] }
 0x1a8   : > { %v482_v63 = vld [vmem:[%s9078_s22 + $0x100] sm:$0xff] }
 0x1ae   : > { %2044 = vmatmul.mubr.bf16.gmra.mrb[52].mxu0 %v991_v10  ;;  %v939_v10 = vpack.c.bf16 %v533_v9, %v526_v8  ;;  %v844_v8 = vld [vmem:[%s9078_s22 + $0xc50] sm:$0xff]  ;;  %v851_v9 = vld [vmem:[%s9078_s22 + $0xc88] sm:$0xff] }
 0x1af   : > { %2051 = vmatprep.mubr.bf16.mxu0 %v999_v11  ;;  %v746_v11 = vld [vmem:[%s9078_s22 + $0x940] sm:$0xff] }
 0x1b0   : > { %8049 = vmatmul.mubr.msk.bf16.gmra.mrb[8].mxu1 %vm1521_vm0, %v939_v10  ;;  %v1047_v15 = vpack.c.bf16 %v753_v12, %v746_v11  ;;  %v859_v10 = vld [vmem:[%s9078_s22 + $0xcc8] sm:$0xff]  ;;  %v866_v11 = vld [vmem:[%s9078_s22 + $0xd00] sm:$0xff]  ;;  %v1096_v12 = vpack.c.bf16 %v851_v9, %v844_v8 }
 0x1b1   : > { %v722_v9 = vld [vmem:[%s9078_s22 + $0x880] sm:$0xff] }
 0x1b6   : > { %2052 = vmatmul.mubr.bf16.gmra.mrb[56].mxu0 %v998_v16  ;;  %v1055_v16 = vpack.c.bf16 %v768_v14, %v761_v13  ;;  %v1104_v13 = vpack.c.bf16 %v866_v11, %v859_v10  ;;  %v624_v14 = vld [vmem:[%s9078_s22 + $0x570] sm:$0xff]  ;;  %v729_v10 = vld [vmem:[%s9078_s22 + $0x8b8] sm:$0xff] }
 0x1b7   : > { %2059 = vmatprep.mubr.bf16.mxu0 %v1006_v17  ;;  %v760_v17 = vld [vmem:[%s9078_s22 + $0x9b0] sm:$0xff]  ;;  %v1037_v11 = vpack.c.bf16 %v729_v10, %v722_v9  ;;  %v595_v9 = vld [vmem:[%s9078_s22 + $0x488] sm:$0xff]  ;;  %v602_v10 = vld [vmem:[%s9078_s22 + $0x4c0] sm:$0xff] }
 0x1b8   : > { %v1054_v21 = vpack.c.bf16 %v767_v18, %v760_v17  ;;  %v638_v17 = vld [vmem:[%s9078_s22 + $0x5e0] sm:$0xff]  ;;  %v645_v18 = vld [vmem:[%s9078_s22 + $0x618] sm:$0xff] }
 0x1b9   : > { %v995_v19 = vpack.c.bf16 %v645_v18, %v638_v17 }
 0x1be   : > { %2060 = vmatmul.mubr.bf16.gmra.mrb[60].mxu0 %v1005_v23  ;;  %v540_v23 = vld [vmem:[%s9078_s22 + $0x2d0] sm:$0xff] }
 0x1bf   : > { %2067 = vmatprep.mubr.bf16.mxu0 %v1013_v24  ;;  %v547_v24 = vld [vmem:[%s9078_s22 + $0x308] sm:$0xff] }
 0x1c0   : > { %v946_v25 = vpack.c.bf16 %v547_v24, %v540_v23  ;;  %v880_v23 = vld [vmem:[%s9078_s22 + $0xd70] sm:$0xff] }
 0x1c2   : > { %8052 = vmatprep.mubr.msk.bf16.mxu1 %vm1521_vm0, %v946_v25 }
 0x1c3   : > { %8053 = vmatmul.mubr.msk.bf16.gmra.mrb[12].mxu1 %vm1521_vm0, %v953_v28  ;;  %v887_v28 = vld [vmem:[%s9078_s22 + $0xda8] sm:$0xff] }
 0x1c6   : > { %2068 = vmatmul.mubr.bf16.gmra.mrb[64].mxu0 %v1012_v30  ;;  %v781_v30 = vld [vmem:[%s9078_s22 + $0xa58] sm:$0xff] }
 0x1c7   : > { %2075 = vmatprep.mubr.bf16.mxu0 %v1020_v31  ;;  %v789_v31 = vld [vmem:[%s9078_s22 + $0xa98] sm:$0xff]  ;;  %v1061_v33 = vpack.c.bf16 %v781_v30, %v774_v29  ;;  %v894_v29 = vld [vmem:[%s9078_s22 + $0xde0] sm:$0xff]  ;;  %v1110_v30 = vpack.c.bf16 %v879_v27, %v872_v26  ;;  %v743_v26 = vld [vmem:[%s9078_s22 + $0x928] sm:$0xff] }
 0x1c8   : > { %v1069_v34 = vpack.c.bf16 %v796_v32, %v789_v31  ;;  %v1118_v31 = vpack.c.bf16 %v894_v29, %v887_v28  ;;  %v652_v32 = vld [vmem:[%s9078_s22 + $0x650] sm:$0xff]  ;;  %v750_v28 = vld [vmem:[%s9078_s22 + $0x960] sm:$0xff]  ;;  %v757_v29 = vld [vmem:[%s9078_s22 + $0x998] sm:$0xff] }
 0x1ce   : > { %2076 = vmatmul.mubr.bf16.gmra.mrb[68].mxu0 %v1019_v42  ;;  %v575_v42 = vld [vmem:[%s9078_s22 + $0x3e8] sm:$0xff] }
 0x1cf   : > { %2083 = vmatprep.mubr.bf16.mxu0 %v1027_v43  ;;  %v960_v43 = vpack.c.bf16 %v575_v42, %v568_v41  ;;  %v462_v41 = vld [vmem:[%s9078_s22 + $0x60] sm:$0xff] }
 0x1d1   : > { %8056 = vmatprep.mubr.msk.bf16.mxu1 %vm1521_vm0, %v960_v43 }
 0x1d2   : > { %8057 = vmatmul.mubr.msk.bf16.gmra.mrb[16].mxu1 %vm1521_vm0, %v967_v46  ;;  %v469_v46 = vld [vmem:[%s9078_s22 + $0x98] sm:$0xff] }
 0x1d6   : > { %2084 = vmatmul.mubr.bf16.gmra.mrb[72].mxu0 %v1026_v48  ;;  %v809_v48 = vld [vmem:[%s9078_s22 + $0xb38] sm:$0xff] }
 0x1d7   : > { %2091 = vmatprep.mubr.bf16.mxu0 %v1034_v49  ;;  %v817_v49 = vld [vmem:[%s9078_s22 + $0xb78] sm:$0xff]  ;;  %v1075_v51 = vpack.c.bf16 %v809_v48, %v802_v47  ;;  %v476_v47 = vld [vmem:[%s9078_s22 + $0xd0] sm:$0xff]  ;;  %v902_v48 = vpack.c.bf16 %v461_v45, %v454_v44  ;;  %v771_v45 = vld [vmem:[%s9078_s22 + $0xa08] sm:$0xff] }
 0x1d8   : > { %v1083_v52 = vpack.c.bf16 %v824_v50, %v817_v49  ;;  %v910_v49 = vpack.c.bf16 %v476_v47, %v469_v46  ;;  %v680_v50 = vld [vmem:[%s9078_s22 + $0x730] sm:$0xff]  ;;  %v778_v47 = vld [vmem:[%s9078_s22 + $0xa40] sm:$0xff] }
 0x1d9   : > { %v764_v44 = vld [vmem:[%s9078_s22 + $0x9d0] sm:$0xff] }
 0x1da   : > { %v1058_v46 = vpack.c.bf16 %v771_v45, %v764_v44  ;;  %v637_v44 = vld [vmem:[%s9078_s22 + $0x5d8] sm:$0xff]  ;;  %v876_v45 = vld [vmem:[%s9078_s22 + $0xd50] sm:$0xff] }
 0x1de   : > { %2092 = vmatmul.mubr.bf16.gmra.mrb[76].mxu0 %v1033_v60  ;;  %v603_v60 = vld [vmem:[%s9078_s22 + $0x4c8] sm:$0xff] }
 0x1df   : > { %2099 = vmatprep.mubr.bf16.mxu0 %v1041_v61  ;;  %v974_v61 = vpack.c.bf16 %v603_v60, %v596_v59  ;;  %v483_v59 = vld [vmem:[%s9078_s22 + $0x108] sm:$0xff]  ;;  %v490_v60 = vld [vmem:[%s9078_s22 + $0x140] sm:$0xff] }
 0x1e0   : > { %v917_v62 = vpack.c.bf16 %v490_v60, %v483_v59  ;;  %v581_v59 = vld [vmem:[%s9078_s22 + $0x418] sm:$0xff]  ;;  %v588_v60 = vld [vmem:[%s9078_s22 + $0x450] sm:$0xff] }
 0x1e1   : > { %8060 = vmatprep.mubr.msk.bf16.mxu1 %vm1521_vm0, %v974_v61 }
 0x1e2   : > { %8061 = vmatmul.mubr.msk.bf16.gmra.mrb[20].mxu1 %vm1521_vm0, %v981_v0  ;;  %v489_v0 = vld [vmem:[%s9078_s22 + $0x138] sm:$0xff] }
 0x1e6   : > { %2100 = vmatmul.mubr.bf16.gmra.mrb[80].mxu0 %v1040_v3  ;;  %v837_v3 = vld [vmem:[%s9078_s22 + $0xc18] sm:$0xff] }
 0x1e7   : > { %2107 = vmatprep.mubr.bf16.mxu0 %v1048_v4  ;;  %v845_v4 = vld [vmem:[%s9078_s22 + $0xc58] sm:$0xff]  ;;  %v1089_v6 = vpack.c.bf16 %v837_v3, %v830_v2  ;;  %v504_v3 = vld [vmem:[%s9078_s22 + $0x1b0] sm:$0xff] }
 0x1e8   : > { %v1097_v7 = vpack.c.bf16 %v852_v5, %v845_v4  ;;  %v497_v2 = vld [vmem:[%s9078_s22 + $0x178] sm:$0xff]  ;;  %v916_v4 = vpack.c.bf16 %v489_v0, %v482_v63  ;;  %v792_v63 = vld [vmem:[%s9078_s22 + $0xab0] sm:$0xff]  ;;  %v799_v0 = vld [vmem:[%s9078_s22 + $0xae8] sm:$0xff] }
 0x1e9   : > { %v924_v5 = vpack.c.bf16 %v504_v3, %v497_v2  ;;  %v1072_v2 = vpack.c.bf16 %v799_v0, %v792_v63  ;;  %v806_v3 = vld [vmem:[%s9078_s22 + $0xb20] sm:$0xff] }
 0x1ee   : > { %2108 = vmatmul.mubr.bf16.gmra.mrb[84].mxu0 %v1047_v15  ;;  %v631_v15 = vld [vmem:[%s9078_s22 + $0x5a8] sm:$0xff] }
 0x1ef   : > { %2115 = vmatprep.mubr.bf16.mxu0 %v1055_v16  ;;  %v988_v16 = vpack.c.bf16 %v631_v15, %v624_v14  ;;  %v503_v14 = vld [vmem:[%s9078_s22 + $0x1a8] sm:$0xff] }
 0x1f0   : > { %v511_v15 = vld [vmem:[%s9078_s22 + $0x1e8] sm:$0xff] }
 0x1f1   : > { %8064 = vmatprep.mubr.msk.bf16.mxu1 %vm1521_vm0, %v988_v16  ;;  %v518_v16 = vld [vmem:[%s9078_s22 + $0x220] sm:$0xff] }
 0x1f2   : > { %8065 = vmatmul.mubr.msk.bf16.gmra.mrb[24].mxu1 %vm1521_vm0, %v995_v19  ;;  %v931_v18 = vpack.c.bf16 %v518_v16, %v511_v15  ;;  %v510_v19 = vld [vmem:[%s9078_s22 + $0x1e0] sm:$0xff] }
 0x1f3   : > { %v834_v15 = vld [vmem:[%s9078_s22 + $0xc00] sm:$0xff] }
 0x1f4   : > { %v594_v16 = vld [vmem:[%s9078_s22 + $0x480] sm:$0xff] }
 0x1f6   : > { %2116 = vmatmul.mubr.bf16.gmra.mrb[88].mxu0 %v1054_v21  ;;  %v865_v21 = vld [vmem:[%s9078_s22 + $0xcf8] sm:$0xff] }
 0x1f7   : > { %2123 = vmatprep.mubr.bf16.mxu0 %v1062_v22  ;;  %v873_v22 = vld [vmem:[%s9078_s22 + $0xd38] sm:$0xff]  ;;  %v1103_v24 = vpack.c.bf16 %v865_v21, %v858_v20 }
 0x1f8   : > { %v1111_v25 = vpack.c.bf16 %v880_v23, %v873_v22  ;;  %v517_v20 = vld [vmem:[%s9078_s22 + $0x218] sm:$0xff]  ;;  %v532_v22 = vld [vmem:[%s9078_s22 + $0x290] sm:$0xff] }
 0x1f9   : > { %v525_v21 = vld [vmem:[%s9078_s22 + $0x258] sm:$0xff]  ;;  %v930_v23 = vpack.c.bf16 %v517_v20, %v510_v19 }
 0x1fa   : > { %v841_v19 = vld [vmem:[%s9078_s22 + $0xc38] sm:$0xff] }
 0x1fb   : > { %v609_v20 = vld [vmem:[%s9078_s22 + $0x4f8] sm:$0xff] }
 0x1fe   : > { %2124 = vmatmul.mubr.bf16.gmra.mrb[92].mxu0 %v1061_v33  ;;  %v659_v33 = vld [vmem:[%s9078_s22 + $0x688] sm:$0xff] }
 0x1ff   : > { %2131 = vmatprep.mubr.bf16.mxu0 %v1069_v34  ;;  %v1002_v34 = vpack.c.bf16 %v659_v33, %v652_v32  ;;  %v524_v32 = vld [vmem:[%s9078_s22 + $0x250] sm:$0xff]  ;;  %v531_v33 = vld [vmem:[%s9078_s22 + $0x288] sm:$0xff] }
 0x200   : > { %v937_v36 = vpack.c.bf16 %v531_v33, %v524_v32  ;;  %v862_v33 = vld [vmem:[%s9078_s22 + $0xce0] sm:$0xff] }
 0x201   : > { %8068 = vmatprep.mubr.msk.bf16.mxu1 %vm1521_vm0, %v1002_v34  ;;  %v539_v34 = vld [vmem:[%s9078_s22 + $0x2c8] sm:$0xff] }
 0x202   : > { %8069 = vmatmul.mubr.msk.bf16.gmra.mrb[28].mxu1 %vm1521_vm0, %v1009_v37  ;;  %v945_v37 = vpack.c.bf16 %v546_v35, %v539_v34  ;;  %v869_v34 = vld [vmem:[%s9078_s22 + $0xd18] sm:$0xff] }
 0x203   : > { %v1107_v35 = vpack.c.bf16 %v869_v34, %v862_v33 }
 0x206   : > { %2132 = vmatmul.mubr.bf16.gmra.mrb[96].mxu0 %v1068_v39  ;;  %v893_v39 = vld [vmem:[%s9078_s22 + $0xdd8] sm:$0xff] }
 0x207   : > { %2139 = vmatprep.mubr.bf16.mxu0 %v1076_v40  ;;  %v455_v40 = vld [vmem:[%s9078_s22 + $0x28] sm:$0xff]  ;;  %v1117_v42 = vpack.c.bf16 %v893_v39, %v886_v38  ;;  %v538_v38 = vld [vmem:[%s9078_s22 + $0x2c0] sm:$0xff]  ;;  %v545_v39 = vld [vmem:[%s9078_s22 + $0x2f8] sm:$0xff] }
 0x208   : > { %v903_v43 = vpack.c.bf16 %v462_v41, %v455_v40  ;;  %v553_v40 = vld [vmem:[%s9078_s22 + $0x338] sm:$0xff]  ;;  %v560_v41 = vld [vmem:[%s9078_s22 + $0x370] sm:$0xff] }
 0x20e   : > { %2140 = vmatmul.mubr.bf16.gmra.mrb[100].mxu0 %v1075_v51  ;;  %v687_v51 = vld [vmem:[%s9078_s22 + $0x768] sm:$0xff] }
 0x20f   : > { %2147 = vmatprep.mubr.bf16.mxu0 %v1083_v52  ;;  %v1016_v52 = vpack.c.bf16 %v687_v51, %v680_v50  ;;  %v8872_v50 = vld [vmem:[%s11929_s3 + $0x18] sm:$0xff]   ;;  %v552_v51 = vld [vmem:[%s9078_s22 + $0x330] sm:$0xff] }
 0x211   : > { %8072 = vmatprep.mubr.msk.bf16.mxu1 %vm1521_vm0, %v1016_v52  ;;  %v559_v52 = vld [vmem:[%s9078_s22 + $0x368] sm:$0xff] }
 0x212   : > { %8073 = vmatmul.mubr.msk.bf16.gmra.mrb[32].mxu1 %vm1521_vm0, %v1023_v55  ;;  %v951_v55 = vpack.c.bf16 %v559_v52, %v552_v51 }
 0x216   : > { %2148 = vmatmul.mubr.bf16.gmra.mrb[104].mxu0 %v1082_v57  ;;  %v468_v57 = vld [vmem:[%s9078_s22 + $0x90] sm:$0xff] }
 0x217   : > { %2155 = vmatprep.mubr.bf16.mxu0 %v1090_v58  ;;  %v475_v58 = vld [vmem:[%s9078_s22 + $0xc8] sm:$0xff] }
 0x218   : > { %v909_v61 = vpack.c.bf16 %v475_v58, %v468_v57  ;;  %v566_v57 = vld [vmem:[%s9078_s22 + $0x3a0] sm:$0xff]  ;;  %v573_v58 = vld [vmem:[%s9078_s22 + $0x3d8] sm:$0xff] }
 0x21e   : > { %2156 = vmatmul.mubr.bf16.gmra.mrb[108].mxu0 %v1089_v6  ;;  %v708_v6 = vld [vmem:[%s9078_s22 + $0x810] sm:$0xff] }
 0x21f   : > { %2163 = vmatprep.mubr.bf16.mxu0 %v1097_v7  ;;  %v715_v7 = vld [vmem:[%s9078_s22 + $0x848] sm:$0xff] }
 0x220   : > { %v1030_v8 = vpack.c.bf16 %v715_v7, %v708_v6  ;;  %v8873_v6 = vld [vmem:[%s11929_s3 + $0x20] sm:$0xff]   ;;  %v580_v7 = vld [vmem:[%s9078_s22 + $0x410] sm:$0xff] }
 0x222   : > { %8076 = vmatprep.mubr.msk.bf16.mxu1 %vm1521_vm0, %v1030_v8  ;;  %v587_v8 = vld [vmem:[%s9078_s22 + $0x448] sm:$0xff] }
 0x223   : > { %8077 = vmatmul.mubr.msk.bf16.gmra.mrb[36].mxu1 %vm1521_vm0, %v1037_v11  ;;  %v965_v11 = vpack.c.bf16 %v587_v8, %v580_v7 }
 0x226   : > { %2164 = vmatmul.mubr.bf16.gmra.mrb[112].mxu0 %v1096_v12  ;;  %v8870_v12 = vld [vmem:[%s11929_s3 + $0x8] sm:$0xff]  }
 0x227   : > { %2171 = vmatprep.mubr.bf16.mxu0 %v1104_v13  ;;  %v496_v13 = vld [vmem:[%s9078_s22 + $0x170] sm:$0xff]  ;;  %8106 = vmatprep.subr.bf16.mxu1 %v8870_v12 }
 0x228   : > { %8107 = vmatpush3.bf16.msra.mxu1 %v8870_v12  ;;  %v923_v17 = vpack.c.bf16 %v503_v14, %v496_v13  ;;  %v973_v12 = vpack.c.bf16 %v602_v10, %v595_v9  ;;  %v820_v13 = vld [vmem:[%s9078_s22 + $0xb90] sm:$0xff]  ;;  %v827_v14 = vld [vmem:[%s9078_s22 + $0xbc8] sm:$0xff] }
 0x229   : > { %v664_v9 = vld [vmem:[%s9078_s22 + $0x6b0] sm:$0xff]  ;;  %v671_v10 = vld [vmem:[%s9078_s22 + $0x6e8] sm:$0xff] }
 0x22e   : > { %2172 = vmatmul.mubr.bf16.gmra.mrb[116].mxu0 %v1103_v24  ;;  %v938_v24 = vpack.c.bf16 %v532_v22, %v525_v21  ;;  %v616_v21 = vld [vmem:[%s9078_s22 + $0x530] sm:$0xff]  ;;  %v1093_v22 = vpack.c.bf16 %v841_v19, %v834_v15  ;;  %v678_v19 = vld [vmem:[%s9078_s22 + $0x720] sm:$0xff] }
 0x22f   : > { %2179 = vmatprep.mubr.bf16.mxu0 %v1111_v25  ;;  %v736_v25 = vld [vmem:[%s9078_s22 + $0x8f0] sm:$0xff] }
 0x230   : > { %v1044_v27 = vpack.c.bf16 %v743_v26, %v736_v25  ;;  %v608_v25 = vld [vmem:[%s9078_s22 + $0x4f0] sm:$0xff]  ;;  %v615_v26 = vld [vmem:[%s9078_s22 + $0x528] sm:$0xff] }
 0x232   : > { %8080 = vmatprep.mubr.msk.bf16.mxu1 %vm1521_vm0, %v1044_v27  ;;  %v8874_v27 = vld [vmem:[%s11929_s3 + $0x28] sm:$0xff]  }
 0x236   : > { %2180 = vmatmul.mubr.bf16.gmra.mrb[120].mxu0 %v1110_v30  ;;  %v1051_v30 = vpack.c.bf16 %v757_v29, %v750_v28  ;;  %v623_v28 = vld [vmem:[%s9078_s22 + $0x568] sm:$0xff]  ;;  %v848_v29 = vld [vmem:[%s9078_s22 + $0xc70] sm:$0xff] }
 0x237   : > { %2187 = vmatprep.mubr.bf16.mxu0 %v1118_v31  ;;  %v8871_v31 = vld [vmem:[%s11929_s3 + $0x10] sm:$0xff]  }
 0x238   : > { %8081 = vmatmul.mubr.msk.bf16.gmra.mrb[40].mxu1 %vm1521_vm0, %v1051_v30  ;;  %8108 = vmatprep.subr.bf16.mxu1 %v8871_v31  ;;  %v855_v30 = vld [vmem:[%s9078_s22 + $0xca8] sm:$0xff] }
 0x239   : > { %8109 = vmatpush3.bf16.msra.mxu1 %v8871_v31  ;;  %8084 = vmatprep.mubr.msk.bf16.mxu1 %vm1521_vm0, %v1058_v46  ;;  %v630_v31 = vld [vmem:[%s9078_s22 + $0x5a0] sm:$0xff]  ;;  %v1100_v32 = vpack.c.bf16 %v855_v30, %v848_v29  ;;  %v883_v46 = vld [vmem:[%s9078_s22 + $0xd88] sm:$0xff] }
 0x23a   : > { %8110 = vmatprep.subr.bf16.mxu1 %v8872_v50 }
 0x23d   : > { %8111 = vmatpush3.bf16.msra.mxu1 %v8872_v50  ;;  %v897_v50 = vld [vmem:[%s9078_s22 + $0xdf8] sm:$0xff] }
 0x23e   : > { %2188 = vmatmul.mubr.bf16.gmra.mrb[124].mxu0 %v1117_v42  ;;  %v944_v42 = vpack.c.bf16 %v545_v39, %v538_v38  ;;  %8112 = vmatprep.subr.bf16.mxu1 %v8873_v6  ;;  %v987_v38 = vpack.c.bf16 %v630_v31, %v623_v28  ;;  %v714_v28 = vld [vmem:[%s9078_s22 + $0x840] sm:$0xff] }
 0x23f   : > { %2228 = vmatprep.mubr.bf16.mxu0 %v903_v43  ;;  %v952_v43 = vpack.c.bf16 %v560_v41, %v553_v40 }
 0x241   : > { %8113 = vmatpush3.bf16.msra.mxu1 %v8873_v6  ;;  %v672_v6 = vld [vmem:[%s9078_s22 + $0x6f0] sm:$0xff] }
 0x242   : > { %8114 = vmatprep.subr.bf16.mxu1 %v8874_v27 }
 0x245   : > { %8115 = vmatpush3.bf16.msra.mxu1 %v8874_v27  ;;  %v707_v27 = vld [vmem:[%s9078_s22 + $0x808] sm:$0xff] }
 0x246   : > { %2229 = vmatmul.mubr.bf16.vlgmr.msra.gmra.mrb[0].mxu0 %v902_v48  ;;  %v785_v48 = vld [vmem:[%s9078_s22 + $0xa78] sm:$0xff]  ;;  %8116 = vmatprep.subr.bf16.mxu1 %v8875_v53  ;;  %v1029_v31 = vpack.c.bf16 %v714_v28, %v707_v27 }
 0x247   : > { %2236 = vmatprep.mubr.bf16.mxu0 %v910_v49  ;;  %v1065_v49 = vpack.c.bf16 %v785_v48, %v778_v47  ;;  %v644_v47 = vld [vmem:[%s9078_s22 + $0x610] sm:$0xff]  ;;  %v1114_v48 = vpack.c.bf16 %v883_v46, %v876_v45  ;;  %v727_v46 = vld [vmem:[%s9078_s22 + $0x8a8] sm:$0xff] }
 0x248   : > { %v994_v54 = vpack.c.bf16 %v644_v47, %v637_v44  ;;  %v720_v45 = vld [vmem:[%s9078_s22 + $0x870] sm:$0xff]  ;;  %v735_v47 = vld [vmem:[%s9078_s22 + $0x8e8] sm:$0xff] }
 0x249   : > { %8085 = vmatmul.mubr.msk.bf16.gmra.mrb[44].mxu1 %vm1521_vm0, %v1065_v49  ;;  %v890_v49 = vld [vmem:[%s9078_s22 + $0xdc0] sm:$0xff] }
 0x24a   : > { %8088 = vmatprep.mubr.msk.bf16.mxu1 %vm1521_vm0, %v1072_v2  ;;  %v1121_v51 = vpack.c.bf16 %v897_v50, %v890_v49  ;;  %8117 = vmatpush3.bf16.msra.mxu1 %v8875_v53  ;;  %v1035_v49 = vpack.c.bf16 %v727_v46, %v720_v45  ;;  %v804_v46 = vld [vmem:[%s9078_s22 + $0xb10] sm:$0xff] }
 0x24e   : > { %2237 = vmatmul.mubr.bf16.gmra.mrb[4].mxu0 %v909_v61  ;;  %v958_v61 = vpack.c.bf16 %v573_v58, %v566_v57  ;;  %v643_v57 = vld [vmem:[%s9078_s22 + $0x608] sm:$0xff] }
 0x24f   : > { %2244 = vmatprep.mubr.bf16.mxu0 %v917_v62  ;;  %v966_v62 = vpack.c.bf16 %v588_v60, %v581_v59  ;;  %v651_v58 = vld [vmem:[%s9078_s22 + $0x648] sm:$0xff]  ;;  %v658_v59 = vld [vmem:[%s9078_s22 + $0x680] sm:$0xff] }
 0x256   : > { %2245 = vmatmul.mubr.bf16.gmra.mrb[8].mxu0 %v916_v4  ;;  %v813_v4 = vld [vmem:[%s9078_s22 + $0xb58] sm:$0xff] }
 0x257   : > { %2252 = vmatprep.mubr.bf16.mxu0 %v924_v5  ;;  %v1079_v5 = vpack.c.bf16 %v813_v4, %v806_v3  ;;  %v650_v3 = vld [vmem:[%s9078_s22 + $0x640] sm:$0xff]  ;;  %v657_v4 = vld [vmem:[%s9078_s22 + $0x678] sm:$0xff] }
 0x258   : > { %v1000_v7 = vpack.c.bf16 %v657_v4, %v650_v3  ;;  %v755_v3 = vld [vmem:[%s9078_s22 + $0x988] sm:$0xff] }
 0x259   : > { %8089 = vmatmul.mubr.msk.bf16.gmra.mrb[48].mxu1 %vm1521_vm0, %v1079_v5  ;;  %v665_v5 = vld [vmem:[%s9078_s22 + $0x6b8] sm:$0xff]  ;;  %v763_v4 = vld [vmem:[%s9078_s22 + $0x9c8] sm:$0xff] }
 0x25a   : > { %v1008_v8 = vpack.c.bf16 %v672_v6, %v665_v5  ;;  %v770_v5 = vld [vmem:[%s9078_s22 + $0xa00] sm:$0xff] }
 0x25e   : > { %2253 = vmatmul.mubr.bf16.gmra.mrb[12].mxu0 %v923_v17  ;;  %v601_v17 = vld [vmem:[%s9078_s22 + $0x4b8] sm:$0xff] }
 0x25f   : > { %2260 = vmatprep.mubr.bf16.mxu0 %v931_v18  ;;  %v1086_v18 = vpack.c.bf16 %v827_v14, %v820_v13  ;;  %v1007_v13 = vpack.c.bf16 %v671_v10, %v664_v9 }
 0x261   : > { %8092 = vmatprep.mubr.msk.bf16.mxu1 %vm1521_vm0, %v1086_v18 }
 0x262   : > { %8093 = vmatmul.mubr.msk.bf16.gmra.mrb[52].mxu1 %vm1521_vm0, %v1093_v22  ;;  %v700_v22 = vld [vmem:[%s9078_s22 + $0x7d0] sm:$0xff] }
 0x263   : > { %8096 = vmatprep.mubr.msk.bf16.mxu1 %vm1521_vm0, %v1100_v32 }
 0x266   : > { %2261 = vmatmul.mubr.bf16.gmra.mrb[16].mxu0 %v930_v23  ;;  %v972_v23 = vpack.c.bf16 %v601_v17, %v594_v16 }
 0x267   : > { %2268 = vmatprep.mubr.bf16.mxu0 %v938_v24  ;;  %v980_v24 = vpack.c.bf16 %v616_v21, %v609_v20  ;;  %v685_v20 = vld [vmem:[%s9078_s22 + $0x758] sm:$0xff] }
 0x268   : > { %v693_v21 = vld [vmem:[%s9078_s22 + $0x798] sm:$0xff] }
 0x26a   : > { %8097 = vmatmul.mubr.msk.bf16.gmra.mrb[56].mxu1 %vm1521_vm0, %v1107_v35  ;;  %v706_v35 = vld [vmem:[%s9078_s22 + $0x800] sm:$0xff] }
 0x26b   : > { %8100 = vmatprep.mubr.msk.bf16.mxu1 %vm1521_vm0, %v1114_v48  ;;  %v742_v48 = vld [vmem:[%s9078_s22 + $0x920] sm:$0xff] }
 0x26e   : > { %2269 = vmatmul.mubr.bf16.gmra.mrb[20].mxu0 %v937_v36  ;;  %v979_v36 = vpack.c.bf16 %v615_v26, %v608_v25  ;;  %v692_v25 = vld [vmem:[%s9078_s22 + $0x790] sm:$0xff]  ;;  %v699_v26 = vld [vmem:[%s9078_s22 + $0x7c8] sm:$0xff] }
 0x26f   : > { %2276 = vmatprep.mubr.bf16.mxu0 %v945_v37  ;;  %v9671_v37 = vpop.f32.mrb[0].mxu1  ;;  %v1021_v29 = vpack.c.bf16 %v699_v26, %v692_v25  ;;  %v798_v25 = vld [vmem:[%s9078_s22 + $0xae0] sm:$0xff] }
 0x270   : > { %v9674_v39 = vpop.f32.mrb[1].mxu1 }
 0x271   : > { %v9677_v40 = vpop.f32.mrb[2].mxu1 }
 0x272   : > { %v9679_v41 = vpop.f32.mrb[3].mxu1  ;;  %8101 = vmatmul.mubr.msk.bf16.gmra.mrb[60].mxu1 %vm1521_vm0, %v1121_v51  ;;  %v1043_v51 = vpack.c.bf16 %v742_v48, %v735_v47  ;;  %v811_v47 = vld [vmem:[%s9078_s22 + $0xb48] sm:$0xff] }
 0x273   : > { %v819_v48 = vld [vmem:[%s9078_s22 + $0xb88] sm:$0xff] }
 0x276   : > { %2277 = vmatmul.mubr.bf16.gmra.mrb[24].mxu0 %v944_v42  ;;  %v622_v42 = vld [vmem:[%s9078_s22 + $0x560] sm:$0xff] }
 0x277   : > { %2284 = vmatprep.mubr.bf16.mxu0 %v952_v43  ;;  %v629_v43 = vld [vmem:[%s9078_s22 + $0x598] sm:$0xff] }
 0x278   : > { %v986_v52 = vpack.c.bf16 %v629_v43, %v622_v42  ;;  %v728_v42 = vld [vmem:[%s9078_s22 + $0x8b0] sm:$0xff] }
 0x27e   : > { %2285 = vmatmul.mubr.bf16.gmra.mrb[28].mxu0 %v951_v55  ;;  %v8876_v55 = vld [vmem:[%s11929_s3 + $0x38] sm:$0xff]  }
 0x27f   : > { %2292 = vmatprep.mubr.bf16.mxu0 %v959_v56  ;;  %v636_v56 = vld [vmem:[%s9078_s22 + $0x5d0] sm:$0xff]  ;;  %8118 = vmatprep.subr.bf16.mxu1 %v8876_v55 }
 0x280   : > { %8119 = vmatpush3.bf16.msra.mxu1 %v8876_v55  ;;  %v993_v60 = vpack.c.bf16 %v643_v57, %v636_v56  ;;  %v734_v55 = vld [vmem:[%s9078_s22 + $0x8e0] sm:$0xff]  ;;  %v741_v56 = vld [vmem:[%s9078_s22 + $0x918] sm:$0xff] }
 0x281   : > { %v749_v57 = vld [vmem:[%s9078_s22 + $0x958] sm:$0xff] }
 0x286   : > { %2293 = vmatmul.mubr.bf16.gmra.mrb[32].mxu0 %v958_v61  ;;  %v9701_v61 = vpop.f32.mrb[4].mxu1 }
 0x287   : > { %2300 = vmatprep.mubr.bf16.mxu0 %v966_v62  ;;  %v1001_v62 = vpack.c.bf16 %v658_v59, %v651_v58  ;;  %v9703_v63 = vpop.f32.mrb[5].mxu1  ;;  %v756_v58 = vld [vmem:[%s9078_s22 + $0x990] sm:$0xff]  ;;  %v1042_v59 = vpack.c.bf16 %v741_v56, %v734_v55 }
 0x288   : > { %v9705_v0 = vpop.f32.mrb[6].mxu1 }
 0x289   : > { %v9707_v2 = vpop.f32.mrb[7].mxu1 }
 0x28a   : > { %v9717_v14 = vpop.f32.mrb[8].mxu1 }
 0x28b   : > { %v9719_v16 = vpop.f32.mrb[9].mxu1 }
 0x28c   : > { %v9721_v17 = vpop.f32.mrb[10].mxu1 }
 0x28d   : > { %v9723_v18 = vpop.f32.mrb[11].mxu1 }
 0x28e   : > { %2301 = vmatmul.mubr.bf16.gmra.mrb[36].mxu0 %v965_v11  ;;  %v679_v11 = vld [vmem:[%s9078_s22 + $0x728] sm:$0xff] }
 0x28f   : > { %2308 = vmatprep.mubr.bf16.mxu0 %v973_v12  ;;  %v686_v12 = vld [vmem:[%s9078_s22 + $0x760] sm:$0xff] }
 0x290   : > { %v1015_v15 = vpack.c.bf16 %v686_v12, %v679_v11  ;;  %v762_v12 = vld [vmem:[%s9078_s22 + $0x9c0] sm:$0xff] }
 0x296   : > { %2309 = vmatmul.mubr.bf16.gmra.mrb[40].mxu0 %v972_v23  ;;  %v1014_v23 = vpack.c.bf16 %v685_v20, %v678_v19  ;;  %v9733_v30 = vpop.f32.mrb[12].mxu1  ;;  %v784_v19 = vld [vmem:[%s9078_s22 + $0xa70] sm:$0xff] }
 0x297   : > { %2316 = vmatprep.mubr.bf16.mxu0 %v980_v24  ;;  %v1022_v24 = vpack.c.bf16 %v700_v22, %v693_v21  ;;  %v9735_v32 = vpop.f32.mrb[13].mxu1  ;;  %v776_v22 = vld [vmem:[%s9078_s22 + $0xa30] sm:$0xff] }
 0x298   : > { %v9737_v33 = vpop.f32.mrb[14].mxu1 }
 0x299   : > { %v9739_v34 = vpop.f32.mrb[15].mxu1 }
 0x29e   : > { %2317 = vmatmul.mubr.bf16.gmra.mrb[44].mxu0 %v979_v36  ;;  %v713_v36 = vld [vmem:[%s9078_s22 + $0x838] sm:$0xff] }
 0x29f   : > { %2324 = vmatprep.mubr.bf16.mxu0 %v987_v38  ;;  %v721_v38 = vld [vmem:[%s9078_s22 + $0x878] sm:$0xff]  ;;  %v1028_v43 = vpack.c.bf16 %v713_v36, %v706_v35  ;;  %v790_v36 = vld [vmem:[%s9078_s22 + $0xaa0] sm:$0xff] }
 0x2a0   : > { %v1036_v44 = vpack.c.bf16 %v728_v42, %v721_v38  ;;  %v797_v38 = vld [vmem:[%s9078_s22 + $0xad8] sm:$0xff] }
 0x2a1   : > { %v805_v42 = vld [vmem:[%s9078_s22 + $0xb18] sm:$0xff] }
 0x2a5   : > { %v9749_v50 = vpop.f32.mrb[16].mxu1 }
 0x2a6   : > { %2325 = vmatmul.mubr.bf16.gmra.mrb[48].mxu0 %v986_v52  ;;  %v9751_v52 = vpop.f32.mrb[17].mxu1 }
 0x2a7   : > { %2332 = vmatprep.mubr.bf16.mxu0 %v994_v54  ;;  %v9753_v53 = vpop.f32.mrb[18].mxu1 }
 0x2a8   : > { %v9755_v54 = vpop.f32.mrb[19].mxu1 }
 0x2ae   : > { %2333 = vmatmul.mubr.bf16.gmra.mrb[52].mxu0 %v993_v60  ;;  %v1050_v60 = vpack.c.bf16 %v756_v58, %v749_v57 }
 0x2af   : > { %2340 = vmatprep.mubr.bf16.mxu0 %v1001_v62  ;;  %v748_v62 = vld [vmem:[%s9078_s22 + $0x950] sm:$0xff] }
 0x2b0   : > { %v1049_v6 = vpack.c.bf16 %v755_v3, %v748_v62  ;;  %v825_v62 = vld [vmem:[%s9078_s22 + $0xbb8] sm:$0xff] }
 0x2b1   : > { %v833_v3 = vld [vmem:[%s9078_s22 + $0xbf8] sm:$0xff] }
 0x2b6   : > { %2341 = vmatmul.mubr.bf16.gmra.mrb[56].mxu0 %v1000_v7  ;;  %v9765_v7 = vpop.f32.mrb[20].mxu1 }
 0x2b7   : > { %2348 = vmatprep.mubr.bf16.mxu0 %v1008_v8  ;;  %v1057_v8 = vpack.c.bf16 %v770_v5, %v763_v4  ;;  %v9767_v9 = vpop.f32.mrb[21].mxu1  ;;  %v840_v4 = vld [vmem:[%s9078_s22 + $0xc30] sm:$0xff] }
 0x2b8   : > { %v9769_v10 = vpop.f32.mrb[22].mxu1 }
 0x2b9   : > { %v9771_v11 = vpop.f32.mrb[23].mxu1 }
 0x2be   : > { %2349 = vmatmul.mubr.bf16.gmra.mrb[60].mxu0 %v1007_v13  ;;  %v769_v13 = vld [vmem:[%s9078_s22 + $0x9f8] sm:$0xff] }
 0x2bf   : > { %2356 = vmatprep.mubr.bf16.mxu0 %v1015_v15  ;;  %v777_v15 = vld [vmem:[%s9078_s22 + $0xa38] sm:$0xff]  ;;  %v1056_v20 = vpack.c.bf16 %v769_v13, %v762_v12  ;;  %v832_v12 = vld [vmem:[%s9078_s22 + $0xbf0] sm:$0xff]  ;;  %v839_v13 = vld [vmem:[%s9078_s22 + $0xc28] sm:$0xff] }
 0x2c0   : > { %v1064_v21 = vpack.c.bf16 %v784_v19, %v777_v15  ;;  %v847_v15 = vld [vmem:[%s9078_s22 + $0xc68] sm:$0xff]  ;;  %v854_v19 = vld [vmem:[%s9078_s22 + $0xca0] sm:$0xff] }
 0x2c5   : > { %v9781_v27 = vpop.f32.mrb[24].mxu1 }
 0x2c6   : > { %2357 = vmatmul.mubr.bf16.gmra.mrb[64].mxu0 %v1014_v23  ;;  %v783_v23 = vld [vmem:[%s9078_s22 + $0xa68] sm:$0xff] }
 0x2c7   : > { %2364 = vmatprep.mubr.bf16.mxu0 %v1022_v24  ;;  %v791_v24 = vld [vmem:[%s9078_s22 + $0xaa8] sm:$0xff]  ;;  %v1063_v26 = vpack.c.bf16 %v783_v23, %v776_v22  ;;  %v1091_v23 = vpack.c.bf16 %v839_v13, %v832_v12 }
 0x2c8   : > { %v1071_v28 = vpack.c.bf16 %v798_v25, %v791_v24 }
 0x2ce   : > { %2365 = vmatmul.mubr.bf16.gmra.mrb[68].mxu0 %v1021_v29  ;;  %v9783_v29 = vpop.f32.mrb[25].mxu1 }
 0x2cf   : > { %2372 = vmatprep.mubr.bf16.mxu0 %v1029_v31  ;;  %v9785_v31 = vpop.f32.mrb[26].mxu1 }
 0x2d0   : > { %v9787_v35 = vpop.f32.mrb[27].mxu1 }
 0x2d5   : > { %v9797_v55 = vpop.f32.mrb[28].mxu1 }
 0x2d6   : > { %2373 = vmatmul.mubr.bf16.gmra.mrb[72].mxu0 %v1028_v43  ;;  %v812_v43 = vld [vmem:[%s9078_s22 + $0xb50] sm:$0xff]  ;;  %v9799_v57 = vpop.f32.mrb[29].mxu1 }
 0x2d7   : > { %2380 = vmatprep.mubr.bf16.mxu0 %v1036_v44  ;;  %v1070_v44 = vpack.c.bf16 %v797_v38, %v790_v36  ;;  %v1078_v45 = vpack.c.bf16 %v812_v43, %v805_v42  ;;  %v9801_v58 = vpop.f32.mrb[30].mxu1 }
 0x2de   : > { %2381 = vmatmul.mubr.bf16.gmra.mrb[76].mxu0 %v1035_v49  ;;  %v826_v49 = vld [vmem:[%s9078_s22 + $0xbc0] sm:$0xff] }
 0x2df   : > { %2388 = vmatprep.mubr.bf16.mxu0 %v1043_v51  ;;  %v1077_v51 = vpack.c.bf16 %v811_v47, %v804_v46  ;;  %v1085_v56 = vpack.c.bf16 %v826_v49, %v819_v48  ;;  %v846_v46 = vld [vmem:[%s9078_s22 + $0xc60] sm:$0xff]  ;;  %v853_v47 = vld [vmem:[%s9078_s22 + $0xc98] sm:$0xff] }
 0x2e6   : > { %2389 = vmatmul.mubr.bf16.gmra.mrb[80].mxu0 %v1042_v59  ;;  %v9803_v59 = vpop.f32.mrb[31].mxu1 }
 0x2e7   : > { %2396 = vmatprep.mubr.bf16.mxu0 %v1050_v60  ;;  %v818_v60 = vld [vmem:[%s9078_s22 + $0xb80] sm:$0xff]  ;;  %v9819_v24 = vpop.f32.mrb[32].mxu1 }
 0x2e8   : > { %v1084_v5 = vpack.c.bf16 %v825_v62, %v818_v60 }
 0x2ee   : > { %2397 = vmatmul.mubr.bf16.gmra.mrb[84].mxu0 %v1049_v6  ;;  %v1092_v6 = vpack.c.bf16 %v840_v4, %v833_v3  ;;  %v1098_v4 = vpack.c.bf16 %v853_v47, %v846_v46 }
 0x2ef   : > { %2404 = vmatprep.mubr.bf16.mxu0 %v1057_v8  ;;  %v9812_v8 = vld [vmem:[%s11928_s2] ss:$0 sm:$0xff] }
 0x2f6   : > { %2405 = vmatmul.mubr.bf16.gmra.mrb[88].mxu0 %v1056_v20 }
 0x2f7   : > { %2412 = vmatprep.mubr.bf16.mxu0 %v1064_v21 }
 0x2fe   : > { %2413 = vmatmul.mubr.bf16.gmra.mrb[92].mxu0 %v1063_v26  ;;  %v1099_v26 = vpack.c.bf16 %v854_v19, %v847_v15  ;;  %v860_v19 = vld [vmem:[%s9078_s22 + $0xcd0] sm:$0xff] }
 0x2ff   : > { %2420 = vmatprep.mubr.bf16.mxu0 %v1071_v28  ;;  %v9821_v28 = vpop.f32.mrb[33].mxu1 }
 0x300   : > { %v9825_v43 = vpop.f32.mrb[34].mxu1 }
 0x306   : > { %2421 = vmatmul.mubr.bf16.gmra.mrb[96].mxu0 %v1070_v44  ;;  %v9827_v44 = vpop.f32.mrb[35].mxu1 }
 0x307   : > { %2428 = vmatprep.mubr.bf16.mxu0 %v1078_v45 }
 0x30e   : > { %2429 = vmatmul.mubr.bf16.gmra.mrb[100].mxu0 %v1077_v51  ;;  %v861_v51 = vld [vmem:[%s9078_s22 + $0xcd8] sm:$0xff] }
 0x30f   : > { %2436 = vmatprep.mubr.bf16.mxu0 %v1085_v56  ;;  %v868_v56 = vld [vmem:[%s9078_s22 + $0xd10] sm:$0xff] }
 0x316   : > { %2437 = vmatmul.mubr.bf16.gmra.mrb[104].mxu0 %v1084_v5 }
 0x317   : > { %2444 = vmatprep.mubr.bf16.mxu0 %v1092_v6 }
 0x319   : > { %v2230_v20 = vpop.f32.mrb[0].mxu0 }
 0x31a   : > { %v8490_v21 = vadd.f32 %v9812_v8, %v2230_v20  ;;  %v2232_v22 = vpop.f32.mrb[1].mxu0  ;;  %v867_v20 = vld [vmem:[%s9078_s22 + $0xd08] sm:$0xff] }
 0x31b   : > { %v2233_v25 = vpop.f32.mrb[2].mxu0 }
 0x31c   : > { %v8491_v36 = vadd.f32 %v9812_v8, %v2233_v25  ;;  %v2520_v38 = vadd.f32 %v8490_v21, %v9674_v39  ;;  %v2235_v42 = vpop.f32.mrb[3].mxu0  ;;  %v882_v25 = vld [vmem:[%s9078_s22 + $0xd80] sm:$0xff] }
 0x31e   : > { %v2523_v45 = vadd.f32 %v8491_v36, %v9679_v41  ;;  %2445 = vmatmul.mubr.bf16.gmra.mrb[108].mxu0 %v1091_v23  ;;  %v2774_v48 = vmax.f32 %v2520_v38, 0.0  ;;  %v1106_v41 = vpack.c.bf16 %v868_v56, %v861_v51  ;;  %v875_v23 = vld [vmem:[%s9078_s22 + $0xd48] sm:$0xff] }
 0x31f   : > { %2452 = vmatprep.mubr.bf16.mxu0 %v1099_v26  ;;  %v8877_v26 = vld [vmem:[%s11931_s5] sm:$0xff]   ;;  %v1113_v47 = vpack.c.bf16 %v882_v25, %v875_v23 }
 0x320   : > { %v2775_v49 = vmax.f32 %v2523_v45, 0.0  ;;  %v1105_v45 = vpack.c.bf16 %v867_v20, %v860_v19  ;;  %8184 = vmatprep.subr.bf16.mxu1 %v8877_v26 }
 0x321   : > { %v2238_v60 = vpop.f32.mrb[4].mxu0 }
 0x322   : > { %v8492_v39 = vadd.f32 %v9812_v8, %v2238_v60  ;;  %v2240_v62 = vpop.f32.mrb[5].mxu0  ;;  %v2838_v3 = vpack.c.bf16 %v2775_v49, %v2774_v48 }
 0x323   : > { %v2241_v5 = vpop.f32.mrb[6].mxu0 }
 0x324   : > { %v2528_v6 = vadd.f32 %v8492_v39, %v9671_v37  ;;  %v8493_v12 = vadd.f32 %v9812_v8, %v2241_v5  ;;  %v2243_v13 = vpop.f32.mrb[7].mxu0  ;;  %8120 = vmatprep.mubr.bf16.mxu1 %v2838_v3  ;;  %v874_v3 = vld [vmem:[%s9078_s22 + $0xd40] sm:$0xff] }
 0x326   : > { %v2531_v15 = vadd.f32 %v8493_v12, %v9677_v40  ;;  %2453 = vmatmul.mubr.bf16.gmra.mrb[112].mxu0 %v1098_v4  ;;  %v2776_v21 = vmax.f32 %v2528_v6, 0.0  ;;  %v9846_v40 = vpop.f32.mrb[36].mxu1  ;;  %v881_v4 = vld [vmem:[%s9078_s22 + $0xd78] sm:$0xff]  ;;  %v896_v12 = vld [vmem:[%s9078_s22 + $0xdf0] sm:$0xff] }
 0x327   : > { %2460 = vmatprep.mubr.bf16.mxu0 %v1106_v41  ;;  %v9848_v48 = vpop.f32.mrb[37].mxu1  ;;  %v889_v6 = vld [vmem:[%s9078_s22 + $0xdb8] sm:$0xff]  ;;  %v1112_v20 = vpack.c.bf16 %v881_v4, %v874_v3 }
 0x328   : > { %v2777_v22 = vmax.f32 %v2531_v15, 0.0  ;;  %v9852_v60 = vpop.f32.mrb[38].mxu1 }
 0x329   : > { %v2246_v36 = vpop.f32.mrb[8].mxu0  ;;  %v9854_v39 = vpop.f32.mrb[39].mxu1 }
 0x32a   : > { %v2839_v37 = vpack.c.bf16 %v2777_v22, %v2776_v21  ;;  %v8494_v38 = vadd.f32 %v9812_v8, %v2246_v36  ;;  %v2248_v42 = vpop.f32.mrb[9].mxu0  ;;  %v1120_v22 = vpack.c.bf16 %v896_v12, %v889_v6  ;;  %v888_v36 = vld [vmem:[%s9078_s22 + $0xdb0] sm:$0xff] }
 0x32b   : > { %v2249_v46 = vpop.f32.mrb[10].mxu0 }
 0x32c   : > { %v8495_v49 = vadd.f32 %v9812_v8, %v2249_v46  ;;  %v2536_v51 = vadd.f32 %v8494_v38, %v9703_v63  ;;  %v2251_v56 = vpop.f32.mrb[11].mxu0  ;;  %8121 = vmatmul.mubr.bf16.vlgmr.msra.gmra.mrb[64].mxu1 %v2839_v37  ;;  %v895_v37 = vld [vmem:[%s9078_s22 + $0xde8] sm:$0xff]  ;;  %s10821_s22 = scalar_lea.vmem %s11939_s13, %s8810_s17 }
 0x32d   : > { %8185 = vmatpush3.bf16.msra.mxu1 %v8877_v26  ;;  %v9868_v56 = vpop.f32.mrb[40].mxu1 }
 0x32e   : > { %v2539_v62 = vadd.f32 %v8495_v49, %v9707_v2  ;;  %2461 = vmatmul.mubr.bf16.gmra.mrb[116].mxu0 %v1105_v45  ;;  %v2778_v5 = vmax.f32 %v2536_v51, 0.0  ;;  %v1119_v51 = vpack.c.bf16 %v895_v37, %v888_v36 }
 0x32f   : > { %2468 = vmatprep.mubr.bf16.mxu0 %v1113_v47 }
 0x330   : > { %v2779_v41 = vmax.f32 %v2539_v62, 0.0  ;;  %v9870_v62 = vpop.f32.mrb[41].mxu1 }
 0x331   : > { %v2254_v63 = vpop.f32.mrb[12].mxu0 }
 0x332   : > { %v8496_v13 = vadd.f32 %v9812_v8, %v2254_v63  ;;  %v2256_v15 = vpop.f32.mrb[13].mxu0  ;;  %v2840_v19 = vpack.c.bf16 %v2779_v41, %v2778_v5  ;;  %v9874_v5 = vpop.f32.mrb[42].mxu1 }
 0x333   : > { %v2257_v21 = vpop.f32.mrb[14].mxu0  ;;  %v9876_v41 = vpop.f32.mrb[43].mxu1 }
 0x334   : > { %v2544_v2 = vadd.f32 %v8496_v13, %v9701_v61  ;;  %v8497_v23 = vadd.f32 %v9812_v8, %v2257_v21  ;;  %v2259_v25 = vpop.f32.mrb[15].mxu0  ;;  %8124 = vmatprep.mubr.bf16.mxu1 %v2840_v19 }
 0x336   : > { %v2547_v26 = vadd.f32 %v8497_v23, %v9705_v0  ;;  %2469 = vmatmul.mubr.bf16.gmra.mrb[120].mxu0 %v1112_v20  ;;  %v2780_v38 = vmax.f32 %v2544_v2, 0.0 }
 0x337   : > { %2476 = vmatprep.mubr.bf16.mxu0 %v1120_v22 }
 0x338   : > { %v2781_v42 = vmax.f32 %v2547_v26, 0.0  ;;  %v8878_v26 = vld [vmem:[%s11931_s5 + $0x8] sm:$0xff]  }
 0x339   : > { %v2262_v45 = vpop.f32.mrb[16].mxu0  ;;  %8186 = vmatprep.subr.bf16.mxu1 %v8878_v26 }
 0x33a   : > { %v8498_v46 = vadd.f32 %v9812_v8, %v2262_v45  ;;  %v2264_v47 = vpop.f32.mrb[17].mxu0  ;;  %v2841_v49 = vpack.c.bf16 %v2781_v42, %v2780_v38  ;;  %v9888_v45 = vpop.f32.mrb[44].mxu1  ;;  %8187 = vmatpush3.bf16.msra.mxu1 %v8878_v26 }
 0x33b   : > { %v2265_v61 = vpop.f32.mrb[18].mxu0 }
 0x33c   : > { %v8499_v3 = vadd.f32 %v9812_v8, %v2265_v61  ;;  %v2552_v0 = vadd.f32 %v8498_v46, %v9719_v16  ;;  %v2267_v4 = vpop.f32.mrb[19].mxu0  ;;  %8125 = vmatmul.mubr.bf16.gmra.mrb[68].mxu1 %v2841_v49  ;;  %v9890_v46 = vpop.f32.mrb[45].mxu1 }
 0x33e   : > { %v2555_v6 = vadd.f32 %v8499_v3, %v9723_v18  ;;  %2477 = vmatmul.mubr.bf16.gmra.mrb[124].mxu0 %v1119_v51  ;;  %v2782_v12 = vmax.f32 %v2552_v0, 0.0  ;;  %v9894_v51 = vpop.f32.mrb[46].mxu1 }
 0x33f   : > { %5637 = vmatprep.mubr.bf16.mxu0 %v8975_v1  ;;  %v9896_v61 = vpop.f32.mrb[47].mxu1 }
 0x340   : > { %v2783_v63 = vmax.f32 %v2555_v6, 0.0 }
 0x341   : > { %v2270_v13 = vpop.f32.mrb[20].mxu0 }
 0x342   : > { %v8500_v15 = vadd.f32 %v9812_v8, %v2270_v13  ;;  %v2272_v19 = vpop.f32.mrb[21].mxu0  ;;  %v2842_v20 = vpack.c.bf16 %v2783_v63, %v2782_v12 }
 0x343   : > { %v2273_v21 = vpop.f32.mrb[22].mxu0 }
 0x344   : > { %v2560_v16 = vadd.f32 %v8500_v15, %v9717_v14  ;;  %v8501_v22 = vadd.f32 %v9812_v8, %v2273_v21  ;;  %v2275_v2 = vpop.f32.mrb[23].mxu0  ;;  %8128 = vmatprep.mubr.bf16.mxu1 %v2842_v20 }
 0x346   : > { %v2563_v23 = vadd.f32 %v8501_v22, %v9721_v17  ;;  %v2784_v18 = vmax.f32 %v2560_v16, 0.0 }
 0x348   : > { %v2785_v25 = vmax.f32 %v2563_v23, 0.0 }
 0x349   : > { %v2278_v36 = vpop.f32.mrb[24].mxu0 }
 0x34a   : > { %v8502_v37 = vadd.f32 %v9812_v8, %v2278_v36  ;;  %v2280_v38 = vpop.f32.mrb[25].mxu0  ;;  %v2843_v42 = vpack.c.bf16 %v2785_v25, %v2784_v18  ;;  %v9904_v25 = vpop.f32.mrb[48].mxu1 }
 0x34b   : > { %v2281_v14 = vpop.f32.mrb[26].mxu0  ;;  %v9906_v36 = vpop.f32.mrb[49].mxu1 }
 0x34c   : > { %v8503_v17 = vadd.f32 %v9812_v8, %v2281_v14  ;;  %v2568_v47 = vadd.f32 %v8502_v37, %v9735_v32  ;;  %v2283_v49 = vpop.f32.mrb[27].mxu0  ;;  %8129 = vmatmul.mubr.bf16.gmra.mrb[72].mxu1 %v2843_v42  ;;  %v9910_v42 = vpop.f32.mrb[50].mxu1 }
 0x34e   : > { %v2571_v3 = vadd.f32 %v8503_v17, %v9739_v34  ;;  %v2786_v0 = vmax.f32 %v2568_v47, 0.0 }
 0x350   : > { %v2787_v4 = vmax.f32 %v2571_v3, 0.0 }
 0x351   : > { %v2286_v6 = vpop.f32.mrb[28].mxu0 }
 0x352   : > { %v8504_v12 = vadd.f32 %v9812_v8, %v2286_v6  ;;  %v2288_v63 = vpop.f32.mrb[29].mxu0  ;;  %v2844_v13 = vpack.c.bf16 %v2787_v4, %v2786_v0 }
 0x353   : > { %v2289_v15 = vpop.f32.mrb[30].mxu0 }
 0x354   : > { %v2576_v19 = vadd.f32 %v8504_v12, %v9733_v30  ;;  %v8505_v32 = vadd.f32 %v9812_v8, %v2289_v15  ;;  %v2291_v20 = vpop.f32.mrb[31].mxu0  ;;  %8132 = vmatprep.mubr.bf16.mxu1 %v2844_v13 }
 0x356   : > { %v2579_v21 = vadd.f32 %v8505_v32, %v9737_v33  ;;  %v2788_v16 = vmax.f32 %v2576_v19, 0.0  ;;  %v9912_v33 = vpop.f32.mrb[51].mxu1 }
 0x358   : > { %v2789_v22 = vmax.f32 %v2579_v21, 0.0 }
 0x359   : > { %v2294_v2 = vpop.f32.mrb[32].mxu0 }
 0x35a   : > { %v8506_v34 = vadd.f32 %v9812_v8, %v2294_v2  ;;  %v2296_v23 = vpop.f32.mrb[33].mxu0  ;;  %v2845_v18 = vpack.c.bf16 %v2789_v22, %v2788_v16  ;;  %v9923_v22 = vpop.f32.mrb[52].mxu1 }
 0x35b   : > { %v2297_v26 = vpop.f32.mrb[34].mxu0  ;;  %v9925_v2 = vpop.f32.mrb[53].mxu1 }
 0x35c   : > { %v8507_v30 = vadd.f32 %v9812_v8, %v2297_v26  ;;  %v2584_v37 = vadd.f32 %v8506_v34, %v9751_v52  ;;  %v2299_v38 = vpop.f32.mrb[35].mxu0  ;;  %8133 = vmatmul.mubr.bf16.gmra.mrb[76].mxu1 %v2845_v18  ;;  %v9929_v18 = vpop.f32.mrb[54].mxu1 }
 0x35d   : > { %v9931_v26 = vpop.f32.mrb[55].mxu1 }
 0x35e   : > { %v2587_v14 = vadd.f32 %v8507_v30, %v9755_v54  ;;  %v2790_v17 = vmax.f32 %v2584_v37, 0.0  ;;  %v8879_v54 = vld [vmem:[%s11931_s5 + $0x10] sm:$0xff]  }
 0x35f   : > { %8188 = vmatprep.subr.bf16.mxu1 %v8879_v54 }
 0x360   : > { %v2791_v47 = vmax.f32 %v2587_v14, 0.0  ;;  %8189 = vmatpush3.bf16.msra.mxu1 %v8879_v54 }
 0x361   : > { %v2302_v49 = vpop.f32.mrb[36].mxu0 }
 0x362   : > { %v8508_v3 = vadd.f32 %v9812_v8, %v2302_v49  ;;  %v2304_v0 = vpop.f32.mrb[37].mxu0  ;;  %v2846_v4 = vpack.c.bf16 %v2791_v47, %v2790_v17 }
 0x363   : > { %v2305_v6 = vpop.f32.mrb[38].mxu0 }
 0x364   : > { %v2592_v12 = vadd.f32 %v8508_v3, %v9749_v50  ;;  %v8509_v52 = vadd.f32 %v9812_v8, %v2305_v6  ;;  %v2307_v63 = vpop.f32.mrb[39].mxu0  ;;  %8136 = vmatprep.mubr.bf16.mxu1 %v2846_v4 }
 0x366   : > { %v2595_v13 = vadd.f32 %v8509_v52, %v9753_v53  ;;  %v2792_v15 = vmax.f32 %v2592_v12, 0.0  ;;  %v9938_v12 = vpop.f32.mrb[56].mxu1 }
 0x367   : > { %v9940_v63 = vpop.f32.mrb[57].mxu1 }
 0x368   : > { %v2793_v19 = vmax.f32 %v2595_v13, 0.0 }
 0x369   : > { %v2310_v32 = vpop.f32.mrb[40].mxu0 }
 0x36a   : > { %v8510_v20 = vadd.f32 %v9812_v8, %v2310_v32  ;;  %v2312_v21 = vpop.f32.mrb[41].mxu0  ;;  %v2847_v16 = vpack.c.bf16 %v2793_v19, %v2792_v15  ;;  %v9942_v15 = vpop.f32.mrb[58].mxu1 }
 0x36b   : > { %v2313_v50 = vpop.f32.mrb[42].mxu0 }
 0x36c   : > { %v8511_v53 = vadd.f32 %v9812_v8, %v2313_v50  ;;  %v2600_v34 = vadd.f32 %v8510_v20, %v9767_v9  ;;  %v2315_v23 = vpop.f32.mrb[43].mxu0  ;;  %8137 = vmatmul.mubr.bf16.gmra.mrb[80].mxu1 %v2847_v16 }
 0x36e   : > { %v2603_v30 = vadd.f32 %v8511_v53, %v9771_v11  ;;  %v2794_v37 = vmax.f32 %v2600_v34, 0.0 }
 0x370   : > { %v2795_v38 = vmax.f32 %v2603_v30, 0.0 }
 0x371   : > { %v2318_v14 = vpop.f32.mrb[44].mxu0 }
 0x372   : > { %v8512_v17 = vadd.f32 %v9812_v8, %v2318_v14  ;;  %v2320_v47 = vpop.f32.mrb[45].mxu0  ;;  %v2848_v49 = vpack.c.bf16 %v2795_v38, %v2794_v37 }
 0x373   : > { %v2321_v3 = vpop.f32.mrb[46].mxu0 }
 0x374   : > { %v2608_v0 = vadd.f32 %v8512_v17, %v9765_v7  ;;  %v8513_v9 = vadd.f32 %v9812_v8, %v2321_v3  ;;  %v2323_v4 = vpop.f32.mrb[47].mxu0  ;;  %8140 = vmatprep.mubr.bf16.mxu1 %v2848_v49  ;;  %v9945_v7 = vpop.f32.mrb[59].mxu1 }
 0x375   : > { %v9947_v21 = vpop.f32.mrb[60].mxu1 }
 0x376   : > { %v2611_v6 = vadd.f32 %v8513_v9, %v9769_v10  ;;  %v2796_v52 = vmax.f32 %v2608_v0, 0.0  ;;  %v9951_v53 = vpop.f32.mrb[61].mxu1 }
 0x377   : > { %v9953_v34 = vpop.f32.mrb[62].mxu1 }
 0x378   : > { %v2797_v11 = vmax.f32 %v2611_v6, 0.0  ;;  %v9956_v30 = vpop.f32.mrb[63].mxu1 }
 0x379   : > { %v2326_v13 = vpop.f32.mrb[48].mxu0 }
 0x37a   : > { %v8514_v19 = vadd.f32 %v9812_v8, %v2326_v13  ;;  %v2328_v54 = vpop.f32.mrb[49].mxu0  ;;  %v2849_v32 = vpack.c.bf16 %v2797_v11, %v2796_v52  ;;  %v8880_v52 = vld [vmem:[%s11931_s5 + $0x18] sm:$0xff]  }
 0x37b   : > { %v2329_v20 = vpop.f32.mrb[50].mxu0  ;;  %8190 = vmatprep.subr.bf16.mxu1 %v8880_v52 }
 0x37c   : > { %v8515_v10 = vadd.f32 %v9812_v8, %v2329_v20  ;;  %v2616_v16 = vadd.f32 %v8514_v19, %v9783_v29  ;;  %v2331_v50 = vpop.f32.mrb[51].mxu0  ;;  %8141 = vmatmul.mubr.bf16.gmra.mrb[84].mxu1 %v2849_v32 }
 0x37d   : > { %8191 = vmatpush3.bf16.msra.mxu1 %v8880_v52 }
 0x37e   : > { %v2619_v23 = vadd.f32 %v8515_v10, %v9787_v35  ;;  %v2798_v37 = vmax.f32 %v2616_v16, 0.0 }
 0x380   : > { %v2799_v38 = vmax.f32 %v2619_v23, 0.0 }
 0x381   : > { %v2334_v14 = vpop.f32.mrb[52].mxu0 }
 0x382   : > { %v8516_v17 = vadd.f32 %v9812_v8, %v2334_v14  ;;  %v2336_v47 = vpop.f32.mrb[53].mxu0  ;;  %v2850_v49 = vpack.c.bf16 %v2799_v38, %v2798_v37 }
 0x383   : > { %v2337_v3 = vpop.f32.mrb[54].mxu0 }
 0x384   : > { %v2624_v29 = vadd.f32 %v8516_v17, %v9781_v27  ;;  %v8517_v0 = vadd.f32 %v9812_v8, %v2337_v3  ;;  %v2339_v9 = vpop.f32.mrb[55].mxu0  ;;  %8144 = vmatprep.mubr.bf16.mxu1 %v2850_v49 }
 0x386   : > { %v2627_v4 = vadd.f32 %v8517_v0, %v9785_v31  ;;  %v2800_v6 = vmax.f32 %v2624_v29, 0.0 }
 0x388   : > { %v2801_v35 = vmax.f32 %v2627_v4, 0.0 }
 0x389   : > { %v2342_v11 = vpop.f32.mrb[56].mxu0 }
 0x38a   : > { %v8518_v13 = vadd.f32 %v9812_v8, %v2342_v11  ;;  %v2344_v19 = vpop.f32.mrb[57].mxu0  ;;  %v2851_v54 = vpack.c.bf16 %v2801_v35, %v2800_v6 }
 0x38b   : > { %v2345_v32 = vpop.f32.mrb[58].mxu0 }
 0x38c   : > { %v8519_v27 = vadd.f32 %v9812_v8, %v2345_v32  ;;  %v2632_v20 = vadd.f32 %v8518_v13, %v9799_v57  ;;  %v2347_v10 = vpop.f32.mrb[59].mxu0  ;;  %8145 = vmatmul.mubr.bf16.gmra.mrb[88].mxu1 %v2851_v54 }
 0x38e   : > { %v2635_v31 = vadd.f32 %v8519_v27, %v9803_v59  ;;  %v2802_v16 = vmax.f32 %v2632_v20, 0.0 }
 0x390   : > { %v2803_v50 = vmax.f32 %v2635_v31, 0.0 }
 0x391   : > { %v2350_v23 = vpop.f32.mrb[60].mxu0 }
 0x392   : > { %v8520_v37 = vadd.f32 %v9812_v8, %v2350_v23  ;;  %v2352_v38 = vpop.f32.mrb[61].mxu0  ;;  %v2852_v14 = vpack.c.bf16 %v2803_v50, %v2802_v16 }
 0x393   : > { %v2353_v17 = vpop.f32.mrb[62].mxu0 }
 0x394   : > { %v2640_v47 = vadd.f32 %v8520_v37, %v9797_v55  ;;  %v8521_v49 = vadd.f32 %v9812_v8, %v2353_v17  ;;  %v2355_v3 = vpop.f32.mrb[63].mxu0  ;;  %8148 = vmatprep.mubr.bf16.mxu1 %v2852_v14 }
 0x396   : > { %v2643_v57 = vadd.f32 %v8521_v49, %v9801_v58  ;;  %v2804_v29 = vmax.f32 %v2640_v47, 0.0 }
 0x398   : > { %v2805_v0 = vmax.f32 %v2643_v57, 0.0 }
 0x399   : > { %v2358_v9 = vpop.f32.mrb[64].mxu0 }
 0x39a   : > { %v8522_v59 = vadd.f32 %v9812_v8, %v2358_v9  ;;  %v2360_v4 = vpop.f32.mrb[65].mxu0  ;;  %v2853_v6 = vpack.c.bf16 %v2805_v0, %v2804_v29 }
 0x39b   : > { %v2361_v35 = vpop.f32.mrb[66].mxu0 }
 0x39c   : > { %v8523_v52 = vadd.f32 %v9812_v8, %v2361_v35  ;;  %v2648_v11 = vadd.f32 %v8522_v59, %v9821_v28  ;;  %v2363_v13 = vpop.f32.mrb[67].mxu0  ;;  %8149 = vmatmul.mubr.bf16.gmra.mrb[92].mxu1 %v2853_v6 }
 0x39e   : > { %v2651_v55 = vadd.f32 %v8523_v52, %v9827_v44  ;;  %v2806_v19 = vmax.f32 %v2648_v11, 0.0 }
 0x3a0   : > { %v2807_v54 = vmax.f32 %v2651_v55, 0.0 }
 0x3a1   : > { %v2366_v32 = vpop.f32.mrb[68].mxu0 }
 0x3a2   : > { %v8524_v58 = vadd.f32 %v9812_v8, %v2366_v32  ;;  %v2368_v27 = vpop.f32.mrb[69].mxu0  ;;  %v2854_v20 = vpack.c.bf16 %v2807_v54, %v2806_v19 }
 0x3a3   : > { %v2369_v10 = vpop.f32.mrb[70].mxu0 }
 0x3a4   : > { %v2656_v31 = vadd.f32 %v8524_v58, %v9819_v24  ;;  %v8525_v16 = vadd.f32 %v9812_v8, %v2369_v10  ;;  %v2371_v50 = vpop.f32.mrb[71].mxu0  ;;  %8152 = vmatprep.mubr.bf16.mxu1 %v2854_v20 }
 0x3a6   : > { %v2659_v28 = vadd.f32 %v8525_v16, %v9825_v43  ;;  %v2808_v23 = vmax.f32 %v2656_v31, 0.0 }
 0x3a8   : > { %v2809_v37 = vmax.f32 %v2659_v28, 0.0 }
 0x3a9   : > { %v2374_v38 = vpop.f32.mrb[72].mxu0 }
 0x3aa   : > { %v8526_v44 = vadd.f32 %v9812_v8, %v2374_v38  ;;  %v2376_v14 = vpop.f32.mrb[73].mxu0  ;;  %v2855_v17 = vpack.c.bf16 %v2809_v37, %v2808_v23 }
 0x3ab   : > { %v2377_v47 = vpop.f32.mrb[74].mxu0 }
 0x3ac   : > { %v8527_v49 = vadd.f32 %v9812_v8, %v2377_v47  ;;  %v2664_v3 = vadd.f32 %v8526_v44, %v9848_v48  ;;  %v2379_v57 = vpop.f32.mrb[75].mxu0  ;;  %8153 = vmatmul.mubr.bf16.gmra.mrb[96].mxu1 %v2855_v17 }
 0x3ae   : > { %v2667_v24 = vadd.f32 %v8527_v49, %v9854_v39  ;;  %v2810_v29 = vmax.f32 %v2664_v3, 0.0 }
 0x3b0   : > { %v2811_v0 = vmax.f32 %v2667_v24, 0.0 }
 0x3b1   : > { %v2382_v9 = vpop.f32.mrb[76].mxu0 }
 0x3b2   : > { %v8528_v43 = vadd.f32 %v9812_v8, %v2382_v9  ;;  %v2384_v59 = vpop.f32.mrb[77].mxu0  ;;  %v2856_v4 = vpack.c.bf16 %v2811_v0, %v2810_v29 }
 0x3b3   : > { %v2385_v6 = vpop.f32.mrb[78].mxu0 }
 0x3b4   : > { %v2672_v35 = vadd.f32 %v8528_v43, %v9846_v40  ;;  %v8529_v52 = vadd.f32 %v9812_v8, %v2385_v6  ;;  %v2387_v11 = vpop.f32.mrb[79].mxu0  ;;  %8156 = vmatprep.mubr.bf16.mxu1 %v2856_v4 }
 0x3b6   : > { %v2675_v48 = vadd.f32 %v8529_v52, %v9852_v60  ;;  %v2812_v13 = vmax.f32 %v2672_v35, 0.0 }
 0x3b8   : > { %v2813_v55 = vmax.f32 %v2675_v48, 0.0 }
 0x3b9   : > { %v2390_v19 = vpop.f32.mrb[80].mxu0 }
 0x3ba   : > { %v8530_v39 = vadd.f32 %v9812_v8, %v2390_v19  ;;  %v2392_v54 = vpop.f32.mrb[81].mxu0  ;;  %v2857_v32 = vpack.c.bf16 %v2813_v55, %v2812_v13 }
 0x3bb   : > { %v2393_v58 = vpop.f32.mrb[82].mxu0 }
 0x3bc   : > { %v8531_v27 = vadd.f32 %v9812_v8, %v2393_v58  ;;  %v2680_v20 = vadd.f32 %v8530_v39, %v9870_v62  ;;  %v2395_v10 = vpop.f32.mrb[83].mxu0  ;;  %8157 = vmatmul.mubr.bf16.gmra.mrb[100].mxu1 %v2857_v32 }
 0x3be   : > { %v2683_v40 = vadd.f32 %v8531_v27, %v9876_v41  ;;  %v2814_v31 = vmax.f32 %v2680_v20, 0.0 }
 0x3c0   : > { %v2815_v16 = vmax.f32 %v2683_v40, 0.0 }
 0x3c1   : > { %v2398_v50 = vpop.f32.mrb[84].mxu0 }
 0x3c2   : > { %v8532_v60 = vadd.f32 %v9812_v8, %v2398_v50  ;;  %v2400_v28 = vpop.f32.mrb[85].mxu0  ;;  %v2858_v23 = vpack.c.bf16 %v2815_v16, %v2814_v31 }
 0x3c3   : > { %v2401_v37 = vpop.f32.mrb[86].mxu0 }
 0x3c4   : > { %v2688_v38 = vadd.f32 %v8532_v60, %v9868_v56  ;;  %v8533_v44 = vadd.f32 %v9812_v8, %v2401_v37  ;;  %v2403_v14 = vpop.f32.mrb[87].mxu0  ;;  %8160 = vmatprep.mubr.bf16.mxu1 %v2858_v23 }
 0x3c6   : > { %v2691_v62 = vadd.f32 %v8533_v44, %v9874_v5  ;;  %v2816_v17 = vmax.f32 %v2688_v38, 0.0 }
 0x3c8   : > { %v2817_v47 = vmax.f32 %v2691_v62, 0.0 }
 0x3c9   : > { %v2406_v49 = vpop.f32.mrb[88].mxu0 }
 0x3ca   : > { %v8534_v41 = vadd.f32 %v9812_v8, %v2406_v49  ;;  %v2408_v3 = vpop.f32.mrb[89].mxu0  ;;  %v2859_v57 = vpack.c.bf16 %v2817_v47, %v2816_v17 }
 0x3cb   : > { %v2409_v24 = vpop.f32.mrb[90].mxu0 }
 0x3cc   : > { %v8535_v29 = vadd.f32 %v9812_v8, %v2409_v24  ;;  %v2696_v0 = vadd.f32 %v8534_v41, %v9890_v46  ;;  %v2411_v9 = vpop.f32.mrb[91].mxu0  ;;  %8161 = vmatmul.mubr.bf16.gmra.mrb[104].mxu1 %v2859_v57 }
 0x3ce   : > { %v2699_v56 = vadd.f32 %v8535_v29, %v9896_v61  ;;  %v2818_v43 = vmax.f32 %v2696_v0, 0.0 }
 0x3d0   : > { %v2819_v59 = vmax.f32 %v2699_v56, 0.0 }
 0x3d1   : > { %v2414_v4 = vpop.f32.mrb[92].mxu0 }
 0x3d2   : > { %v8536_v5 = vadd.f32 %v9812_v8, %v2414_v4  ;;  %v2416_v6 = vpop.f32.mrb[93].mxu0  ;;  %v2860_v35 = vpack.c.bf16 %v2819_v59, %v2818_v43 }
 0x3d3   : > { %v2417_v52 = vpop.f32.mrb[94].mxu0 }
 0x3d4   : > { %v2704_v11 = vadd.f32 %v8536_v5, %v9888_v45  ;;  %v8537_v48 = vadd.f32 %v9812_v8, %v2417_v52  ;;  %v2419_v13 = vpop.f32.mrb[95].mxu0  ;;  %8164 = vmatprep.mubr.bf16.mxu1 %v2860_v35 }
 0x3d6   : > { %v2707_v46 = vadd.f32 %v8537_v48, %v9894_v51  ;;  %v2820_v55 = vmax.f32 %v2704_v11, 0.0 }
 0x3d8   : > { %v2821_v19 = vmax.f32 %v2707_v46, 0.0 }
 0x3d9   : > { %v2422_v39 = vpop.f32.mrb[96].mxu0 }
 0x3da   : > { %v8538_v61 = vadd.f32 %v9812_v8, %v2422_v39  ;;  %v2424_v54 = vpop.f32.mrb[97].mxu0  ;;  %v2861_v32 = vpack.c.bf16 %v2821_v19, %v2820_v55 }
 0x3db   : > { %v2425_v58 = vpop.f32.mrb[98].mxu0 }
 0x3dc   : > { %v8539_v27 = vadd.f32 %v9812_v8, %v2425_v58  ;;  %v2712_v20 = vadd.f32 %v8538_v61, %v9906_v36  ;;  %v2427_v10 = vpop.f32.mrb[99].mxu0  ;;  %8165 = vmatmul.mubr.bf16.gmra.mrb[108].mxu1 %v2861_v32 }
 0x3de   : > { %v2715_v45 = vadd.f32 %v8539_v27, %v9912_v33  ;;  %v2822_v40 = vmax.f32 %v2712_v20, 0.0 }
 0x3e0   : > { %v2823_v31 = vmax.f32 %v2715_v45, 0.0 }
 0x3e1   : > { %v2430_v16 = vpop.f32.mrb[100].mxu0 }
 0x3e2   : > { %v8540_v51 = vadd.f32 %v9812_v8, %v2430_v16  ;;  %v2432_v50 = vpop.f32.mrb[101].mxu0  ;;  %v2862_v60 = vpack.c.bf16 %v2823_v31, %v2822_v40 }
 0x3e3   : > { %v2433_v28 = vpop.f32.mrb[102].mxu0 }
 0x3e4   : > { %v2720_v23 = vadd.f32 %v8540_v51, %v9904_v25  ;;  %v8541_v37 = vadd.f32 %v9812_v8, %v2433_v28  ;;  %v2435_v38 = vpop.f32.mrb[103].mxu0  ;;  %8168 = vmatprep.mubr.bf16.mxu1 %v2862_v60 }
 0x3e6   : > { %v2723_v36 = vadd.f32 %v8541_v37, %v9910_v42  ;;  %v2824_v44 = vmax.f32 %v2720_v23, 0.0 }
 0x3e8   : > { %v2825_v14 = vmax.f32 %v2723_v36, 0.0 }
 0x3e9   : > { %v2438_v62 = vpop.f32.mrb[104].mxu0 }
 0x3ea   : > { %v8542_v33 = vadd.f32 %v9812_v8, %v2438_v62  ;;  %v2440_v17 = vpop.f32.mrb[105].mxu0  ;;  %v2863_v47 = vpack.c.bf16 %v2825_v14, %v2824_v44 }
 0x3eb   : > { %v2441_v49 = vpop.f32.mrb[106].mxu0 }
 0x3ec   : > { %v8543_v41 = vadd.f32 %v9812_v8, %v2441_v49  ;;  %v2728_v3 = vadd.f32 %v8542_v33, %v9925_v2  ;;  %v2443_v57 = vpop.f32.mrb[107].mxu0  ;;  %8169 = vmatmul.mubr.bf16.gmra.mrb[112].mxu1 %v2863_v47  ;;  %v8881_v33 = vld [vmem:[%s11933_s7] sm:$0xff]  }
 0x3ed   : > { %8256 = vmatprep.subr.bf16.mxu1 %v8881_v33 }
 0x3ee   : > { %v2731_v25 = vadd.f32 %v8543_v41, %v9931_v26  ;;  %v2826_v24 = vmax.f32 %v2728_v3, 0.0 }
 0x3f0   : > { %v2827_v29 = vmax.f32 %v2731_v25, 0.0 }
 0x3f1   : > { %v2446_v0 = vpop.f32.mrb[108].mxu0 }
 0x3f2   : > { %v8544_v42 = vadd.f32 %v9812_v8, %v2446_v0  ;;  %v2448_v9 = vpop.f32.mrb[109].mxu0  ;;  %v2864_v56 = vpack.c.bf16 %v2827_v29, %v2826_v24 }
 0x3f3   : > { %v2449_v43 = vpop.f32.mrb[110].mxu0 }
 0x3f4   : > { %v2736_v59 = vadd.f32 %v8544_v42, %v9923_v22  ;;  %v8545_v4 = vadd.f32 %v9812_v8, %v2449_v43  ;;  %v2451_v5 = vpop.f32.mrb[111].mxu0  ;;  %8172 = vmatprep.mubr.bf16.mxu1 %v2864_v56  ;;  %v10027_v22 = vld [vmem:[%s11930_s4] ss:$0 sm:$0xff] }
 0x3f6   : > { %v2739_v2 = vadd.f32 %v8545_v4, %v9929_v18  ;;  %v2828_v6 = vmax.f32 %v2736_v59, 0.0 }
 0x3f8   : > { %v2829_v35 = vmax.f32 %v2739_v2, 0.0 }
 0x3f9   : > { %v2454_v52 = vpop.f32.mrb[112].mxu0 }
 0x3fa   : > { %v8546_v26 = vadd.f32 %v9812_v8, %v2454_v52  ;;  %v2456_v11 = vpop.f32.mrb[113].mxu0  ;;  %v2865_v48 = vpack.c.bf16 %v2829_v35, %v2828_v6 }
 0x3fb   : > { %v2457_v13 = vpop.f32.mrb[114].mxu0 }
 0x3fc   : > { %v2744_v46 = vadd.f32 %v8546_v26, %v9940_v63  ;;  %v8547_v55 = vadd.f32 %v9812_v8, %v2457_v13  ;;  %v2459_v19 = vpop.f32.mrb[115].mxu0  ;;  %8173 = vmatmul.mubr.bf16.gmra.mrb[116].mxu1 %v2865_v48 }
 0x3fe   : > { %v2747_v18 = vadd.f32 %v8547_v55, %v9945_v7  ;;  %v2830_v61 = vmax.f32 %v2744_v46, 0.0 }
 0x3ff   : > { %v8122_v39 = vpop.f32.mrb[64].mxu1 }
 0x400   : > { %v2831_v54 = vmax.f32 %v2747_v18, 0.0  ;;  %v2984_v32 = vadd.f32 %v8122_v39, %v10027_v22  ;;  %v2975_v58 = vpop.f32.mrb[65].mxu1 }
 0x401   : > { %v2976_v27 = vadd.f32 %v10027_v22, %v2975_v58  ;;  %v2462_v63 = vpop.f32.mrb[116].mxu0  ;;  %v8123_v20 = vpop.f32.mrb[66].mxu1 }
 0x402   : > { %v8548_v10 = vadd.f32 %v9812_v8, %v2462_v63  ;;  %v2987_v45 = vadd.f32 %v8123_v20, %v10027_v22  ;;  %v2464_v40 = vpop.f32.mrb[117].mxu0  ;;  %v2978_v31 = vpop.f32.mrb[67].mxu1  ;;  %v2866_v16 = vpack.c.bf16 %v2831_v54, %v2830_v61  ;;  %v3232_v50 = vmax.f32 %v2984_v32, 0.0 }
 0x403   : > { %v2979_v51 = vadd.f32 %v10027_v22, %v2978_v31  ;;  %v2465_v7 = vpop.f32.mrb[118].mxu0  ;;  %v3230_v38 = vmax.f32 %v2976_v27, 0.0 }
 0x404   : > { %v2752_v60 = vadd.f32 %v8548_v10, %v9938_v12  ;;  %v3233_v28 = vmax.f32 %v2987_v45, 0.0  ;;  %v8549_v23 = vadd.f32 %v9812_v8, %v2465_v7  ;;  %v2467_v37 = vpop.f32.mrb[119].mxu0  ;;  %8176 = vmatprep.mubr.bf16.mxu1 %v2866_v16 }
 0x405   : > { %v3231_v36 = vmax.f32 %v2979_v51, 0.0 }
 0x406   : > { %v3295_v44 = vpack.c.bf16 %v3233_v28, %v3232_v50  ;;  %v2755_v14 = vadd.f32 %v8549_v23, %v9942_v15  ;;  %v2832_v17 = vmax.f32 %v2752_v60, 0.0 }
 0x407   : > { %v3294_v62 = vpack.c.bf16 %v3231_v36, %v3230_v38 }
 0x408   : > { %v2833_v47 = vmax.f32 %v2755_v14, 0.0 }
 0x409   : > { %v2470_v49 = vpop.f32.mrb[120].mxu0 }
 0x40a   : > { %v8550_v12 = vadd.f32 %v9812_v8, %v2470_v49  ;;  %v2472_v41 = vpop.f32.mrb[121].mxu0  ;;  %v2867_v3 = vpack.c.bf16 %v2833_v47, %v2832_v17 }
 0x40b   : > { %v2473_v57 = vpop.f32.mrb[122].mxu0 }
 0x40c   : > { %v2760_v25 = vadd.f32 %v8550_v12, %v9951_v53  ;;  %v8551_v24 = vadd.f32 %v9812_v8, %v2473_v57  ;;  %v2475_v29 = vpop.f32.mrb[123].mxu0  ;;  %8177 = vmatmul.mubr.bf16.gmra.mrb[120].mxu1 %v2867_v3 }
 0x40e   : > { %v2763_v15 = vadd.f32 %v8551_v24, %v9956_v30  ;;  %v2834_v42 = vmax.f32 %v2760_v25, 0.0 }
 0x40f   : > { %v8126_v0 = vpop.f32.mrb[68].mxu1 }
 0x410   : > { %v2835_v9 = vmax.f32 %v2763_v15, 0.0  ;;  %v3000_v56 = vadd.f32 %v8126_v0, %v10027_v22  ;;  %v2991_v43 = vpop.f32.mrb[69].mxu1 }
 0x411   : > { %v2992_v59 = vadd.f32 %v10027_v22, %v2991_v43  ;;  %v2478_v4 = vpop.f32.mrb[124].mxu0  ;;  %v8127_v5 = vpop.f32.mrb[70].mxu1 }
 0x412   : > { %v8552_v2 = vadd.f32 %v9812_v8, %v2478_v4  ;;  %v3003_v53 = vadd.f32 %v8127_v5, %v10027_v22  ;;  %v2480_v6 = vpop.f32.mrb[125].mxu0  ;;  %v2994_v35 = vpop.f32.mrb[71].mxu1  ;;  %v2868_v52 = vpack.c.bf16 %v2835_v9, %v2834_v42  ;;  %v3236_v11 = vmax.f32 %v3000_v56, 0.0 }
 0x413   : > { %v2995_v26 = vadd.f32 %v10027_v22, %v2994_v35  ;;  %v2481_v30 = vpop.f32.mrb[126].mxu0  ;;  %v3234_v19 = vmax.f32 %v2992_v59, 0.0 }
 0x414   : > { %v2768_v48 = vadd.f32 %v8552_v2, %v9947_v21  ;;  %v3237_v13 = vmax.f32 %v3003_v53, 0.0  ;;  %v8553_v46 = vadd.f32 %v9812_v8, %v2481_v30  ;;  %v2483_v55 = vpop.f32.mrb[127].mxu0  ;;  %8180 = vmatprep.mubr.bf16.mxu1 %v2868_v52 }
 0x415   : > { %v3235_v18 = vmax.f32 %v2995_v26, 0.0 }
 0x416   : > { %v3297_v39 = vpack.c.bf16 %v3237_v13, %v3236_v11  ;;  %v2771_v61 = vadd.f32 %v8553_v46, %v9953_v34  ;;  %v2836_v32 = vmax.f32 %v2768_v48, 0.0 }
 0x417   : > { %v3296_v54 = vpack.c.bf16 %v3235_v18, %v3234_v19 }
 0x418   : > { %v2837_v58 = vmax.f32 %v2771_v61, 0.0 }
 0x41a   : > { %v2869_v27 = vpack.c.bf16 %v2837_v58, %v2836_v32 }
 0x41c   : > { %8181 = vmatmul.mubr.bf16.gmra.mrb[124].mxu1 %v2869_v27 }
 0x41d   : > { %8192 = vmatprep.mubr.msk.bf16.mxu1 %vm3365_vm1, %v3294_v62 }
 0x41f   : > { %v8130_v63 = vpop.f32.mrb[72].mxu1 }
 0x420   : > { %v3016_v21 = vadd.f32 %v8130_v63, %v10027_v22  ;;  %v3007_v20 = vpop.f32.mrb[73].mxu1 }
 0x421   : > { %v3008_v8 = vadd.f32 %v10027_v22, %v3007_v20  ;;  %v8131_v10 = vpop.f32.mrb[74].mxu1 }
 0x422   : > { %v3019_v45 = vadd.f32 %v8131_v10, %v10027_v22  ;;  %v3010_v40 = vpop.f32.mrb[75].mxu1  ;;  %v3240_v31 = vmax.f32 %v3016_v21, 0.0 }
 0x423   : > { %v3011_v34 = vadd.f32 %v10027_v22, %v3010_v40  ;;  %v3238_v51 = vmax.f32 %v3008_v8, 0.0 }
 0x424   : > { %v3241_v16 = vmax.f32 %v3019_v45, 0.0  ;;  %8193 = vmatmul.mubr.msk.bf16.vlgmr.msra.gmra.mrb[128].mxu1 %vm3365_vm1, %v3295_v44 }
 0x425   : > { %v3239_v7 = vmax.f32 %v3011_v34, 0.0  ;;  %8196 = vmatprep.mubr.msk.bf16.mxu1 %vm3365_vm1, %v3296_v54  ;;  %8257 = vmatpush3.bf16.msra.mxu1 %v8881_v33 }
 0x426   : > { %v3299_v50 = vpack.c.bf16 %v3241_v16, %v3240_v31 }
 0x427   : > { %v3298_v60 = vpack.c.bf16 %v3239_v7, %v3238_v51 }
 0x42c   : > { %8197 = vmatmul.mubr.msk.bf16.gmra.mrb[132].mxu1 %vm3365_vm1, %v3297_v39 }
 0x42d   : > { %8200 = vmatprep.mubr.msk.bf16.mxu1 %vm3365_vm1, %v3298_v60 }
 0x42f   : > { %v8134_v28 = vpop.f32.mrb[76].mxu1 }
 0x430   : > { %v3032_v23 = vadd.f32 %v8134_v28, %v10027_v22  ;;  %v3023_v37 = vpop.f32.mrb[77].mxu1 }
 0x431   : > { %v3024_v38 = vadd.f32 %v10027_v22, %v3023_v37  ;;  %v8135_v36 = vpop.f32.mrb[78].mxu1 }
 0x432   : > { %v3035_v44 = vadd.f32 %v8135_v36, %v10027_v22  ;;  %v3026_v14 = vpop.f32.mrb[79].mxu1  ;;  %v3244_v17 = vmax.f32 %v3032_v23, 0.0 }
 0x433   : > { %v3027_v62 = vadd.f32 %v10027_v22, %v3026_v14  ;;  %v3242_v47 = vmax.f32 %v3024_v38, 0.0 }
 0x434   : > { %v3245_v33 = vmax.f32 %v3035_v44, 0.0  ;;  %8201 = vmatmul.mubr.msk.bf16.gmra.mrb[136].mxu1 %vm3365_vm1, %v3299_v50 }
 0x435   : > { %v3243_v49 = vmax.f32 %v3027_v62, 0.0 }
 0x436   : > { %v3301_v12 = vpack.c.bf16 %v3245_v33, %v3244_v17 }
 0x437   : > { %v3300_v41 = vpack.c.bf16 %v3243_v49, %v3242_v47 }
 0x439   : > { %8204 = vmatprep.mubr.msk.bf16.mxu1 %vm3365_vm1, %v3300_v41 }
 0x43c   : > { %8205 = vmatmul.mubr.msk.bf16.gmra.mrb[140].mxu1 %vm3365_vm1, %v3301_v12 }
 0x43f   : > { %v8138_v3 = vpop.f32.mrb[80].mxu1 }
 0x440   : > { %v3048_v57 = vadd.f32 %v8138_v3, %v10027_v22  ;;  %v3039_v25 = vpop.f32.mrb[81].mxu1 }
 0x441   : > { %v3040_v24 = vadd.f32 %v10027_v22, %v3039_v25  ;;  %v8139_v29 = vpop.f32.mrb[82].mxu1 }
 0x442   : > { %v3051_v15 = vadd.f32 %v8139_v29, %v10027_v22  ;;  %v3042_v0 = vpop.f32.mrb[83].mxu1  ;;  %v3248_v9 = vmax.f32 %v3048_v57, 0.0 }
 0x443   : > { %v3043_v42 = vadd.f32 %v10027_v22, %v3042_v0  ;;  %v3246_v43 = vmax.f32 %v3040_v24, 0.0 }
 0x444   : > { %v3249_v56 = vmax.f32 %v3051_v15, 0.0 }
 0x445   : > { %v3247_v59 = vmax.f32 %v3043_v42, 0.0 }
 0x446   : > { %v3303_v4 = vpack.c.bf16 %v3249_v56, %v3248_v9 }
 0x447   : > { %v3302_v5 = vpack.c.bf16 %v3247_v59, %v3246_v43 }
 0x449   : > { %8208 = vmatprep.mubr.msk.bf16.mxu1 %vm3365_vm1, %v3302_v5 }
 0x44a   : > { %8209 = vmatmul.mubr.msk.bf16.gmra.mrb[144].mxu1 %vm3365_vm1, %v3303_v4 }
 0x44f   : > { %v8142_v2 = vpop.f32.mrb[84].mxu1 }
 0x450   : > { %v3064_v53 = vadd.f32 %v8142_v2, %v10027_v22  ;;  %v3055_v6 = vpop.f32.mrb[85].mxu1 }
 0x451   : > { %v3056_v35 = vadd.f32 %v10027_v22, %v3055_v6  ;;  %v8143_v52 = vpop.f32.mrb[86].mxu1 }
 0x452   : > { %v3067_v26 = vadd.f32 %v8143_v52, %v10027_v22  ;;  %v3058_v30 = vpop.f32.mrb[87].mxu1  ;;  %v3252_v48 = vmax.f32 %v3064_v53, 0.0 }
 0x453   : > { %v3059_v11 = vadd.f32 %v10027_v22, %v3058_v30  ;;  %v3250_v46 = vmax.f32 %v3056_v35, 0.0 }
 0x454   : > { %v3253_v13 = vmax.f32 %v3067_v26, 0.0 }
 0x455   : > { %v3251_v55 = vmax.f32 %v3059_v11, 0.0 }
 0x456   : > { %v3305_v19 = vpack.c.bf16 %v3253_v13, %v3252_v48 }
 0x457   : > { %v3304_v18 = vpack.c.bf16 %v3251_v55, %v3250_v46 }
 0x459   : > { %8212 = vmatprep.mubr.msk.bf16.mxu1 %vm3365_vm1, %v3304_v18 }
 0x45a   : > { %8213 = vmatmul.mubr.msk.bf16.gmra.mrb[148].mxu1 %vm3365_vm1, %v3305_v19 }
 0x45f   : > { %v8146_v39 = vpop.f32.mrb[88].mxu1 }
 0x460   : > { %v3080_v61 = vadd.f32 %v8146_v39, %v10027_v22  ;;  %v3071_v54 = vpop.f32.mrb[89].mxu1 }
 0x461   : > { %v3072_v32 = vadd.f32 %v10027_v22, %v3071_v54  ;;  %v8147_v58 = vpop.f32.mrb[90].mxu1 }
 0x462   : > { %v3083_v27 = vadd.f32 %v8147_v58, %v10027_v22  ;;  %v3074_v63 = vpop.f32.mrb[91].mxu1  ;;  %v3256_v20 = vmax.f32 %v3080_v61, 0.0 }
 0x463   : > { %v3075_v21 = vadd.f32 %v10027_v22, %v3074_v63  ;;  %v3254_v10 = vmax.f32 %v3072_v32, 0.0 }
 0x464   : > { %v3257_v8 = vmax.f32 %v3083_v27, 0.0 }
 0x465   : > { %v3255_v45 = vmax.f32 %v3075_v21, 0.0 }
 0x466   : > { %v3307_v40 = vpack.c.bf16 %v3257_v8, %v3256_v20 }
 0x467   : > { %v3306_v34 = vpack.c.bf16 %v3255_v45, %v3254_v10 }
 0x469   : > { %8216 = vmatprep.mubr.msk.bf16.mxu1 %vm3365_vm1, %v3306_v34 }
 0x46a   : > { %8217 = vmatmul.mubr.msk.bf16.gmra.mrb[152].mxu1 %vm3365_vm1, %v3307_v40 }
 0x46f   : > { %v8150_v31 = vpop.f32.mrb[92].mxu1 }
 0x470   : > { %v3096_v16 = vadd.f32 %v8150_v31, %v10027_v22  ;;  %v3087_v51 = vpop.f32.mrb[93].mxu1 }
 0x471   : > { %v3088_v7 = vadd.f32 %v10027_v22, %v3087_v51  ;;  %v8151_v50 = vpop.f32.mrb[94].mxu1 }
 0x472   : > { %v3099_v60 = vadd.f32 %v8151_v50, %v10027_v22  ;;  %v3090_v28 = vpop.f32.mrb[95].mxu1  ;;  %v3260_v37 = vmax.f32 %v3096_v16, 0.0 }
 0x473   : > { %v3091_v23 = vadd.f32 %v10027_v22, %v3090_v28  ;;  %v3258_v36 = vmax.f32 %v3088_v7, 0.0 }
 0x474   : > { %v3261_v38 = vmax.f32 %v3099_v60, 0.0 }
 0x475   : > { %v3259_v44 = vmax.f32 %v3091_v23, 0.0 }
 0x476   : > { %v3309_v14 = vpack.c.bf16 %v3261_v38, %v3260_v37 }
 0x477   : > { %v3308_v62 = vpack.c.bf16 %v3259_v44, %v3258_v36 }
 0x479   : > { %8220 = vmatprep.mubr.msk.bf16.mxu1 %vm3365_vm1, %v3308_v62 }
 0x47a   : > { %8221 = vmatmul.mubr.msk.bf16.gmra.mrb[156].mxu1 %vm3365_vm1, %v3309_v14 }
 0x47f   : > { %v8154_v17 = vpop.f32.mrb[96].mxu1 }
 0x480   : > { %v3112_v33 = vadd.f32 %v8154_v17, %v10027_v22  ;;  %v3103_v47 = vpop.f32.mrb[97].mxu1 }
 0x481   : > { %v3104_v49 = vadd.f32 %v10027_v22, %v3103_v47  ;;  %v8155_v12 = vpop.f32.mrb[98].mxu1 }
 0x482   : > { %v3115_v41 = vadd.f32 %v8155_v12, %v10027_v22  ;;  %v3106_v3 = vpop.f32.mrb[99].mxu1  ;;  %v3264_v25 = vmax.f32 %v3112_v33, 0.0 }
 0x483   : > { %v3107_v57 = vadd.f32 %v10027_v22, %v3106_v3  ;;  %v3262_v29 = vmax.f32 %v3104_v49, 0.0 }
 0x484   : > { %v3265_v24 = vmax.f32 %v3115_v41, 0.0 }
 0x485   : > { %v3263_v15 = vmax.f32 %v3107_v57, 0.0 }
 0x486   : > { %v3311_v0 = vpack.c.bf16 %v3265_v24, %v3264_v25 }
 0x487   : > { %v3310_v42 = vpack.c.bf16 %v3263_v15, %v3262_v29 }
 0x489   : > { %8224 = vmatprep.mubr.msk.bf16.mxu1 %vm3365_vm1, %v3310_v42 }
 0x48a   : > { %8225 = vmatmul.mubr.msk.bf16.gmra.mrb[160].mxu1 %vm3365_vm1, %v3311_v0 }
 0x48f   : > { %v8158_v9 = vpop.f32.mrb[100].mxu1 }
 0x490   : > { %v3128_v56 = vadd.f32 %v8158_v9, %v10027_v22  ;;  %v3119_v43 = vpop.f32.mrb[101].mxu1 }
 0x491   : > { %v3120_v59 = vadd.f32 %v10027_v22, %v3119_v43  ;;  %v8159_v4 = vpop.f32.mrb[102].mxu1 }
 0x492   : > { %v3131_v5 = vadd.f32 %v8159_v4, %v10027_v22  ;;  %v3122_v2 = vpop.f32.mrb[103].mxu1  ;;  %v3268_v6 = vmax.f32 %v3128_v56, 0.0 }
 0x493   : > { %v3123_v53 = vadd.f32 %v10027_v22, %v3122_v2  ;;  %v3266_v52 = vmax.f32 %v3120_v59, 0.0 }
 0x494   : > { %v3269_v35 = vmax.f32 %v3131_v5, 0.0 }
 0x495   : > { %v3267_v26 = vmax.f32 %v3123_v53, 0.0 }
 0x496   : > { %v3313_v30 = vpack.c.bf16 %v3269_v35, %v3268_v6 }
 0x497   : > { %v3312_v11 = vpack.c.bf16 %v3267_v26, %v3266_v52 }
 0x499   : > { %8228 = vmatprep.mubr.msk.bf16.mxu1 %vm3365_vm1, %v3312_v11 }
 0x49a   : > { %8229 = vmatmul.mubr.msk.bf16.gmra.mrb[164].mxu1 %vm3365_vm1, %v3313_v30 }
 0x49f   : > { %v8162_v48 = vpop.f32.mrb[104].mxu1 }
 0x4a0   : > { %v3144_v13 = vadd.f32 %v8162_v48, %v10027_v22  ;;  %v3135_v46 = vpop.f32.mrb[105].mxu1 }
 0x4a1   : > { %v3136_v55 = vadd.f32 %v10027_v22, %v3135_v46  ;;  %v8163_v19 = vpop.f32.mrb[106].mxu1 }
 0x4a2   : > { %v3147_v18 = vadd.f32 %v8163_v19, %v10027_v22  ;;  %v3138_v39 = vpop.f32.mrb[107].mxu1  ;;  %v3272_v54 = vmax.f32 %v3144_v13, 0.0 }
 0x4a3   : > { %v3139_v61 = vadd.f32 %v10027_v22, %v3138_v39  ;;  %v3270_v58 = vmax.f32 %v3136_v55, 0.0  ;;  %v8882_v39 = vld [vmem:[%s11935_s9] sm:$0xff]  }
 0x4a4   : > { %v3273_v32 = vmax.f32 %v3147_v18, 0.0  ;;  %8322 = vmatprep.subr.bf16.mxu1 %v8882_v39 }
 0x4a5   : > { %v3271_v27 = vmax.f32 %v3139_v61, 0.0 }
 0x4a6   : > { %v3315_v63 = vpack.c.bf16 %v3273_v32, %v3272_v54 }
 0x4a7   : > { %v3314_v21 = vpack.c.bf16 %v3271_v27, %v3270_v58 }
 0x4a9   : > { %8232 = vmatprep.mubr.msk.bf16.mxu1 %vm3365_vm1, %v3314_v21 }
 0x4aa   : > { %8233 = vmatmul.mubr.msk.bf16.gmra.mrb[168].mxu1 %vm3365_vm1, %v3315_v63 }
 0x4af   : > { %v8166_v20 = vpop.f32.mrb[108].mxu1 }
 0x4b0   : > { %v3160_v8 = vadd.f32 %v8166_v20, %v10027_v22  ;;  %v3151_v10 = vpop.f32.mrb[109].mxu1 }
 0x4b1   : > { %v3152_v45 = vadd.f32 %v10027_v22, %v3151_v10  ;;  %v8167_v40 = vpop.f32.mrb[110].mxu1 }
 0x4b2   : > { %v3163_v34 = vadd.f32 %v8167_v40, %v10027_v22  ;;  %v3154_v31 = vpop.f32.mrb[111].mxu1  ;;  %v3276_v51 = vmax.f32 %v3160_v8, 0.0 }
 0x4b3   : > { %v3155_v16 = vadd.f32 %v10027_v22, %v3154_v31  ;;  %v3274_v50 = vmax.f32 %v3152_v45, 0.0 }
 0x4b4   : > { %v3277_v7 = vmax.f32 %v3163_v34, 0.0 }
 0x4b5   : > { %v3275_v60 = vmax.f32 %v3155_v16, 0.0  ;;  %v10145_v16 = vld [vmem:[%s11932_s6] ss:$0 sm:$0xff] }
 0x4b6   : > { %v3317_v28 = vpack.c.bf16 %v3277_v7, %v3276_v51 }
 0x4b7   : > { %v3316_v23 = vpack.c.bf16 %v3275_v60, %v3274_v50 }
 0x4b9   : > { %8236 = vmatprep.mubr.msk.bf16.mxu1 %vm3365_vm1, %v3316_v23 }
 0x4ba   : > { %8237 = vmatmul.mubr.msk.bf16.gmra.mrb[172].mxu1 %vm3365_vm1, %v3317_v28 }
 0x4bf   : > { %v8170_v37 = vpop.f32.mrb[112].mxu1 }
 0x4c0   : > { %v3176_v38 = vadd.f32 %v8170_v37, %v10027_v22  ;;  %v3167_v36 = vpop.f32.mrb[113].mxu1 }
 0x4c1   : > { %v3168_v44 = vadd.f32 %v10027_v22, %v3167_v36  ;;  %v8171_v14 = vpop.f32.mrb[114].mxu1 }
 0x4c2   : > { %v3179_v62 = vadd.f32 %v8171_v14, %v10027_v22  ;;  %v3170_v17 = vpop.f32.mrb[115].mxu1  ;;  %v3280_v47 = vmax.f32 %v3176_v38, 0.0 }
 0x4c3   : > { %v3171_v33 = vadd.f32 %v10027_v22, %v3170_v17  ;;  %v3278_v12 = vmax.f32 %v3168_v44, 0.0 }
 0x4c4   : > { %v3281_v49 = vmax.f32 %v3179_v62, 0.0 }
 0x4c5   : > { %v3279_v41 = vmax.f32 %v3171_v33, 0.0 }
 0x4c6   : > { %v3319_v3 = vpack.c.bf16 %v3281_v49, %v3280_v47 }
 0x4c7   : > { %v3318_v57 = vpack.c.bf16 %v3279_v41, %v3278_v12 }
 0x4c9   : > { %8240 = vmatprep.mubr.msk.bf16.mxu1 %vm3365_vm1, %v3318_v57 }
 0x4ca   : > { %8241 = vmatmul.mubr.msk.bf16.gmra.mrb[176].mxu1 %vm3365_vm1, %v3319_v3 }
 0x4cf   : > { %v8174_v25 = vpop.f32.mrb[116].mxu1 }
 0x4d0   : > { %v3192_v24 = vadd.f32 %v8174_v25, %v10027_v22  ;;  %v3183_v29 = vpop.f32.mrb[117].mxu1 }
 0x4d1   : > { %v3184_v15 = vadd.f32 %v10027_v22, %v3183_v29  ;;  %v8175_v0 = vpop.f32.mrb[118].mxu1 }
 0x4d2   : > { %v3195_v42 = vadd.f32 %v8175_v0, %v10027_v22  ;;  %v3186_v9 = vpop.f32.mrb[119].mxu1  ;;  %v3284_v43 = vmax.f32 %v3192_v24, 0.0 }
 0x4d3   : > { %v3187_v56 = vadd.f32 %v10027_v22, %v3186_v9  ;;  %v3282_v4 = vmax.f32 %v3184_v15, 0.0 }
 0x4d4   : > { %v3285_v59 = vmax.f32 %v3195_v42, 0.0 }
 0x4d5   : > { %v3283_v5 = vmax.f32 %v3187_v56, 0.0  ;;  %v8883_v56 = vld [vmem:[%s11935_s9 + $0x8] sm:$0xff]  }
 0x4d6   : > { %v3321_v2 = vpack.c.bf16 %v3285_v59, %v3284_v43 }
 0x4d7   : > { %v3320_v53 = vpack.c.bf16 %v3283_v5, %v3282_v4 }
 0x4d9   : > { %8244 = vmatprep.mubr.msk.bf16.mxu1 %vm3365_vm1, %v3320_v53 }
 0x4da   : > { %8245 = vmatmul.mubr.msk.bf16.gmra.mrb[180].mxu1 %vm3365_vm1, %v3321_v2 }
 0x4df   : > { %v8178_v6 = vpop.f32.mrb[120].mxu1 }
 0x4e0   : > { %v3208_v35 = vadd.f32 %v8178_v6, %v10027_v22  ;;  %v3199_v52 = vpop.f32.mrb[121].mxu1 }
 0x4e1   : > { %v3200_v26 = vadd.f32 %v10027_v22, %v3199_v52  ;;  %v8179_v30 = vpop.f32.mrb[122].mxu1 }
 0x4e2   : > { %v3211_v11 = vadd.f32 %v8179_v30, %v10027_v22  ;;  %v3202_v48 = vpop.f32.mrb[123].mxu1  ;;  %v3288_v46 = vmax.f32 %v3208_v35, 0.0 }
 0x4e3   : > { %v3203_v13 = vadd.f32 %v10027_v22, %v3202_v48  ;;  %v3286_v19 = vmax.f32 %v3200_v26, 0.0 }
 0x4e4   : > { %v3289_v55 = vmax.f32 %v3211_v11, 0.0 }
 0x4e5   : > { %v3287_v18 = vmax.f32 %v3203_v13, 0.0 }
 0x4e6   : > { %v3323_v61 = vpack.c.bf16 %v3289_v55, %v3288_v46 }
 0x4e7   : > { %v3322_v54 = vpack.c.bf16 %v3287_v18, %v3286_v19 }
 0x4e9   : > { %8248 = vmatprep.mubr.msk.bf16.mxu1 %vm3365_vm1, %v3322_v54 }
 0x4ea   : > { %8249 = vmatmul.mubr.msk.bf16.gmra.mrb[184].mxu1 %vm3365_vm1, %v3323_v61 }
 0x4ef   : > { %v8182_v32 = vpop.f32.mrb[124].mxu1 }
 0x4f0   : > { %v3224_v58 = vadd.f32 %v8182_v32, %v10027_v22  ;;  %v3215_v27 = vpop.f32.mrb[125].mxu1 }
 0x4f1   : > { %v3216_v63 = vadd.f32 %v10027_v22, %v3215_v27  ;;  %v8183_v21 = vpop.f32.mrb[126].mxu1 }
 0x4f2   : > { %v3227_v20 = vadd.f32 %v8183_v21, %v10027_v22  ;;  %v3218_v8 = vpop.f32.mrb[127].mxu1  ;;  %v3292_v45 = vmax.f32 %v3224_v58, 0.0 }
 0x4f3   : > { %v3219_v10 = vadd.f32 %v10027_v22, %v3218_v8  ;;  %v3290_v34 = vmax.f32 %v3216_v63, 0.0 }
 0x4f4   : > { %v3293_v40 = vmax.f32 %v3227_v20, 0.0 }
 0x4f5   : > { %v3291_v31 = vmax.f32 %v3219_v10, 0.0 }
 0x4f6   : > { %v3325_v51 = vpack.c.bf16 %v3293_v40, %v3292_v45 }
 0x4f7   : > { %v3324_v7 = vpack.c.bf16 %v3291_v31, %v3290_v34  ;;  %v8194_v50 = vpop.f32.mrb[128].mxu1 }
 0x4f8   : > { %v3505_v60 = vadd.f32 %v8194_v50, %v10145_v16  ;;  %v3496_v28 = vpop.f32.mrb[129].mxu1 }
 0x4f9   : > { %v3497_v23 = vadd.f32 %v10145_v16, %v3496_v28  ;;  %v8195_v37 = vpop.f32.mrb[130].mxu1  ;;  %8252 = vmatprep.mubr.msk.bf16.mxu1 %vm3365_vm1, %v3324_v7 }
 0x4fa   : > { %v3508_v22 = vadd.f32 %v8195_v37, %v10145_v16  ;;  %v3499_v38 = vpop.f32.mrb[131].mxu1  ;;  %8253 = vmatmul.mubr.msk.bf16.gmra.mrb[188].mxu1 %vm3365_vm1, %v3325_v51  ;;  %v3753_v44 = vmax.f32 %v3505_v60, 0.0 }
 0x4fb   : > { %v3500_v36 = vadd.f32 %v10145_v16, %v3499_v38  ;;  %v3751_v62 = vmax.f32 %v3497_v23, 0.0 }
 0x4fc   : > { %v3754_v14 = vmax.f32 %v3508_v22, 0.0 }
 0x4fd   : > { %v3752_v17 = vmax.f32 %v3500_v36, 0.0 }
 0x4fe   : > { %v3816_v33 = vpack.c.bf16 %v3754_v14, %v3753_v44  ;;  %v8884_v14 = vld [vmem:[%s11935_s9 + $0x10] sm:$0xff]  }
 0x4ff   : > { %v3815_v47 = vpack.c.bf16 %v3752_v17, %v3751_v62  ;;  %v8198_v49 = vpop.f32.mrb[132].mxu1 }
 0x500   : > { %v3521_v12 = vadd.f32 %v8198_v49, %v10145_v16  ;;  %v3512_v41 = vpop.f32.mrb[133].mxu1 }
 0x501   : > { %v3513_v3 = vadd.f32 %v10145_v16, %v3512_v41  ;;  %v8199_v57 = vpop.f32.mrb[134].mxu1  ;;  %8258 = vmatprep.mubr.msk.bf16.mxu1 %vm1521_vm0, %v3815_v47 }
 0x502   : > { %v3524_v25 = vadd.f32 %v8199_v57, %v10145_v16  ;;  %v3515_v24 = vpop.f32.mrb[135].mxu1  ;;  %8259 = vmatmul.mubr.msk.bf16.vlgmr.msra.gmra.mrb[192].mxu1 %vm1521_vm0, %v3816_v33  ;;  %v3757_v15 = vmax.f32 %v3521_v12, 0.0 }
 0x503   : > { %v3516_v29 = vadd.f32 %v10145_v16, %v3515_v24  ;;  %8323 = vmatpush3.bf16.msra.mxu1 %v8882_v39  ;;  %v3755_v42 = vmax.f32 %v3513_v3, 0.0 }
 0x504   : > { %v3758_v0 = vmax.f32 %v3524_v25, 0.0  ;;  %8324 = vmatprep.subr.bf16.mxu1 %v8883_v56 }
 0x505   : > { %v3756_v9 = vmax.f32 %v3516_v29, 0.0 }
 0x506   : > { %v3818_v43 = vpack.c.bf16 %v3758_v0, %v3757_v15 }
 0x507   : > { %v3817_v59 = vpack.c.bf16 %v3756_v9, %v3755_v42  ;;  %v8202_v4 = vpop.f32.mrb[136].mxu1  ;;  %8325 = vmatpush3.bf16.msra.mxu1 %v8883_v56 }
 0x508   : > { %v3537_v5 = vadd.f32 %v8202_v4, %v10145_v16  ;;  %v3528_v2 = vpop.f32.mrb[137].mxu1  ;;  %8326 = vmatprep.subr.bf16.mxu1 %v8884_v14 }
 0x509   : > { %v3529_v53 = vadd.f32 %v10145_v16, %v3528_v2  ;;  %v8203_v6 = vpop.f32.mrb[138].mxu1  ;;  %8262 = vmatprep.mubr.msk.bf16.mxu1 %vm1521_vm0, %v3817_v59 }
 0x50a   : > { %v3540_v35 = vadd.f32 %v8203_v6, %v10145_v16  ;;  %v3531_v52 = vpop.f32.mrb[139].mxu1  ;;  %8263 = vmatmul.mubr.msk.bf16.gmra.mrb[196].mxu1 %vm1521_vm0, %v3818_v43  ;;  %v3761_v30 = vmax.f32 %v3537_v5, 0.0 }
 0x50b   : > { %v3532_v26 = vadd.f32 %v10145_v16, %v3531_v52  ;;  %v3759_v48 = vmax.f32 %v3529_v53, 0.0  ;;  %8327 = vmatpush3.bf16.msra.mxu1 %v8884_v14 }
 0x50c   : > { %v3762_v11 = vmax.f32 %v3540_v35, 0.0 }
 0x50d   : > { %v3760_v13 = vmax.f32 %v3532_v26, 0.0 }
 0x50e   : > { %v3820_v46 = vpack.c.bf16 %v3762_v11, %v3761_v30  ;;  %v8885_v11 = vld [vmem:[%s11935_s9 + $0x18] sm:$0xff]  }
 0x50f   : > { %v3819_v55 = vpack.c.bf16 %v3760_v13, %v3759_v48  ;;  %v8206_v19 = vpop.f32.mrb[140].mxu1  ;;  %8328 = vmatprep.subr.bf16.mxu1 %v8885_v11 }
 0x510   : > { %v3553_v18 = vadd.f32 %v8206_v19, %v10145_v16  ;;  %v3544_v39 = vpop.f32.mrb[141].mxu1  ;;  %8329 = vmatpush3.bf16.msra.mxu1 %v8885_v11 }
 0x511   : > { %v3545_v61 = vadd.f32 %v10145_v16, %v3544_v39  ;;  %v8207_v54 = vpop.f32.mrb[142].mxu1  ;;  %8266 = vmatprep.mubr.msk.bf16.mxu1 %vm1521_vm0, %v3819_v55 }
 0x512   : > { %v3556_v32 = vadd.f32 %v8207_v54, %v10145_v16  ;;  %v3547_v58 = vpop.f32.mrb[143].mxu1  ;;  %8267 = vmatmul.mubr.msk.bf16.gmra.mrb[200].mxu1 %vm1521_vm0, %v3820_v46  ;;  %v3765_v63 = vmax.f32 %v3553_v18, 0.0 }
 0x513   : > { %v3548_v27 = vadd.f32 %v10145_v16, %v3547_v58  ;;  %v3763_v20 = vmax.f32 %v3545_v61, 0.0 }
 0x514   : > { %v3766_v21 = vmax.f32 %v3556_v32, 0.0 }
 0x515   : > { %v3764_v8 = vmax.f32 %v3548_v27, 0.0 }
 0x516   : > { %v3822_v10 = vpack.c.bf16 %v3766_v21, %v3765_v63 }
 0x517   : > { %v3821_v45 = vpack.c.bf16 %v3764_v8, %v3763_v20 }
 0x519   : > { %8270 = vmatprep.mubr.msk.bf16.mxu1 %vm1521_vm0, %v3821_v45 }
 0x51a   : > { %8271 = vmatmul.mubr.msk.bf16.gmra.mrb[204].mxu1 %vm1521_vm0, %v3822_v10 }
 0x51d   : > { %v8210_v40 = vpop.f32.mrb[144].mxu1 }
 0x51e   : > { %v3569_v34 = vadd.f32 %v8210_v40, %v10145_v16  ;;  %v3560_v31 = vpop.f32.mrb[145].mxu1 }
 0x51f   : > { %v3561_v51 = vadd.f32 %v10145_v16, %v3560_v31  ;;  %v8211_v7 = vpop.f32.mrb[146].mxu1 }
 0x520   : > { %v3572_v50 = vadd.f32 %v8211_v7, %v10145_v16  ;;  %v3563_v60 = vpop.f32.mrb[147].mxu1  ;;  %v3769_v23 = vmax.f32 %v3569_v34, 0.0 }
 0x521   : > { %v3564_v28 = vadd.f32 %v10145_v16, %v3563_v60  ;;  %v3767_v22 = vmax.f32 %v3561_v51, 0.0 }
 0x522   : > { %v3770_v37 = vmax.f32 %v3572_v50, 0.0 }
 0x523   : > { %v3768_v38 = vmax.f32 %v3564_v28, 0.0 }
 0x524   : > { %v3824_v36 = vpack.c.bf16 %v3770_v37, %v3769_v23 }
 0x525   : > { %v3823_v44 = vpack.c.bf16 %v3768_v38, %v3767_v22 }
 0x527   : > { %8274 = vmatprep.mubr.msk.bf16.mxu1 %vm1521_vm0, %v3823_v44 }
 0x528   : > { %8275 = vmatmul.mubr.msk.bf16.gmra.mrb[208].mxu1 %vm1521_vm0, %v3824_v36 }
 0x52d   : > { %v8214_v62 = vpop.f32.mrb[148].mxu1 }
 0x52e   : > { %v3585_v17 = vadd.f32 %v8214_v62, %v10145_v16  ;;  %v3576_v33 = vpop.f32.mrb[149].mxu1 }
 0x52f   : > { %v3577_v47 = vadd.f32 %v10145_v16, %v3576_v33  ;;  %v8215_v49 = vpop.f32.mrb[150].mxu1 }
 0x530   : > { %v3588_v12 = vadd.f32 %v8215_v49, %v10145_v16  ;;  %v3579_v41 = vpop.f32.mrb[151].mxu1  ;;  %v3773_v57 = vmax.f32 %v3585_v17, 0.0 }
 0x531   : > { %v3580_v3 = vadd.f32 %v10145_v16, %v3579_v41  ;;  %v3771_v24 = vmax.f32 %v3577_v47, 0.0 }
 0x532   : > { %v3774_v25 = vmax.f32 %v3588_v12, 0.0 }
 0x533   : > { %v3772_v29 = vmax.f32 %v3580_v3, 0.0 }
 0x534   : > { %v3826_v15 = vpack.c.bf16 %v3774_v25, %v3773_v57 }
 0x535   : > { %v3825_v0 = vpack.c.bf16 %v3772_v29, %v3771_v24 }
 0x537   : > { %8278 = vmatprep.mubr.msk.bf16.mxu1 %vm1521_vm0, %v3825_v0 }
 0x538   : > { %8279 = vmatmul.mubr.msk.bf16.gmra.mrb[212].mxu1 %vm1521_vm0, %v3826_v15 }
 0x53d   : > { %v8218_v42 = vpop.f32.mrb[152].mxu1 }
 0x53e   : > { %v3601_v9 = vadd.f32 %v8218_v42, %v10145_v16  ;;  %v3592_v56 = vpop.f32.mrb[153].mxu1 }
 0x53f   : > { %v3593_v43 = vadd.f32 %v10145_v16, %v3592_v56  ;;  %v8219_v59 = vpop.f32.mrb[154].mxu1 }
 0x540   : > { %v3604_v4 = vadd.f32 %v8219_v59, %v10145_v16  ;;  %v3595_v5 = vpop.f32.mrb[155].mxu1  ;;  %v3777_v53 = vmax.f32 %v3601_v9, 0.0 }
 0x541   : > { %v3596_v2 = vadd.f32 %v10145_v16, %v3595_v5  ;;  %v3775_v35 = vmax.f32 %v3593_v43, 0.0 }
 0x542   : > { %v3778_v6 = vmax.f32 %v3604_v4, 0.0 }
 0x543   : > { %v3776_v52 = vmax.f32 %v3596_v2, 0.0 }
 0x544   : > { %v3828_v26 = vpack.c.bf16 %v3778_v6, %v3777_v53 }
 0x545   : > { %v3827_v30 = vpack.c.bf16 %v3776_v52, %v3775_v35 }
 0x547   : > { %8282 = vmatprep.mubr.msk.bf16.mxu1 %vm1521_vm0, %v3827_v30 }
 0x548   : > { %8283 = vmatmul.mubr.msk.bf16.gmra.mrb[216].mxu1 %vm1521_vm0, %v3828_v26 }
 0x54d   : > { %v8222_v48 = vpop.f32.mrb[156].mxu1 }
 0x54e   : > { %v3617_v13 = vadd.f32 %v8222_v48, %v10145_v16  ;;  %v3608_v46 = vpop.f32.mrb[157].mxu1 }
 0x54f   : > { %v3609_v55 = vadd.f32 %v10145_v16, %v3608_v46  ;;  %v8223_v19 = vpop.f32.mrb[158].mxu1 }
 0x550   : > { %v3620_v18 = vadd.f32 %v8223_v19, %v10145_v16  ;;  %v3611_v39 = vpop.f32.mrb[159].mxu1  ;;  %v3781_v54 = vmax.f32 %v3617_v13, 0.0 }
 0x551   : > { %v3612_v61 = vadd.f32 %v10145_v16, %v3611_v39  ;;  %v3779_v58 = vmax.f32 %v3609_v55, 0.0 }
 0x552   : > { %v3782_v32 = vmax.f32 %v3620_v18, 0.0 }
 0x553   : > { %v3780_v27 = vmax.f32 %v3612_v61, 0.0 }
 0x554   : > { %v3830_v63 = vpack.c.bf16 %v3782_v32, %v3781_v54 }
 0x555   : > { %v3829_v21 = vpack.c.bf16 %v3780_v27, %v3779_v58 }
 0x557   : > { %8286 = vmatprep.mubr.msk.bf16.mxu1 %vm1521_vm0, %v3829_v21 }
 0x558   : > { %8287 = vmatmul.mubr.msk.bf16.gmra.mrb[220].mxu1 %vm1521_vm0, %v3830_v63 }
 0x55d   : > { %v8226_v20 = vpop.f32.mrb[160].mxu1 }
 0x55e   : > { %v3633_v8 = vadd.f32 %v8226_v20, %v10145_v16  ;;  %v3624_v10 = vpop.f32.mrb[161].mxu1 }
 0x55f   : > { %v3625_v45 = vadd.f32 %v10145_v16, %v3624_v10  ;;  %v8227_v40 = vpop.f32.mrb[162].mxu1 }
 0x560   : > { %v3636_v34 = vadd.f32 %v8227_v40, %v10145_v16  ;;  %v3627_v31 = vpop.f32.mrb[163].mxu1  ;;  %v3785_v7 = vmax.f32 %v3633_v8, 0.0 }
 0x561   : > { %v3628_v51 = vadd.f32 %v10145_v16, %v3627_v31  ;;  %v3783_v60 = vmax.f32 %v3625_v45, 0.0 }
 0x562   : > { %v3786_v50 = vmax.f32 %v3636_v34, 0.0 }
 0x563   : > { %v3784_v28 = vmax.f32 %v3628_v51, 0.0 }
 0x564   : > { %v3832_v23 = vpack.c.bf16 %v3786_v50, %v3785_v7 }
 0x565   : > { %v3831_v37 = vpack.c.bf16 %v3784_v28, %v3783_v60 }
 0x567   : > { %8290 = vmatprep.mubr.msk.bf16.mxu1 %vm1521_vm0, %v3831_v37 }
 0x568   : > { %8291 = vmatmul.mubr.msk.bf16.gmra.mrb[224].mxu1 %vm1521_vm0, %v3832_v23 }
 0x56d   : > { %v8230_v22 = vpop.f32.mrb[164].mxu1 }
 0x56e   : > { %v3649_v38 = vadd.f32 %v8230_v22, %v10145_v16  ;;  %v3640_v36 = vpop.f32.mrb[165].mxu1 }
 0x56f   : > { %v3641_v44 = vadd.f32 %v10145_v16, %v3640_v36  ;;  %v8231_v14 = vpop.f32.mrb[166].mxu1 }
 0x570   : > { %v3652_v62 = vadd.f32 %v8231_v14, %v10145_v16  ;;  %v3643_v17 = vpop.f32.mrb[167].mxu1  ;;  %v3789_v47 = vmax.f32 %v3649_v38, 0.0 }
 0x571   : > { %v3644_v33 = vadd.f32 %v10145_v16, %v3643_v17  ;;  %v3787_v12 = vmax.f32 %v3641_v44, 0.0 }
 0x572   : > { %v3790_v49 = vmax.f32 %v3652_v62, 0.0 }
 0x573   : > { %v3788_v41 = vmax.f32 %v3644_v33, 0.0 }
 0x574   : > { %v3834_v3 = vpack.c.bf16 %v3790_v49, %v3789_v47 }
 0x575   : > { %v3833_v57 = vpack.c.bf16 %v3788_v41, %v3787_v12 }
 0x577   : > { %8294 = vmatprep.mubr.msk.bf16.mxu1 %vm1521_vm0, %v3833_v57 }
 0x578   : > { %8295 = vmatmul.mubr.msk.bf16.gmra.mrb[228].mxu1 %vm1521_vm0, %v3834_v3 }
 0x57d   : > { %v8234_v25 = vpop.f32.mrb[168].mxu1 }
 0x57e   : > { %v3665_v24 = vadd.f32 %v8234_v25, %v10145_v16  ;;  %v3656_v29 = vpop.f32.mrb[169].mxu1 }
 0x57f   : > { %v3657_v15 = vadd.f32 %v10145_v16, %v3656_v29  ;;  %v8235_v0 = vpop.f32.mrb[170].mxu1 }
 0x580   : > { %v3668_v42 = vadd.f32 %v8235_v0, %v10145_v16  ;;  %v3659_v9 = vpop.f32.mrb[171].mxu1  ;;  %v3793_v43 = vmax.f32 %v3665_v24, 0.0 }
 0x581   : > { %v3660_v56 = vadd.f32 %v10145_v16, %v3659_v9  ;;  %v3791_v4 = vmax.f32 %v3657_v15, 0.0  ;;  %v8888_v9 = vld [vmem:[%s11937_s11 + $0x4] ss:$28 sps:$4 sm:$0xff]  }
 0x582   : > { %v3794_v59 = vmax.f32 %v3668_v42, 0.0  ;;  %5252 = vmatprep.subr.bf16.mxu1 %v8888_v9 }
 0x583   : > { %v3792_v5 = vmax.f32 %v3660_v56, 0.0 }
 0x584   : > { %v3836_v2 = vpack.c.bf16 %v3794_v59, %v3793_v43 }
 0x585   : > { %v3835_v53 = vpack.c.bf16 %v3792_v5, %v3791_v4 }
 0x587   : > { %8298 = vmatprep.mubr.msk.bf16.mxu1 %vm1521_vm0, %v3835_v53 }
 0x588   : > { %8299 = vmatmul.mubr.msk.bf16.gmra.mrb[232].mxu1 %vm1521_vm0, %v3836_v2 }
 0x58d   : > { %v8238_v6 = vpop.f32.mrb[172].mxu1 }
 0x58e   : > { %v3681_v35 = vadd.f32 %v8238_v6, %v10145_v16  ;;  %v3672_v52 = vpop.f32.mrb[173].mxu1 }
 0x58f   : > { %v3673_v26 = vadd.f32 %v10145_v16, %v3672_v52  ;;  %v8239_v30 = vpop.f32.mrb[174].mxu1 }
 0x590   : > { %v3684_v11 = vadd.f32 %v8239_v30, %v10145_v16  ;;  %v3675_v48 = vpop.f32.mrb[175].mxu1  ;;  %v3797_v46 = vmax.f32 %v3681_v35, 0.0 }
 0x591   : > { %v3676_v13 = vadd.f32 %v10145_v16, %v3675_v48  ;;  %v3795_v19 = vmax.f32 %v3673_v26, 0.0 }
 0x592   : > { %v3798_v55 = vmax.f32 %v3684_v11, 0.0 }
 0x593   : > { %v3796_v18 = vmax.f32 %v3676_v13, 0.0  ;;  %v10258_v13 = vld [vmem:[%s11934_s8] ss:$0 sm:$0xff] }
 0x594   : > { %v3838_v39 = vpack.c.bf16 %v3798_v55, %v3797_v46 }
 0x595   : > { %v3837_v61 = vpack.c.bf16 %v3796_v18, %v3795_v19 }
 0x597   : > { %8302 = vmatprep.mubr.msk.bf16.mxu1 %vm1521_vm0, %v3837_v61 }
 0x598   : > { %8303 = vmatmul.mubr.msk.bf16.gmra.mrb[236].mxu1 %vm1521_vm0, %v3838_v39 }
 0x59d   : > { %v8242_v54 = vpop.f32.mrb[176].mxu1 }
 0x59e   : > { %v3697_v32 = vadd.f32 %v8242_v54, %v10145_v16  ;;  %v3688_v58 = vpop.f32.mrb[177].mxu1 }
 0x59f   : > { %v3689_v27 = vadd.f32 %v10145_v16, %v3688_v58  ;;  %v8243_v63 = vpop.f32.mrb[178].mxu1 }
 0x5a0   : > { %v3700_v21 = vadd.f32 %v8243_v63, %v10145_v16  ;;  %v3691_v20 = vpop.f32.mrb[179].mxu1  ;;  %v3801_v10 = vmax.f32 %v3697_v32, 0.0 }
 0x5a1   : > { %v3692_v8 = vadd.f32 %v10145_v16, %v3691_v20  ;;  %v3799_v40 = vmax.f32 %v3689_v27, 0.0 }
 0x5a2   : > { %v3802_v45 = vmax.f32 %v3700_v21, 0.0 }
 0x5a3   : > { %v3800_v34 = vmax.f32 %v3692_v8, 0.0 }
 0x5a4   : > { %v3840_v31 = vpack.c.bf16 %v3802_v45, %v3801_v10 }
 0x5a5   : > { %v3839_v51 = vpack.c.bf16 %v3800_v34, %v3799_v40  ;;  %v8886_v40 = vld [vmem:[%s11937_s11] ss:$28 sps:$4 sm:$0xff]  }
 0x5a7   : > { %8306 = vmatprep.mubr.msk.bf16.mxu1 %vm1521_vm0, %v3839_v51  ;;  %v8891_v51 = vld [vmem:[%s11937_s11 + $0x3c] ss:$28 sps:$4 sm:$0xff]  }
 0x5a8   : > { %8307 = vmatmul.mubr.msk.bf16.gmra.mrb[240].mxu1 %vm1521_vm0, %v3840_v31 }
 0x5ad   : > { %v8246_v7 = vpop.f32.mrb[180].mxu1 }
 0x5ae   : > { %v3713_v50 = vadd.f32 %v8246_v7, %v10145_v16  ;;  %v3704_v60 = vpop.f32.mrb[181].mxu1 }
 0x5af   : > { %v3705_v28 = vadd.f32 %v10145_v16, %v3704_v60  ;;  %v8247_v23 = vpop.f32.mrb[182].mxu1 }
 0x5b0   : > { %v3716_v37 = vadd.f32 %v8247_v23, %v10145_v16  ;;  %v3707_v22 = vpop.f32.mrb[183].mxu1  ;;  %v3805_v36 = vmax.f32 %v3713_v50, 0.0 }
 0x5b1   : > { %v3708_v38 = vadd.f32 %v10145_v16, %v3707_v22  ;;  %v3803_v14 = vmax.f32 %v3705_v28, 0.0 }
 0x5b2   : > { %v3806_v44 = vmax.f32 %v3716_v37, 0.0  ;;  %v8889_v37 = vld [vmem:[%s11937_s11 + $0x38] ss:$28 sps:$4 sm:$0xff]  }
 0x5b3   : > { %v3804_v62 = vmax.f32 %v3708_v38, 0.0 }
 0x5b4   : > { %v3842_v17 = vpack.c.bf16 %v3806_v44, %v3805_v36 }
 0x5b5   : > { %v3841_v33 = vpack.c.bf16 %v3804_v62, %v3803_v14  ;;  %v8894_v14 = vld [vmem:[%s11937_s11 + $0x74] ss:$28 sps:$4 sm:$0xff]  }
 0x5b7   : > { %8310 = vmatprep.mubr.msk.bf16.mxu1 %vm1521_vm0, %v3841_v33 }
 0x5b8   : > { %8311 = vmatmul.mubr.msk.bf16.gmra.mrb[244].mxu1 %vm1521_vm0, %v3842_v17 }
 0x5bd   : > { %v8250_v47 = vpop.f32.mrb[184].mxu1 }
 0x5be   : > { %v3729_v49 = vadd.f32 %v8250_v47, %v10145_v16  ;;  %v3720_v12 = vpop.f32.mrb[185].mxu1  ;;  %v8892_v47 = vld [vmem:[%s11937_s11 + $0x70] ss:$28 sps:$4 sm:$0xff]  }
 0x5bf   : > { %v3721_v41 = vadd.f32 %v10145_v16, %v3720_v12  ;;  %v8251_v3 = vpop.f32.mrb[186].mxu1 }
 0x5c0   : > { %v3732_v57 = vadd.f32 %v8251_v3, %v10145_v16  ;;  %v3723_v25 = vpop.f32.mrb[187].mxu1  ;;  %v3809_v29 = vmax.f32 %v3729_v49, 0.0 }
 0x5c1   : > { %v3724_v24 = vadd.f32 %v10145_v16, %v3723_v25  ;;  %v3807_v0 = vmax.f32 %v3721_v41, 0.0 }
 0x5c2   : > { %v3810_v15 = vmax.f32 %v3732_v57, 0.0 }
 0x5c3   : > { %v3808_v42 = vmax.f32 %v3724_v24, 0.0 }
 0x5c4   : > { %v3844_v56 = vpack.c.bf16 %v3810_v15, %v3809_v29 }
 0x5c5   : > { %v3843_v43 = vpack.c.bf16 %v3808_v42, %v3807_v0 }
 0x5c7   : > { %8314 = vmatprep.mubr.msk.bf16.mxu1 %vm1521_vm0, %v3843_v43 }
 0x5c8   : > { %8315 = vmatmul.mubr.msk.bf16.gmra.mrb[248].mxu1 %vm1521_vm0, %v3844_v56 }
 0x5cd   : > { %v8254_v59 = vpop.f32.mrb[188].mxu1 }
 0x5ce   : > { %v3745_v4 = vadd.f32 %v8254_v59, %v10145_v16  ;;  %v3736_v5 = vpop.f32.mrb[189].mxu1 }
 0x5cf   : > { %v3737_v2 = vadd.f32 %v10145_v16, %v3736_v5  ;;  %v8255_v53 = vpop.f32.mrb[190].mxu1 }
 0x5d0   : > { %v3748_v6 = vadd.f32 %v8255_v53, %v10145_v16  ;;  %v3739_v35 = vpop.f32.mrb[191].mxu1  ;;  %v3813_v26 = vmax.f32 %v3745_v4, 0.0 }
 0x5d1   : > { %v3740_v52 = vadd.f32 %v10145_v16, %v3739_v35  ;;  %v3811_v11 = vmax.f32 %v3737_v2, 0.0 }
 0x5d2   : > { %v3814_v30 = vmax.f32 %v3748_v6, 0.0 }
 0x5d3   : > { %v3812_v48 = vmax.f32 %v3740_v52, 0.0 }
 0x5d4   : > { %v3846_v46 = vpack.c.bf16 %v3814_v30, %v3813_v26 }
 0x5d5   : > { %v3845_v55 = vpack.c.bf16 %v3812_v48, %v3811_v11  ;;  %v8260_v19 = vpop.f32.mrb[192].mxu1  ;;  %v8895_v48 = vld [vmem:[%s11937_s11 + $0xa8] ss:$28 sps:$4 sm:$0xff]  }
 0x5d6   : > { %v4001_v18 = vadd.f32 %v8260_v19, %v10258_v13  ;;  %v3992_v39 = vpop.f32.mrb[193].mxu1  ;;  %v8898_v19 = vld [vmem:[%s11937_s11 + $0x8] ss:$28 sps:$4 sm:$0xff]  }
 0x5d7   : > { %v3993_v61 = vadd.f32 %v10258_v13, %v3992_v39  ;;  %v8261_v54 = vpop.f32.mrb[194].mxu1  ;;  %8318 = vmatprep.mubr.msk.bf16.mxu1 %vm1521_vm0, %v3845_v55 }
 0x5d8   : > { %v4004_v16 = vadd.f32 %v8261_v54, %v10258_v13  ;;  %v3995_v32 = vpop.f32.mrb[195].mxu1  ;;  %8319 = vmatmul.mubr.msk.bf16.gmra.mrb[252].mxu1 %vm1521_vm0, %v3846_v46  ;;  %v4249_v27 = vmax.f32 %v4001_v18, 0.0  ;;  %v8897_v46 = vld [vmem:[%s11937_s11 + $0xac] ss:$28 sps:$4 sm:$0xff]  }
 0x5d9   : > { %v3996_v58 = vadd.f32 %v10258_v13, %v3995_v32  ;;  %v4247_v21 = vmax.f32 %v3993_v61, 0.0  ;;  %v8900_v18 = vld [vmem:[%s11937_s11 + $0xc] ss:$28 sps:$4 sm:$0xff]  }
 0x5da   : > { %v4250_v63 = vmax.f32 %v4004_v16, 0.0  ;;  %5605 = vmatprep.subr.bf16.mxu0 %v8900_v18 }
 0x5db   : > { %v4248_v20 = vmax.f32 %v3996_v58, 0.0  ;;  %5606 = vmatpush1.bf16.msra.mxu0 %v8898_v19 }
 0x5dc   : > { %v4312_v8 = vpack.c.bf16 %v4250_v63, %v4249_v27 }
 0x5dd   : > { %v4311_v10 = vpack.c.bf16 %v4248_v20, %v4247_v21  ;;  %v8264_v45 = vpop.f32.mrb[196].mxu1 }
 0x5de   : > { %v4017_v34 = vadd.f32 %v8264_v45, %v10258_v13  ;;  %v4008_v31 = vpop.f32.mrb[197].mxu1 }
 0x5df   : > { %v4009_v7 = vadd.f32 %v10258_v13, %v4008_v31  ;;  %v8265_v50 = vpop.f32.mrb[198].mxu1  ;;  %8330 = vmatprep.mubr.msk.bf16.mxu1 %vm3365_vm1, %v4311_v10  ;;  %v8901_v31 = vld [vmem:[%s11937_s11 + $0xe0] ss:$28 sps:$4 sm:$0xff]  }
 0x5e0   : > { %v4020_v60 = vadd.f32 %v8265_v50, %v10258_v13  ;;  %v4011_v28 = vpop.f32.mrb[199].mxu1  ;;  %8331 = vmatmul.mubr.msk.bf16.vlgmr.msra.gmra.mrb[0].mxu1 %vm3365_vm1, %v4312_v8  ;;  %v4253_v22 = vmax.f32 %v4017_v34, 0.0 }
 0x5e1   : > { %v4012_v23 = vadd.f32 %v10258_v13, %v4011_v28  ;;  %5253 = vmatpush1.bf16.msra.mxu1 %v8886_v40  ;;  %v4251_v36 = vmax.f32 %v4009_v7, 0.0 }
 0x5e2   : > { %v4254_v38 = vmax.f32 %v4020_v60, 0.0  ;;  %5254 = vmatprep.subr.bf16.mxu1 %v8891_v51  ;;  %v8903_v51 = vld [vmem:[%s11937_s11 + $0xe4] ss:$28 sps:$4 sm:$0xff]  }
 0x5e3   : > { %v4252_v44 = vmax.f32 %v4012_v23, 0.0 }
 0x5e4   : > { %v4314_v62 = vpack.c.bf16 %v4254_v38, %v4253_v22 }
 0x5e5   : > { %v4313_v17 = vpack.c.bf16 %v4252_v44, %v4251_v36  ;;  %v8268_v33 = vpop.f32.mrb[200].mxu1  ;;  %5255 = vmatpush1.bf16.msra.mxu1 %v8889_v37 }
 0x5e6   : > { %v4033_v49 = vadd.f32 %v8268_v33, %v10258_v13  ;;  %v4024_v12 = vpop.f32.mrb[201].mxu1  ;;  %5256 = vmatprep.subr.bf16.mxu1 %v8894_v14 }
 0x5e7   : > { %v4025_v41 = vadd.f32 %v10258_v13, %v4024_v12  ;;  %v8269_v3 = vpop.f32.mrb[202].mxu1  ;;  %8334 = vmatprep.mubr.msk.bf16.mxu1 %vm3365_vm1, %v4313_v17  ;;  %v8907_v12 = vld [vmem:[%s11937_s11 + $0x40] ss:$28 sps:$4 sm:$0xff]  }
 0x5e8   : > { %v4036_v57 = vadd.f32 %v8269_v3, %v10258_v13  ;;  %v4027_v25 = vpop.f32.mrb[203].mxu1  ;;  %8335 = vmatmul.mubr.msk.bf16.gmra.mrb[4].mxu1 %vm3365_vm1, %v4314_v62  ;;  %v4257_v29 = vmax.f32 %v4033_v49, 0.0  ;;  %v8906_v49 = vld [vmem:[%s11937_s11 + $0x11c] ss:$28 sps:$4 sm:$0xff]  }
 0x5e9   : > { %v4028_v24 = vadd.f32 %v10258_v13, %v4027_v25  ;;  %5257 = vmatpush1.bf16.msra.mxu1 %v8892_v47  ;;  %v4255_v0 = vmax.f32 %v4025_v41, 0.0  ;;  %v8904_v47 = vld [vmem:[%s11937_s11 + $0x118] ss:$28 sps:$4 sm:$0xff]   ;;  %v8909_v41 = vld [vmem:[%s11937_s11 + $0x44] ss:$28 sps:$4 sm:$0xff]  }
 0x5ea   : > { %v4258_v15 = vmax.f32 %v4036_v57, 0.0  ;;  %5258 = vmatprep.subr.bf16.mxu1 %v8897_v46  ;;  %5607 = vmatprep.subr.bf16.mxu0 %v8909_v41 }
 0x5eb   : > { %v4256_v42 = vmax.f32 %v4028_v24, 0.0  ;;  %5608 = vmatpush1.bf16.msra.mxu0 %v8907_v12 }
 0x5ec   : > { %v4316_v9 = vpack.c.bf16 %v4258_v15, %v4257_v29 }
 0x5ed   : > { %v4315_v56 = vpack.c.bf16 %v4256_v42, %v4255_v0  ;;  %v8272_v43 = vpop.f32.mrb[204].mxu1  ;;  %5259 = vmatpush1.bf16.msra.mxu1 %v8895_v48 }
 0x5ee   : > { %v4049_v59 = vadd.f32 %v8272_v43, %v10258_v13  ;;  %v4040_v4 = vpop.f32.mrb[205].mxu1  ;;  %5260 = vmatprep.subr.bf16.mxu1 %v8903_v51  ;;  %v8931_v51 = vld [vmem:[%s11937_s11 + $0x190] ss:$28 sps:$4 sm:$0xff]  }
 0x5ef   : > { %v4041_v5 = vadd.f32 %v10258_v13, %v4040_v4  ;;  %v8273_v2 = vpop.f32.mrb[206].mxu1  ;;  %8338 = vmatprep.mubr.msk.bf16.mxu1 %vm3365_vm1, %v4315_v56 }
 0x5f0   : > { %v4052_v53 = vadd.f32 %v8273_v2, %v10258_v13  ;;  %v4043_v6 = vpop.f32.mrb[207].mxu1  ;;  %8339 = vmatmul.mubr.msk.bf16.gmra.mrb[8].mxu1 %vm3365_vm1, %v4316_v9  ;;  %v4261_v52 = vmax.f32 %v4049_v59, 0.0  ;;  %v8910_v2 = vld [vmem:[%s11937_s11 + $0x150] ss:$28 sps:$4 sm:$0xff]  }
 0x5f1   : > { %v4044_v35 = vadd.f32 %v10258_v13, %v4043_v6  ;;  %v4259_v30 = vmax.f32 %v4041_v5, 0.0  ;;  %5261 = vmatpush1.bf16.msra.mxu1 %v8901_v31  ;;  %v8915_v6 = vld [vmem:[%s11937_s11 + $0x7c] ss:$28 sps:$4 sm:$0xff]   ;;  %v8933_v31 = vld [vmem:[%s11937_s11 + $0x194] ss:$28 sps:$4 sm:$0xff]  }
 0x5f2   : > { %v4262_v26 = vmax.f32 %v4052_v53, 0.0  ;;  %5262 = vmatprep.subr.bf16.mxu1 %v8906_v49  ;;  %v8912_v53 = vld [vmem:[%s11937_s11 + $0x154] ss:$28 sps:$4 sm:$0xff]   ;;  %5609 = vmatprep.subr.bf16.mxu0 %v8915_v6 }
 0x5f3   : > { %v4260_v11 = vmax.f32 %v4044_v35, 0.0  ;;  %v8913_v35 = vld [vmem:[%s11937_s11 + $0x78] ss:$28 sps:$4 sm:$0xff]  }
 0x5f4   : > { %v4318_v55 = vpack.c.bf16 %v4262_v26, %v4261_v52  ;;  %v8918_v52 = vld [vmem:[%s11937_s11 + $0xb4] ss:$28 sps:$4 sm:$0xff]   ;;  %5610 = vmatpush1.bf16.msra.mxu0 %v8913_v35 }
 0x5f5   : > { %v4317_v39 = vpack.c.bf16 %v4260_v11, %v4259_v30  ;;  %5263 = vmatpush1.bf16.msra.mxu1 %v8904_v47  ;;  %v8916_v26 = vld [vmem:[%s11937_s11 + $0xb0] ss:$28 sps:$4 sm:$0xff]   ;;  %5611 = vmatprep.subr.bf16.mxu0 %v8918_v52 }
 0x5f6   : > { %5264 = vmatprep.subr.bf16.mxu1 %v8912_v53  ;;  %v8921_v11 = vld [vmem:[%s11937_s11 + $0xec] ss:$28 sps:$4 sm:$0xff]   ;;  %v8936_v47 = vld [vmem:[%s11937_s11 + $0x14] ss:$28 sps:$4 sm:$0xff]  }
 0x5f7   : > { %8342 = vmatprep.mubr.msk.bf16.mxu1 %vm3365_vm1, %v4317_v39 }
 0x5f8   : > { %8343 = vmatmul.mubr.msk.bf16.gmra.mrb[12].mxu1 %vm3365_vm1, %v4318_v55  ;;  %5612 = vmatpush1.bf16.msra.mxu0 %v8916_v26  ;;  %v8919_v55 = vld [vmem:[%s11937_s11 + $0xe8] ss:$28 sps:$4 sm:$0xff]  }
 0x5f9   : > { %5265 = vmatpush1.bf16.msra.mxu1 %v8910_v2  ;;  %5613 = vmatprep.subr.bf16.mxu0 %v8921_v11 }
 0x5fb   : > { %v8276_v61 = vpop.f32.mrb[208].mxu1 }
 0x5fc   : > { %v4065_v54 = vadd.f32 %v8276_v61, %v10258_v13  ;;  %v4056_v16 = vpop.f32.mrb[209].mxu1  ;;  %5614 = vmatpush1.bf16.msra.mxu0 %v8919_v55 }
 0x5fd   : > { %v4057_v32 = vadd.f32 %v10258_v13, %v4056_v16  ;;  %v8277_v58 = vpop.f32.mrb[210].mxu1  ;;  %v8927_v16 = vld [vmem:[%s11937_s11 + $0x124] ss:$28 sps:$4 sm:$0xff]  }
 0x5fe   : > { %v4068_v27 = vadd.f32 %v8277_v58, %v10258_v13  ;;  %v4059_v63 = vpop.f32.mrb[211].mxu1  ;;  %v4265_v20 = vmax.f32 %v4065_v54, 0.0  ;;  %5615 = vmatprep.subr.bf16.mxu0 %v8927_v16 }
 0x5ff   : > { %v4060_v21 = vadd.f32 %v10258_v13, %v4059_v63  ;;  %v4263_v10 = vmax.f32 %v4057_v32, 0.0 }
 0x600   : > { %v4266_v8 = vmax.f32 %v4068_v27, 0.0  ;;  %v8925_v27 = vld [vmem:[%s11937_s11 + $0x120] ss:$28 sps:$4 sm:$0xff]  }
 0x601   : > { %v4264_v45 = vmax.f32 %v4060_v21, 0.0  ;;  %5616 = vmatpush1.bf16.msra.mxu0 %v8925_v27 }
 0x602   : > { %v4320_v40 = vpack.c.bf16 %v4266_v8, %v4265_v20 }
 0x603   : > { %v4319_v34 = vpack.c.bf16 %v4264_v45, %v4263_v10  ;;  %v8922_v10 = vld [vmem:[%s11937_s11 + $0x188] ss:$28 sps:$4 sm:$0xff]  }
 0x604   : > { %v8924_v45 = vld [vmem:[%s11937_s11 + $0x18c] ss:$28 sps:$4 sm:$0xff]  }
 0x605   : > { %8346 = vmatprep.mubr.msk.bf16.mxu1 %vm3365_vm1, %v4319_v34  ;;  %v8930_v34 = vld [vmem:[%s11937_s11 + $0x15c] ss:$28 sps:$4 sm:$0xff]   ;;  %5266 = vmatprep.subr.bf16.mxu1 %v8924_v45 }
 0x606   : > { %8347 = vmatmul.mubr.msk.bf16.gmra.mrb[16].mxu1 %vm3365_vm1, %v4320_v40  ;;  %v8928_v40 = vld [vmem:[%s11937_s11 + $0x158] ss:$28 sps:$4 sm:$0xff]   ;;  %5617 = vmatprep.subr.bf16.mxu0 %v8930_v34 }
 0x607   : > { %5267 = vmatpush1.bf16.msra.mxu1 %v8922_v10  ;;  %5618 = vmatpush1.bf16.msra.mxu0 %v8928_v40 }
 0x608   : > { %5619 = vmatprep.subr.bf16.mxu0 %v8933_v31  ;;  %5958 = vmatprep.subr.bf16.mxu1 %v8936_v47 }
 0x60b   : > { %v8280_v7 = vpop.f32.mrb[212].mxu1  ;;  %5620 = vmatpush1.bf16.msra.mxu0 %v8931_v51 }
 0x60c   : > { %v4081_v50 = vadd.f32 %v8280_v7, %v10258_v13  ;;  %v4072_v60 = vpop.f32.mrb[213].mxu1 }
 0x60d   : > { %v4073_v28 = vadd.f32 %v10258_v13, %v4072_v60  ;;  %v8281_v23 = vpop.f32.mrb[214].mxu1 }
 0x60e   : > { %v4084_v37 = vadd.f32 %v8281_v23, %v10258_v13  ;;  %v4075_v22 = vpop.f32.mrb[215].mxu1  ;;  %v4269_v36 = vmax.f32 %v4081_v50, 0.0 }
 0x60f   : > { %v4076_v38 = vadd.f32 %v10258_v13, %v4075_v22  ;;  %v4267_v14 = vmax.f32 %v4073_v28, 0.0 }
 0x610   : > { %v4270_v44 = vmax.f32 %v4084_v37, 0.0 }
 0x611   : > { %v4268_v62 = vmax.f32 %v4076_v38, 0.0 }
 0x612   : > { %v4322_v17 = vpack.c.bf16 %v4270_v44, %v4269_v36 }
 0x613   : > { %v4321_v33 = vpack.c.bf16 %v4268_v62, %v4267_v14 }
 0x615   : > { %8350 = vmatprep.mubr.msk.bf16.mxu1 %vm3365_vm1, %v4321_v33 }
 0x616   : > { %8351 = vmatmul.mubr.msk.bf16.gmra.mrb[20].mxu1 %vm3365_vm1, %v4322_v17 }
 0x61b   : > { %v8284_v3 = vpop.f32.mrb[216].mxu1 }
 0x61c   : > { %v4097_v57 = vadd.f32 %v8284_v3, %v10258_v13  ;;  %v4088_v25 = vpop.f32.mrb[217].mxu1 }
 0x61d   : > { %v4089_v24 = vadd.f32 %v10258_v13, %v4088_v25  ;;  %v8285_v29 = vpop.f32.mrb[218].mxu1 }
 0x61e   : > { %v4100_v15 = vadd.f32 %v8285_v29, %v10258_v13  ;;  %v4091_v0 = vpop.f32.mrb[219].mxu1  ;;  %v4273_v9 = vmax.f32 %v4097_v57, 0.0 }
 0x61f   : > { %v4092_v42 = vadd.f32 %v10258_v13, %v4091_v0  ;;  %v4271_v43 = vmax.f32 %v4089_v24, 0.0 }
 0x620   : > { %v4274_v56 = vmax.f32 %v4100_v15, 0.0 }
 0x621   : > { %v4272_v59 = vmax.f32 %v4092_v42, 0.0 }
 0x622   : > { %v4324_v4 = vpack.c.bf16 %v4274_v56, %v4273_v9 }
 0x623   : > { %v4323_v5 = vpack.c.bf16 %v4272_v59, %v4271_v43 }
 0x625   : > { %8354 = vmatprep.mubr.msk.bf16.mxu1 %vm3365_vm1, %v4323_v5 }
 0x626   : > { %8355 = vmatmul.mubr.msk.bf16.gmra.mrb[24].mxu1 %vm3365_vm1, %v4324_v4 }
 0x62b   : > { %v8288_v30 = vpop.f32.mrb[220].mxu1 }
 0x62c   : > { %v4113_v48 = vadd.f32 %v8288_v30, %v10258_v13  ;;  %v4104_v46 = vpop.f32.mrb[221].mxu1 }
 0x62d   : > { %v4105_v19 = vadd.f32 %v10258_v13, %v4104_v46  ;;  %v8289_v18 = vpop.f32.mrb[222].mxu1 }
 0x62e   : > { %v4116_v39 = vadd.f32 %v8289_v18, %v10258_v13  ;;  %v4107_v61 = vpop.f32.mrb[223].mxu1  ;;  %v4277_v32 = vmax.f32 %v4113_v48, 0.0 }
 0x62f   : > { %v4108_v54 = vadd.f32 %v10258_v13, %v4107_v61  ;;  %v4275_v63 = vmax.f32 %v4105_v19, 0.0 }
 0x630   : > { %v4278_v58 = vmax.f32 %v4116_v39, 0.0 }
 0x631   : > { %v4276_v21 = vmax.f32 %v4108_v54, 0.0 }
 0x632   : > { %v4326_v20 = vpack.c.bf16 %v4278_v58, %v4277_v32 }
 0x633   : > { %v4325_v8 = vpack.c.bf16 %v4276_v21, %v4275_v63 }
 0x635   : > { %8358 = vmatprep.mubr.msk.bf16.mxu1 %vm3365_vm1, %v4325_v8 }
 0x636   : > { %8359 = vmatmul.mubr.msk.bf16.gmra.mrb[28].mxu1 %vm3365_vm1, %v4326_v20 }
 0x63b   : > { %v8292_v7 = vpop.f32.mrb[224].mxu1 }
 0x63c   : > { %v4129_v50 = vadd.f32 %v8292_v7, %v10258_v13  ;;  %v4120_v60 = vpop.f32.mrb[225].mxu1 }
 0x63d   : > { %v4121_v28 = vadd.f32 %v10258_v13, %v4120_v60  ;;  %v8293_v23 = vpop.f32.mrb[226].mxu1 }
 0x63e   : > { %v4132_v37 = vadd.f32 %v8293_v23, %v10258_v13  ;;  %v4123_v22 = vpop.f32.mrb[227].mxu1  ;;  %v4281_v36 = vmax.f32 %v4129_v50, 0.0 }
 0x63f   : > { %v4124_v38 = vadd.f32 %v10258_v13, %v4123_v22  ;;  %v4279_v14 = vmax.f32 %v4121_v28, 0.0 }
 0x640   : > { %v4282_v44 = vmax.f32 %v4132_v37, 0.0 }
 0x641   : > { %v4280_v62 = vmax.f32 %v4124_v38, 0.0 }
 0x642   : > { %v4328_v17 = vpack.c.bf16 %v4282_v44, %v4281_v36 }
 0x643   : > { %v4327_v33 = vpack.c.bf16 %v4280_v62, %v4279_v14 }
 0x645   : > { %8362 = vmatprep.mubr.msk.bf16.mxu1 %vm3365_vm1, %v4327_v33 }
 0x646   : > { %8363 = vmatmul.mubr.msk.bf16.gmra.mrb[32].mxu1 %vm3365_vm1, %v4328_v17 }
 0x64b   : > { %v8296_v49 = vpop.f32.mrb[228].mxu1 }
 0x64c   : > { %v4145_v12 = vadd.f32 %v8296_v49, %v10258_v13  ;;  %v4136_v41 = vpop.f32.mrb[229].mxu1 }
 0x64d   : > { %v4137_v3 = vadd.f32 %v10258_v13, %v4136_v41  ;;  %v8297_v57 = vpop.f32.mrb[230].mxu1 }
 0x64e   : > { %v4148_v25 = vadd.f32 %v8297_v57, %v10258_v13  ;;  %v4139_v24 = vpop.f32.mrb[231].mxu1  ;;  %v4285_v15 = vmax.f32 %v4145_v12, 0.0 }
 0x64f   : > { %v4140_v29 = vadd.f32 %v10258_v13, %v4139_v24  ;;  %v4283_v42 = vmax.f32 %v4137_v3, 0.0 }
 0x650   : > { %v4286_v0 = vmax.f32 %v4148_v25, 0.0 }
 0x651   : > { %v4284_v9 = vmax.f32 %v4140_v29, 0.0 }
 0x652   : > { %v4330_v56 = vpack.c.bf16 %v4286_v0, %v4285_v15 }
 0x653   : > { %v4329_v43 = vpack.c.bf16 %v4284_v9, %v4283_v42 }
 0x655   : > { %8366 = vmatprep.mubr.msk.bf16.mxu1 %vm3365_vm1, %v4329_v43 }
 0x656   : > { %8367 = vmatmul.mubr.msk.bf16.gmra.mrb[36].mxu1 %vm3365_vm1, %v4330_v56 }
 0x65b   : > { %v8300_v59 = vpop.f32.mrb[232].mxu1 }
 0x65c   : > { %v4161_v4 = vadd.f32 %v8300_v59, %v10258_v13  ;;  %v4152_v5 = vpop.f32.mrb[233].mxu1 }
 0x65d   : > { %v4153_v2 = vadd.f32 %v10258_v13, %v4152_v5  ;;  %v8301_v53 = vpop.f32.mrb[234].mxu1 }
 0x65e   : > { %v4164_v6 = vadd.f32 %v8301_v53, %v10258_v13  ;;  %v4155_v35 = vpop.f32.mrb[235].mxu1  ;;  %v4289_v26 = vmax.f32 %v4161_v4, 0.0 }
 0x65f   : > { %v4156_v52 = vadd.f32 %v10258_v13, %v4155_v35  ;;  %v4287_v11 = vmax.f32 %v4153_v2, 0.0 }
 0x660   : > { %v4290_v30 = vmax.f32 %v4164_v6, 0.0 }
 0x661   : > { %v4288_v48 = vmax.f32 %v4156_v52, 0.0 }
 0x662   : > { %v4332_v46 = vpack.c.bf16 %v4290_v30, %v4289_v26 }
 0x663   : > { %v4331_v55 = vpack.c.bf16 %v4288_v48, %v4287_v11 }
 0x665   : > { %8370 = vmatprep.mubr.msk.bf16.mxu1 %vm3365_vm1, %v4331_v55 }
 0x666   : > { %8371 = vmatmul.mubr.msk.bf16.gmra.mrb[40].mxu1 %vm3365_vm1, %v4332_v46 }
 0x66b   : > { %v8304_v19 = vpop.f32.mrb[236].mxu1 }
 0x66c   : > { %v4177_v18 = vadd.f32 %v8304_v19, %v10258_v13  ;;  %v4168_v39 = vpop.f32.mrb[237].mxu1 }
 0x66d   : > { %v4169_v61 = vadd.f32 %v10258_v13, %v4168_v39  ;;  %v8305_v54 = vpop.f32.mrb[238].mxu1 }
 0x66e   : > { %v4180_v16 = vadd.f32 %v8305_v54, %v10258_v13  ;;  %v4171_v32 = vpop.f32.mrb[239].mxu1  ;;  %v4293_v27 = vmax.f32 %v4177_v18, 0.0 }
 0x66f   : > { %v4172_v58 = vadd.f32 %v10258_v13, %v4171_v32  ;;  %v4291_v21 = vmax.f32 %v4169_v61, 0.0  ;;  %v10455_v32 = vld [vmem:[%s11936_s10] ss:$0 sm:$0xff] }
 0x670   : > { %v4294_v63 = vmax.f32 %v4180_v16, 0.0 }
 0x671   : > { %v4292_v20 = vmax.f32 %v4172_v58, 0.0 }
 0x672   : > { %v4334_v8 = vpack.c.bf16 %v4294_v63, %v4293_v27 }
 0x673   : > { %v4333_v10 = vpack.c.bf16 %v4292_v20, %v4291_v21 }
 0x675   : > { %8374 = vmatprep.mubr.msk.bf16.mxu1 %vm3365_vm1, %v4333_v10 }
 0x676   : > { %8375 = vmatmul.mubr.msk.bf16.gmra.mrb[44].mxu1 %vm3365_vm1, %v4334_v8 }
 0x67b   : > { %v8308_v45 = vpop.f32.mrb[240].mxu1 }
 0x67c   : > { %v4193_v40 = vadd.f32 %v8308_v45, %v10258_v13  ;;  %v4184_v34 = vpop.f32.mrb[241].mxu1 }
 0x67d   : > { %v4185_v31 = vadd.f32 %v10258_v13, %v4184_v34  ;;  %v8309_v51 = vpop.f32.mrb[242].mxu1 }
 0x67e   : > { %v4196_v7 = vadd.f32 %v8309_v51, %v10258_v13  ;;  %v4187_v50 = vpop.f32.mrb[243].mxu1  ;;  %v4297_v28 = vmax.f32 %v4193_v40, 0.0 }
 0x67f   : > { %v4188_v60 = vadd.f32 %v10258_v13, %v4187_v50  ;;  %v4295_v37 = vmax.f32 %v4185_v31, 0.0 }
 0x680   : > { %v4298_v23 = vmax.f32 %v4196_v7, 0.0 }
 0x681   : > { %v4296_v22 = vmax.f32 %v4188_v60, 0.0 }
 0x682   : > { %v4336_v38 = vpack.c.bf16 %v4298_v23, %v4297_v28  ;;  %v8934_v23 = vld [vmem:[%s11937_s11 + $0x10] ss:$28 sps:$4 sm:$0xff]  }
 0x683   : > { %v4335_v36 = vpack.c.bf16 %v4296_v22, %v4295_v37 }
 0x685   : > { %8378 = vmatprep.mubr.msk.bf16.mxu1 %vm3365_vm1, %v4335_v36 }
 0x686   : > { %8379 = vmatmul.mubr.msk.bf16.gmra.mrb[48].mxu1 %vm3365_vm1, %v4336_v38  ;;  %v8939_v38 = vld [vmem:[%s11937_s11 + $0x4c] ss:$28 sps:$4 sm:$0xff]  }
 0x68b   : > { %v8312_v44 = vpop.f32.mrb[244].mxu1 }
 0x68c   : > { %v4209_v14 = vadd.f32 %v8312_v44, %v10258_v13  ;;  %v4200_v62 = vpop.f32.mrb[245].mxu1 }
 0x68d   : > { %v4201_v17 = vadd.f32 %v10258_v13, %v4200_v62  ;;  %v8313_v33 = vpop.f32.mrb[246].mxu1 }
 0x68e   : > { %v4212_v47 = vadd.f32 %v8313_v33, %v10258_v13  ;;  %v4203_v49 = vpop.f32.mrb[247].mxu1  ;;  %v4301_v41 = vmax.f32 %v4209_v14, 0.0  ;;  %v8937_v33 = vld [vmem:[%s11937_s11 + $0x48] ss:$28 sps:$4 sm:$0xff]  }
 0x68f   : > { %v4204_v12 = vadd.f32 %v10258_v13, %v4203_v49  ;;  %v4299_v57 = vmax.f32 %v4201_v17, 0.0 }
 0x690   : > { %v4302_v3 = vmax.f32 %v4212_v47, 0.0 }
 0x691   : > { %v4300_v25 = vmax.f32 %v4204_v12, 0.0  ;;  %v8942_v12 = vld [vmem:[%s11937_s11 + $0x84] ss:$28 sps:$4 sm:$0xff]  }
 0x692   : > { %v4338_v24 = vpack.c.bf16 %v4302_v3, %v4301_v41 }
 0x693   : > { %v4337_v29 = vpack.c.bf16 %v4300_v25, %v4299_v57 }
 0x695   : > { %8382 = vmatprep.mubr.msk.bf16.mxu1 %vm3365_vm1, %v4337_v29  ;;  %v8940_v29 = vld [vmem:[%s11937_s11 + $0x80] ss:$28 sps:$4 sm:$0xff]  }
 0x696   : > { %8383 = vmatmul.mubr.msk.bf16.gmra.mrb[52].mxu1 %vm3365_vm1, %v4338_v24 }
 0x69b   : > { %v8316_v15 = vpop.f32.mrb[248].mxu1 }
 0x69c   : > { %v4225_v0 = vadd.f32 %v8316_v15, %v10258_v13  ;;  %v4216_v42 = vpop.f32.mrb[249].mxu1 }
 0x69d   : > { %v4217_v9 = vadd.f32 %v10258_v13, %v4216_v42  ;;  %v8317_v56 = vpop.f32.mrb[250].mxu1  ;;  %v8945_v42 = vld [vmem:[%s11937_s11 + $0xbc] ss:$28 sps:$4 sm:$0xff]  }
 0x69e   : > { %v4228_v43 = vadd.f32 %v8317_v56, %v10258_v13  ;;  %v4219_v59 = vpop.f32.mrb[251].mxu1  ;;  %v4305_v5 = vmax.f32 %v4225_v0, 0.0 }
 0x69f   : > { %v4220_v4 = vadd.f32 %v10258_v13, %v4219_v59  ;;  %v4303_v53 = vmax.f32 %v4217_v9, 0.0 }
 0x6a0   : > { %v4306_v2 = vmax.f32 %v4228_v43, 0.0 }
 0x6a1   : > { %v4304_v6 = vmax.f32 %v4220_v4, 0.0 }
 0x6a2   : > { %v4340_v35 = vpack.c.bf16 %v4306_v2, %v4305_v5  ;;  %v8943_v5 = vld [vmem:[%s11937_s11 + $0xb8] ss:$28 sps:$4 sm:$0xff]  }
 0x6a3   : > { %v4339_v52 = vpack.c.bf16 %v4304_v6, %v4303_v53  ;;  %v8948_v6 = vld [vmem:[%s11937_s11 + $0xf4] ss:$28 sps:$4 sm:$0xff]  }
 0x6a5   : > { %8386 = vmatprep.mubr.msk.bf16.mxu1 %vm3365_vm1, %v4339_v52 }
 0x6a6   : > { %8387 = vmatmul.mubr.msk.bf16.gmra.mrb[56].mxu1 %vm3365_vm1, %v4340_v35 }
 0x6ab   : > { %v8320_v26 = vpop.f32.mrb[252].mxu1 }
 0x6ac   : > { %v4241_v30 = vadd.f32 %v8320_v26, %v10258_v13  ;;  %v4232_v11 = vpop.f32.mrb[253].mxu1 }
 0x6ad   : > { %v4233_v48 = vadd.f32 %v10258_v13, %v4232_v11  ;;  %v8321_v46 = vpop.f32.mrb[254].mxu1 }
 0x6ae   : > { %v4244_v55 = vadd.f32 %v8321_v46, %v10258_v13  ;;  %v4235_v19 = vpop.f32.mrb[255].mxu1  ;;  %v4309_v39 = vmax.f32 %v4241_v30, 0.0 }
 0x6af   : > { %v4236_v18 = vadd.f32 %v10258_v13, %v4235_v19  ;;  %v4307_v54 = vmax.f32 %v4233_v48, 0.0  ;;  %v8946_v48 = vld [vmem:[%s11937_s11 + $0xf0] ss:$28 sps:$4 sm:$0xff]  }
 0x6b0   : > { %v4310_v61 = vmax.f32 %v4244_v55, 0.0 }
 0x6b1   : > { %v4308_v16 = vmax.f32 %v4236_v18, 0.0 }
 0x6b2   : > { %v4342_v58 = vpack.c.bf16 %v4310_v61, %v4309_v39 }
 0x6b3   : > { %v4341_v27 = vpack.c.bf16 %v4308_v16, %v4307_v54  ;;  %v8332_v63 = vpop.f32.mrb[0].mxu1 }
 0x6b4   : > { %v4521_v21 = vadd.f32 %v8332_v63, %v10455_v32  ;;  %v4512_v20 = vpop.f32.mrb[1].mxu1 }
 0x6b5   : > { %v4513_v8 = vadd.f32 %v10455_v32, %v4512_v20  ;;  %v8333_v10 = vpop.f32.mrb[2].mxu1  ;;  %8390 = vmatprep.mubr.msk.bf16.mxu1 %vm3365_vm1, %v4341_v27 }
 0x6b6   : > { %v4524_v13 = vadd.f32 %v8333_v10, %v10455_v32  ;;  %v4515_v45 = vpop.f32.mrb[3].mxu1  ;;  %8391 = vmatmul.mubr.msk.bf16.gmra.mrb[60].mxu1 %vm3365_vm1, %v4342_v58  ;;  %v4769_v34 = vmax.f32 %v4521_v21, 0.0 }
 0x6b7   : > { %v4516_v40 = vadd.f32 %v10455_v32, %v4515_v45  ;;  %5284 = vmatprep.mubr.bf16.mxu1 %v8975_v1  ;;  %v4767_v51 = vmax.f32 %v4513_v8, 0.0 }
 0x6b8   : > { %v4770_v31 = vmax.f32 %v4524_v13, 0.0 }
 0x6b9   : > { %v4768_v7 = vmax.f32 %v4516_v40, 0.0 }
 0x6ba   : > { %v10464_v50 = vpack.c.bf16 %v4770_v31, %v4769_v34 }
 0x6bb   : > { %v10466_v60 = vpack.c.bf16 %v4768_v7, %v4767_v51  ;;  %v8336_v28 = vpop.f32.mrb[4].mxu1 }
 0x6bc   : > { %v4537_v37 = vadd.f32 %v8336_v28, %v10455_v32  ;;  %v4528_v22 = vpop.f32.mrb[5].mxu1 }
 0x6bd   : > { %v4529_v36 = vadd.f32 %v10455_v32, %v4528_v22  ;;  %v8337_v44 = vpop.f32.mrb[6].mxu1  ;;  %5638 = vmatmul.mubr.bf16.vlgmr.msra.gmra.mrb[128].mxu0 %v10466_v60 }
 0x6be   : > { %v4540_v14 = vadd.f32 %v8337_v44, %v10455_v32  ;;  %v4531_v62 = vpop.f32.mrb[7].mxu1  ;;  %5285 = vmatmul.mubr.bf16.vlgmr.msra.gmra.mrb[64].mxu1 %v10466_v60  ;;  %5647 = vmatprep.mubr.bf16.mxu0 %v8975_v1  ;;  %v4773_v47 = vmax.f32 %v4537_v37, 0.0  ;;  %v8951_v44 = vld [vmem:[%s11937_s11 + $0x12c] ss:$28 sps:$4 sm:$0xff]  }
 0x6bf   : > { %v4532_v17 = vadd.f32 %v10455_v32, %v4531_v62  ;;  %5959 = vmatpush1.bf16.msra.mxu1 %v8934_v23  ;;  %5294 = vmatprep.mubr.bf16.mxu1 %v8975_v1  ;;  %v4771_v41 = vmax.f32 %v4529_v36, 0.0  ;;  %v8949_v36 = vld [vmem:[%s11937_s11 + $0x128] ss:$28 sps:$4 sm:$0xff]  }
 0x6c0   : > { %v4774_v49 = vmax.f32 %v4540_v14, 0.0  ;;  %5960 = vmatprep.subr.bf16.mxu1 %v8939_v38 }
 0x6c1   : > { %v4772_v3 = vmax.f32 %v4532_v17, 0.0 }
 0x6c2   : > { %v10488_v57 = vpack.c.bf16 %v4774_v49, %v4773_v47 }
 0x6c3   : > { %v10490_v25 = vpack.c.bf16 %v4772_v3, %v4771_v41  ;;  %v8340_v24 = vpop.f32.mrb[8].mxu1  ;;  %5961 = vmatpush1.bf16.msra.mxu1 %v8937_v33 }
 0x6c4   : > { %v4553_v15 = vadd.f32 %v8340_v24, %v10455_v32  ;;  %v4544_v0 = vpop.f32.mrb[9].mxu1  ;;  %5962 = vmatprep.subr.bf16.mxu1 %v8942_v12 }
 0x6c5   : > { %v4545_v9 = vadd.f32 %v10455_v32, %v4544_v0  ;;  %v8341_v56 = vpop.f32.mrb[10].mxu1  ;;  %5648 = vmatmul.mubr.bf16.gmra.mrb[132].mxu0 %v10464_v50 }
 0x6c6   : > { %v4556_v43 = vadd.f32 %v8341_v56, %v10455_v32  ;;  %v4547_v59 = vpop.f32.mrb[11].mxu1  ;;  %5295 = vmatmul.mubr.bf16.gmra.mrb[68].mxu1 %v10464_v50  ;;  %5657 = vmatprep.mubr.bf16.mxu0 %v8975_v1  ;;  %v4777_v2 = vmax.f32 %v4553_v15, 0.0 }
 0x6c7   : > { %v4548_v4 = vadd.f32 %v10455_v32, %v4547_v59  ;;  %5304 = vmatprep.mubr.bf16.mxu1 %v8975_v1  ;;  %5963 = vmatpush1.bf16.msra.mxu1 %v8940_v29  ;;  %v4775_v35 = vmax.f32 %v4545_v9, 0.0  ;;  %v10572_v9 = vld [vmem:[%s11937_s11 + $0x18] ss:$28 sps:$4 sm:$0xff]  }
 0x6c8   : > { %v4778_v53 = vmax.f32 %v4556_v43, 0.0  ;;  %5964 = vmatprep.subr.bf16.mxu1 %v8945_v42  ;;  %8394 = vmatprep.subr.bf16.mxu0 %v10572_v9 }
 0x6c9   : > { %v4776_v52 = vmax.f32 %v4548_v4, 0.0  ;;  %8395 = vmatpush3.bf16.msra.mxu0 %v10572_v9 }
 0x6ca   : > { %v10512_v26 = vpack.c.bf16 %v4778_v53, %v4777_v2 }
 0x6cb   : > { %v10514_v30 = vpack.c.bf16 %v4776_v52, %v4775_v35  ;;  %v8344_v11 = vpop.f32.mrb[12].mxu1  ;;  %5965 = vmatpush1.bf16.msra.mxu1 %v8943_v5 }
 0x6cc   : > { %v4569_v46 = vadd.f32 %v8344_v11, %v10455_v32  ;;  %v4560_v55 = vpop.f32.mrb[13].mxu1  ;;  %5966 = vmatprep.subr.bf16.mxu1 %v8948_v6 }
 0x6cd   : > { %v4561_v19 = vadd.f32 %v10455_v32, %v4560_v55  ;;  %v8345_v18 = vpop.f32.mrb[14].mxu1  ;;  %5658 = vmatmul.mubr.bf16.gmra.mrb[136].mxu0 %v10490_v25 }
 0x6ce   : > { %v4572_v39 = vadd.f32 %v8345_v18, %v10455_v32  ;;  %v4563_v61 = vpop.f32.mrb[15].mxu1  ;;  %5305 = vmatmul.mubr.bf16.gmra.mrb[72].mxu1 %v10490_v25  ;;  %5667 = vmatprep.mubr.bf16.mxu0 %v8975_v1  ;;  %v4781_v16 = vmax.f32 %v4569_v46, 0.0  ;;  %v8955_v18 = vld [vmem:[%s11937_s11 + $0x164] ss:$28 sps:$4 sm:$0xff]  }
 0x6cf   : > { %v4564_v54 = vadd.f32 %v10455_v32, %v4563_v61  ;;  %5314 = vmatprep.mubr.bf16.mxu1 %v8975_v1  ;;  %5967 = vmatpush1.bf16.msra.mxu1 %v8946_v48  ;;  %v4779_v27 = vmax.f32 %v4561_v19, 0.0  ;;  %v8953_v19 = vld [vmem:[%s11937_s11 + $0x160] ss:$28 sps:$4 sm:$0xff]  }
 0x6d0   : > { %v4782_v58 = vmax.f32 %v4572_v39, 0.0  ;;  %5968 = vmatprep.subr.bf16.mxu1 %v8951_v44 }
 0x6d1   : > { %v4780_v63 = vmax.f32 %v4564_v54, 0.0 }
 0x6d2   : > { %v10527_v21 = vpack.c.bf16 %v4782_v58, %v4781_v16 }
 0x6d3   : > { %v10529_v20 = vpack.c.bf16 %v4780_v63, %v4779_v27  ;;  %5969 = vmatpush1.bf16.msra.mxu1 %v8949_v36 }
 0x6d4   : > { %5970 = vmatprep.subr.bf16.mxu1 %v8955_v18  ;;  %v10680_v18 = vld [vmem:[%s11937_s11 + $0x130] ss:$28 sps:$4 sm:$0xff]  }
 0x6d5   : > { %5668 = vmatmul.mubr.bf16.gmra.mrb[140].mxu0 %v10488_v57 }
 0x6d6   : > { %5315 = vmatmul.mubr.bf16.gmra.mrb[76].mxu1 %v10488_v57  ;;  %5677 = vmatprep.mubr.bf16.mxu0 %v8975_v1 }
 0x6d7   : > { %5324 = vmatprep.mubr.bf16.mxu1 %v8975_v1  ;;  %5971 = vmatpush1.bf16.msra.mxu1 %v8953_v19 }
 0x6d9   : > { %v8348_v8 = vpop.f32.mrb[16].mxu1 }
 0x6da   : > { %v4585_v10 = vadd.f32 %v8348_v8, %v10455_v32  ;;  %v4576_v13 = vpop.f32.mrb[17].mxu1 }
 0x6db   : > { %v4577_v45 = vadd.f32 %v10455_v32, %v4576_v13  ;;  %v8349_v40 = vpop.f32.mrb[18].mxu1 }
 0x6dc   : > { %v4588_v34 = vadd.f32 %v8349_v40, %v10455_v32  ;;  %v4579_v31 = vpop.f32.mrb[19].mxu1  ;;  %v4785_v7 = vmax.f32 %v4585_v10, 0.0 }
 0x6dd   : > { %v4580_v51 = vadd.f32 %v10455_v32, %v4579_v31  ;;  %5678 = vmatmul.mubr.bf16.gmra.mrb[144].mxu0 %v10514_v30  ;;  %v4783_v23 = vmax.f32 %v4577_v45, 0.0 }
 0x6de   : > { %v4786_v28 = vmax.f32 %v4588_v34, 0.0  ;;  %5325 = vmatmul.mubr.bf16.gmra.mrb[80].mxu1 %v10514_v30  ;;  %5687 = vmatprep.mubr.bf16.mxu0 %v8975_v1 }
 0x6df   : > { %v4784_v37 = vmax.f32 %v4580_v51, 0.0  ;;  %5334 = vmatprep.mubr.bf16.mxu1 %v8975_v1  ;;  %v10617_v51 = vld [vmem:[%s11937_s11 + $0x50] ss:$28 sps:$4 sm:$0xff]  }
 0x6e0   : > { %v10543_v22 = vpack.c.bf16 %v4786_v28, %v4785_v7  ;;  %8396 = vmatprep.subr.bf16.mxu0 %v10617_v51 }
 0x6e1   : > { %v10545_v38 = vpack.c.bf16 %v4784_v37, %v4783_v23  ;;  %8397 = vmatpush3.bf16.msra.mxu0 %v10617_v51 }
 0x6e5   : > { %5688 = vmatmul.mubr.bf16.gmra.mrb[148].mxu0 %v10512_v26 }
 0x6e6   : > { %5335 = vmatmul.mubr.bf16.gmra.mrb[84].mxu1 %v10512_v26  ;;  %5697 = vmatprep.mubr.bf16.mxu0 %v8975_v1 }
 0x6e7   : > { %5344 = vmatprep.mubr.bf16.mxu1 %v8975_v1 }
 0x6e9   : > { %v8352_v14 = vpop.f32.mrb[20].mxu1 }
 0x6ea   : > { %v4601_v62 = vadd.f32 %v8352_v14, %v10455_v32  ;;  %v4592_v17 = vpop.f32.mrb[21].mxu1 }
 0x6eb   : > { %v4593_v33 = vadd.f32 %v10455_v32, %v4592_v17  ;;  %v8353_v47 = vpop.f32.mrb[22].mxu1 }
 0x6ec   : > { %v4604_v49 = vadd.f32 %v8353_v47, %v10455_v32  ;;  %v4595_v12 = vpop.f32.mrb[23].mxu1  ;;  %v4789_v3 = vmax.f32 %v4601_v62, 0.0 }
 0x6ed   : > { %v4596_v41 = vadd.f32 %v10455_v32, %v4595_v12  ;;  %5698 = vmatmul.mubr.bf16.gmra.mrb[152].mxu0 %v10529_v20  ;;  %v4787_v29 = vmax.f32 %v4593_v33, 0.0 }
 0x6ee   : > { %v4790_v24 = vmax.f32 %v4604_v49, 0.0  ;;  %5345 = vmatmul.mubr.bf16.gmra.mrb[88].mxu1 %v10529_v20  ;;  %5707 = vmatprep.mubr.bf16.mxu0 %v8975_v1 }
 0x6ef   : > { %v4788_v15 = vmax.f32 %v4596_v41, 0.0  ;;  %5354 = vmatprep.mubr.bf16.mxu1 %v8975_v1 }
 0x6f0   : > { %v10565_v0 = vpack.c.bf16 %v4790_v24, %v4789_v3  ;;  %v8957_v3 = vld [vmem:[%s11937_s11 + $0x198] ss:$28 sps:$4 sm:$0xff]  }
 0x6f1   : > { %v10567_v42 = vpack.c.bf16 %v4788_v15, %v4787_v29  ;;  %v8959_v24 = vld [vmem:[%s11937_s11 + $0x19c] ss:$28 sps:$4 sm:$0xff]   ;;  %v10646_v29 = vld [vmem:[%s11937_s11 + $0x88] ss:$28 sps:$4 sm:$0xff]  }
 0x6f2   : > { %5972 = vmatprep.subr.bf16.mxu1 %v8959_v24  ;;  %8398 = vmatprep.subr.bf16.mxu0 %v10646_v29  ;;  %v10657_v15 = vld [vmem:[%s11937_s11 + $0xc0] ss:$28 sps:$4 sm:$0xff]  }
 0x6f3   : > { %5973 = vmatpush1.bf16.msra.mxu1 %v8957_v3  ;;  %8399 = vmatpush3.bf16.msra.mxu0 %v10646_v29 }
 0x6f4   : > { %8474 = vmatprep.subr.bf16.mxu1 %v10572_v9  ;;  %8400 = vmatprep.subr.bf16.mxu0 %v10657_v15 }
 0x6f5   : > { %5708 = vmatmul.mubr.bf16.gmra.mrb[156].mxu0 %v10527_v21 }
 0x6f6   : > { %5355 = vmatmul.mubr.bf16.gmra.mrb[92].mxu1 %v10527_v21  ;;  %5717 = vmatprep.mubr.bf16.mxu0 %v8975_v1 }
 0x6f7   : > { %5364 = vmatprep.mubr.bf16.mxu1 %v8975_v1  ;;  %8401 = vmatpush3.bf16.msra.mxu0 %v10657_v15 }
 0x6f9   : > { %v8356_v56 = vpop.f32.mrb[24].mxu1 }
 0x6fa   : > { %v4617_v43 = vadd.f32 %v8356_v56, %v10455_v32  ;;  %v4608_v59 = vpop.f32.mrb[25].mxu1 }
 0x6fb   : > { %v4609_v4 = vadd.f32 %v10455_v32, %v4608_v59  ;;  %v8357_v5 = vpop.f32.mrb[26].mxu1 }
 0x6fc   : > { %v4620_v2 = vadd.f32 %v8357_v5, %v10455_v32  ;;  %v4611_v53 = vpop.f32.mrb[27].mxu1  ;;  %v4793_v35 = vmax.f32 %v4617_v43, 0.0 }
 0x6fd   : > { %v4612_v6 = vadd.f32 %v10455_v32, %v4611_v53  ;;  %5718 = vmatmul.mubr.bf16.gmra.mrb[160].mxu0 %v10545_v38  ;;  %v4791_v11 = vmax.f32 %v4609_v4, 0.0 }
 0x6fe   : > { %v4794_v52 = vmax.f32 %v4620_v2, 0.0  ;;  %5365 = vmatmul.mubr.bf16.gmra.mrb[96].mxu1 %v10545_v38  ;;  %5727 = vmatprep.mubr.bf16.mxu0 %v8975_v1  ;;  %v10667_v2 = vld [vmem:[%s11937_s11 + $0xf8] ss:$28 sps:$4 sm:$0xff]  }
 0x6ff   : > { %v4792_v48 = vmax.f32 %v4612_v6, 0.0  ;;  %5374 = vmatprep.mubr.bf16.mxu1 %v8975_v1  ;;  %8402 = vmatprep.subr.bf16.mxu0 %v10667_v2 }
 0x700   : > { %v10588_v46 = vpack.c.bf16 %v4794_v52, %v4793_v35  ;;  %8403 = vmatpush3.bf16.msra.mxu0 %v10667_v2 }
 0x701   : > { %v10590_v55 = vpack.c.bf16 %v4792_v48, %v4791_v11  ;;  %8404 = vmatprep.subr.bf16.mxu0 %v10680_v18 }
 0x704   : > { %8405 = vmatpush3.bf16.msra.mxu0 %v10680_v18 }
 0x705   : > { %5728 = vmatmul.mubr.bf16.gmra.mrb[164].mxu0 %v10543_v22 }
 0x706   : > { %5375 = vmatmul.mubr.bf16.gmra.mrb[100].mxu1 %v10543_v22  ;;  %5737 = vmatprep.mubr.bf16.mxu0 %v8975_v1 }
 0x707   : > { %5384 = vmatprep.mubr.bf16.mxu1 %v8975_v1 }
 0x709   : > { %v8360_v39 = vpop.f32.mrb[28].mxu1 }
 0x70a   : > { %v4633_v61 = vadd.f32 %v8360_v39, %v10455_v32  ;;  %v4624_v54 = vpop.f32.mrb[29].mxu1 }
 0x70b   : > { %v4625_v16 = vadd.f32 %v10455_v32, %v4624_v54  ;;  %v8361_v58 = vpop.f32.mrb[30].mxu1  ;;  %v10691_v54 = vld [vmem:[%s11937_s11 + $0x168] ss:$28 sps:$4 sm:$0xff]  }
 0x70c   : > { %v4636_v27 = vadd.f32 %v8361_v58, %v10455_v32  ;;  %v4627_v63 = vpop.f32.mrb[31].mxu1  ;;  %v4797_v10 = vmax.f32 %v4633_v61, 0.0  ;;  %8406 = vmatprep.subr.bf16.mxu0 %v10691_v54 }
 0x70d   : > { %v4628_v8 = vadd.f32 %v10455_v32, %v4627_v63  ;;  %5738 = vmatmul.mubr.bf16.gmra.mrb[168].mxu0 %v10567_v42  ;;  %v4795_v45 = vmax.f32 %v4625_v16, 0.0  ;;  %v10702_v16 = vld [vmem:[%s11937_s11 + $0x1a0] ss:$28 sps:$4 sm:$0xff]  }
 0x70e   : > { %v4798_v13 = vmax.f32 %v4636_v27, 0.0  ;;  %5385 = vmatmul.mubr.bf16.gmra.mrb[104].mxu1 %v10567_v42  ;;  %5747 = vmatprep.mubr.bf16.mxu0 %v8975_v1 }
 0x70f   : > { %v4796_v40 = vmax.f32 %v4628_v8, 0.0  ;;  %5394 = vmatprep.mubr.bf16.mxu1 %v8975_v1  ;;  %8407 = vmatpush3.bf16.msra.mxu0 %v10691_v54 }
 0x710   : > { %v10610_v34 = vpack.c.bf16 %v4798_v13, %v4797_v10  ;;  %8408 = vmatprep.subr.bf16.mxu0 %v10702_v16 }
 0x711   : > { %v10612_v31 = vpack.c.bf16 %v4796_v40, %v4795_v45 }
 0x713   : > { %8409 = vmatpush3.bf16.msra.mxu0 %v10702_v16 }
 0x715   : > { %5748 = vmatmul.mubr.bf16.gmra.mrb[172].mxu0 %v10565_v0 }
 0x716   : > { %5395 = vmatmul.mubr.bf16.gmra.mrb[108].mxu1 %v10565_v0  ;;  %5757 = vmatprep.mubr.bf16.mxu0 %v8975_v1 }
 0x717   : > { %5404 = vmatprep.mubr.bf16.mxu1 %v8975_v1 }
 0x719   : > { %v8364_v7 = vpop.f32.mrb[32].mxu1 }
 0x71a   : > { %v4649_v28 = vadd.f32 %v8364_v7, %v10455_v32  ;;  %v4640_v23 = vpop.f32.mrb[33].mxu1 }
 0x71b   : > { %v4641_v37 = vadd.f32 %v10455_v32, %v4640_v23  ;;  %v8365_v36 = vpop.f32.mrb[34].mxu1 }
 0x71c   : > { %v4652_v44 = vadd.f32 %v8365_v36, %v10455_v32  ;;  %v4643_v14 = vpop.f32.mrb[35].mxu1  ;;  %v4801_v17 = vmax.f32 %v4649_v28, 0.0 }
 0x71d   : > { %v4644_v62 = vadd.f32 %v10455_v32, %v4643_v14  ;;  %5758 = vmatmul.mubr.bf16.gmra.mrb[176].mxu0 %v10590_v55  ;;  %v4799_v47 = vmax.f32 %v4641_v37, 0.0 }
 0x71e   : > { %v4802_v33 = vmax.f32 %v4652_v44, 0.0  ;;  %5405 = vmatmul.mubr.bf16.gmra.mrb[112].mxu1 %v10590_v55  ;;  %5767 = vmatprep.mubr.bf16.mxu0 %v8975_v1 }
 0x71f   : > { %v4800_v49 = vmax.f32 %v4644_v62, 0.0  ;;  %5414 = vmatprep.mubr.bf16.mxu1 %v8975_v1 }
 0x720   : > { %v10633_v12 = vpack.c.bf16 %v4802_v33, %v4801_v17 }
 0x721   : > { %v10635_v41 = vpack.c.bf16 %v4800_v49, %v4799_v47 }
 0x725   : > { %5768 = vmatmul.mubr.bf16.gmra.mrb[180].mxu0 %v10588_v46 }
 0x726   : > { %5415 = vmatmul.mubr.bf16.gmra.mrb[116].mxu1 %v10588_v46  ;;  %5777 = vmatprep.mubr.bf16.mxu0 %v8975_v1 }
 0x727   : > { %5424 = vmatprep.mubr.bf16.mxu1 %v8975_v1 }
 0x729   : > { %v8368_v56 = vpop.f32.mrb[36].mxu1 }
 0x72a   : > { %v4665_v43 = vadd.f32 %v8368_v56, %v10455_v32  ;;  %v4656_v59 = vpop.f32.mrb[37].mxu1 }
 0x72b   : > { %v4657_v4 = vadd.f32 %v10455_v32, %v4656_v59  ;;  %v8369_v5 = vpop.f32.mrb[38].mxu1 }
 0x72c   : > { %v4668_v53 = vadd.f32 %v8369_v5, %v10455_v32  ;;  %v4659_v6 = vpop.f32.mrb[39].mxu1  ;;  %v4805_v52 = vmax.f32 %v4665_v43, 0.0 }
 0x72d   : > { %v4660_v35 = vadd.f32 %v10455_v32, %v4659_v6  ;;  %5778 = vmatmul.mubr.bf16.gmra.mrb[184].mxu0 %v10612_v31  ;;  %v4803_v48 = vmax.f32 %v4657_v4, 0.0 }
 0x72e   : > { %v4806_v11 = vmax.f32 %v4668_v53, 0.0  ;;  %5425 = vmatmul.mubr.bf16.gmra.mrb[120].mxu1 %v10612_v31  ;;  %5787 = vmatprep.mubr.bf16.mxu0 %v8975_v1 }
 0x72f   : > { %v4804_v19 = vmax.f32 %v4660_v35, 0.0  ;;  %5434 = vmatprep.mubr.bf16.mxu1 %v8975_v1 }
 0x730   : > { %v10682_v39 = vpack.c.bf16 %v4806_v11, %v4805_v52 }
 0x731   : > { %v10684_v61 = vpack.c.bf16 %v4804_v19, %v4803_v48 }
 0x735   : > { %5788 = vmatmul.mubr.bf16.gmra.mrb[188].mxu0 %v10610_v34 }
 0x736   : > { %5435 = vmatmul.mubr.bf16.gmra.mrb[124].mxu1 %v10610_v34  ;;  %5797 = vmatprep.mubr.bf16.mxu0 %v8975_v1 }
 0x737   : > { %5444 = vmatprep.mubr.bf16.mxu1 %v8975_v1 }
 0x739   : > { %v8372_v58 = vpop.f32.mrb[40].mxu1 }
 0x73a   : > { %v4681_v27 = vadd.f32 %v8372_v58, %v10455_v32  ;;  %v4672_v63 = vpop.f32.mrb[41].mxu1 }
 0x73b   : > { %v4673_v8 = vadd.f32 %v10455_v32, %v4672_v63  ;;  %v8373_v10 = vpop.f32.mrb[42].mxu1 }
 0x73c   : > { %v4684_v13 = vadd.f32 %v8373_v10, %v10455_v32  ;;  %v4675_v45 = vpop.f32.mrb[43].mxu1  ;;  %v4809_v7 = vmax.f32 %v4681_v27, 0.0 }
 0x73d   : > { %v4676_v40 = vadd.f32 %v10455_v32, %v4675_v45  ;;  %5798 = vmatmul.mubr.bf16.gmra.mrb[192].mxu0 %v10635_v41  ;;  %v4807_v23 = vmax.f32 %v4673_v8, 0.0 }
 0x73e   : > { %v4810_v28 = vmax.f32 %v4684_v13, 0.0  ;;  %5445 = vmatmul.mubr.bf16.gmra.mrb[128].mxu1 %v10635_v41  ;;  %5807 = vmatprep.mubr.bf16.mxu0 %v8975_v1 }
 0x73f   : > { %v4808_v37 = vmax.f32 %v4676_v40, 0.0  ;;  %5454 = vmatprep.mubr.bf16.mxu1 %v8975_v1 }
 0x740   : > { %v10714_v36 = vpack.c.bf16 %v4810_v28, %v4809_v7 }
 0x741   : > { %v10716_v44 = vpack.c.bf16 %v4808_v37, %v4807_v23 }
 0x745   : > { %5808 = vmatmul.mubr.bf16.gmra.mrb[196].mxu0 %v10633_v12 }
 0x746   : > { %5455 = vmatmul.mubr.bf16.gmra.mrb[132].mxu1 %v10633_v12  ;;  %5817 = vmatprep.mubr.bf16.mxu0 %v8975_v1 }
 0x747   : > { %5464 = vmatprep.mubr.bf16.mxu1 %v8975_v1 }
 0x749   : > { %v8376_v14 = vpop.f32.mrb[44].mxu1 }
 0x74a   : > { %v4697_v62 = vadd.f32 %v8376_v14, %v10455_v32  ;;  %v4688_v17 = vpop.f32.mrb[45].mxu1 }
 0x74b   : > { %v4689_v33 = vadd.f32 %v10455_v32, %v4688_v17  ;;  %v8377_v47 = vpop.f32.mrb[46].mxu1 }
 0x74c   : > { %v4700_v49 = vadd.f32 %v8377_v47, %v10455_v32  ;;  %v4691_v3 = vpop.f32.mrb[47].mxu1  ;;  %v4813_v56 = vmax.f32 %v4697_v62, 0.0 }
 0x74d   : > { %v4692_v24 = vadd.f32 %v10455_v32, %v4691_v3  ;;  %5818 = vmatmul.mubr.bf16.gmra.mrb[200].mxu0 %v10684_v61  ;;  %v4811_v59 = vmax.f32 %v4689_v33, 0.0 }
 0x74e   : > { %v4814_v43 = vmax.f32 %v4700_v49, 0.0  ;;  %5465 = vmatmul.mubr.bf16.gmra.mrb[136].mxu1 %v10684_v61  ;;  %5827 = vmatprep.mubr.bf16.mxu0 %v8975_v1 }
 0x74f   : > { %v4812_v4 = vmax.f32 %v4692_v24, 0.0  ;;  %5474 = vmatprep.mubr.bf16.mxu1 %v8975_v1 }
 0x750   : > { %v10730_v5 = vpack.c.bf16 %v4814_v43, %v4813_v56 }
 0x751   : > { %v10732_v53 = vpack.c.bf16 %v4812_v4, %v4811_v59 }
 0x755   : > { %5828 = vmatmul.mubr.bf16.gmra.mrb[204].mxu0 %v10682_v39 }
 0x756   : > { %5475 = vmatmul.mubr.bf16.gmra.mrb[140].mxu1 %v10682_v39  ;;  %5837 = vmatprep.mubr.bf16.mxu0 %v8975_v1 }
 0x757   : > { %5484 = vmatprep.mubr.bf16.mxu1 %v8975_v1 }
 0x759   : > { %v8380_v6 = vpop.f32.mrb[48].mxu1 }
 0x75a   : > { %v4713_v35 = vadd.f32 %v8380_v6, %v10455_v32  ;;  %v4704_v52 = vpop.f32.mrb[49].mxu1 }
 0x75b   : > { %v4705_v11 = vadd.f32 %v10455_v32, %v4704_v52  ;;  %v8381_v48 = vpop.f32.mrb[50].mxu1 }
 0x75c   : > { %v4716_v19 = vadd.f32 %v8381_v48, %v10455_v32  ;;  %v4707_v58 = vpop.f32.mrb[51].mxu1  ;;  %v4817_v63 = vmax.f32 %v4713_v35, 0.0 }
 0x75d   : > { %v4708_v27 = vadd.f32 %v10455_v32, %v4707_v58  ;;  %5838 = vmatmul.mubr.bf16.gmra.mrb[208].mxu0 %v10716_v44  ;;  %v4815_v10 = vmax.f32 %v4705_v11, 0.0 }
 0x75e   : > { %v4818_v8 = vmax.f32 %v4716_v19, 0.0  ;;  %5485 = vmatmul.mubr.bf16.gmra.mrb[144].mxu1 %v10716_v44  ;;  %5847 = vmatprep.mubr.bf16.mxu0 %v8975_v1 }
 0x75f   : > { %v4816_v13 = vmax.f32 %v4708_v27, 0.0  ;;  %5494 = vmatprep.mubr.bf16.mxu1 %v8975_v1 }
 0x760   : > { %v10746_v45 = vpack.c.bf16 %v4818_v8, %v4817_v63 }
 0x761   : > { %v10748_v40 = vpack.c.bf16 %v4816_v13, %v4815_v10 }
 0x765   : > { %5848 = vmatmul.mubr.bf16.gmra.mrb[212].mxu0 %v10714_v36 }
 0x766   : > { %5495 = vmatmul.mubr.bf16.gmra.mrb[148].mxu1 %v10714_v36  ;;  %5857 = vmatprep.mubr.bf16.mxu0 %v8975_v1 }
 0x767   : > { %5504 = vmatprep.mubr.bf16.mxu1 %v8975_v1 }
 0x769   : > { %v8384_v7 = vpop.f32.mrb[52].mxu1 }
 0x76a   : > { %v4729_v28 = vadd.f32 %v8384_v7, %v10455_v32  ;;  %v4720_v23 = vpop.f32.mrb[53].mxu1  ;;  %v4929_v7 = vlaneseq }
 0x76b   : > { %v4721_v37 = vadd.f32 %v10455_v32, %v4720_v23  ;;  %v8385_v14 = vpop.f32.mrb[54].mxu1 }
 0x76c   : > { %v4732_v62 = vadd.f32 %v8385_v14, %v10455_v32  ;;  %v4723_v17 = vpop.f32.mrb[55].mxu1  ;;  %v4821_v47 = vmax.f32 %v4729_v28, 0.0  ;;  %v10783_v28 = vshrl.u32 %v4929_v7, 7 }
 0x76d   : > { %v4724_v33 = vadd.f32 %v10455_v32, %v4723_v17  ;;  %5858 = vmatmul.mubr.bf16.gmra.mrb[216].mxu0 %v10732_v53  ;;  %v4819_v3 = vmax.f32 %v4721_v37, 0.0  ;;  %v4927_v17 = vld [vmem:[%s11938_s12] sm:$0x7f] }
 0x76e   : > { %v4822_v49 = vmax.f32 %v4732_v62, 0.0  ;;  %5505 = vmatmul.mubr.bf16.gmra.mrb[152].mxu1 %v10732_v53  ;;  %5867 = vmatprep.mubr.bf16.mxu0 %v8975_v1  ;;  %v4939_v37 = vsub.s32 2, %v10783_v28 }
 0x76f   : > { %v4820_v24 = vmax.f32 %v4724_v33, 0.0  ;;  %5514 = vmatprep.mubr.bf16.mxu1 %v8975_v1  ;;  %v4931_v33 = vsub.s32 0, %v10783_v28 }
 0x770   : > { %v10762_v56 = vpack.c.bf16 %v4822_v49, %v4821_v47  ;;  %v4943_v47 = vsub.s32 3, %v10783_v28 }
 0x771   : > { %v10764_v43 = vpack.c.bf16 %v4820_v24, %v4819_v3  ;;  %v4935_v24 = vsub.s32 1, %v10783_v28 }
 0x775   : > { %5868 = vmatmul.mubr.bf16.gmra.mrb[220].mxu0 %v10730_v5 }
 0x776   : > { %5515 = vmatmul.mubr.bf16.gmra.mrb[156].mxu1 %v10730_v5  ;;  %5877 = vmatprep.mubr.bf16.mxu0 %v8975_v1 }
 0x777   : > { %5524 = vmatprep.mubr.bf16.mxu1 %v8975_v1 }
 0x779   : > { %v8388_v59 = vpop.f32.mrb[56].mxu1 }
 0x77a   : > { %v4745_v4 = vadd.f32 %v8388_v59, %v10455_v32  ;;  %v4736_v6 = vpop.f32.mrb[57].mxu1 }
 0x77b   : > { %v4737_v35 = vadd.f32 %v10455_v32, %v4736_v6  ;;  %v8389_v52 = vpop.f32.mrb[58].mxu1 }
 0x77c   : > { %v4748_v11 = vadd.f32 %v8389_v52, %v10455_v32  ;;  %v4739_v48 = vpop.f32.mrb[59].mxu1  ;;  %v4825_v58 = vmax.f32 %v4745_v4, 0.0 }
 0x77d   : > { %v4740_v19 = vadd.f32 %v10455_v32, %v4739_v48  ;;  %5878 = vmatmul.mubr.bf16.gmra.mrb[224].mxu0 %v10748_v40  ;;  %v4823_v63 = vmax.f32 %v4737_v35, 0.0  ;;  %v10800_v35 = vrot.slane %v4927_v17, %v4939_v37  ;;  %v10803_v48 = vrot.slane %v4927_v17, %v4931_v33 }
 0x77e   : > { %v4826_v27 = vmax.f32 %v4748_v11, 0.0  ;;  %5525 = vmatmul.mubr.bf16.gmra.mrb[160].mxu1 %v10748_v40  ;;  %5887 = vmatprep.mubr.bf16.mxu0 %v8975_v1 }
 0x77f   : > { %v4824_v8 = vmax.f32 %v4740_v19, 0.0  ;;  %5534 = vmatprep.mubr.bf16.mxu1 %v8975_v1  ;;  %v10805_v19 = vrot.slane %v4927_v17, %v4943_v47 }
 0x780   : > { %v10778_v10 = vpack.c.bf16 %v4826_v27, %v4825_v58 }
 0x781   : > { %v10780_v13 = vpack.c.bf16 %v4824_v8, %v4823_v63  ;;  %v10808_v63 = vrot.slane %v4927_v17, %v4935_v24 }
 0x785   : > { %5888 = vmatmul.mubr.bf16.gmra.mrb[228].mxu0 %v10746_v45 }
 0x786   : > { %5535 = vmatmul.mubr.bf16.gmra.mrb[164].mxu1 %v10746_v45  ;;  %5897 = vmatprep.mubr.bf16.mxu0 %v8975_v1 }
 0x787   : > { %5544 = vmatprep.mubr.bf16.mxu1 %v8975_v1 }
 0x789   : > { %v8392_v23 = vpop.f32.mrb[60].mxu1 }
 0x78a   : > { %v4761_v14 = vadd.f32 %v8392_v23, %v10455_v32  ;;  %v4752_v62 = vpop.f32.mrb[61].mxu1 }
 0x78b   : > { %v4753_v49 = vadd.f32 %v10455_v32, %v4752_v62  ;;  %v8393_v3 = vpop.f32.mrb[62].mxu1 }
 0x78c   : > { %v4764_v59 = vadd.f32 %v8393_v3, %v10455_v32  ;;  %v4755_v4 = vpop.f32.mrb[63].mxu1  ;;  %v4829_v52 = vmax.f32 %v4761_v14, 0.0 }
 0x78d   : > { %v4756_v6 = vadd.f32 %v10455_v32, %v4755_v4  ;;  %5898 = vmatmul.mubr.bf16.gmra.mrb[232].mxu0 %v10764_v43  ;;  %v4827_v58 = vmax.f32 %v4753_v49, 0.0 }
 0x78e   : > { %v4830_v11 = vmax.f32 %v4764_v59, 0.0  ;;  %5545 = vmatmul.mubr.bf16.gmra.mrb[168].mxu1 %v10764_v43  ;;  %5907 = vmatprep.mubr.bf16.mxu0 %v8975_v1 }
 0x78f   : > { %v4828_v27 = vmax.f32 %v4756_v6, 0.0  ;;  %5554 = vmatprep.mubr.bf16.mxu1 %v8975_v1 }
 0x790   : > { %v10811_v32 = vpack.c.bf16 %v4830_v11, %v4829_v52  ;;  %v5639_v8 = vpop.f32.mrb[128].mxu0 }
 0x791   : > { %v10813_v7 = vpack.c.bf16 %v4828_v27, %v4827_v58  ;;  %v5640_v23 = vadd.f32 %v5639_v8, %v10800_v35  ;;  %v5286_v37 = vpop.f32.mrb[64].mxu1  ;;  %v5641_v14 = vpop.f32.mrb[129].mxu0 }
 0x792   : > { %v5287_v62 = vadd.f32 %v5286_v37, %v10803_v48  ;;  %v5642_v17 = vadd.f32 %v5641_v14, %v10805_v19  ;;  %v5288_v33 = vpop.f32.mrb[65].mxu1  ;;  %v5643_v47 = vpop.f32.mrb[130].mxu0 }
 0x793   : > { %v6602_v49 = vmax.f32 %v5640_v23, 0.0  ;;  %v5289_v3 = vadd.f32 %v5288_v33, %v10808_v63  ;;  %v5644_v24 = vadd.f32 %v5643_v47, %v10800_v35  ;;  %v5290_v59 = vpop.f32.mrb[66].mxu1  ;;  %v5645_v4 = vpop.f32.mrb[131].mxu0 }
 0x794   : > { %v6600_v6 = vmax.f32 %v5287_v62, 0.0  ;;  %v6603_v52 = vmax.f32 %v5642_v17, 0.0  ;;  %v5291_v11 = vadd.f32 %v5290_v59, %v10803_v48  ;;  %v5646_v58 = vadd.f32 %v5645_v4, %v10805_v19  ;;  %v5292_v27 = vpop.f32.mrb[67].mxu1 }
 0x795   : > { %7050 = vst [vmem:[%s10821_s22 + $0x10] sm:$0xff] %v6602_v49  ;;  %v6601_v8 = vmax.f32 %v5289_v3, 0.0  ;;  %v6609_v23 = vmax.f32 %v5644_v24, 0.0  ;;  %v5293_v37 = vadd.f32 %v5292_v27, %v10808_v63  ;;  %5908 = vmatmul.mubr.bf16.gmra.mrb[236].mxu0 %v10762_v56 }
 0x796   : > { %7048 = vst [vmem:[%s10821_s22] sm:$0xff] %v6600_v6  ;;  %7051 = vst [vmem:[%s10821_s22 + $0x18] sm:$0xff] %v6603_v52  ;;  %v6607_v14 = vmax.f32 %v5291_v11, 0.0  ;;  %v6610_v62 = vmax.f32 %v5646_v58, 0.0  ;;  %5555 = vmatmul.mubr.bf16.gmra.mrb[172].mxu1 %v10762_v56  ;;  %5917 = vmatprep.mubr.bf16.mxu0 %v8975_v1 }
 0x797   : > { %7049 = vst [vmem:[%s10821_s22 + $0x8] sm:$0xff] %v6601_v8  ;;  %7057 = vst [vmem:[%s10821_s22 + $0x48] sm:$0xff] %v6609_v23  ;;  %v6608_v17 = vmax.f32 %v5293_v37, 0.0  ;;  %5564 = vmatprep.mubr.bf16.mxu1 %v8975_v1 }
 0x798   : > { %7055 = vst [vmem:[%s10821_s22 + $0x38] sm:$0xff] %v6607_v14  ;;  %7058 = vst [vmem:[%s10821_s22 + $0x50] sm:$0xff] %v6610_v62  ;;  %v5649_v33 = vpop.f32.mrb[132].mxu0 }
 0x799   : > { %7056 = vst [vmem:[%s10821_s22 + $0x40] sm:$0xff] %v6608_v17  ;;  %v5650_v47 = vadd.f32 %v5649_v33, %v10800_v35  ;;  %v5296_v49 = vpop.f32.mrb[68].mxu1  ;;  %v5651_v3 = vpop.f32.mrb[133].mxu0 }
 0x79a   : > { %v5297_v24 = vadd.f32 %v5296_v49, %v10803_v48  ;;  %v5652_v59 = vadd.f32 %v5651_v3, %v10805_v19  ;;  %v5298_v4 = vpop.f32.mrb[69].mxu1  ;;  %v5653_v6 = vpop.f32.mrb[134].mxu0 }
 0x79b   : > { %v6616_v52 = vmax.f32 %v5650_v47, 0.0  ;;  %v5299_v11 = vadd.f32 %v5298_v4, %v10808_v63  ;;  %v5654_v58 = vadd.f32 %v5653_v6, %v10800_v35  ;;  %v5300_v27 = vpop.f32.mrb[70].mxu1  ;;  %v5655_v8 = vpop.f32.mrb[135].mxu0 }
 0x79c   : > { %v6614_v23 = vmax.f32 %v5297_v24, 0.0  ;;  %v6617_v37 = vmax.f32 %v5652_v59, 0.0  ;;  %v5301_v14 = vadd.f32 %v5300_v27, %v10803_v48  ;;  %v5656_v62 = vadd.f32 %v5655_v8, %v10805_v19  ;;  %v5302_v17 = vpop.f32.mrb[71].mxu1 }
 0x79d   : > { %7064 = vst [vmem:[%s10821_s22 + $0x80] sm:$0xff] %v6616_v52  ;;  %v6615_v33 = vmax.f32 %v5299_v11, 0.0  ;;  %v6623_v47 = vmax.f32 %v5654_v58, 0.0  ;;  %v5303_v49 = vadd.f32 %v5302_v17, %v10808_v63  ;;  %5918 = vmatmul.mubr.bf16.gmra.mrb[240].mxu0 %v10780_v13 }
 0x79e   : > { %7062 = vst [vmem:[%s10821_s22 + $0x70] sm:$0xff] %v6614_v23  ;;  %7065 = vst [vmem:[%s10821_s22 + $0x88] sm:$0xff] %v6617_v37  ;;  %v6621_v3 = vmax.f32 %v5301_v14, 0.0  ;;  %v6624_v24 = vmax.f32 %v5656_v62, 0.0  ;;  %5565 = vmatmul.mubr.bf16.gmra.mrb[176].mxu1 %v10780_v13  ;;  %5927 = vmatprep.mubr.bf16.mxu0 %v8975_v1 }
 0x79f   : > { %7063 = vst [vmem:[%s10821_s22 + $0x78] sm:$0xff] %v6615_v33  ;;  %7071 = vst [vmem:[%s10821_s22 + $0xb8] sm:$0xff] %v6623_v47  ;;  %v6622_v59 = vmax.f32 %v5303_v49, 0.0  ;;  %5574 = vmatprep.mubr.bf16.mxu1 %v8975_v1 }
 0x7a0   : > { %7069 = vst [vmem:[%s10821_s22 + $0xa8] sm:$0xff] %v6621_v3  ;;  %7072 = vst [vmem:[%s10821_s22 + $0xc0] sm:$0xff] %v6624_v24  ;;  %v5659_v4 = vpop.f32.mrb[136].mxu0 }
 0x7a1   : > { %7070 = vst [vmem:[%s10821_s22 + $0xb0] sm:$0xff] %v6622_v59  ;;  %v5660_v6 = vadd.f32 %v5659_v4, %v10800_v35  ;;  %v5306_v52 = vpop.f32.mrb[72].mxu1  ;;  %v5661_v11 = vpop.f32.mrb[137].mxu0 }
 0x7a2   : > { %v5307_v58 = vadd.f32 %v5306_v52, %v10803_v48  ;;  %v5662_v27 = vadd.f32 %v5661_v11, %v10805_v19  ;;  %v5308_v8 = vpop.f32.mrb[73].mxu1  ;;  %v5663_v23 = vpop.f32.mrb[138].mxu0 }
 0x7a3   : > { %v6630_v37 = vmax.f32 %v5660_v6, 0.0  ;;  %v5309_v14 = vadd.f32 %v5308_v8, %v10808_v63  ;;  %v5664_v62 = vadd.f32 %v5663_v23, %v10800_v35  ;;  %v5310_v17 = vpop.f32.mrb[74].mxu1  ;;  %v5665_v33 = vpop.f32.mrb[139].mxu0 }
 0x7a4   : > { %v6628_v47 = vmax.f32 %v5307_v58, 0.0  ;;  %v6631_v49 = vmax.f32 %v5662_v27, 0.0  ;;  %v5311_v3 = vadd.f32 %v5310_v17, %v10803_v48  ;;  %v5666_v24 = vadd.f32 %v5665_v33, %v10805_v19  ;;  %v5312_v59 = vpop.f32.mrb[75].mxu1 }
 0x7a5   : > { %7078 = vst [vmem:[%s10821_s22 + $0xf0] sm:$0xff] %v6630_v37  ;;  %v6629_v4 = vmax.f32 %v5309_v14, 0.0  ;;  %v6637_v6 = vmax.f32 %v5664_v62, 0.0  ;;  %v5313_v52 = vadd.f32 %v5312_v59, %v10808_v63  ;;  %5928 = vmatmul.mubr.bf16.gmra.mrb[244].mxu0 %v10778_v10 }
 0x7a6   : > { %7076 = vst [vmem:[%s10821_s22 + $0xe0] sm:$0xff] %v6628_v47  ;;  %7079 = vst [vmem:[%s10821_s22 + $0xf8] sm:$0xff] %v6631_v49  ;;  %v6635_v11 = vmax.f32 %v5311_v3, 0.0  ;;  %v6638_v58 = vmax.f32 %v5666_v24, 0.0  ;;  %5575 = vmatmul.mubr.bf16.gmra.mrb[180].mxu1 %v10778_v10  ;;  %5937 = vmatprep.mubr.bf16.mxu0 %v8975_v1 }
 0x7a7   : > { %7077 = vst [vmem:[%s10821_s22 + $0xe8] sm:$0xff] %v6629_v4  ;;  %7085 = vst [vmem:[%s10821_s22 + $0x128] sm:$0xff] %v6637_v6  ;;  %v6636_v27 = vmax.f32 %v5313_v52, 0.0  ;;  %5584 = vmatprep.mubr.bf16.mxu1 %v8975_v1 }
 0x7a8   : > { %7083 = vst [vmem:[%s10821_s22 + $0x118] sm:$0xff] %v6635_v11  ;;  %7086 = vst [vmem:[%s10821_s22 + $0x130] sm:$0xff] %v6638_v58  ;;  %v5669_v8 = vpop.f32.mrb[140].mxu0 }
 0x7a9   : > { %7084 = vst [vmem:[%s10821_s22 + $0x120] sm:$0xff] %v6636_v27  ;;  %v5670_v23 = vadd.f32 %v5669_v8, %v10800_v35  ;;  %v5316_v37 = vpop.f32.mrb[76].mxu1  ;;  %v5671_v14 = vpop.f32.mrb[141].mxu0 }
 0x7aa   : > { %v5317_v62 = vadd.f32 %v5316_v37, %v10803_v48  ;;  %v5672_v17 = vadd.f32 %v5671_v14, %v10805_v19  ;;  %v5318_v33 = vpop.f32.mrb[77].mxu1  ;;  %v5673_v47 = vpop.f32.mrb[142].mxu0 }
 0x7ab   : > { %v6644_v49 = vmax.f32 %v5670_v23, 0.0  ;;  %v5319_v3 = vadd.f32 %v5318_v33, %v10808_v63  ;;  %v5674_v24 = vadd.f32 %v5673_v47, %v10800_v35  ;;  %v5320_v59 = vpop.f32.mrb[78].mxu1  ;;  %v5675_v4 = vpop.f32.mrb[143].mxu0 }
 0x7ac   : > { %v6642_v6 = vmax.f32 %v5317_v62, 0.0  ;;  %v6645_v52 = vmax.f32 %v5672_v17, 0.0  ;;  %v5321_v11 = vadd.f32 %v5320_v59, %v10803_v48  ;;  %v5676_v58 = vadd.f32 %v5675_v4, %v10805_v19  ;;  %v5322_v27 = vpop.f32.mrb[79].mxu1 }
 0x7ad   : > { %7092 = vst [vmem:[%s10821_s22 + $0x160] sm:$0xff] %v6644_v49  ;;  %v6643_v8 = vmax.f32 %v5319_v3, 0.0  ;;  %v6651_v23 = vmax.f32 %v5674_v24, 0.0  ;;  %v5323_v37 = vadd.f32 %v5322_v27, %v10808_v63  ;;  %5938 = vmatmul.mubr.bf16.gmra.mrb[248].mxu0 %v10813_v7 }
 0x7ae   : > { %7090 = vst [vmem:[%s10821_s22 + $0x150] sm:$0xff] %v6642_v6  ;;  %7093 = vst [vmem:[%s10821_s22 + $0x168] sm:$0xff] %v6645_v52  ;;  %v6649_v14 = vmax.f32 %v5321_v11, 0.0  ;;  %v6652_v62 = vmax.f32 %v5676_v58, 0.0  ;;  %5585 = vmatmul.mubr.bf16.gmra.mrb[184].mxu1 %v10813_v7  ;;  %5947 = vmatprep.mubr.bf16.mxu0 %v8975_v1 }
 0x7af   : > { %7091 = vst [vmem:[%s10821_s22 + $0x158] sm:$0xff] %v6643_v8  ;;  %7099 = vst [vmem:[%s10821_s22 + $0x198] sm:$0xff] %v6651_v23  ;;  %v6650_v17 = vmax.f32 %v5323_v37, 0.0  ;;  %5594 = vmatprep.mubr.bf16.mxu1 %v8975_v1 }
 0x7b0   : > { %7097 = vst [vmem:[%s10821_s22 + $0x188] sm:$0xff] %v6649_v14  ;;  %7100 = vst [vmem:[%s10821_s22 + $0x1a0] sm:$0xff] %v6652_v62  ;;  %v5679_v33 = vpop.f32.mrb[144].mxu0 }
 0x7b1   : > { %7098 = vst [vmem:[%s10821_s22 + $0x190] sm:$0xff] %v6650_v17  ;;  %v5680_v47 = vadd.f32 %v5679_v33, %v10800_v35  ;;  %v5326_v49 = vpop.f32.mrb[80].mxu1  ;;  %v5681_v3 = vpop.f32.mrb[145].mxu0 }
 0x7b2   : > { %v5327_v24 = vadd.f32 %v5326_v49, %v10803_v48  ;;  %v5682_v59 = vadd.f32 %v5681_v3, %v10805_v19  ;;  %v5328_v4 = vpop.f32.mrb[81].mxu1  ;;  %v5683_v6 = vpop.f32.mrb[146].mxu0 }
 0x7b3   : > { %v6658_v52 = vmax.f32 %v5680_v47, 0.0  ;;  %v5329_v11 = vadd.f32 %v5328_v4, %v10808_v63  ;;  %v5684_v58 = vadd.f32 %v5683_v6, %v10800_v35  ;;  %v5330_v27 = vpop.f32.mrb[82].mxu1  ;;  %v5685_v8 = vpop.f32.mrb[147].mxu0 }
 0x7b4   : > { %v6656_v23 = vmax.f32 %v5327_v24, 0.0  ;;  %v6659_v37 = vmax.f32 %v5682_v59, 0.0  ;;  %v5331_v14 = vadd.f32 %v5330_v27, %v10803_v48  ;;  %v5686_v62 = vadd.f32 %v5685_v8, %v10805_v19  ;;  %v5332_v17 = vpop.f32.mrb[83].mxu1 }
 0x7b5   : > { %7106 = vst [vmem:[%s10821_s22 + $0x1d0] sm:$0xff] %v6658_v52  ;;  %v6657_v33 = vmax.f32 %v5329_v11, 0.0  ;;  %v6665_v47 = vmax.f32 %v5684_v58, 0.0  ;;  %v5333_v49 = vadd.f32 %v5332_v17, %v10808_v63  ;;  %5948 = vmatmul.mubr.bf16.gmra.mrb[252].mxu0 %v10811_v32 }
 0x7b6   : > { %7104 = vst [vmem:[%s10821_s22 + $0x1c0] sm:$0xff] %v6656_v23  ;;  %7107 = vst [vmem:[%s10821_s22 + $0x1d8] sm:$0xff] %v6659_v37  ;;  %v6663_v3 = vmax.f32 %v5331_v14, 0.0  ;;  %v6666_v24 = vmax.f32 %v5686_v62, 0.0  ;;  %5595 = vmatmul.mubr.bf16.gmra.mrb[188].mxu1 %v10811_v32  ;;  %8410 = vmatprep.mubr.bf16.mxu0 %v10466_v60 }
 0x7b7   : > { %7105 = vst [vmem:[%s10821_s22 + $0x1c8] sm:$0xff] %v6657_v33  ;;  %7113 = vst [vmem:[%s10821_s22 + $0x208] sm:$0xff] %v6665_v47  ;;  %v6664_v59 = vmax.f32 %v5333_v49, 0.0  ;;  %5990 = vmatprep.mubr.bf16.mxu1 %v8975_v1 }
 0x7b8   : > { %7111 = vst [vmem:[%s10821_s22 + $0x1f8] sm:$0xff] %v6663_v3  ;;  %7114 = vst [vmem:[%s10821_s22 + $0x210] sm:$0xff] %v6666_v24  ;;  %v5689_v4 = vpop.f32.mrb[148].mxu0 }
 0x7b9   : > { %7112 = vst [vmem:[%s10821_s22 + $0x200] sm:$0xff] %v6664_v59  ;;  %v5690_v6 = vadd.f32 %v5689_v4, %v10800_v35  ;;  %v5336_v52 = vpop.f32.mrb[84].mxu1  ;;  %v5691_v11 = vpop.f32.mrb[149].mxu0 }
 0x7ba   : > { %v5337_v58 = vadd.f32 %v5336_v52, %v10803_v48  ;;  %v5692_v27 = vadd.f32 %v5691_v11, %v10805_v19  ;;  %v5338_v8 = vpop.f32.mrb[85].mxu1  ;;  %v5693_v23 = vpop.f32.mrb[150].mxu0 }
 0x7bb   : > { %v6672_v37 = vmax.f32 %v5690_v6, 0.0  ;;  %v5339_v14 = vadd.f32 %v5338_v8, %v10808_v63  ;;  %v5694_v62 = vadd.f32 %v5693_v23, %v10800_v35  ;;  %v5340_v17 = vpop.f32.mrb[86].mxu1  ;;  %v5695_v33 = vpop.f32.mrb[151].mxu0 }
 0x7bc   : > { %v6670_v47 = vmax.f32 %v5337_v58, 0.0  ;;  %v6673_v49 = vmax.f32 %v5692_v27, 0.0  ;;  %v5341_v3 = vadd.f32 %v5340_v17, %v10803_v48  ;;  %v5696_v24 = vadd.f32 %v5695_v33, %v10805_v19  ;;  %v5342_v59 = vpop.f32.mrb[87].mxu1 }
 0x7bd   : > { %7120 = vst [vmem:[%s10821_s22 + $0x240] sm:$0xff] %v6672_v37  ;;  %v6671_v4 = vmax.f32 %v5339_v14, 0.0  ;;  %v6679_v6 = vmax.f32 %v5694_v62, 0.0  ;;  %v5343_v52 = vadd.f32 %v5342_v59, %v10808_v63  ;;  %8411 = vmatmul.mubr.bf16.vlgmr.msra.gmra.mrb[0].mxu0 %v10464_v50 }
 0x7be   : > { %7118 = vst [vmem:[%s10821_s22 + $0x230] sm:$0xff] %v6670_v47  ;;  %7121 = vst [vmem:[%s10821_s22 + $0x248] sm:$0xff] %v6673_v49  ;;  %v6677_v11 = vmax.f32 %v5341_v3, 0.0  ;;  %v6680_v58 = vmax.f32 %v5696_v24, 0.0  ;;  %5991 = vmatmul.mubr.bf16.vlgmr.msra.gmra.mrb[192].mxu1 %v10466_v60  ;;  %8414 = vmatprep.mubr.bf16.mxu0 %v10490_v25 }
 0x7bf   : > { %7119 = vst [vmem:[%s10821_s22 + $0x238] sm:$0xff] %v6671_v4  ;;  %7127 = vst [vmem:[%s10821_s22 + $0x278] sm:$0xff] %v6679_v6  ;;  %v6678_v27 = vmax.f32 %v5343_v52, 0.0  ;;  %8482 = vmatpush3.bf16.msra.mxu1 %v10572_v9  ;;  %6000 = vmatprep.mubr.bf16.mxu1 %v8975_v1 }
 0x7c0   : > { %7125 = vst [vmem:[%s10821_s22 + $0x268] sm:$0xff] %v6677_v11  ;;  %7128 = vst [vmem:[%s10821_s22 + $0x280] sm:$0xff] %v6680_v58  ;;  %v5699_v8 = vpop.f32.mrb[152].mxu0  ;;  %8475 = vmatprep.subr.bf16.mxu1 %v10617_v51 }
 0x7c1   : > { %7126 = vst [vmem:[%s10821_s22 + $0x270] sm:$0xff] %v6678_v27  ;;  %v5700_v23 = vadd.f32 %v5699_v8, %v10800_v35  ;;  %v5346_v37 = vpop.f32.mrb[88].mxu1  ;;  %v5701_v14 = vpop.f32.mrb[153].mxu0 }
 0x7c2   : > { %v5347_v60 = vadd.f32 %v5346_v37, %v10803_v48  ;;  %v5702_v62 = vadd.f32 %v5701_v14, %v10805_v19  ;;  %v5348_v17 = vpop.f32.mrb[89].mxu1  ;;  %v5703_v33 = vpop.f32.mrb[154].mxu0 }
 0x7c3   : > { %v6686_v9 = vmax.f32 %v5700_v23, 0.0  ;;  %v5349_v47 = vadd.f32 %v5348_v17, %v10808_v63  ;;  %v5704_v49 = vadd.f32 %v5703_v33, %v10800_v35  ;;  %v5350_v3 = vpop.f32.mrb[90].mxu1  ;;  %v5705_v24 = vpop.f32.mrb[155].mxu0  ;;  %8483 = vmatpush3.bf16.msra.mxu1 %v10617_v51 }
 0x7c4   : > { %v6684_v59 = vmax.f32 %v5347_v60, 0.0  ;;  %v6687_v4 = vmax.f32 %v5702_v62, 0.0  ;;  %v5351_v6 = vadd.f32 %v5350_v3, %v10803_v48  ;;  %v5706_v52 = vadd.f32 %v5705_v24, %v10805_v19  ;;  %v5352_v11 = vpop.f32.mrb[91].mxu1  ;;  %8476 = vmatprep.subr.bf16.mxu1 %v10646_v29 }
 0x7c5   : > { %7134 = vst [vmem:[%s10821_s22 + $0x2b0] sm:$0xff] %v6686_v9  ;;  %v6685_v58 = vmax.f32 %v5349_v47, 0.0  ;;  %v6693_v27 = vmax.f32 %v5704_v49, 0.0  ;;  %v5353_v8 = vadd.f32 %v5352_v11, %v10808_v63  ;;  %8415 = vmatmul.mubr.bf16.gmra.mrb[4].mxu0 %v10488_v57 }
 0x7c6   : > { %7132 = vst [vmem:[%s10821_s22 + $0x2a0] sm:$0xff] %v6684_v59  ;;  %7135 = vst [vmem:[%s10821_s22 + $0x2b8] sm:$0xff] %v6687_v4  ;;  %v6691_v51 = vmax.f32 %v5351_v6, 0.0  ;;  %v6694_v23 = vmax.f32 %v5706_v52, 0.0  ;;  %6001 = vmatmul.mubr.bf16.gmra.mrb[196].mxu1 %v10464_v50  ;;  %8418 = vmatprep.mubr.bf16.mxu0 %v10514_v30 }
 0x7c7   : > { %7133 = vst [vmem:[%s10821_s22 + $0x2a8] sm:$0xff] %v6685_v58  ;;  %7141 = vst [vmem:[%s10821_s22 + $0x2e8] sm:$0xff] %v6693_v27  ;;  %v6692_v37 = vmax.f32 %v5353_v8, 0.0  ;;  %6010 = vmatprep.mubr.bf16.mxu1 %v8975_v1  ;;  %8484 = vmatpush3.bf16.msra.mxu1 %v10646_v29 }
 0x7c8   : > { %7139 = vst [vmem:[%s10821_s22 + $0x2d8] sm:$0xff] %v6691_v51  ;;  %7142 = vst [vmem:[%s10821_s22 + $0x2f0] sm:$0xff] %v6694_v23  ;;  %v5709_v14 = vpop.f32.mrb[156].mxu0  ;;  %8477 = vmatprep.subr.bf16.mxu1 %v10657_v15 }
 0x7c9   : > { %7140 = vst [vmem:[%s10821_s22 + $0x2e0] sm:$0xff] %v6692_v37  ;;  %v5710_v60 = vadd.f32 %v5709_v14, %v10800_v35  ;;  %v5356_v62 = vpop.f32.mrb[92].mxu1  ;;  %v5711_v17 = vpop.f32.mrb[157].mxu0 }
 0x7ca   : > { %v5357_v50 = vadd.f32 %v5356_v62, %v10803_v48  ;;  %v5712_v33 = vadd.f32 %v5711_v17, %v10805_v19  ;;  %v5358_v9 = vpop.f32.mrb[93].mxu1  ;;  %v5713_v47 = vpop.f32.mrb[158].mxu0 }
 0x7cb   : > { %v6700_v49 = vmax.f32 %v5710_v60, 0.0  ;;  %v5359_v29 = vadd.f32 %v5358_v9, %v10808_v63  ;;  %v5714_v3 = vadd.f32 %v5713_v47, %v10800_v35  ;;  %v5360_v24 = vpop.f32.mrb[94].mxu1  ;;  %v5715_v59 = vpop.f32.mrb[159].mxu0  ;;  %8485 = vmatpush3.bf16.msra.mxu1 %v10657_v15 }
 0x7cc   : > { %v6698_v4 = vmax.f32 %v5357_v50, 0.0  ;;  %v6701_v6 = vmax.f32 %v5712_v33, 0.0  ;;  %v5361_v52 = vadd.f32 %v5360_v24, %v10803_v48  ;;  %v5716_v11 = vadd.f32 %v5715_v59, %v10805_v19  ;;  %v5362_v58 = vpop.f32.mrb[95].mxu1  ;;  %8478 = vmatprep.subr.bf16.mxu1 %v10667_v2 }
 0x7cd   : > { %7148 = vst [vmem:[%s10821_s22 + $0x320] sm:$0xff] %v6700_v49  ;;  %v6699_v27 = vmax.f32 %v5359_v29, 0.0  ;;  %v6707_v8 = vmax.f32 %v5714_v3, 0.0  ;;  %v5363_v51 = vadd.f32 %v5362_v58, %v10808_v63  ;;  %8419 = vmatmul.mubr.bf16.gmra.mrb[8].mxu0 %v10512_v26 }
 0x7ce   : > { %7146 = vst [vmem:[%s10821_s22 + $0x310] sm:$0xff] %v6698_v4  ;;  %7149 = vst [vmem:[%s10821_s22 + $0x328] sm:$0xff] %v6701_v6  ;;  %v6705_v15 = vmax.f32 %v5361_v52, 0.0  ;;  %v6708_v23 = vmax.f32 %v5716_v11, 0.0  ;;  %6011 = vmatmul.mubr.bf16.gmra.mrb[200].mxu1 %v10490_v25  ;;  %8422 = vmatprep.mubr.bf16.mxu0 %v10529_v20 }
 0x7cf   : > { %7147 = vst [vmem:[%s10821_s22 + $0x318] sm:$0xff] %v6699_v27  ;;  %7155 = vst [vmem:[%s10821_s22 + $0x358] sm:$0xff] %v6707_v8  ;;  %v6706_v37 = vmax.f32 %v5363_v51, 0.0  ;;  %6020 = vmatprep.mubr.bf16.mxu1 %v8975_v1  ;;  %8486 = vmatpush3.bf16.msra.mxu1 %v10667_v2 }
 0x7d0   : > { %7153 = vst [vmem:[%s10821_s22 + $0x348] sm:$0xff] %v6705_v15  ;;  %7156 = vst [vmem:[%s10821_s22 + $0x360] sm:$0xff] %v6708_v23  ;;  %v5719_v14 = vpop.f32.mrb[160].mxu0  ;;  %8479 = vmatprep.subr.bf16.mxu1 %v10680_v18 }
 0x7d1   : > { %7154 = vst [vmem:[%s10821_s22 + $0x350] sm:$0xff] %v6706_v37  ;;  %v5720_v60 = vadd.f32 %v5719_v14, %v10800_v35  ;;  %v5366_v62 = vpop.f32.mrb[96].mxu1  ;;  %v5721_v17 = vpop.f32.mrb[161].mxu0 }
 0x7d2   : > { %v5367_v25 = vadd.f32 %v5366_v62, %v10803_v48  ;;  %v5722_v50 = vadd.f32 %v5721_v17, %v10805_v19  ;;  %v5368_v33 = vpop.f32.mrb[97].mxu1  ;;  %v5723_v9 = vpop.f32.mrb[162].mxu0 }
 0x7d3   : > { %v6714_v47 = vmax.f32 %v5720_v60, 0.0  ;;  %v5369_v2 = vadd.f32 %v5368_v33, %v10808_v63  ;;  %v5724_v49 = vadd.f32 %v5723_v9, %v10800_v35  ;;  %v5370_v29 = vpop.f32.mrb[98].mxu1  ;;  %v5725_v3 = vpop.f32.mrb[163].mxu0  ;;  %8487 = vmatpush3.bf16.msra.mxu1 %v10680_v18 }
 0x7d4   : > { %v6712_v24 = vmax.f32 %v5367_v25, 0.0  ;;  %v6715_v59 = vmax.f32 %v5722_v50, 0.0  ;;  %v5371_v4 = vadd.f32 %v5370_v29, %v10803_v48  ;;  %v5726_v6 = vadd.f32 %v5725_v3, %v10805_v19  ;;  %v5372_v52 = vpop.f32.mrb[99].mxu1  ;;  %8480 = vmatprep.subr.bf16.mxu1 %v10691_v54 }
 0x7d5   : > { %7162 = vst [vmem:[%s10821_s22 + $0x390] sm:$0xff] %v6714_v47  ;;  %v6713_v11 = vmax.f32 %v5369_v2, 0.0  ;;  %v6721_v58 = vmax.f32 %v5724_v49, 0.0  ;;  %v5373_v27 = vadd.f32 %v5372_v52, %v10808_v63  ;;  %8423 = vmatmul.mubr.bf16.gmra.mrb[12].mxu0 %v10527_v21 }
 0x7d6   : > { %7160 = vst [vmem:[%s10821_s22 + $0x380] sm:$0xff] %v6712_v24  ;;  %7163 = vst [vmem:[%s10821_s22 + $0x398] sm:$0xff] %v6715_v59  ;;  %v6719_v18 = vmax.f32 %v5371_v4, 0.0  ;;  %v6722_v8 = vmax.f32 %v5726_v6, 0.0  ;;  %6021 = vmatmul.mubr.bf16.gmra.mrb[204].mxu1 %v10488_v57  ;;  %8426 = vmatprep.mubr.bf16.mxu0 %v10545_v38 }
 0x7d7   : > { %7161 = vst [vmem:[%s10821_s22 + $0x388] sm:$0xff] %v6713_v11  ;;  %7169 = vst [vmem:[%s10821_s22 + $0x3c8] sm:$0xff] %v6721_v58  ;;  %v6720_v51 = vmax.f32 %v5373_v27, 0.0  ;;  %6030 = vmatprep.mubr.bf16.mxu1 %v8975_v1  ;;  %8488 = vmatpush3.bf16.msra.mxu1 %v10691_v54 }
 0x7d8   : > { %7167 = vst [vmem:[%s10821_s22 + $0x3b8] sm:$0xff] %v6719_v18  ;;  %7170 = vst [vmem:[%s10821_s22 + $0x3d0] sm:$0xff] %v6722_v8  ;;  %v5729_v15 = vpop.f32.mrb[164].mxu0  ;;  %8481 = vmatprep.subr.bf16.mxu1 %v10702_v16 }
 0x7d9   : > { %7168 = vst [vmem:[%s10821_s22 + $0x3c0] sm:$0xff] %v6720_v51  ;;  %v5730_v23 = vadd.f32 %v5729_v15, %v10800_v35  ;;  %v5376_v37 = vpop.f32.mrb[100].mxu1  ;;  %v5731_v14 = vpop.f32.mrb[165].mxu0 }
 0x7da   : > { %v5377_v57 = vadd.f32 %v5376_v37, %v10803_v48  ;;  %v5732_v60 = vadd.f32 %v5731_v14, %v10805_v19  ;;  %v5378_v62 = vpop.f32.mrb[101].mxu1  ;;  %v5733_v17 = vpop.f32.mrb[166].mxu0 }
 0x7db   : > { %v6728_v25 = vmax.f32 %v5730_v23, 0.0  ;;  %v5379_v54 = vadd.f32 %v5378_v62, %v10808_v63  ;;  %v5734_v50 = vadd.f32 %v5733_v17, %v10800_v35  ;;  %v5380_v33 = vpop.f32.mrb[102].mxu1  ;;  %v5735_v9 = vpop.f32.mrb[167].mxu0  ;;  %8489 = vmatpush3.bf16.msra.mxu1 %v10702_v16 }
 0x7dc   : > { %v6726_v47 = vmax.f32 %v5377_v57, 0.0  ;;  %v6729_v2 = vmax.f32 %v5732_v60, 0.0  ;;  %v5381_v49 = vadd.f32 %v5380_v33, %v10803_v48  ;;  %v5736_v29 = vadd.f32 %v5735_v9, %v10805_v19  ;;  %v5382_v3 = vpop.f32.mrb[103].mxu1 }
 0x7dd   : > { %7176 = vst [vmem:[%s10821_s22 + $0x400] sm:$0xff] %v6728_v25  ;;  %v6727_v24 = vmax.f32 %v5379_v54, 0.0  ;;  %v6735_v59 = vmax.f32 %v5734_v50, 0.0  ;;  %v5383_v4 = vadd.f32 %v5382_v3, %v10808_v63  ;;  %8427 = vmatmul.mubr.bf16.gmra.mrb[16].mxu0 %v10543_v22 }
 0x7de   : > { %7174 = vst [vmem:[%s10821_s22 + $0x3f0] sm:$0xff] %v6726_v47  ;;  %7177 = vst [vmem:[%s10821_s22 + $0x408] sm:$0xff] %v6729_v2  ;;  %v6733_v16 = vmax.f32 %v5381_v49, 0.0  ;;  %v6736_v6 = vmax.f32 %v5736_v29, 0.0  ;;  %6031 = vmatmul.mubr.bf16.gmra.mrb[208].mxu1 %v10514_v30  ;;  %8430 = vmatprep.mubr.bf16.mxu0 %v10567_v42 }
 0x7df   : > { %7175 = vst [vmem:[%s10821_s22 + $0x3f8] sm:$0xff] %v6727_v24  ;;  %7183 = vst [vmem:[%s10821_s22 + $0x438] sm:$0xff] %v6735_v59  ;;  %v6734_v52 = vmax.f32 %v5383_v4, 0.0  ;;  %6040 = vmatprep.mubr.bf16.mxu1 %v8975_v1 }
 0x7e0   : > { %7181 = vst [vmem:[%s10821_s22 + $0x428] sm:$0xff] %v6733_v16  ;;  %7184 = vst [vmem:[%s10821_s22 + $0x440] sm:$0xff] %v6736_v6  ;;  %v5739_v11 = vpop.f32.mrb[168].mxu0 }
 0x7e1   : > { %7182 = vst [vmem:[%s10821_s22 + $0x430] sm:$0xff] %v6734_v52  ;;  %v5740_v58 = vadd.f32 %v5739_v11, %v10800_v35  ;;  %v5386_v27 = vpop.f32.mrb[104].mxu1  ;;  %v5741_v18 = vpop.f32.mrb[169].mxu0 }
 0x7e2   : > { %v5387_v8 = vadd.f32 %v5386_v27, %v10803_v48  ;;  %v5742_v30 = vadd.f32 %v5741_v18, %v10805_v19  ;;  %v5388_v51 = vpop.f32.mrb[105].mxu1  ;;  %v5743_v15 = vpop.f32.mrb[170].mxu0 }
 0x7e3   : > { %v6742_v23 = vmax.f32 %v5740_v58, 0.0  ;;  %v5389_v37 = vadd.f32 %v5388_v51, %v10808_v63  ;;  %v5744_v14 = vadd.f32 %v5743_v15, %v10800_v35  ;;  %v5390_v57 = vpop.f32.mrb[106].mxu1  ;;  %v5745_v60 = vpop.f32.mrb[171].mxu0 }
 0x7e4   : > { %v6740_v62 = vmax.f32 %v5387_v8, 0.0  ;;  %v6743_v17 = vmax.f32 %v5742_v30, 0.0  ;;  %v5391_v25 = vadd.f32 %v5390_v57, %v10803_v48  ;;  %v5746_v54 = vadd.f32 %v5745_v60, %v10805_v19  ;;  %v5392_v50 = vpop.f32.mrb[107].mxu1 }
 0x7e5   : > { %7190 = vst [vmem:[%s10821_s22 + $0x470] sm:$0xff] %v6742_v23  ;;  %v6741_v33 = vmax.f32 %v5389_v37, 0.0  ;;  %v6749_v9 = vmax.f32 %v5744_v14, 0.0  ;;  %v5393_v47 = vadd.f32 %v5392_v50, %v10808_v63  ;;  %8431 = vmatmul.mubr.bf16.gmra.mrb[20].mxu0 %v10565_v0 }
 0x7e6   : > { %7188 = vst [vmem:[%s10821_s22 + $0x460] sm:$0xff] %v6740_v62  ;;  %7191 = vst [vmem:[%s10821_s22 + $0x478] sm:$0xff] %v6743_v17  ;;  %v6747_v2 = vmax.f32 %v5391_v25, 0.0  ;;  %v6750_v49 = vmax.f32 %v5746_v54, 0.0  ;;  %6041 = vmatmul.mubr.bf16.gmra.mrb[212].mxu1 %v10512_v26  ;;  %8434 = vmatprep.mubr.bf16.mxu0 %v10590_v55 }
 0x7e7   : > { %7189 = vst [vmem:[%s10821_s22 + $0x468] sm:$0xff] %v6741_v33  ;;  %7197 = vst [vmem:[%s10821_s22 + $0x4a8] sm:$0xff] %v6749_v9  ;;  %v6748_v29 = vmax.f32 %v5393_v47, 0.0  ;;  %6050 = vmatprep.mubr.bf16.mxu1 %v8975_v1 }
 0x7e8   : > { %7195 = vst [vmem:[%s10821_s22 + $0x498] sm:$0xff] %v6747_v2  ;;  %7198 = vst [vmem:[%s10821_s22 + $0x4b0] sm:$0xff] %v6750_v49  ;;  %v5749_v3 = vpop.f32.mrb[172].mxu0 }
 0x7e9   : > { %7196 = vst [vmem:[%s10821_s22 + $0x4a0] sm:$0xff] %v6748_v29  ;;  %v5750_v24 = vadd.f32 %v5749_v3, %v10800_v35  ;;  %v5396_v59 = vpop.f32.mrb[108].mxu1  ;;  %v5751_v4 = vpop.f32.mrb[173].mxu0 }
 0x7ea   : > { %v5397_v16 = vadd.f32 %v5396_v59, %v10803_v48  ;;  %v5752_v26 = vadd.f32 %v5751_v4, %v10805_v19  ;;  %v5398_v6 = vpop.f32.mrb[109].mxu1  ;;  %v5753_v52 = vpop.f32.mrb[174].mxu0 }
 0x7eb   : > { %v6756_v11 = vmax.f32 %v5750_v24, 0.0  ;;  %v5399_v58 = vadd.f32 %v5398_v6, %v10808_v63  ;;  %v5754_v27 = vadd.f32 %v5753_v52, %v10800_v35  ;;  %v5400_v18 = vpop.f32.mrb[110].mxu1  ;;  %v5755_v8 = vpop.f32.mrb[175].mxu0 }
 0x7ec   : > { %v6754_v30 = vmax.f32 %v5397_v16, 0.0  ;;  %v6757_v51 = vmax.f32 %v5752_v26, 0.0  ;;  %v5401_v15 = vadd.f32 %v5400_v18, %v10803_v48  ;;  %v5756_v23 = vadd.f32 %v5755_v8, %v10805_v19  ;;  %v5402_v37 = vpop.f32.mrb[111].mxu1 }
 0x7ed   : > { %7204 = vst [vmem:[%s10821_s22 + $0x4e0] sm:$0xff] %v6756_v11  ;;  %v6755_v14 = vmax.f32 %v5399_v58, 0.0  ;;  %v6763_v57 = vmax.f32 %v5754_v27, 0.0  ;;  %v5403_v60 = vadd.f32 %v5402_v37, %v10808_v63  ;;  %8435 = vmatmul.mubr.bf16.gmra.mrb[24].mxu0 %v10588_v46 }
 0x7ee   : > { %7202 = vst [vmem:[%s10821_s22 + $0x4d0] sm:$0xff] %v6754_v30  ;;  %7205 = vst [vmem:[%s10821_s22 + $0x4e8] sm:$0xff] %v6757_v51  ;;  %v6761_v62 = vmax.f32 %v5401_v15, 0.0  ;;  %v6764_v17 = vmax.f32 %v5756_v23, 0.0  ;;  %6051 = vmatmul.mubr.bf16.gmra.mrb[216].mxu1 %v10529_v20  ;;  %8438 = vmatprep.mubr.bf16.mxu0 %v10612_v31 }
 0x7ef   : > { %7203 = vst [vmem:[%s10821_s22 + $0x4d8] sm:$0xff] %v6755_v14  ;;  %7211 = vst [vmem:[%s10821_s22 + $0x518] sm:$0xff] %v6763_v57  ;;  %v6762_v25 = vmax.f32 %v5403_v60, 0.0  ;;  %6060 = vmatprep.mubr.bf16.mxu1 %v8975_v1 }
 0x7f0   : > { %7209 = vst [vmem:[%s10821_s22 + $0x508] sm:$0xff] %v6761_v62  ;;  %7212 = vst [vmem:[%s10821_s22 + $0x520] sm:$0xff] %v6764_v17  ;;  %v5759_v54 = vpop.f32.mrb[176].mxu0 }
 0x7f1   : > { %7210 = vst [vmem:[%s10821_s22 + $0x510] sm:$0xff] %v6762_v25  ;;  %v5760_v50 = vadd.f32 %v5759_v54, %v10800_v35  ;;  %v5406_v33 = vpop.f32.mrb[112].mxu1  ;;  %v5761_v9 = vpop.f32.mrb[177].mxu0 }
 0x7f2   : > { %v5407_v47 = vadd.f32 %v5406_v33, %v10803_v48  ;;  %v5762_v20 = vadd.f32 %v5761_v9, %v10805_v19  ;;  %v5408_v2 = vpop.f32.mrb[113].mxu1  ;;  %v5763_v49 = vpop.f32.mrb[178].mxu0 }
 0x7f3   : > { %v6770_v29 = vmax.f32 %v5760_v50, 0.0  ;;  %v5409_v3 = vadd.f32 %v5408_v2, %v10808_v63  ;;  %v5764_v24 = vadd.f32 %v5763_v49, %v10800_v35  ;;  %v5410_v59 = vpop.f32.mrb[114].mxu1  ;;  %v5765_v4 = vpop.f32.mrb[179].mxu0 }
 0x7f4   : > { %v6768_v16 = vmax.f32 %v5407_v47, 0.0  ;;  %v6771_v26 = vmax.f32 %v5762_v20, 0.0  ;;  %v5411_v6 = vadd.f32 %v5410_v59, %v10803_v48  ;;  %v5766_v52 = vadd.f32 %v5765_v4, %v10805_v19  ;;  %v5412_v11 = vpop.f32.mrb[115].mxu1 }
 0x7f5   : > { %7218 = vst [vmem:[%s10821_s22 + $0x550] sm:$0xff] %v6770_v29  ;;  %v6769_v58 = vmax.f32 %v5409_v3, 0.0  ;;  %v6777_v27 = vmax.f32 %v5764_v24, 0.0  ;;  %v5413_v18 = vadd.f32 %v5412_v11, %v10808_v63  ;;  %8439 = vmatmul.mubr.bf16.gmra.mrb[28].mxu0 %v10610_v34 }
 0x7f6   : > { %7216 = vst [vmem:[%s10821_s22 + $0x540] sm:$0xff] %v6768_v16  ;;  %7219 = vst [vmem:[%s10821_s22 + $0x558] sm:$0xff] %v6771_v26  ;;  %v6775_v8 = vmax.f32 %v5411_v6, 0.0  ;;  %v6778_v30 = vmax.f32 %v5766_v52, 0.0  ;;  %6061 = vmatmul.mubr.bf16.gmra.mrb[220].mxu1 %v10527_v21  ;;  %8442 = vmatprep.mubr.bf16.mxu0 %v10635_v41 }
 0x7f7   : > { %7217 = vst [vmem:[%s10821_s22 + $0x548] sm:$0xff] %v6769_v58  ;;  %7225 = vst [vmem:[%s10821_s22 + $0x588] sm:$0xff] %v6777_v27  ;;  %v6776_v51 = vmax.f32 %v5413_v18, 0.0  ;;  %6070 = vmatprep.mubr.bf16.mxu1 %v8975_v1 }
 0x7f8   : > { %7223 = vst [vmem:[%s10821_s22 + $0x578] sm:$0xff] %v6775_v8  ;;  %7226 = vst [vmem:[%s10821_s22 + $0x590] sm:$0xff] %v6778_v30  ;;  %v5769_v15 = vpop.f32.mrb[180].mxu0 }
 0x7f9   : > { %7224 = vst [vmem:[%s10821_s22 + $0x580] sm:$0xff] %v6776_v51  ;;  %v5770_v23 = vadd.f32 %v5769_v15, %v10800_v35  ;;  %v5416_v37 = vpop.f32.mrb[116].mxu1  ;;  %v5771_v14 = vpop.f32.mrb[181].mxu0 }
 0x7fa   : > { %v5417_v57 = vadd.f32 %v5416_v37, %v10803_v48  ;;  %v5772_v21 = vadd.f32 %v5771_v14, %v10805_v19  ;;  %v5418_v60 = vpop.f32.mrb[117].mxu1  ;;  %v5773_v62 = vpop.f32.mrb[182].mxu0 }
 0x7fb   : > { %v6784_v17 = vmax.f32 %v5770_v23, 0.0  ;;  %v5419_v25 = vadd.f32 %v5418_v60, %v10808_v63  ;;  %v5774_v54 = vadd.f32 %v5773_v62, %v10800_v35  ;;  %v5420_v50 = vpop.f32.mrb[118].mxu1  ;;  %v5775_v33 = vpop.f32.mrb[183].mxu0 }
 0x7fc   : > { %v6782_v9 = vmax.f32 %v5417_v57, 0.0  ;;  %v6785_v47 = vmax.f32 %v5772_v21, 0.0  ;;  %v5421_v20 = vadd.f32 %v5420_v50, %v10803_v48  ;;  %v5776_v2 = vadd.f32 %v5775_v33, %v10805_v19  ;;  %v5422_v49 = vpop.f32.mrb[119].mxu1 }
 0x7fd   : > { %7232 = vst [vmem:[%s10821_s22 + $0x5c0] sm:$0xff] %v6784_v17  ;;  %v6783_v29 = vmax.f32 %v5419_v25, 0.0  ;;  %v6791_v3 = vmax.f32 %v5774_v54, 0.0  ;;  %v5423_v24 = vadd.f32 %v5422_v49, %v10808_v63  ;;  %8443 = vmatmul.mubr.bf16.gmra.mrb[32].mxu0 %v10633_v12 }
 0x7fe   : > { %7230 = vst [vmem:[%s10821_s22 + $0x5b0] sm:$0xff] %v6782_v9  ;;  %7233 = vst [vmem:[%s10821_s22 + $0x5c8] sm:$0xff] %v6785_v47  ;;  %v6789_v59 = vmax.f32 %v5421_v20, 0.0  ;;  %v6792_v4 = vmax.f32 %v5776_v2, 0.0  ;;  %6071 = vmatmul.mubr.bf16.gmra.mrb[224].mxu1 %v10545_v38  ;;  %8446 = vmatprep.mubr.bf16.mxu0 %v10684_v61 }
 0x7ff   : > { %7231 = vst [vmem:[%s10821_s22 + $0x5b8] sm:$0xff] %v6783_v29  ;;  %7239 = vst [vmem:[%s10821_s22 + $0x5f8] sm:$0xff] %v6791_v3  ;;  %v6790_v16 = vmax.f32 %v5423_v24, 0.0  ;;  %6080 = vmatprep.mubr.bf16.mxu1 %v8975_v1 }
 0x800   : > { %7237 = vst [vmem:[%s10821_s22 + $0x5e8] sm:$0xff] %v6789_v59  ;;  %7240 = vst [vmem:[%s10821_s22 + $0x600] sm:$0xff] %v6792_v4  ;;  %v5779_v26 = vpop.f32.mrb[184].mxu0 }
 0x801   : > { %7238 = vst [vmem:[%s10821_s22 + $0x5f0] sm:$0xff] %v6790_v16  ;;  %v5780_v6 = vadd.f32 %v5779_v26, %v10800_v35  ;;  %v5426_v52 = vpop.f32.mrb[120].mxu1  ;;  %v5781_v11 = vpop.f32.mrb[185].mxu0 }
 0x802   : > { %v5427_v58 = vadd.f32 %v5426_v52, %v10803_v48  ;;  %v5782_v38 = vadd.f32 %v5781_v11, %v10805_v19  ;;  %v5428_v27 = vpop.f32.mrb[121].mxu1  ;;  %v5783_v18 = vpop.f32.mrb[186].mxu0 }
 0x803   : > { %v6798_v8 = vmax.f32 %v5780_v6, 0.0  ;;  %v5429_v30 = vadd.f32 %v5428_v27, %v10808_v63  ;;  %v5784_v51 = vadd.f32 %v5783_v18, %v10800_v35  ;;  %v5430_v15 = vpop.f32.mrb[122].mxu1  ;;  %v5785_v23 = vpop.f32.mrb[187].mxu0 }
 0x804   : > { %v6796_v37 = vmax.f32 %v5427_v58, 0.0  ;;  %v6799_v14 = vmax.f32 %v5782_v38, 0.0  ;;  %v5431_v57 = vadd.f32 %v5430_v15, %v10803_v48  ;;  %v5786_v21 = vadd.f32 %v5785_v23, %v10805_v19  ;;  %v5432_v60 = vpop.f32.mrb[123].mxu1 }
 0x805   : > { %7246 = vst [vmem:[%s10821_s22 + $0x630] sm:$0xff] %v6798_v8  ;;  %v6797_v62 = vmax.f32 %v5429_v30, 0.0  ;;  %v6805_v17 = vmax.f32 %v5784_v51, 0.0  ;;  %v5433_v25 = vadd.f32 %v5432_v60, %v10808_v63  ;;  %8447 = vmatmul.mubr.bf16.gmra.mrb[36].mxu0 %v10682_v39 }
 0x806   : > { %7244 = vst [vmem:[%s10821_s22 + $0x620] sm:$0xff] %v6796_v37  ;;  %7247 = vst [vmem:[%s10821_s22 + $0x638] sm:$0xff] %v6799_v14  ;;  %v6803_v54 = vmax.f32 %v5431_v57, 0.0  ;;  %v6806_v50 = vmax.f32 %v5786_v21, 0.0  ;;  %6081 = vmatmul.mubr.bf16.gmra.mrb[228].mxu1 %v10543_v22  ;;  %8450 = vmatprep.mubr.bf16.mxu0 %v10716_v44 }
 0x807   : > { %7245 = vst [vmem:[%s10821_s22 + $0x628] sm:$0xff] %v6797_v62  ;;  %7253 = vst [vmem:[%s10821_s22 + $0x668] sm:$0xff] %v6805_v17  ;;  %v6804_v33 = vmax.f32 %v5433_v25, 0.0  ;;  %6090 = vmatprep.mubr.bf16.mxu1 %v8975_v1 }
 0x808   : > { %7251 = vst [vmem:[%s10821_s22 + $0x658] sm:$0xff] %v6803_v54  ;;  %7254 = vst [vmem:[%s10821_s22 + $0x670] sm:$0xff] %v6806_v50  ;;  %v5789_v9 = vpop.f32.mrb[188].mxu0 }
 0x809   : > { %7252 = vst [vmem:[%s10821_s22 + $0x660] sm:$0xff] %v6804_v33  ;;  %v5790_v47 = vadd.f32 %v5789_v9, %v10800_v35  ;;  %v5436_v20 = vpop.f32.mrb[124].mxu1  ;;  %v5791_v2 = vpop.f32.mrb[189].mxu0 }
 0x80a   : > { %v5437_v49 = vadd.f32 %v5436_v20, %v10803_v48  ;;  %v5792_v22 = vadd.f32 %v5791_v2, %v10805_v19  ;;  %v5438_v29 = vpop.f32.mrb[125].mxu1  ;;  %v5793_v3 = vpop.f32.mrb[190].mxu0 }
 0x80b   : > { %v6812_v24 = vmax.f32 %v5790_v47, 0.0  ;;  %v5439_v59 = vadd.f32 %v5438_v29, %v10808_v63  ;;  %v5794_v4 = vadd.f32 %v5793_v3, %v10800_v35  ;;  %v5440_v16 = vpop.f32.mrb[126].mxu1  ;;  %v5795_v26 = vpop.f32.mrb[191].mxu0 }
 0x80c   : > { %v6810_v6 = vmax.f32 %v5437_v49, 0.0  ;;  %v6813_v52 = vmax.f32 %v5792_v22, 0.0  ;;  %v5441_v11 = vadd.f32 %v5440_v16, %v10803_v48  ;;  %v5796_v58 = vadd.f32 %v5795_v26, %v10805_v19  ;;  %v5442_v38 = vpop.f32.mrb[127].mxu1 }
 0x80d   : > { %7260 = vst [vmem:[%s10821_s22 + $0x6a0] sm:$0xff] %v6812_v24  ;;  %v6811_v27 = vmax.f32 %v5439_v59, 0.0  ;;  %v6819_v18 = vmax.f32 %v5794_v4, 0.0  ;;  %v5443_v8 = vadd.f32 %v5442_v38, %v10808_v63  ;;  %8451 = vmatmul.mubr.bf16.gmra.mrb[40].mxu0 %v10714_v36 }
 0x80e   : > { %7258 = vst [vmem:[%s10821_s22 + $0x690] sm:$0xff] %v6810_v6  ;;  %7261 = vst [vmem:[%s10821_s22 + $0x6a8] sm:$0xff] %v6813_v52  ;;  %v6817_v30 = vmax.f32 %v5441_v11, 0.0  ;;  %v6820_v51 = vmax.f32 %v5796_v58, 0.0  ;;  %6091 = vmatmul.mubr.bf16.gmra.mrb[232].mxu1 %v10567_v42  ;;  %8454 = vmatprep.mubr.bf16.mxu0 %v10732_v53 }
 0x80f   : > { %7259 = vst [vmem:[%s10821_s22 + $0x698] sm:$0xff] %v6811_v27  ;;  %7267 = vst [vmem:[%s10821_s22 + $0x6d8] sm:$0xff] %v6819_v18  ;;  %v6818_v15 = vmax.f32 %v5443_v8, 0.0  ;;  %6100 = vmatprep.mubr.bf16.mxu1 %v8975_v1 }
 0x810   : > { %7265 = vst [vmem:[%s10821_s22 + $0x6c8] sm:$0xff] %v6817_v30  ;;  %7268 = vst [vmem:[%s10821_s22 + $0x6e0] sm:$0xff] %v6820_v51  ;;  %v5799_v23 = vpop.f32.mrb[192].mxu0 }
 0x811   : > { %7266 = vst [vmem:[%s10821_s22 + $0x6d0] sm:$0xff] %v6818_v15  ;;  %v5800_v37 = vadd.f32 %v5799_v23, %v10800_v35  ;;  %v5446_v14 = vpop.f32.mrb[128].mxu1  ;;  %v5801_v57 = vpop.f32.mrb[193].mxu0 }
 0x812   : > { %v5447_v21 = vadd.f32 %v5446_v14, %v10803_v48  ;;  %v5802_v42 = vadd.f32 %v5801_v57, %v10805_v19  ;;  %v5448_v60 = vpop.f32.mrb[129].mxu1  ;;  %v5803_v62 = vpop.f32.mrb[194].mxu0 }
 0x813   : > { %v6826_v17 = vmax.f32 %v5800_v37, 0.0  ;;  %v5449_v25 = vadd.f32 %v5448_v60, %v10808_v63  ;;  %v5804_v54 = vadd.f32 %v5803_v62, %v10800_v35  ;;  %v5450_v50 = vpop.f32.mrb[130].mxu1  ;;  %v5805_v33 = vpop.f32.mrb[195].mxu0 }
 0x814   : > { %v6824_v9 = vmax.f32 %v5447_v21, 0.0  ;;  %v6827_v47 = vmax.f32 %v5802_v42, 0.0  ;;  %v5451_v20 = vadd.f32 %v5450_v50, %v10803_v48  ;;  %v5806_v2 = vadd.f32 %v5805_v33, %v10805_v19  ;;  %v5452_v49 = vpop.f32.mrb[131].mxu1 }
 0x815   : > { %7274 = vst [vmem:[%s10821_s22 + $0x710] sm:$0xff] %v6826_v17  ;;  %v6825_v22 = vmax.f32 %v5449_v25, 0.0  ;;  %v6833_v29 = vmax.f32 %v5804_v54, 0.0  ;;  %v5453_v3 = vadd.f32 %v5452_v49, %v10808_v63  ;;  %8455 = vmatmul.mubr.bf16.gmra.mrb[44].mxu0 %v10730_v5 }
 0x816   : > { %7272 = vst [vmem:[%s10821_s22 + $0x700] sm:$0xff] %v6824_v9  ;;  %7275 = vst [vmem:[%s10821_s22 + $0x718] sm:$0xff] %v6827_v47  ;;  %v6831_v24 = vmax.f32 %v5451_v20, 0.0  ;;  %v6834_v59 = vmax.f32 %v5806_v2, 0.0  ;;  %6101 = vmatmul.mubr.bf16.gmra.mrb[236].mxu1 %v10565_v0  ;;  %8458 = vmatprep.mubr.bf16.mxu0 %v10748_v40 }
 0x817   : > { %7273 = vst [vmem:[%s10821_s22 + $0x708] sm:$0xff] %v6825_v22  ;;  %7281 = vst [vmem:[%s10821_s22 + $0x748] sm:$0xff] %v6833_v29  ;;  %v6832_v4 = vmax.f32 %v5453_v3, 0.0  ;;  %6110 = vmatprep.mubr.bf16.mxu1 %v8975_v1 }
 0x818   : > { %7279 = vst [vmem:[%s10821_s22 + $0x738] sm:$0xff] %v6831_v24  ;;  %7282 = vst [vmem:[%s10821_s22 + $0x750] sm:$0xff] %v6834_v59  ;;  %v5809_v16 = vpop.f32.mrb[196].mxu0 }
 0x819   : > { %7280 = vst [vmem:[%s10821_s22 + $0x740] sm:$0xff] %v6832_v4  ;;  %v5810_v26 = vadd.f32 %v5809_v16, %v10800_v35  ;;  %v5456_v6 = vpop.f32.mrb[132].mxu1  ;;  %v5811_v52 = vpop.f32.mrb[197].mxu0 }
 0x81a   : > { %v5457_v11 = vadd.f32 %v5456_v6, %v10803_v48  ;;  %v5812_v0 = vadd.f32 %v5811_v52, %v10805_v19  ;;  %v5458_v58 = vpop.f32.mrb[133].mxu1  ;;  %v5813_v38 = vpop.f32.mrb[198].mxu0 }
 0x81b   : > { %v6840_v27 = vmax.f32 %v5810_v26, 0.0  ;;  %v5459_v18 = vadd.f32 %v5458_v58, %v10808_v63  ;;  %v5814_v8 = vadd.f32 %v5813_v38, %v10800_v35  ;;  %v5460_v30 = vpop.f32.mrb[134].mxu1  ;;  %v5815_v51 = vpop.f32.mrb[199].mxu0 }
 0x81c   : > { %v6838_v15 = vmax.f32 %v5457_v11, 0.0  ;;  %v6841_v23 = vmax.f32 %v5812_v0, 0.0  ;;  %v5461_v37 = vadd.f32 %v5460_v30, %v10803_v48  ;;  %v5816_v14 = vadd.f32 %v5815_v51, %v10805_v19  ;;  %v5462_v57 = vpop.f32.mrb[135].mxu1 }
 0x81d   : > { %7288 = vst [vmem:[%s10821_s22 + $0x780] sm:$0xff] %v6840_v27  ;;  %v6839_v21 = vmax.f32 %v5459_v18, 0.0  ;;  %v6847_v42 = vmax.f32 %v5814_v8, 0.0  ;;  %v5463_v60 = vadd.f32 %v5462_v57, %v10808_v63  ;;  %8459 = vmatmul.mubr.bf16.gmra.mrb[48].mxu0 %v10746_v45 }
 0x81e   : > { %7286 = vst [vmem:[%s10821_s22 + $0x770] sm:$0xff] %v6838_v15  ;;  %7289 = vst [vmem:[%s10821_s22 + $0x788] sm:$0xff] %v6841_v23  ;;  %v6845_v62 = vmax.f32 %v5461_v37, 0.0  ;;  %v6848_v17 = vmax.f32 %v5816_v14, 0.0  ;;  %6111 = vmatmul.mubr.bf16.gmra.mrb[240].mxu1 %v10590_v55 }
 0x81f   : > { %7287 = vst [vmem:[%s10821_s22 + $0x778] sm:$0xff] %v6839_v21  ;;  %7295 = vst [vmem:[%s10821_s22 + $0x7b8] sm:$0xff] %v6847_v42  ;;  %v6846_v25 = vmax.f32 %v5463_v60, 0.0  ;;  %6120 = vmatprep.mubr.bf16.mxu1 %v8975_v1 }
 0x820   : > { %7293 = vst [vmem:[%s10821_s22 + $0x7a8] sm:$0xff] %v6845_v62  ;;  %7296 = vst [vmem:[%s10821_s22 + $0x7c0] sm:$0xff] %v6848_v17  ;;  %v5819_v54 = vpop.f32.mrb[200].mxu0 }
 0x821   : > { %7294 = vst [vmem:[%s10821_s22 + $0x7b0] sm:$0xff] %v6846_v25  ;;  %v5820_v50 = vadd.f32 %v5819_v54, %v10800_v35  ;;  %v5466_v33 = vpop.f32.mrb[136].mxu1  ;;  %v5821_v9 = vpop.f32.mrb[201].mxu0 }
 0x822   : > { %v5467_v47 = vadd.f32 %v5466_v33, %v10803_v48  ;;  %v5822_v20 = vadd.f32 %v5821_v9, %v10805_v19  ;;  %v5468_v2 = vpop.f32.mrb[137].mxu1  ;;  %v5823_v55 = vpop.f32.mrb[202].mxu0 }
 0x823   : > { %v6854_v49 = vmax.f32 %v5820_v50, 0.0  ;;  %v5469_v22 = vadd.f32 %v5468_v2, %v10808_v63  ;;  %v5824_v29 = vadd.f32 %v5823_v55, %v10800_v35  ;;  %v5470_v3 = vpop.f32.mrb[138].mxu1  ;;  %v5825_v24 = vpop.f32.mrb[203].mxu0 }
 0x824   : > { %v6852_v59 = vmax.f32 %v5467_v47, 0.0  ;;  %v6855_v4 = vmax.f32 %v5822_v20, 0.0  ;;  %v5471_v16 = vadd.f32 %v5470_v3, %v10803_v48  ;;  %v5826_v26 = vadd.f32 %v5825_v24, %v10805_v19  ;;  %v5472_v6 = vpop.f32.mrb[139].mxu1 }
 0x825   : > { %7302 = vst [vmem:[%s10821_s22 + $0x7f0] sm:$0xff] %v6854_v49  ;;  %v6853_v52 = vmax.f32 %v5469_v22, 0.0  ;;  %v6861_v11 = vmax.f32 %v5824_v29, 0.0  ;;  %v5473_v0 = vadd.f32 %v5472_v6, %v10808_v63 }
 0x826   : > { %7300 = vst [vmem:[%s10821_s22 + $0x7e0] sm:$0xff] %v6852_v59  ;;  %7303 = vst [vmem:[%s10821_s22 + $0x7f8] sm:$0xff] %v6855_v4  ;;  %v6859_v58 = vmax.f32 %v5471_v16, 0.0  ;;  %v6862_v38 = vmax.f32 %v5826_v26, 0.0  ;;  %6121 = vmatmul.mubr.bf16.gmra.mrb[244].mxu1 %v10588_v46 }
 0x827   : > { %7301 = vst [vmem:[%s10821_s22 + $0x7e8] sm:$0xff] %v6853_v52  ;;  %7309 = vst [vmem:[%s10821_s22 + $0x828] sm:$0xff] %v6861_v11  ;;  %v6860_v27 = vmax.f32 %v5473_v0, 0.0  ;;  %6130 = vmatprep.mubr.bf16.mxu1 %v8975_v1 }
 0x828   : > { %7307 = vst [vmem:[%s10821_s22 + $0x818] sm:$0xff] %v6859_v58  ;;  %7310 = vst [vmem:[%s10821_s22 + $0x830] sm:$0xff] %v6862_v38  ;;  %v5829_v18 = vpop.f32.mrb[204].mxu0 }
 0x829   : > { %7308 = vst [vmem:[%s10821_s22 + $0x820] sm:$0xff] %v6860_v27  ;;  %v5830_v8 = vadd.f32 %v5829_v18, %v10800_v35  ;;  %v5476_v30 = vpop.f32.mrb[140].mxu1  ;;  %v5831_v51 = vpop.f32.mrb[205].mxu0 }
 0x82a   : > { %v5477_v15 = vadd.f32 %v5476_v30, %v10803_v48  ;;  %v5832_v23 = vadd.f32 %v5831_v51, %v10805_v19  ;;  %v5478_v37 = vpop.f32.mrb[141].mxu1  ;;  %v5833_v46 = vpop.f32.mrb[206].mxu0 }
 0x82b   : > { %v6868_v14 = vmax.f32 %v5830_v8, 0.0  ;;  %v5479_v57 = vadd.f32 %v5478_v37, %v10808_v63  ;;  %v5834_v21 = vadd.f32 %v5833_v46, %v10800_v35  ;;  %v5480_v42 = vpop.f32.mrb[142].mxu1  ;;  %v5835_v60 = vpop.f32.mrb[207].mxu0 }
 0x82c   : > { %v6866_v62 = vmax.f32 %v5477_v15, 0.0  ;;  %v6869_v17 = vmax.f32 %v5832_v23, 0.0  ;;  %v5481_v25 = vadd.f32 %v5480_v42, %v10803_v48  ;;  %v5836_v54 = vadd.f32 %v5835_v60, %v10805_v19  ;;  %v5482_v50 = vpop.f32.mrb[143].mxu1 }
 0x82d   : > { %7316 = vst [vmem:[%s10821_s22 + $0x860] sm:$0xff] %v6868_v14  ;;  %v6867_v33 = vmax.f32 %v5479_v57, 0.0  ;;  %v6875_v9 = vmax.f32 %v5834_v21, 0.0  ;;  %v5483_v47 = vadd.f32 %v5482_v50, %v10808_v63 }
 0x82e   : > { %7314 = vst [vmem:[%s10821_s22 + $0x850] sm:$0xff] %v6866_v62  ;;  %7317 = vst [vmem:[%s10821_s22 + $0x868] sm:$0xff] %v6869_v17  ;;  %v6873_v20 = vmax.f32 %v5481_v25, 0.0  ;;  %v6876_v2 = vmax.f32 %v5836_v54, 0.0  ;;  %6131 = vmatmul.mubr.bf16.gmra.mrb[248].mxu1 %v10612_v31 }
 0x82f   : > { %7315 = vst [vmem:[%s10821_s22 + $0x858] sm:$0xff] %v6867_v33  ;;  %7323 = vst [vmem:[%s10821_s22 + $0x898] sm:$0xff] %v6875_v9  ;;  %v6874_v55 = vmax.f32 %v5483_v47, 0.0  ;;  %6140 = vmatprep.mubr.bf16.mxu1 %v8975_v1 }
 0x830   : > { %7321 = vst [vmem:[%s10821_s22 + $0x888] sm:$0xff] %v6873_v20  ;;  %7324 = vst [vmem:[%s10821_s22 + $0x8a0] sm:$0xff] %v6876_v2  ;;  %v5839_v49 = vpop.f32.mrb[208].mxu0 }
 0x831   : > { %7322 = vst [vmem:[%s10821_s22 + $0x890] sm:$0xff] %v6874_v55  ;;  %v5840_v22 = vadd.f32 %v5839_v49, %v10800_v35  ;;  %v5486_v29 = vpop.f32.mrb[144].mxu1  ;;  %v5841_v3 = vpop.f32.mrb[209].mxu0 }
 0x832   : > { %v5487_v24 = vadd.f32 %v5486_v29, %v10803_v48  ;;  %v5842_v59 = vadd.f32 %v5841_v3, %v10805_v19  ;;  %v5488_v4 = vpop.f32.mrb[145].mxu1  ;;  %v5843_v31 = vpop.f32.mrb[210].mxu0 }
 0x833   : > { %v6882_v16 = vmax.f32 %v5840_v22, 0.0  ;;  %v5489_v26 = vadd.f32 %v5488_v4, %v10808_v63  ;;  %v5844_v6 = vadd.f32 %v5843_v31, %v10800_v35  ;;  %v5490_v52 = vpop.f32.mrb[146].mxu1  ;;  %v5845_v11 = vpop.f32.mrb[211].mxu0 }
 0x834   : > { %v6880_v0 = vmax.f32 %v5487_v24, 0.0  ;;  %v6883_v58 = vmax.f32 %v5842_v59, 0.0  ;;  %v5491_v38 = vadd.f32 %v5490_v52, %v10803_v48  ;;  %v5846_v27 = vadd.f32 %v5845_v11, %v10805_v19  ;;  %v5492_v18 = vpop.f32.mrb[147].mxu1 }
 0x835   : > { %7330 = vst [vmem:[%s10821_s22 + $0x8d0] sm:$0xff] %v6882_v16  ;;  %v6881_v8 = vmax.f32 %v5489_v26, 0.0  ;;  %v6889_v30 = vmax.f32 %v5844_v6, 0.0  ;;  %v5493_v51 = vadd.f32 %v5492_v18, %v10808_v63 }
 0x836   : > { %7328 = vst [vmem:[%s10821_s22 + $0x8c0] sm:$0xff] %v6880_v0  ;;  %7331 = vst [vmem:[%s10821_s22 + $0x8d8] sm:$0xff] %v6883_v58  ;;  %v6887_v15 = vmax.f32 %v5491_v38, 0.0  ;;  %v6890_v23 = vmax.f32 %v5846_v27, 0.0  ;;  %6141 = vmatmul.mubr.bf16.gmra.mrb[252].mxu1 %v10610_v34 }
 0x837   : > { %7329 = vst [vmem:[%s10821_s22 + $0x8c8] sm:$0xff] %v6881_v8  ;;  %7337 = vst [vmem:[%s10821_s22 + $0x908] sm:$0xff] %v6889_v30  ;;  %v6888_v37 = vmax.f32 %v5493_v51, 0.0  ;;  %6150 = vmatprep.mubr.bf16.mxu1 %v8975_v1 }
 0x838   : > { %7335 = vst [vmem:[%s10821_s22 + $0x8f8] sm:$0xff] %v6887_v15  ;;  %7338 = vst [vmem:[%s10821_s22 + $0x910] sm:$0xff] %v6890_v23  ;;  %v5849_v46 = vpop.f32.mrb[212].mxu0 }
 0x839   : > { %7336 = vst [vmem:[%s10821_s22 + $0x900] sm:$0xff] %v6888_v37  ;;  %v5850_v14 = vadd.f32 %v5849_v46, %v10800_v35  ;;  %v5496_v57 = vpop.f32.mrb[148].mxu1  ;;  %v5851_v21 = vpop.f32.mrb[213].mxu0 }
 0x83a   : > { %v5497_v42 = vadd.f32 %v5496_v57, %v10803_v48  ;;  %v5852_v60 = vadd.f32 %v5851_v21, %v10805_v19  ;;  %v5498_v62 = vpop.f32.mrb[149].mxu1  ;;  %v5853_v34 = vpop.f32.mrb[214].mxu0 }
 0x83b   : > { %v6896_v17 = vmax.f32 %v5850_v14, 0.0  ;;  %v5499_v25 = vadd.f32 %v5498_v62, %v10808_v63  ;;  %v5854_v54 = vadd.f32 %v5853_v34, %v10800_v35  ;;  %v5500_v50 = vpop.f32.mrb[150].mxu1  ;;  %v5855_v33 = vpop.f32.mrb[215].mxu0 }
 0x83c   : > { %v6894_v9 = vmax.f32 %v5497_v42, 0.0  ;;  %v6897_v47 = vmax.f32 %v5852_v60, 0.0  ;;  %v5501_v20 = vadd.f32 %v5500_v50, %v10803_v48  ;;  %v5856_v2 = vadd.f32 %v5855_v33, %v10805_v19  ;;  %v5502_v55 = vpop.f32.mrb[151].mxu1 }
 0x83d   : > { %7344 = vst [vmem:[%s10821_s22 + $0x940] sm:$0xff] %v6896_v17  ;;  %v6895_v49 = vmax.f32 %v5499_v25, 0.0  ;;  %v6903_v22 = vmax.f32 %v5854_v54, 0.0  ;;  %v5503_v29 = vadd.f32 %v5502_v55, %v10808_v63 }
 0x83e   : > { %7342 = vst [vmem:[%s10821_s22 + $0x930] sm:$0xff] %v6894_v9  ;;  %7345 = vst [vmem:[%s10821_s22 + $0x948] sm:$0xff] %v6897_v47  ;;  %v6901_v3 = vmax.f32 %v5501_v20, 0.0  ;;  %v6904_v24 = vmax.f32 %v5856_v2, 0.0  ;;  %6151 = vmatmul.mubr.bf16.gmra.mrb[0].mxu1 %v10635_v41 }
 0x83f   : > { %7343 = vst [vmem:[%s10821_s22 + $0x938] sm:$0xff] %v6895_v49  ;;  %7351 = vst [vmem:[%s10821_s22 + $0x978] sm:$0xff] %v6903_v22  ;;  %v6902_v59 = vmax.f32 %v5503_v29, 0.0  ;;  %6160 = vmatprep.mubr.bf16.mxu1 %v8975_v1 }
 0x840   : > { %7349 = vst [vmem:[%s10821_s22 + $0x968] sm:$0xff] %v6901_v3  ;;  %7352 = vst [vmem:[%s10821_s22 + $0x980] sm:$0xff] %v6904_v24  ;;  %v5859_v4 = vpop.f32.mrb[216].mxu0 }
 0x841   : > { %7350 = vst [vmem:[%s10821_s22 + $0x970] sm:$0xff] %v6902_v59  ;;  %v5860_v31 = vadd.f32 %v5859_v4, %v10800_v35  ;;  %v5506_v16 = vpop.f32.mrb[152].mxu1  ;;  %v5861_v26 = vpop.f32.mrb[217].mxu0 }
 0x842   : > { %v5507_v6 = vadd.f32 %v5506_v16, %v10803_v48  ;;  %v5862_v52 = vadd.f32 %v5861_v26, %v10805_v19  ;;  %v5508_v11 = vpop.f32.mrb[153].mxu1  ;;  %v5863_v41 = vpop.f32.mrb[218].mxu0 }
 0x843   : > { %v6910_v0 = vmax.f32 %v5860_v31, 0.0  ;;  %v5509_v58 = vadd.f32 %v5508_v11, %v10808_v63  ;;  %v5864_v38 = vadd.f32 %v5863_v41, %v10800_v35  ;;  %v5510_v27 = vpop.f32.mrb[154].mxu1  ;;  %v5865_v18 = vpop.f32.mrb[219].mxu0 }
 0x844   : > { %v6908_v8 = vmax.f32 %v5507_v6, 0.0  ;;  %v6911_v30 = vmax.f32 %v5862_v52, 0.0  ;;  %v5511_v51 = vadd.f32 %v5510_v27, %v10803_v48  ;;  %v5866_v15 = vadd.f32 %v5865_v18, %v10805_v19  ;;  %v5512_v23 = vpop.f32.mrb[155].mxu1 }
 0x845   : > { %7358 = vst [vmem:[%s10821_s22 + $0x9b0] sm:$0xff] %v6910_v0  ;;  %v6909_v37 = vmax.f32 %v5509_v58, 0.0  ;;  %v6917_v46 = vmax.f32 %v5864_v38, 0.0  ;;  %v5513_v14 = vadd.f32 %v5512_v23, %v10808_v63 }
 0x846   : > { %7356 = vst [vmem:[%s10821_s22 + $0x9a0] sm:$0xff] %v6908_v8  ;;  %7359 = vst [vmem:[%s10821_s22 + $0x9b8] sm:$0xff] %v6911_v30  ;;  %v6915_v57 = vmax.f32 %v5511_v51, 0.0  ;;  %v6918_v21 = vmax.f32 %v5866_v15, 0.0  ;;  %6161 = vmatmul.mubr.bf16.gmra.mrb[4].mxu1 %v10633_v12 }
 0x847   : > { %7357 = vst [vmem:[%s10821_s22 + $0x9a8] sm:$0xff] %v6909_v37  ;;  %7365 = vst [vmem:[%s10821_s22 + $0x9e8] sm:$0xff] %v6917_v46  ;;  %v6916_v42 = vmax.f32 %v5513_v14, 0.0  ;;  %6170 = vmatprep.mubr.bf16.mxu1 %v8975_v1 }
 0x848   : > { %7363 = vst [vmem:[%s10821_s22 + $0x9d8] sm:$0xff] %v6915_v57  ;;  %7366 = vst [vmem:[%s10821_s22 + $0x9f0] sm:$0xff] %v6918_v21  ;;  %v5869_v60 = vpop.f32.mrb[220].mxu0 }
 0x849   : > { %7364 = vst [vmem:[%s10821_s22 + $0x9e0] sm:$0xff] %v6916_v42  ;;  %v5870_v62 = vadd.f32 %v5869_v60, %v10800_v35  ;;  %v5516_v34 = vpop.f32.mrb[156].mxu1  ;;  %v5871_v17 = vpop.f32.mrb[221].mxu0 }
 0x84a   : > { %v5517_v25 = vadd.f32 %v5516_v34, %v10803_v48  ;;  %v5872_v54 = vadd.f32 %v5871_v17, %v10805_v19  ;;  %v5518_v50 = vpop.f32.mrb[157].mxu1  ;;  %v5873_v12 = vpop.f32.mrb[222].mxu0 }
 0x84b   : > { %v6924_v33 = vmax.f32 %v5870_v62, 0.0  ;;  %v5519_v9 = vadd.f32 %v5518_v50, %v10808_v63  ;;  %v5874_v47 = vadd.f32 %v5873_v12, %v10800_v35  ;;  %v5520_v20 = vpop.f32.mrb[158].mxu1  ;;  %v5875_v2 = vpop.f32.mrb[223].mxu0 }
 0x84c   : > { %v6922_v55 = vmax.f32 %v5517_v25, 0.0  ;;  %v6925_v49 = vmax.f32 %v5872_v54, 0.0  ;;  %v5521_v22 = vadd.f32 %v5520_v20, %v10803_v48  ;;  %v5876_v29 = vadd.f32 %v5875_v2, %v10805_v19  ;;  %v5522_v3 = vpop.f32.mrb[159].mxu1 }
 0x84d   : > { %7372 = vst [vmem:[%s10821_s22 + $0xa20] sm:$0xff] %v6924_v33  ;;  %v6923_v24 = vmax.f32 %v5519_v9, 0.0  ;;  %v6931_v59 = vmax.f32 %v5874_v47, 0.0  ;;  %v5523_v4 = vadd.f32 %v5522_v3, %v10808_v63 }
 0x84e   : > { %7370 = vst [vmem:[%s10821_s22 + $0xa10] sm:$0xff] %v6922_v55  ;;  %7373 = vst [vmem:[%s10821_s22 + $0xa28] sm:$0xff] %v6925_v49  ;;  %v6929_v31 = vmax.f32 %v5521_v22, 0.0  ;;  %v6932_v16 = vmax.f32 %v5876_v29, 0.0  ;;  %6171 = vmatmul.mubr.bf16.gmra.mrb[8].mxu1 %v10684_v61 }
 0x84f   : > { %7371 = vst [vmem:[%s10821_s22 + $0xa18] sm:$0xff] %v6923_v24  ;;  %7379 = vst [vmem:[%s10821_s22 + $0xa58] sm:$0xff] %v6931_v59  ;;  %v6930_v26 = vmax.f32 %v5523_v4, 0.0  ;;  %6180 = vmatprep.mubr.bf16.mxu1 %v8975_v1 }
 0x850   : > { %7377 = vst [vmem:[%s10821_s22 + $0xa48] sm:$0xff] %v6929_v31  ;;  %7380 = vst [vmem:[%s10821_s22 + $0xa60] sm:$0xff] %v6932_v16  ;;  %v5879_v6 = vpop.f32.mrb[224].mxu0 }
 0x851   : > { %7378 = vst [vmem:[%s10821_s22 + $0xa50] sm:$0xff] %v6930_v26  ;;  %v5880_v52 = vadd.f32 %v5879_v6, %v10800_v35  ;;  %v5526_v11 = vpop.f32.mrb[160].mxu1  ;;  %v5881_v41 = vpop.f32.mrb[225].mxu0 }
 0x852   : > { %v5527_v0 = vadd.f32 %v5526_v11, %v10803_v48  ;;  %v5882_v58 = vadd.f32 %v5881_v41, %v10805_v19  ;;  %v5528_v38 = vpop.f32.mrb[161].mxu1  ;;  %v5883_v61 = vpop.f32.mrb[226].mxu0 }
 0x853   : > { %v6938_v27 = vmax.f32 %v5880_v52, 0.0  ;;  %v5529_v18 = vadd.f32 %v5528_v38, %v10808_v63  ;;  %v5884_v8 = vadd.f32 %v5883_v61, %v10800_v35  ;;  %v5530_v30 = vpop.f32.mrb[162].mxu1  ;;  %v5885_v51 = vpop.f32.mrb[227].mxu0 }
 0x854   : > { %v6936_v15 = vmax.f32 %v5527_v0, 0.0  ;;  %v6939_v23 = vmax.f32 %v5882_v58, 0.0  ;;  %v5531_v37 = vadd.f32 %v5530_v30, %v10803_v48  ;;  %v5886_v46 = vadd.f32 %v5885_v51, %v10805_v19  ;;  %v5532_v14 = vpop.f32.mrb[163].mxu1 }
 0x855   : > { %7386 = vst [vmem:[%s10821_s22 + $0xa90] sm:$0xff] %v6938_v27  ;;  %v6937_v57 = vmax.f32 %v5529_v18, 0.0  ;;  %v6945_v21 = vmax.f32 %v5884_v8, 0.0  ;;  %v5533_v42 = vadd.f32 %v5532_v14, %v10808_v63 }
 0x856   : > { %7384 = vst [vmem:[%s10821_s22 + $0xa80] sm:$0xff] %v6936_v15  ;;  %7387 = vst [vmem:[%s10821_s22 + $0xa98] sm:$0xff] %v6939_v23  ;;  %v6943_v60 = vmax.f32 %v5531_v37, 0.0  ;;  %v6946_v62 = vmax.f32 %v5886_v46, 0.0  ;;  %6181 = vmatmul.mubr.bf16.gmra.mrb[12].mxu1 %v10682_v39 }
 0x857   : > { %7385 = vst [vmem:[%s10821_s22 + $0xa88] sm:$0xff] %v6937_v57  ;;  %7393 = vst [vmem:[%s10821_s22 + $0xac8] sm:$0xff] %v6945_v21  ;;  %v6944_v34 = vmax.f32 %v5533_v42, 0.0  ;;  %6190 = vmatprep.mubr.bf16.mxu1 %v8975_v1 }
 0x858   : > { %7391 = vst [vmem:[%s10821_s22 + $0xab8] sm:$0xff] %v6943_v60  ;;  %7394 = vst [vmem:[%s10821_s22 + $0xad0] sm:$0xff] %v6946_v62  ;;  %v5889_v17 = vpop.f32.mrb[228].mxu0 }
 0x859   : > { %7392 = vst [vmem:[%s10821_s22 + $0xac0] sm:$0xff] %v6944_v34  ;;  %v5890_v25 = vadd.f32 %v5889_v17, %v10800_v35  ;;  %v5536_v54 = vpop.f32.mrb[164].mxu1  ;;  %v5891_v50 = vpop.f32.mrb[229].mxu0 }
 0x85a   : > { %v5537_v12 = vadd.f32 %v5536_v54, %v10803_v48  ;;  %v5892_v33 = vadd.f32 %v5891_v50, %v10805_v19  ;;  %v5538_v9 = vpop.f32.mrb[165].mxu1  ;;  %v5893_v39 = vpop.f32.mrb[230].mxu0 }
 0x85b   : > { %v6952_v47 = vmax.f32 %v5890_v25, 0.0  ;;  %v5539_v20 = vadd.f32 %v5538_v9, %v10808_v63  ;;  %v5894_v2 = vadd.f32 %v5893_v39, %v10800_v35  ;;  %v5540_v55 = vpop.f32.mrb[166].mxu1  ;;  %v5895_v49 = vpop.f32.mrb[231].mxu0 }
 0x85c   : > { %v6950_v22 = vmax.f32 %v5537_v12, 0.0  ;;  %v6953_v29 = vmax.f32 %v5892_v33, 0.0  ;;  %v5541_v3 = vadd.f32 %v5540_v55, %v10803_v48  ;;  %v5896_v24 = vadd.f32 %v5895_v49, %v10805_v19  ;;  %v5542_v59 = vpop.f32.mrb[167].mxu1 }
 0x85d   : > { %7400 = vst [vmem:[%s10821_s22 + $0xb00] sm:$0xff] %v6952_v47  ;;  %v6951_v4 = vmax.f32 %v5539_v20, 0.0  ;;  %v6959_v31 = vmax.f32 %v5894_v2, 0.0  ;;  %v5543_v16 = vadd.f32 %v5542_v59, %v10808_v63 }
 0x85e   : > { %7398 = vst [vmem:[%s10821_s22 + $0xaf0] sm:$0xff] %v6950_v22  ;;  %7401 = vst [vmem:[%s10821_s22 + $0xb08] sm:$0xff] %v6953_v29  ;;  %v6957_v26 = vmax.f32 %v5541_v3, 0.0  ;;  %v6960_v6 = vmax.f32 %v5896_v24, 0.0  ;;  %6191 = vmatmul.mubr.bf16.gmra.mrb[16].mxu1 %v10716_v44 }
 0x85f   : > { %7399 = vst [vmem:[%s10821_s22 + $0xaf8] sm:$0xff] %v6951_v4  ;;  %7407 = vst [vmem:[%s10821_s22 + $0xb38] sm:$0xff] %v6959_v31  ;;  %v6958_v52 = vmax.f32 %v5543_v16, 0.0  ;;  %6200 = vmatprep.mubr.bf16.mxu1 %v8975_v1 }
 0x860   : > { %7405 = vst [vmem:[%s10821_s22 + $0xb28] sm:$0xff] %v6957_v26  ;;  %7408 = vst [vmem:[%s10821_s22 + $0xb40] sm:$0xff] %v6960_v6  ;;  %v5899_v11 = vpop.f32.mrb[232].mxu0 }
 0x861   : > { %7406 = vst [vmem:[%s10821_s22 + $0xb30] sm:$0xff] %v6958_v52  ;;  %v5900_v41 = vadd.f32 %v5899_v11, %v10800_v35  ;;  %v5546_v0 = vpop.f32.mrb[168].mxu1  ;;  %v5901_v58 = vpop.f32.mrb[233].mxu0 }
 0x862   : > { %v5547_v38 = vadd.f32 %v5546_v0, %v10803_v48  ;;  %v5902_v61 = vadd.f32 %v5901_v58, %v10805_v19  ;;  %v5548_v27 = vpop.f32.mrb[169].mxu1  ;;  %v5903_v44 = vpop.f32.mrb[234].mxu0 }
 0x863   : > { %v6966_v18 = vmax.f32 %v5900_v41, 0.0  ;;  %v5549_v8 = vadd.f32 %v5548_v27, %v10808_v63  ;;  %v5904_v30 = vadd.f32 %v5903_v44, %v10800_v35  ;;  %v5550_v51 = vpop.f32.mrb[170].mxu1  ;;  %v5905_v15 = vpop.f32.mrb[235].mxu0 }
 0x864   : > { %v6964_v23 = vmax.f32 %v5547_v38, 0.0  ;;  %v6967_v37 = vmax.f32 %v5902_v61, 0.0  ;;  %v5551_v46 = vadd.f32 %v5550_v51, %v10803_v48  ;;  %v5906_v14 = vadd.f32 %v5905_v15, %v10805_v19  ;;  %v5552_v57 = vpop.f32.mrb[171].mxu1 }
 0x865   : > { %7414 = vst [vmem:[%s10821_s22 + $0xb70] sm:$0xff] %v6966_v18  ;;  %v6965_v21 = vmax.f32 %v5549_v8, 0.0  ;;  %v6973_v42 = vmax.f32 %v5904_v30, 0.0  ;;  %v5553_v60 = vadd.f32 %v5552_v57, %v10808_v63 }
 0x866   : > { %7412 = vst [vmem:[%s10821_s22 + $0xb60] sm:$0xff] %v6964_v23  ;;  %7415 = vst [vmem:[%s10821_s22 + $0xb78] sm:$0xff] %v6967_v37  ;;  %v6971_v62 = vmax.f32 %v5551_v46, 0.0  ;;  %v6974_v34 = vmax.f32 %v5906_v14, 0.0  ;;  %6201 = vmatmul.mubr.bf16.gmra.mrb[20].mxu1 %v10714_v36 }
 0x867   : > { %7413 = vst [vmem:[%s10821_s22 + $0xb68] sm:$0xff] %v6965_v21  ;;  %7421 = vst [vmem:[%s10821_s22 + $0xba8] sm:$0xff] %v6973_v42  ;;  %v6972_v17 = vmax.f32 %v5553_v60, 0.0  ;;  %6210 = vmatprep.mubr.bf16.mxu1 %v8975_v1 }
 0x868   : > { %7419 = vst [vmem:[%s10821_s22 + $0xb98] sm:$0xff] %v6971_v62  ;;  %7422 = vst [vmem:[%s10821_s22 + $0xbb0] sm:$0xff] %v6974_v34  ;;  %v5909_v25 = vpop.f32.mrb[236].mxu0 }
 0x869   : > { %7420 = vst [vmem:[%s10821_s22 + $0xba0] sm:$0xff] %v6972_v17  ;;  %v5910_v54 = vadd.f32 %v5909_v25, %v10800_v35  ;;  %v5556_v50 = vpop.f32.mrb[172].mxu1  ;;  %v5911_v12 = vpop.f32.mrb[237].mxu0 }
 0x86a   : > { %v5557_v33 = vadd.f32 %v5556_v50, %v10803_v48  ;;  %v5912_v9 = vadd.f32 %v5911_v12, %v10805_v19  ;;  %v5558_v39 = vpop.f32.mrb[173].mxu1  ;;  %v5913_v36 = vpop.f32.mrb[238].mxu0 }
 0x86b   : > { %v6980_v47 = vmax.f32 %v5910_v54, 0.0  ;;  %v5559_v20 = vadd.f32 %v5558_v39, %v10808_v63  ;;  %v5914_v2 = vadd.f32 %v5913_v36, %v10800_v35  ;;  %v5560_v55 = vpop.f32.mrb[174].mxu1  ;;  %v5915_v49 = vpop.f32.mrb[239].mxu0 }
 0x86c   : > { %v6978_v22 = vmax.f32 %v5557_v33, 0.0  ;;  %v6981_v29 = vmax.f32 %v5912_v9, 0.0  ;;  %v5561_v3 = vadd.f32 %v5560_v55, %v10803_v48  ;;  %v5916_v24 = vadd.f32 %v5915_v49, %v10805_v19  ;;  %v5562_v59 = vpop.f32.mrb[175].mxu1 }
 0x86d   : > { %7428 = vst [vmem:[%s10821_s22 + $0xbe0] sm:$0xff] %v6980_v47  ;;  %v6979_v4 = vmax.f32 %v5559_v20, 0.0  ;;  %v6987_v31 = vmax.f32 %v5914_v2, 0.0  ;;  %v5563_v16 = vadd.f32 %v5562_v59, %v10808_v63 }
 0x86e   : > { %7426 = vst [vmem:[%s10821_s22 + $0xbd0] sm:$0xff] %v6978_v22  ;;  %7429 = vst [vmem:[%s10821_s22 + $0xbe8] sm:$0xff] %v6981_v29  ;;  %v6985_v26 = vmax.f32 %v5561_v3, 0.0  ;;  %v6988_v6 = vmax.f32 %v5916_v24, 0.0  ;;  %6211 = vmatmul.mubr.bf16.gmra.mrb[24].mxu1 %v10732_v53 }
 0x86f   : > { %7427 = vst [vmem:[%s10821_s22 + $0xbd8] sm:$0xff] %v6979_v4  ;;  %7435 = vst [vmem:[%s10821_s22 + $0xc18] sm:$0xff] %v6987_v31  ;;  %v6986_v52 = vmax.f32 %v5563_v16, 0.0  ;;  %6220 = vmatprep.mubr.bf16.mxu1 %v8975_v1 }
 0x870   : > { %7433 = vst [vmem:[%s10821_s22 + $0xc08] sm:$0xff] %v6985_v26  ;;  %7436 = vst [vmem:[%s10821_s22 + $0xc20] sm:$0xff] %v6988_v6  ;;  %v5919_v11 = vpop.f32.mrb[240].mxu0 }
 0x871   : > { %7434 = vst [vmem:[%s10821_s22 + $0xc10] sm:$0xff] %v6986_v52  ;;  %v5920_v41 = vadd.f32 %v5919_v11, %v10800_v35  ;;  %v5566_v0 = vpop.f32.mrb[176].mxu1  ;;  %v5921_v58 = vpop.f32.mrb[241].mxu0 }
 0x872   : > { %v5567_v38 = vadd.f32 %v5566_v0, %v10803_v48  ;;  %v5922_v61 = vadd.f32 %v5921_v58, %v10805_v19  ;;  %v5568_v27 = vpop.f32.mrb[177].mxu1  ;;  %v5923_v53 = vpop.f32.mrb[242].mxu0 }
 0x873   : > { %v6994_v44 = vmax.f32 %v5920_v41, 0.0  ;;  %v5569_v18 = vadd.f32 %v5568_v27, %v10808_v63  ;;  %v5924_v8 = vadd.f32 %v5923_v53, %v10800_v35  ;;  %v5570_v30 = vpop.f32.mrb[178].mxu1  ;;  %v5925_v51 = vpop.f32.mrb[243].mxu0 }
 0x874   : > { %v6992_v15 = vmax.f32 %v5567_v38, 0.0  ;;  %v6995_v23 = vmax.f32 %v5922_v61, 0.0  ;;  %v5571_v37 = vadd.f32 %v5570_v30, %v10803_v48  ;;  %v5926_v46 = vadd.f32 %v5925_v51, %v10805_v19  ;;  %v5572_v14 = vpop.f32.mrb[179].mxu1 }
 0x875   : > { %7442 = vst [vmem:[%s10821_s22 + $0xc50] sm:$0xff] %v6994_v44  ;;  %v6993_v57 = vmax.f32 %v5569_v18, 0.0  ;;  %v7001_v21 = vmax.f32 %v5924_v8, 0.0  ;;  %v5573_v42 = vadd.f32 %v5572_v14, %v10808_v63 }
 0x876   : > { %7440 = vst [vmem:[%s10821_s22 + $0xc40] sm:$0xff] %v6992_v15  ;;  %7443 = vst [vmem:[%s10821_s22 + $0xc58] sm:$0xff] %v6995_v23  ;;  %v6999_v60 = vmax.f32 %v5571_v37, 0.0  ;;  %v7002_v62 = vmax.f32 %v5926_v46, 0.0  ;;  %6221 = vmatmul.mubr.bf16.gmra.mrb[28].mxu1 %v10730_v5 }
 0x877   : > { %7441 = vst [vmem:[%s10821_s22 + $0xc48] sm:$0xff] %v6993_v57  ;;  %7449 = vst [vmem:[%s10821_s22 + $0xc88] sm:$0xff] %v7001_v21  ;;  %v7000_v34 = vmax.f32 %v5573_v42, 0.0  ;;  %6230 = vmatprep.mubr.bf16.mxu1 %v8975_v1 }
 0x878   : > { %7447 = vst [vmem:[%s10821_s22 + $0xc78] sm:$0xff] %v6999_v60  ;;  %7450 = vst [vmem:[%s10821_s22 + $0xc90] sm:$0xff] %v7002_v62  ;;  %v5929_v17 = vpop.f32.mrb[244].mxu0 }
 0x879   : > { %7448 = vst [vmem:[%s10821_s22 + $0xc80] sm:$0xff] %v7000_v34  ;;  %v5930_v25 = vadd.f32 %v5929_v17, %v10800_v35  ;;  %v5576_v54 = vpop.f32.mrb[180].mxu1  ;;  %v5931_v50 = vpop.f32.mrb[245].mxu0 }
 0x87a   : > { %v5577_v12 = vadd.f32 %v5576_v54, %v10803_v48  ;;  %v5932_v33 = vadd.f32 %v5931_v50, %v10805_v19  ;;  %v5578_v9 = vpop.f32.mrb[181].mxu1  ;;  %v5933_v5 = vpop.f32.mrb[246].mxu0 }
 0x87b   : > { %v7008_v39 = vmax.f32 %v5930_v25, 0.0  ;;  %v5579_v36 = vadd.f32 %v5578_v9, %v10808_v63  ;;  %v5934_v47 = vadd.f32 %v5933_v5, %v10800_v35  ;;  %v5580_v20 = vpop.f32.mrb[182].mxu1  ;;  %v5935_v2 = vpop.f32.mrb[247].mxu0  ;;  %v4955_v25 = vsub.s32 6, %v10783_v28 }
 0x87c   : > { %v7006_v55 = vmax.f32 %v5577_v12, 0.0  ;;  %v7009_v49 = vmax.f32 %v5932_v33, 0.0  ;;  %v5581_v22 = vadd.f32 %v5580_v20, %v10803_v48  ;;  %v5936_v29 = vadd.f32 %v5935_v2, %v10805_v19  ;;  %v5582_v3 = vpop.f32.mrb[183].mxu1 }
 0x87d   : > { %7456 = vst [vmem:[%s10821_s22 + $0xcc0] sm:$0xff] %v7008_v39  ;;  %v7007_v24 = vmax.f32 %v5579_v36, 0.0  ;;  %v7015_v59 = vmax.f32 %v5934_v47, 0.0  ;;  %v5583_v4 = vadd.f32 %v5582_v3, %v10808_v63  ;;  %v4947_v33 = vsub.s32 4, %v10783_v28 }
 0x87e   : > { %7454 = vst [vmem:[%s10821_s22 + $0xcb0] sm:$0xff] %v7006_v55  ;;  %7457 = vst [vmem:[%s10821_s22 + $0xcc8] sm:$0xff] %v7009_v49  ;;  %v7013_v31 = vmax.f32 %v5581_v22, 0.0  ;;  %v7016_v16 = vmax.f32 %v5936_v29, 0.0  ;;  %6231 = vmatmul.mubr.bf16.gmra.mrb[32].mxu1 %v10748_v40  ;;  %v4951_v20 = vsub.s32 5, %v10783_v28 }
 0x87f   : > { %7455 = vst [vmem:[%s10821_s22 + $0xcb8] sm:$0xff] %v7007_v24  ;;  %7463 = vst [vmem:[%s10821_s22 + $0xcf8] sm:$0xff] %v7015_v59  ;;  %v7014_v26 = vmax.f32 %v5583_v4, 0.0  ;;  %6240 = vmatprep.mubr.bf16.mxu1 %v8975_v1  ;;  %v8966_v28 = vld [vmem:[%s11938_s12] sm:$0x7f] }
 0x880   : > { %7461 = vst [vmem:[%s10821_s22 + $0xce8] sm:$0xff] %v7013_v31  ;;  %7464 = vst [vmem:[%s10821_s22 + $0xd00] sm:$0xff] %v7016_v16  ;;  %v5939_v6 = vpop.f32.mrb[248].mxu0  ;;  %v11445_v59 = vrot.slane %v8966_v28, %v4955_v25  ;;  %v11454_v16 = vrot.slane %v8966_v28, %v4951_v20 }
 0x881   : > { %7462 = vst [vmem:[%s10821_s22 + $0xcf0] sm:$0xff] %v7014_v26  ;;  %v5940_v52 = vadd.f32 %v5939_v6, %v10800_v35  ;;  %v5586_v11 = vpop.f32.mrb[184].mxu1  ;;  %v5941_v41 = vpop.f32.mrb[249].mxu0 }
 0x882   : > { %v5587_v0 = vadd.f32 %v5586_v11, %v10803_v48  ;;  %v5942_v58 = vadd.f32 %v5941_v41, %v10805_v19  ;;  %v5588_v38 = vpop.f32.mrb[185].mxu1  ;;  %v5943_v40 = vpop.f32.mrb[250].mxu0 }
 0x883   : > { %v7022_v61 = vmax.f32 %v5940_v52, 0.0  ;;  %v5589_v27 = vadd.f32 %v5588_v38, %v10808_v63  ;;  %v5944_v53 = vadd.f32 %v5943_v40, %v10800_v35  ;;  %v5590_v44 = vpop.f32.mrb[186].mxu1  ;;  %v5945_v18 = vpop.f32.mrb[251].mxu0 }
 0x884   : > { %v7020_v8 = vmax.f32 %v5587_v0, 0.0  ;;  %v7023_v30 = vmax.f32 %v5942_v58, 0.0  ;;  %v5591_v51 = vadd.f32 %v5590_v44, %v10803_v48  ;;  %v5946_v15 = vadd.f32 %v5945_v18, %v10805_v19  ;;  %v5592_v23 = vpop.f32.mrb[187].mxu1 }
 0x885   : > { %7470 = vst [vmem:[%s10821_s22 + $0xd30] sm:$0xff] %v7022_v61  ;;  %v7021_v37 = vmax.f32 %v5589_v27, 0.0  ;;  %v7029_v46 = vmax.f32 %v5944_v53, 0.0  ;;  %v5593_v14 = vadd.f32 %v5592_v23, %v10808_v63 }
 0x886   : > { %7468 = vst [vmem:[%s10821_s22 + $0xd20] sm:$0xff] %v7020_v8  ;;  %7471 = vst [vmem:[%s10821_s22 + $0xd38] sm:$0xff] %v7023_v30  ;;  %v7027_v57 = vmax.f32 %v5591_v51, 0.0  ;;  %v7030_v21 = vmax.f32 %v5946_v15, 0.0  ;;  %6241 = vmatmul.mubr.bf16.gmra.mrb[36].mxu1 %v10746_v45 }
 0x887   : > { %7469 = vst [vmem:[%s10821_s22 + $0xd28] sm:$0xff] %v7021_v37  ;;  %7477 = vst [vmem:[%s10821_s22 + $0xd68] sm:$0xff] %v7029_v46  ;;  %v7028_v42 = vmax.f32 %v5593_v14, 0.0  ;;  %6250 = vmatprep.mubr.bf16.mxu1 %v8975_v1 }
 0x888   : > { %7475 = vst [vmem:[%s10821_s22 + $0xd58] sm:$0xff] %v7027_v57  ;;  %7478 = vst [vmem:[%s10821_s22 + $0xd70] sm:$0xff] %v7030_v21  ;;  %v5949_v60 = vpop.f32.mrb[252].mxu0 }
 0x889   : > { %7476 = vst [vmem:[%s10821_s22 + $0xd60] sm:$0xff] %v7028_v42  ;;  %v5950_v62 = vadd.f32 %v5949_v60, %v10800_v35  ;;  %v5596_v34 = vpop.f32.mrb[188].mxu1  ;;  %v5951_v17 = vpop.f32.mrb[253].mxu0 }
 0x88a   : > { %v5597_v54 = vadd.f32 %v5596_v34, %v10803_v48  ;;  %v5952_v45 = vadd.f32 %v5951_v17, %v10805_v19  ;;  %v5598_v50 = vpop.f32.mrb[189].mxu1  ;;  %v5953_v12 = vpop.f32.mrb[254].mxu0 }
 0x88b   : > { %v7036_v9 = vmax.f32 %v5950_v62, 0.0  ;;  %v5599_v5 = vadd.f32 %v5598_v50, %v10808_v63  ;;  %v5954_v39 = vadd.f32 %v5953_v12, %v10800_v35  ;;  %v5600_v36 = vpop.f32.mrb[190].mxu1  ;;  %v5955_v47 = vpop.f32.mrb[255].mxu0 }
 0x88c   : > { %v7034_v2 = vmax.f32 %v5597_v54, 0.0  ;;  %v7037_v55 = vmax.f32 %v5952_v45, 0.0  ;;  %v5601_v49 = vadd.f32 %v5600_v36, %v10803_v48  ;;  %v5956_v22 = vadd.f32 %v5955_v47, %v10805_v19  ;;  %v5602_v29 = vpop.f32.mrb[191].mxu1 }
 0x88d   : > { %7484 = vst [vmem:[%s10821_s22 + $0xda0] sm:$0xff] %v7036_v9  ;;  %v7035_v3 = vmax.f32 %v5599_v5, 0.0  ;;  %v7043_v24 = vmax.f32 %v5954_v39, 0.0  ;;  %v5603_v35 = vadd.f32 %v5602_v29, %v10808_v63  ;;  %v11450_v19 = vrot.slane %v8966_v28, %v4947_v33 }
 0x88e   : > { %7482 = vst [vmem:[%s10821_s22 + $0xd90] sm:$0xff] %v7034_v2  ;;  %7485 = vst [vmem:[%s10821_s22 + $0xda8] sm:$0xff] %v7037_v55  ;;  %v7041_v48 = vmax.f32 %v5601_v49, 0.0  ;;  %v7044_v4 = vmax.f32 %v5956_v22, 0.0  ;;  %6251 = vmatmul.mubr.bf16.gmra.mrb[40].mxu1 %v10764_v43 }
 0x88f   : > { %7483 = vst [vmem:[%s10821_s22 + $0xd98] sm:$0xff] %v7035_v3  ;;  %7491 = vst [vmem:[%s10821_s22 + $0xdd8] sm:$0xff] %v7043_v24  ;;  %v7042_v31 = vmax.f32 %v5603_v35, 0.0  ;;  %6260 = vmatprep.mubr.bf16.mxu1 %v8975_v1 }
 0x890   : > { %7489 = vst [vmem:[%s10821_s22 + $0xdc8] sm:$0xff] %v7041_v48  ;;  %7492 = vst [vmem:[%s10821_s22 + $0xde0] sm:$0xff] %v7044_v4  ;;  %v8412_v63 = vpop.f32.mrb[0].mxu0 }
 0x891   : > { %7490 = vst [vmem:[%s10821_s22 + $0xdd0] sm:$0xff] %v7042_v31  ;;  %v6354_v26 = vadd.f32 %v8412_v63, %v11445_v59  ;;  %v5992_v6 = vpop.f32.mrb[192].mxu1  ;;  %v6345_v52 = vpop.f32.mrb[1].mxu0 }
 0x892   : > { %v5993_v11 = vadd.f32 %v5992_v6, %v11450_v19  ;;  %v6346_v41 = vadd.f32 %v6345_v52, %v11445_v59  ;;  %v5994_v0 = vpop.f32.mrb[193].mxu1  ;;  %v8413_v58 = vpop.f32.mrb[2].mxu0 }
 0x893   : > { %v6620_v38 = vmax.f32 %v6354_v26, 0.0  ;;  %v5995_v40 = vadd.f32 %v5994_v0, %v11454_v16  ;;  %v6357_v61 = vadd.f32 %v8413_v58, %v11445_v59  ;;  %v5996_v27 = vpop.f32.mrb[194].mxu1  ;;  %v6348_v53 = vpop.f32.mrb[3].mxu0 }
 0x894   : > { %v6604_v44 = vmax.f32 %v5993_v11, 0.0  ;;  %v6606_v18 = vmax.f32 %v6346_v41, 0.0  ;;  %v5997_v8 = vadd.f32 %v5996_v27, %v11450_v19  ;;  %v6349_v30 = vadd.f32 %v6348_v53, %v11445_v59  ;;  %v5998_v51 = vpop.f32.mrb[195].mxu1 }
 0x895   : > { %7068 = vst.msk [vmem:[%s10821_s22 + $0xa0] sm:$0xff] %vm1521_vm0, %v6620_v38  ;;  %v6605_v15 = vmax.f32 %v5995_v40, 0.0  ;;  %v6627_v23 = vmax.f32 %v6357_v61, 0.0  ;;  %v5999_v37 = vadd.f32 %v5998_v51, %v11454_v16 }
 0x896   : > { %7052 = vst [vmem:[%s10821_s22 + $0x20] sm:$0xff] %v6604_v44  ;;  %7054 = vst.msk [vmem:[%s10821_s22 + $0x30] sm:$0xff] %vm1521_vm0, %v6606_v18  ;;  %v6611_v46 = vmax.f32 %v5997_v8, 0.0  ;;  %v6613_v14 = vmax.f32 %v6349_v30, 0.0  ;;  %6261 = vmatmul.mubr.bf16.gmra.mrb[44].mxu1 %v10762_v56 }
 0x897   : > { %7053 = vst [vmem:[%s10821_s22 + $0x28] sm:$0xff] %v6605_v15  ;;  %7075 = vst.msk [vmem:[%s10821_s22 + $0xd8] sm:$0xff] %vm1521_vm0, %v6627_v23  ;;  %v6612_v57 = vmax.f32 %v5999_v37, 0.0  ;;  %6270 = vmatprep.mubr.bf16.mxu1 %v8975_v1 }
 0x898   : > { %7059 = vst [vmem:[%s10821_s22 + $0x58] sm:$0xff] %v6611_v46  ;;  %7061 = vst.msk [vmem:[%s10821_s22 + $0x68] sm:$0xff] %vm1521_vm0, %v6613_v14  ;;  %v8416_v21 = vpop.f32.mrb[4].mxu0 }
 0x899   : > { %7060 = vst [vmem:[%s10821_s22 + $0x60] sm:$0xff] %v6612_v57  ;;  %v6370_v42 = vadd.f32 %v8416_v21, %v11445_v59  ;;  %v6002_v60 = vpop.f32.mrb[196].mxu1  ;;  %v6361_v62 = vpop.f32.mrb[5].mxu0 }
 0x89a   : > { %v6003_v34 = vadd.f32 %v6002_v60, %v11450_v19  ;;  %v6362_v17 = vadd.f32 %v6361_v62, %v11445_v59  ;;  %v6004_v25 = vpop.f32.mrb[197].mxu1  ;;  %v8417_v54 = vpop.f32.mrb[6].mxu0 }
 0x89b   : > { %v6648_v45 = vmax.f32 %v6370_v42, 0.0  ;;  %v6005_v50 = vadd.f32 %v6004_v25, %v11454_v16  ;;  %v6373_v12 = vadd.f32 %v8417_v54, %v11445_v59  ;;  %v6006_v33 = vpop.f32.mrb[198].mxu1  ;;  %v6364_v9 = vpop.f32.mrb[7].mxu0 }
 0x89c   : > { %v6618_v5 = vmax.f32 %v6003_v34, 0.0  ;;  %v6634_v39 = vmax.f32 %v6362_v17, 0.0  ;;  %v6007_v36 = vadd.f32 %v6006_v33, %v11450_v19  ;;  %v6365_v47 = vadd.f32 %v6364_v9, %v11445_v59  ;;  %v6008_v20 = vpop.f32.mrb[199].mxu1 }
 0x89d   : > { %7096 = vst.msk [vmem:[%s10821_s22 + $0x180] sm:$0xff] %vm1521_vm0, %v6648_v45  ;;  %v6619_v2 = vmax.f32 %v6005_v50, 0.0  ;;  %v6655_v55 = vmax.f32 %v6373_v12, 0.0  ;;  %v6009_v49 = vadd.f32 %v6008_v20, %v11454_v16 }
 0x89e   : > { %7066 = vst [vmem:[%s10821_s22 + $0x90] sm:$0xff] %v6618_v5  ;;  %7082 = vst.msk [vmem:[%s10821_s22 + $0x110] sm:$0xff] %vm1521_vm0, %v6634_v39  ;;  %v6625_v22 = vmax.f32 %v6007_v36, 0.0  ;;  %v6641_v29 = vmax.f32 %v6365_v47, 0.0  ;;  %6271 = vmatmul.mubr.bf16.gmra.mrb[48].mxu1 %v10780_v13 }
 0x89f   : > { %7067 = vst [vmem:[%s10821_s22 + $0x98] sm:$0xff] %v6619_v2  ;;  %7103 = vst.msk [vmem:[%s10821_s22 + $0x1b8] sm:$0xff] %vm1521_vm0, %v6655_v55  ;;  %v6626_v3 = vmax.f32 %v6009_v49, 0.0  ;;  %6280 = vmatprep.mubr.bf16.mxu1 %v8975_v1 }
 0x8a0   : > { %7073 = vst [vmem:[%s10821_s22 + $0xc8] sm:$0xff] %v6625_v22  ;;  %7089 = vst.msk [vmem:[%s10821_s22 + $0x148] sm:$0xff] %vm1521_vm0, %v6641_v29  ;;  %v8420_v24 = vpop.f32.mrb[8].mxu0 }
 0x8a1   : > { %7074 = vst [vmem:[%s10821_s22 + $0xd0] sm:$0xff] %v6626_v3  ;;  %v6386_v35 = vadd.f32 %v8420_v24, %v11445_v59  ;;  %v6012_v28 = vpop.f32.mrb[200].mxu1  ;;  %v6377_v48 = vpop.f32.mrb[9].mxu0 }
 0x8a2   : > { %v6013_v4 = vadd.f32 %v6012_v28, %v11450_v19  ;;  %v6378_v31 = vadd.f32 %v6377_v48, %v11445_v59  ;;  %v6014_v63 = vpop.f32.mrb[201].mxu1  ;;  %v8421_v26 = vpop.f32.mrb[10].mxu0 }
 0x8a3   : > { %v6676_v6 = vmax.f32 %v6386_v35, 0.0  ;;  %v6015_v52 = vadd.f32 %v6014_v63, %v11454_v16  ;;  %v6389_v11 = vadd.f32 %v8421_v26, %v11445_v59  ;;  %v6016_v41 = vpop.f32.mrb[202].mxu1  ;;  %v6380_v0 = vpop.f32.mrb[11].mxu0 }
 0x8a4   : > { %v6632_v58 = vmax.f32 %v6013_v4, 0.0  ;;  %v6662_v38 = vmax.f32 %v6378_v31, 0.0  ;;  %v6017_v40 = vadd.f32 %v6016_v41, %v11450_v19  ;;  %v6381_v61 = vadd.f32 %v6380_v0, %v11445_v59  ;;  %v6018_v27 = vpop.f32.mrb[203].mxu1 }
 0x8a5   : > { %7124 = vst.msk [vmem:[%s10821_s22 + $0x260] sm:$0xff] %vm1521_vm0, %v6676_v6  ;;  %v6633_v53 = vmax.f32 %v6015_v52, 0.0  ;;  %v6683_v44 = vmax.f32 %v6389_v11, 0.0  ;;  %v6019_v18 = vadd.f32 %v6018_v27, %v11454_v16 }
 0x8a6   : > { %7080 = vst [vmem:[%s10821_s22 + $0x100] sm:$0xff] %v6632_v58  ;;  %7110 = vst.msk [vmem:[%s10821_s22 + $0x1f0] sm:$0xff] %vm1521_vm0, %v6662_v38  ;;  %v6639_v8 = vmax.f32 %v6017_v40, 0.0  ;;  %v6669_v30 = vmax.f32 %v6381_v61, 0.0  ;;  %6281 = vmatmul.mubr.bf16.gmra.mrb[52].mxu1 %v10778_v10 }
 0x8a7   : > { %7081 = vst [vmem:[%s10821_s22 + $0x108] sm:$0xff] %v6633_v53  ;;  %7131 = vst.msk [vmem:[%s10821_s22 + $0x298] sm:$0xff] %vm1521_vm0, %v6683_v44  ;;  %v6640_v51 = vmax.f32 %v6019_v18, 0.0  ;;  %6290 = vmatprep.mubr.bf16.mxu1 %v8975_v1 }
 0x8a8   : > { %7087 = vst [vmem:[%s10821_s22 + $0x138] sm:$0xff] %v6639_v8  ;;  %7117 = vst.msk [vmem:[%s10821_s22 + $0x228] sm:$0xff] %vm1521_vm0, %v6669_v30  ;;  %v8424_v15 = vpop.f32.mrb[12].mxu0 }
 0x8a9   : > { %7088 = vst [vmem:[%s10821_s22 + $0x140] sm:$0xff] %v6640_v51  ;;  %v6402_v23 = vadd.f32 %v8424_v15, %v11445_v59  ;;  %v6022_v37 = vpop.f32.mrb[204].mxu1  ;;  %v6393_v46 = vpop.f32.mrb[13].mxu0 }
 0x8aa   : > { %v6023_v14 = vadd.f32 %v6022_v37, %v11450_v19  ;;  %v6394_v57 = vadd.f32 %v6393_v46, %v11445_v59  ;;  %v6024_v21 = vpop.f32.mrb[205].mxu1  ;;  %v8425_v42 = vpop.f32.mrb[14].mxu0 }
 0x8ab   : > { %v6704_v60 = vmax.f32 %v6402_v23, 0.0  ;;  %v6025_v62 = vadd.f32 %v6024_v21, %v11454_v16  ;;  %v6405_v34 = vadd.f32 %v8425_v42, %v11445_v59  ;;  %v6026_v17 = vpop.f32.mrb[206].mxu1  ;;  %v6396_v25 = vpop.f32.mrb[15].mxu0 }
 0x8ac   : > { %v6646_v54 = vmax.f32 %v6023_v14, 0.0  ;;  %v6690_v45 = vmax.f32 %v6394_v57, 0.0  ;;  %v6027_v50 = vadd.f32 %v6026_v17, %v11450_v19  ;;  %v6397_v12 = vadd.f32 %v6396_v25, %v11445_v59  ;;  %v6028_v33 = vpop.f32.mrb[207].mxu1 }
 0x8ad   : > { %7152 = vst.msk [vmem:[%s10821_s22 + $0x340] sm:$0xff] %vm1521_vm0, %v6704_v60  ;;  %v6647_v9 = vmax.f32 %v6025_v62, 0.0  ;;  %v6711_v5 = vmax.f32 %v6405_v34, 0.0  ;;  %v6029_v39 = vadd.f32 %v6028_v33, %v11454_v16 }
 0x8ae   : > { %7094 = vst [vmem:[%s10821_s22 + $0x170] sm:$0xff] %v6646_v54  ;;  %7138 = vst.msk [vmem:[%s10821_s22 + $0x2d0] sm:$0xff] %vm1521_vm0, %v6690_v45  ;;  %v6653_v36 = vmax.f32 %v6027_v50, 0.0  ;;  %v6697_v47 = vmax.f32 %v6397_v12, 0.0  ;;  %6291 = vmatmul.mubr.bf16.gmra.mrb[56].mxu1 %v10813_v7 }
 0x8af   : > { %7095 = vst [vmem:[%s10821_s22 + $0x178] sm:$0xff] %v6647_v9  ;;  %7159 = vst.msk [vmem:[%s10821_s22 + $0x378] sm:$0xff] %vm1521_vm0, %v6711_v5  ;;  %v6654_v20 = vmax.f32 %v6029_v39, 0.0  ;;  %6300 = vmatprep.mubr.bf16.mxu1 %v8975_v1 }
 0x8b0   : > { %7101 = vst [vmem:[%s10821_s22 + $0x1a8] sm:$0xff] %v6653_v36  ;;  %7145 = vst.msk [vmem:[%s10821_s22 + $0x308] sm:$0xff] %vm1521_vm0, %v6697_v47  ;;  %v8428_v2 = vpop.f32.mrb[16].mxu0 }
 0x8b1   : > { %7102 = vst [vmem:[%s10821_s22 + $0x1b0] sm:$0xff] %v6654_v20  ;;  %v6418_v55 = vadd.f32 %v8428_v2, %v11445_v59  ;;  %v6032_v49 = vpop.f32.mrb[208].mxu1  ;;  %v6409_v22 = vpop.f32.mrb[17].mxu0 }
 0x8b2   : > { %v6033_v29 = vadd.f32 %v6032_v49, %v11450_v19  ;;  %v6410_v3 = vadd.f32 %v6409_v22, %v11445_v59  ;;  %v6034_v24 = vpop.f32.mrb[209].mxu1  ;;  %v8429_v35 = vpop.f32.mrb[18].mxu0 }
 0x8b3   : > { %v6732_v28 = vmax.f32 %v6418_v55, 0.0  ;;  %v6035_v1 = vadd.f32 %v6034_v24, %v11454_v16  ;;  %v6421_v48 = vadd.f32 %v8429_v35, %v11445_v59  ;;  %v6036_v4 = vpop.f32.mrb[210].mxu1  ;;  %v6412_v31 = vpop.f32.mrb[19].mxu0 }
 0x8b4   : > { %v6660_v63 = vmax.f32 %v6033_v29, 0.0  ;;  %v6718_v26 = vmax.f32 %v6410_v3, 0.0  ;;  %v6037_v6 = vadd.f32 %v6036_v4, %v11450_v19  ;;  %v6413_v52 = vadd.f32 %v6412_v31, %v11445_v59  ;;  %v6038_v11 = vpop.f32.mrb[211].mxu1 }
 0x8b5   : > { %7180 = vst.msk [vmem:[%s10821_s22 + $0x420] sm:$0xff] %vm1521_vm0, %v6732_v28  ;;  %v6661_v41 = vmax.f32 %v6035_v1, 0.0  ;;  %v6739_v0 = vmax.f32 %v6421_v48, 0.0  ;;  %v6039_v58 = vadd.f32 %v6038_v11, %v11454_v16 }
 0x8b6   : > { %7108 = vst [vmem:[%s10821_s22 + $0x1e0] sm:$0xff] %v6660_v63  ;;  %7166 = vst.msk [vmem:[%s10821_s22 + $0x3b0] sm:$0xff] %vm1521_vm0, %v6718_v26  ;;  %v6667_v38 = vmax.f32 %v6037_v6, 0.0  ;;  %v6725_v40 = vmax.f32 %v6413_v52, 0.0  ;;  %6301 = vmatmul.mubr.bf16.gmra.mrb[60].mxu1 %v10811_v32 }
 0x8b7   : > { %7109 = vst [vmem:[%s10821_s22 + $0x1e8] sm:$0xff] %v6661_v41  ;;  %7187 = vst.msk [vmem:[%s10821_s22 + $0x458] sm:$0xff] %vm1521_vm0, %v6739_v0  ;;  %v6668_v61 = vmax.f32 %v6039_v58, 0.0  ;;  %8462 = vmatprep.mubr.bf16.mxu1 %v10764_v43 }
 0x8b8   : > { %7115 = vst [vmem:[%s10821_s22 + $0x218] sm:$0xff] %v6667_v38  ;;  %7173 = vst.msk [vmem:[%s10821_s22 + $0x3e8] sm:$0xff] %vm1521_vm0, %v6725_v40  ;;  %v8432_v27 = vpop.f32.mrb[20].mxu0 }
 0x8b9   : > { %7116 = vst [vmem:[%s10821_s22 + $0x220] sm:$0xff] %v6668_v61  ;;  %v6434_v53 = vadd.f32 %v8432_v27, %v11445_v59  ;;  %v6042_v44 = vpop.f32.mrb[212].mxu1  ;;  %v6425_v18 = vpop.f32.mrb[21].mxu0 }
 0x8ba   : > { %v6043_v8 = vadd.f32 %v6042_v44, %v11450_v19  ;;  %v6426_v30 = vadd.f32 %v6425_v18, %v11445_v59  ;;  %v6044_v51 = vpop.f32.mrb[213].mxu1  ;;  %v8433_v15 = vpop.f32.mrb[22].mxu0 }
 0x8bb   : > { %v6760_v23 = vmax.f32 %v6434_v53, 0.0  ;;  %v6045_v43 = vadd.f32 %v6044_v51, %v11454_v16  ;;  %v6437_v37 = vadd.f32 %v8433_v15, %v11445_v59  ;;  %v6046_v46 = vpop.f32.mrb[214].mxu1  ;;  %v6428_v14 = vpop.f32.mrb[23].mxu0 }
 0x8bc   : > { %v6674_v57 = vmax.f32 %v6043_v8, 0.0  ;;  %v6746_v21 = vmax.f32 %v6426_v30, 0.0  ;;  %v6047_v42 = vadd.f32 %v6046_v46, %v11450_v19  ;;  %v6429_v60 = vadd.f32 %v6428_v14, %v11445_v59  ;;  %v6048_v62 = vpop.f32.mrb[215].mxu1 }
 0x8bd   : > { %7208 = vst.msk [vmem:[%s10821_s22 + $0x500] sm:$0xff] %vm1521_vm0, %v6760_v23  ;;  %v6675_v34 = vmax.f32 %v6045_v43, 0.0  ;;  %v6767_v17 = vmax.f32 %v6437_v37, 0.0  ;;  %v6049_v25 = vadd.f32 %v6048_v62, %v11454_v16 }
 0x8be   : > { %7122 = vst [vmem:[%s10821_s22 + $0x250] sm:$0xff] %v6674_v57  ;;  %7194 = vst.msk [vmem:[%s10821_s22 + $0x490] sm:$0xff] %vm1521_vm0, %v6746_v21  ;;  %v6681_v54 = vmax.f32 %v6047_v42, 0.0  ;;  %v6753_v45 = vmax.f32 %v6429_v60, 0.0  ;;  %8463 = vmatmul.mubr.bf16.vlgmr.msra.gmra.mrb[64].mxu1 %v10762_v56 }
 0x8bf   : > { %7123 = vst [vmem:[%s10821_s22 + $0x258] sm:$0xff] %v6675_v34  ;;  %7215 = vst.msk [vmem:[%s10821_s22 + $0x538] sm:$0xff] %vm1521_vm0, %v6767_v17  ;;  %v6682_v50 = vmax.f32 %v6049_v25, 0.0  ;;  %8466 = vmatprep.mubr.bf16.mxu1 %v10780_v13 }
 0x8c0   : > { %7129 = vst [vmem:[%s10821_s22 + $0x288] sm:$0xff] %v6681_v54  ;;  %7201 = vst.msk [vmem:[%s10821_s22 + $0x4c8] sm:$0xff] %vm1521_vm0, %v6753_v45  ;;  %v8436_v12 = vpop.f32.mrb[24].mxu0 }
 0x8c1   : > { %7130 = vst [vmem:[%s10821_s22 + $0x290] sm:$0xff] %v6682_v50  ;;  %v6450_v33 = vadd.f32 %v8436_v12, %v11445_v59  ;;  %v6052_v9 = vpop.f32.mrb[216].mxu1  ;;  %v6441_v5 = vpop.f32.mrb[25].mxu0 }
 0x8c2   : > { %v6053_v39 = vadd.f32 %v6052_v9, %v11450_v19  ;;  %v6442_v56 = vadd.f32 %v6441_v5, %v11445_v59  ;;  %v6054_v36 = vpop.f32.mrb[217].mxu1  ;;  %v8437_v47 = vpop.f32.mrb[26].mxu0 }
 0x8c3   : > { %v6788_v20 = vmax.f32 %v6450_v33, 0.0  ;;  %v6055_v13 = vadd.f32 %v6054_v36, %v11454_v16  ;;  %v6453_v2 = vadd.f32 %v8437_v47, %v11445_v59  ;;  %v6056_v55 = vpop.f32.mrb[218].mxu1  ;;  %v6444_v49 = vpop.f32.mrb[27].mxu0 }
 0x8c4   : > { %v6688_v22 = vmax.f32 %v6053_v39, 0.0  ;;  %v6774_v29 = vmax.f32 %v6442_v56, 0.0  ;;  %v6057_v3 = vadd.f32 %v6056_v55, %v11450_v19  ;;  %v6445_v24 = vadd.f32 %v6444_v49, %v11445_v59  ;;  %v6058_v35 = vpop.f32.mrb[219].mxu1 }
 0x8c5   : > { %7236 = vst.msk [vmem:[%s10821_s22 + $0x5e0] sm:$0xff] %vm1521_vm0, %v6788_v20  ;;  %v6689_v28 = vmax.f32 %v6055_v13, 0.0  ;;  %v6795_v1 = vmax.f32 %v6453_v2, 0.0  ;;  %v6059_v48 = vadd.f32 %v6058_v35, %v11454_v16 }
 0x8c6   : > { %7136 = vst [vmem:[%s10821_s22 + $0x2c0] sm:$0xff] %v6688_v22  ;;  %7222 = vst.msk [vmem:[%s10821_s22 + $0x570] sm:$0xff] %vm1521_vm0, %v6774_v29  ;;  %v6695_v4 = vmax.f32 %v6057_v3, 0.0  ;;  %v6781_v31 = vmax.f32 %v6445_v24, 0.0  ;;  %8467 = vmatmul.mubr.bf16.gmra.mrb[68].mxu1 %v10778_v10 }
 0x8c7   : > { %7137 = vst [vmem:[%s10821_s22 + $0x2c8] sm:$0xff] %v6689_v28  ;;  %7243 = vst.msk [vmem:[%s10821_s22 + $0x618] sm:$0xff] %vm1521_vm0, %v6795_v1  ;;  %v6696_v63 = vmax.f32 %v6059_v48, 0.0  ;;  %8470 = vmatprep.mubr.bf16.mxu1 %v10813_v7 }
 0x8c8   : > { %7143 = vst [vmem:[%s10821_s22 + $0x2f8] sm:$0xff] %v6695_v4  ;;  %7229 = vst.msk [vmem:[%s10821_s22 + $0x5a8] sm:$0xff] %vm1521_vm0, %v6781_v31  ;;  %v8440_v26 = vpop.f32.mrb[28].mxu0 }
 0x8c9   : > { %7144 = vst [vmem:[%s10821_s22 + $0x300] sm:$0xff] %v6696_v63  ;;  %v6466_v6 = vadd.f32 %v8440_v26, %v11445_v59  ;;  %v6062_v52 = vpop.f32.mrb[220].mxu1  ;;  %v6457_v11 = vpop.f32.mrb[29].mxu0 }
 0x8ca   : > { %v6063_v41 = vadd.f32 %v6062_v52, %v11450_v19  ;;  %v6458_v10 = vadd.f32 %v6457_v11, %v11445_v59  ;;  %v6064_v0 = vpop.f32.mrb[221].mxu1  ;;  %v8441_v58 = vpop.f32.mrb[30].mxu0 }
 0x8cb   : > { %v6816_v38 = vmax.f32 %v6466_v6, 0.0  ;;  %v6065_v7 = vadd.f32 %v6064_v0, %v11454_v16  ;;  %v6469_v40 = vadd.f32 %v8441_v58, %v11445_v59  ;;  %v6066_v61 = vpop.f32.mrb[222].mxu1  ;;  %v6460_v27 = vpop.f32.mrb[31].mxu0 }
 0x8cc   : > { %v6702_v53 = vmax.f32 %v6063_v41, 0.0  ;;  %v6802_v44 = vmax.f32 %v6458_v10, 0.0  ;;  %v6067_v18 = vadd.f32 %v6066_v61, %v11450_v19  ;;  %v6461_v8 = vadd.f32 %v6460_v27, %v11445_v59  ;;  %v6068_v30 = vpop.f32.mrb[223].mxu1 }
 0x8cd   : > { %7264 = vst.msk [vmem:[%s10821_s22 + $0x6c0] sm:$0xff] %vm1521_vm0, %v6816_v38  ;;  %v6703_v51 = vmax.f32 %v6065_v7, 0.0  ;;  %v6823_v15 = vmax.f32 %v6469_v40, 0.0  ;;  %v6069_v23 = vadd.f32 %v6068_v30, %v11454_v16 }
 0x8ce   : > { %7150 = vst [vmem:[%s10821_s22 + $0x330] sm:$0xff] %v6702_v53  ;;  %7250 = vst.msk [vmem:[%s10821_s22 + $0x650] sm:$0xff] %vm1521_vm0, %v6802_v44  ;;  %v6709_v43 = vmax.f32 %v6067_v18, 0.0  ;;  %v6809_v37 = vmax.f32 %v6461_v8, 0.0  ;;  %8471 = vmatmul.mubr.bf16.gmra.mrb[72].mxu1 %v10811_v32 }
 0x8cf   : > { %7151 = vst [vmem:[%s10821_s22 + $0x338] sm:$0xff] %v6703_v51  ;;  %7271 = vst.msk [vmem:[%s10821_s22 + $0x6f8] sm:$0xff] %vm1521_vm0, %v6823_v15  ;;  %v6710_v46 = vmax.f32 %v6069_v23, 0.0 }
 0x8d0   : > { %7157 = vst [vmem:[%s10821_s22 + $0x368] sm:$0xff] %v6709_v43  ;;  %7257 = vst.msk [vmem:[%s10821_s22 + $0x688] sm:$0xff] %vm1521_vm0, %v6809_v37  ;;  %v8444_v14 = vpop.f32.mrb[32].mxu0 }
 0x8d1   : > { %7158 = vst [vmem:[%s10821_s22 + $0x370] sm:$0xff] %v6710_v46  ;;  %v6482_v57 = vadd.f32 %v8444_v14, %v11445_v59  ;;  %v6072_v21 = vpop.f32.mrb[224].mxu1  ;;  %v6473_v42 = vpop.f32.mrb[33].mxu0 }
 0x8d2   : > { %v6073_v60 = vadd.f32 %v6072_v21, %v11450_v19  ;;  %v6474_v62 = vadd.f32 %v6473_v42, %v11445_v59  ;;  %v6074_v34 = vpop.f32.mrb[225].mxu1  ;;  %v8445_v32 = vpop.f32.mrb[34].mxu0 }
 0x8d3   : > { %v6844_v17 = vmax.f32 %v6482_v57, 0.0  ;;  %v6075_v25 = vadd.f32 %v6074_v34, %v11454_v16  ;;  %v6485_v54 = vadd.f32 %v8445_v32, %v11445_v59  ;;  %v6076_v45 = vpop.f32.mrb[226].mxu1  ;;  %v6476_v50 = vpop.f32.mrb[35].mxu0 }
 0x8d4   : > { %v6716_v12 = vmax.f32 %v6073_v60, 0.0  ;;  %v6830_v33 = vmax.f32 %v6474_v62, 0.0  ;;  %v6077_v9 = vadd.f32 %v6076_v45, %v11450_v19  ;;  %v6477_v5 = vadd.f32 %v6476_v50, %v11445_v59  ;;  %v6078_v39 = vpop.f32.mrb[227].mxu1 }
 0x8d5   : > { %7292 = vst.msk [vmem:[%s10821_s22 + $0x7a0] sm:$0xff] %vm1521_vm0, %v6844_v17  ;;  %v6717_v56 = vmax.f32 %v6075_v25, 0.0  ;;  %v6851_v36 = vmax.f32 %v6485_v54, 0.0  ;;  %v6079_v47 = vadd.f32 %v6078_v39, %v11454_v16 }
 0x8d6   : > { %7164 = vst [vmem:[%s10821_s22 + $0x3a0] sm:$0xff] %v6716_v12  ;;  %7278 = vst.msk [vmem:[%s10821_s22 + $0x730] sm:$0xff] %vm1521_vm0, %v6830_v33  ;;  %v6723_v20 = vmax.f32 %v6077_v9, 0.0  ;;  %v6837_v13 = vmax.f32 %v6477_v5, 0.0 }
 0x8d7   : > { %7165 = vst [vmem:[%s10821_s22 + $0x3a8] sm:$0xff] %v6717_v56  ;;  %7299 = vst.msk [vmem:[%s10821_s22 + $0x7d8] sm:$0xff] %vm1521_vm0, %v6851_v36  ;;  %v6724_v2 = vmax.f32 %v6079_v47, 0.0 }
 0x8d8   : > { %7171 = vst [vmem:[%s10821_s22 + $0x3d8] sm:$0xff] %v6723_v20  ;;  %7285 = vst.msk [vmem:[%s10821_s22 + $0x768] sm:$0xff] %vm1521_vm0, %v6837_v13  ;;  %v8448_v55 = vpop.f32.mrb[36].mxu0 }
 0x8d9   : > { %7172 = vst [vmem:[%s10821_s22 + $0x3e0] sm:$0xff] %v6724_v2  ;;  %v6498_v49 = vadd.f32 %v8448_v55, %v11445_v59  ;;  %v6082_v22 = vpop.f32.mrb[228].mxu1  ;;  %v6489_v29 = vpop.f32.mrb[37].mxu0 }
 0x8da   : > { %v6083_v3 = vadd.f32 %v6082_v22, %v11450_v19  ;;  %v6490_v24 = vadd.f32 %v6489_v29, %v11445_v59  ;;  %v6084_v35 = vpop.f32.mrb[229].mxu1  ;;  %v8449_v28 = vpop.f32.mrb[38].mxu0 }
 0x8db   : > { %v6872_v1 = vmax.f32 %v6498_v49, 0.0  ;;  %v6085_v48 = vadd.f32 %v6084_v35, %v11454_v16  ;;  %v6501_v4 = vadd.f32 %v8449_v28, %v11445_v59  ;;  %v6086_v31 = vpop.f32.mrb[230].mxu1  ;;  %v6492_v63 = vpop.f32.mrb[39].mxu0 }
 0x8dc   : > { %v6730_v26 = vmax.f32 %v6083_v3, 0.0  ;;  %v6858_v6 = vmax.f32 %v6490_v24, 0.0  ;;  %v6087_v52 = vadd.f32 %v6086_v31, %v11450_v19  ;;  %v6493_v11 = vadd.f32 %v6492_v63, %v11445_v59  ;;  %v6088_v41 = vpop.f32.mrb[231].mxu1 }
 0x8dd   : > { %7320 = vst.msk [vmem:[%s10821_s22 + $0x880] sm:$0xff] %vm1521_vm0, %v6872_v1  ;;  %v6731_v10 = vmax.f32 %v6085_v48, 0.0  ;;  %v6879_v0 = vmax.f32 %v6501_v4, 0.0  ;;  %v6089_v58 = vadd.f32 %v6088_v41, %v11454_v16 }
 0x8de   : > { %7178 = vst [vmem:[%s10821_s22 + $0x410] sm:$0xff] %v6730_v26  ;;  %7306 = vst.msk [vmem:[%s10821_s22 + $0x810] sm:$0xff] %vm1521_vm0, %v6858_v6  ;;  %v6737_v38 = vmax.f32 %v6087_v52, 0.0  ;;  %v6865_v7 = vmax.f32 %v6493_v11, 0.0 }
 0x8df   : > { %7179 = vst [vmem:[%s10821_s22 + $0x418] sm:$0xff] %v6731_v10  ;;  %7327 = vst.msk [vmem:[%s10821_s22 + $0x8b8] sm:$0xff] %vm1521_vm0, %v6879_v0  ;;  %v6738_v40 = vmax.f32 %v6089_v58, 0.0 }
 0x8e0   : > { %7185 = vst [vmem:[%s10821_s22 + $0x448] sm:$0xff] %v6737_v38  ;;  %7313 = vst.msk [vmem:[%s10821_s22 + $0x848] sm:$0xff] %vm1521_vm0, %v6865_v7  ;;  %v8452_v61 = vpop.f32.mrb[40].mxu0 }
 0x8e1   : > { %7186 = vst [vmem:[%s10821_s22 + $0x450] sm:$0xff] %v6738_v40  ;;  %v6514_v27 = vadd.f32 %v8452_v61, %v11445_v59  ;;  %v6092_v53 = vpop.f32.mrb[232].mxu1  ;;  %v6505_v44 = vpop.f32.mrb[41].mxu0 }
 0x8e2   : > { %v6093_v18 = vadd.f32 %v6092_v53, %v11450_v19  ;;  %v6506_v8 = vadd.f32 %v6505_v44, %v11445_v59  ;;  %v6094_v30 = vpop.f32.mrb[233].mxu1  ;;  %v8453_v51 = vpop.f32.mrb[42].mxu0 }
 0x8e3   : > { %v6900_v15 = vmax.f32 %v6514_v27, 0.0  ;;  %v6095_v23 = vadd.f32 %v6094_v30, %v11454_v16  ;;  %v6517_v43 = vadd.f32 %v8453_v51, %v11445_v59  ;;  %v6096_v37 = vpop.f32.mrb[234].mxu1  ;;  %v6508_v46 = vpop.f32.mrb[43].mxu0 }
 0x8e4   : > { %v6744_v14 = vmax.f32 %v6093_v18, 0.0  ;;  %v6886_v57 = vmax.f32 %v6506_v8, 0.0  ;;  %v6097_v21 = vadd.f32 %v6096_v37, %v11450_v19  ;;  %v6509_v42 = vadd.f32 %v6508_v46, %v11445_v59  ;;  %v6098_v60 = vpop.f32.mrb[235].mxu1 }
 0x8e5   : > { %7348 = vst.msk [vmem:[%s10821_s22 + $0x960] sm:$0xff] %vm1521_vm0, %v6900_v15  ;;  %v6745_v62 = vmax.f32 %v6095_v23, 0.0  ;;  %v6907_v34 = vmax.f32 %v6517_v43, 0.0  ;;  %v6099_v32 = vadd.f32 %v6098_v60, %v11454_v16 }
 0x8e6   : > { %7192 = vst [vmem:[%s10821_s22 + $0x480] sm:$0xff] %v6744_v14  ;;  %7334 = vst.msk [vmem:[%s10821_s22 + $0x8f0] sm:$0xff] %vm1521_vm0, %v6886_v57  ;;  %v6751_v17 = vmax.f32 %v6097_v21, 0.0  ;;  %v6893_v25 = vmax.f32 %v6509_v42, 0.0 }
 0x8e7   : > { %7193 = vst [vmem:[%s10821_s22 + $0x488] sm:$0xff] %v6745_v62  ;;  %7355 = vst.msk [vmem:[%s10821_s22 + $0x998] sm:$0xff] %vm1521_vm0, %v6907_v34  ;;  %v6752_v54 = vmax.f32 %v6099_v32, 0.0 }
 0x8e8   : > { %7199 = vst [vmem:[%s10821_s22 + $0x4b8] sm:$0xff] %v6751_v17  ;;  %7341 = vst.msk [vmem:[%s10821_s22 + $0x928] sm:$0xff] %vm1521_vm0, %v6893_v25  ;;  %v8456_v45 = vpop.f32.mrb[44].mxu0 }
 0x8e9   : > { %7200 = vst [vmem:[%s10821_s22 + $0x4c0] sm:$0xff] %v6752_v54  ;;  %v6530_v50 = vadd.f32 %v8456_v45, %v11445_v59  ;;  %v6102_v12 = vpop.f32.mrb[236].mxu1  ;;  %v6521_v33 = vpop.f32.mrb[45].mxu0 }
 0x8ea   : > { %v6103_v9 = vadd.f32 %v6102_v12, %v11450_v19  ;;  %v6522_v5 = vadd.f32 %v6521_v33, %v11445_v59  ;;  %v6104_v39 = vpop.f32.mrb[237].mxu1  ;;  %v8457_v56 = vpop.f32.mrb[46].mxu0 }
 0x8eb   : > { %v6928_v36 = vmax.f32 %v6530_v50, 0.0  ;;  %v6105_v47 = vadd.f32 %v6104_v39, %v11454_v16  ;;  %v6533_v20 = vadd.f32 %v8457_v56, %v11445_v59  ;;  %v6106_v13 = vpop.f32.mrb[238].mxu1  ;;  %v6524_v2 = vpop.f32.mrb[47].mxu0 }
 0x8ec   : > { %v6758_v55 = vmax.f32 %v6103_v9, 0.0  ;;  %v6914_v49 = vmax.f32 %v6522_v5, 0.0  ;;  %v6107_v22 = vadd.f32 %v6106_v13, %v11450_v19  ;;  %v6525_v29 = vadd.f32 %v6524_v2, %v11445_v59  ;;  %v6108_v3 = vpop.f32.mrb[239].mxu1 }
 0x8ed   : > { %7376 = vst.msk [vmem:[%s10821_s22 + $0xa40] sm:$0xff] %vm1521_vm0, %v6928_v36  ;;  %v6759_v24 = vmax.f32 %v6105_v47, 0.0  ;;  %v6935_v35 = vmax.f32 %v6533_v20, 0.0  ;;  %v6109_v28 = vadd.f32 %v6108_v3, %v11454_v16 }
 0x8ee   : > { %7206 = vst [vmem:[%s10821_s22 + $0x4f0] sm:$0xff] %v6758_v55  ;;  %7362 = vst.msk [vmem:[%s10821_s22 + $0x9d0] sm:$0xff] %vm1521_vm0, %v6914_v49  ;;  %v6765_v1 = vmax.f32 %v6107_v22, 0.0  ;;  %v6921_v48 = vmax.f32 %v6525_v29, 0.0 }
 0x8ef   : > { %7207 = vst [vmem:[%s10821_s22 + $0x4f8] sm:$0xff] %v6759_v24  ;;  %7383 = vst.msk [vmem:[%s10821_s22 + $0xa78] sm:$0xff] %vm1521_vm0, %v6935_v35  ;;  %v6766_v4 = vmax.f32 %v6109_v28, 0.0 }
 0x8f0   : > { %7213 = vst [vmem:[%s10821_s22 + $0x528] sm:$0xff] %v6765_v1  ;;  %7369 = vst.msk [vmem:[%s10821_s22 + $0xa08] sm:$0xff] %vm1521_vm0, %v6921_v48  ;;  %v8460_v31 = vpop.f32.mrb[48].mxu0 }
 0x8f1   : > { %7214 = vst [vmem:[%s10821_s22 + $0x530] sm:$0xff] %v6766_v4  ;;  %v6546_v63 = vadd.f32 %v8460_v31, %v11445_v59  ;;  %v6112_v26 = vpop.f32.mrb[240].mxu1  ;;  %v6537_v6 = vpop.f32.mrb[49].mxu0 }
 0x8f2   : > { %v6113_v52 = vadd.f32 %v6112_v26, %v11450_v19  ;;  %v6538_v11 = vadd.f32 %v6537_v6, %v11445_v59  ;;  %v6114_v41 = vpop.f32.mrb[241].mxu1  ;;  %v8461_v10 = vpop.f32.mrb[50].mxu0 }
 0x8f3   : > { %v6956_v0 = vmax.f32 %v6546_v63, 0.0  ;;  %v6115_v58 = vadd.f32 %v6114_v41, %v11454_v16  ;;  %v6549_v38 = vadd.f32 %v8461_v10, %v11445_v59  ;;  %v6116_v7 = vpop.f32.mrb[242].mxu1  ;;  %v6540_v40 = vpop.f32.mrb[51].mxu0 }
 0x8f4   : > { %v6772_v61 = vmax.f32 %v6113_v52, 0.0  ;;  %v6942_v27 = vmax.f32 %v6538_v11, 0.0  ;;  %v6117_v53 = vadd.f32 %v6116_v7, %v11450_v19  ;;  %v6541_v44 = vadd.f32 %v6540_v40, %v11445_v59  ;;  %v6118_v18 = vpop.f32.mrb[243].mxu1 }
 0x8f5   : > { %7404 = vst.msk [vmem:[%s10821_s22 + $0xb20] sm:$0xff] %vm1521_vm0, %v6956_v0  ;;  %v6773_v8 = vmax.f32 %v6115_v58, 0.0  ;;  %v6963_v30 = vmax.f32 %v6549_v38, 0.0  ;;  %v6119_v51 = vadd.f32 %v6118_v18, %v11454_v16 }
 0x8f6   : > { %7220 = vst [vmem:[%s10821_s22 + $0x560] sm:$0xff] %v6772_v61  ;;  %7390 = vst.msk [vmem:[%s10821_s22 + $0xab0] sm:$0xff] %vm1521_vm0, %v6942_v27  ;;  %v6779_v15 = vmax.f32 %v6117_v53, 0.0  ;;  %v6949_v23 = vmax.f32 %v6541_v44, 0.0 }
 0x8f7   : > { %7221 = vst [vmem:[%s10821_s22 + $0x568] sm:$0xff] %v6773_v8  ;;  %7411 = vst.msk [vmem:[%s10821_s22 + $0xb58] sm:$0xff] %vm1521_vm0, %v6963_v30  ;;  %v6780_v43 = vmax.f32 %v6119_v51, 0.0 }
 0x8f8   : > { %7227 = vst [vmem:[%s10821_s22 + $0x598] sm:$0xff] %v6779_v15  ;;  %7397 = vst.msk [vmem:[%s10821_s22 + $0xae8] sm:$0xff] %vm1521_vm0, %v6949_v23 }
 0x8f9   : > { %7228 = vst [vmem:[%s10821_s22 + $0x5a0] sm:$0xff] %v6780_v43  ;;  %v6122_v37 = vpop.f32.mrb[244].mxu1 }
 0x8fa   : > { %v6123_v46 = vadd.f32 %v6122_v37, %v11450_v19  ;;  %v6124_v14 = vpop.f32.mrb[245].mxu1 }
 0x8fb   : > { %v6125_v57 = vadd.f32 %v6124_v14, %v11454_v16  ;;  %v6126_v21 = vpop.f32.mrb[246].mxu1 }
 0x8fc   : > { %v6786_v42 = vmax.f32 %v6123_v46, 0.0  ;;  %v6127_v60 = vadd.f32 %v6126_v21, %v11450_v19  ;;  %v6128_v62 = vpop.f32.mrb[247].mxu1 }
 0x8fd   : > { %v6787_v34 = vmax.f32 %v6125_v57, 0.0  ;;  %v6129_v32 = vadd.f32 %v6128_v62, %v11454_v16 }
 0x8fe   : > { %7234 = vst [vmem:[%s10821_s22 + $0x5d0] sm:$0xff] %v6786_v42  ;;  %v6793_v17 = vmax.f32 %v6127_v60, 0.0 }
 0x8ff   : > { %7235 = vst [vmem:[%s10821_s22 + $0x5d8] sm:$0xff] %v6787_v34  ;;  %v6794_v25 = vmax.f32 %v6129_v32, 0.0 }
 0x900   : > { %7241 = vst [vmem:[%s10821_s22 + $0x608] sm:$0xff] %v6793_v17 }
 0x901   : > { %7242 = vst [vmem:[%s10821_s22 + $0x610] sm:$0xff] %v6794_v25  ;;  %v6132_v54 = vpop.f32.mrb[248].mxu1 }
 0x902   : > { %v6133_v45 = vadd.f32 %v6132_v54, %v11450_v19  ;;  %v6134_v50 = vpop.f32.mrb[249].mxu1 }
 0x903   : > { %v6135_v12 = vadd.f32 %v6134_v50, %v11454_v16  ;;  %v6136_v33 = vpop.f32.mrb[250].mxu1 }
 0x904   : > { %v6800_v9 = vmax.f32 %v6133_v45, 0.0  ;;  %v6137_v5 = vadd.f32 %v6136_v33, %v11450_v19  ;;  %v6138_v39 = vpop.f32.mrb[251].mxu1 }
 0x905   : > { %v6801_v56 = vmax.f32 %v6135_v12, 0.0  ;;  %v6139_v36 = vadd.f32 %v6138_v39, %v11454_v16 }
 0x906   : > { %7248 = vst [vmem:[%s10821_s22 + $0x640] sm:$0xff] %v6800_v9  ;;  %v6807_v47 = vmax.f32 %v6137_v5, 0.0 }
 0x907   : > { %7249 = vst [vmem:[%s10821_s22 + $0x648] sm:$0xff] %v6801_v56  ;;  %v6808_v20 = vmax.f32 %v6139_v36, 0.0 }
 0x908   : > { %7255 = vst [vmem:[%s10821_s22 + $0x678] sm:$0xff] %v6807_v47 }
 0x909   : > { %7256 = vst [vmem:[%s10821_s22 + $0x680] sm:$0xff] %v6808_v20  ;;  %v6142_v13 = vpop.f32.mrb[252].mxu1 }
 0x90a   : > { %v6143_v2 = vadd.f32 %v6142_v13, %v11450_v19  ;;  %v6144_v55 = vpop.f32.mrb[253].mxu1 }
 0x90b   : > { %v6145_v49 = vadd.f32 %v6144_v55, %v11454_v16  ;;  %v6146_v22 = vpop.f32.mrb[254].mxu1 }
 0x90c   : > { %v6814_v29 = vmax.f32 %v6143_v2, 0.0  ;;  %v6147_v3 = vadd.f32 %v6146_v22, %v11450_v19  ;;  %v6148_v24 = vpop.f32.mrb[255].mxu1 }
 0x90d   : > { %v6815_v35 = vmax.f32 %v6145_v49, 0.0  ;;  %v6149_v28 = vadd.f32 %v6148_v24, %v11454_v16 }
 0x90e   : > { %7262 = vst [vmem:[%s10821_s22 + $0x6b0] sm:$0xff] %v6814_v29  ;;  %v6821_v1 = vmax.f32 %v6147_v3, 0.0 }
 0x90f   : > { %7263 = vst [vmem:[%s10821_s22 + $0x6b8] sm:$0xff] %v6815_v35  ;;  %v6822_v48 = vmax.f32 %v6149_v28, 0.0 }
 0x910   : > { %7269 = vst [vmem:[%s10821_s22 + $0x6e8] sm:$0xff] %v6821_v1 }
 0x911   : > { %7270 = vst [vmem:[%s10821_s22 + $0x6f0] sm:$0xff] %v6822_v48  ;;  %v6152_v4 = vpop.f32.mrb[0].mxu1 }
 0x912   : > { %v6153_v31 = vadd.f32 %v6152_v4, %v11450_v19  ;;  %v6154_v63 = vpop.f32.mrb[1].mxu1 }
 0x913   : > { %v6155_v26 = vadd.f32 %v6154_v63, %v11454_v16  ;;  %v6156_v6 = vpop.f32.mrb[2].mxu1 }
 0x914   : > { %v6828_v52 = vmax.f32 %v6153_v31, 0.0  ;;  %v6157_v11 = vadd.f32 %v6156_v6, %v11450_v19  ;;  %v6158_v41 = vpop.f32.mrb[3].mxu1 }
 0x915   : > { %v6829_v10 = vmax.f32 %v6155_v26, 0.0  ;;  %v6159_v0 = vadd.f32 %v6158_v41, %v11454_v16 }
 0x916   : > { %7276 = vst [vmem:[%s10821_s22 + $0x720] sm:$0xff] %v6828_v52  ;;  %v6835_v58 = vmax.f32 %v6157_v11, 0.0 }
 0x917   : > { %7277 = vst [vmem:[%s10821_s22 + $0x728] sm:$0xff] %v6829_v10  ;;  %v6836_v38 = vmax.f32 %v6159_v0, 0.0 }
 0x918   : > { %7283 = vst [vmem:[%s10821_s22 + $0x758] sm:$0xff] %v6835_v58 }
 0x919   : > { %7284 = vst [vmem:[%s10821_s22 + $0x760] sm:$0xff] %v6836_v38  ;;  %v6162_v7 = vpop.f32.mrb[4].mxu1 }
 0x91a   : > { %v6163_v40 = vadd.f32 %v6162_v7, %v11450_v19  ;;  %v6164_v61 = vpop.f32.mrb[5].mxu1 }
 0x91b   : > { %v6165_v27 = vadd.f32 %v6164_v61, %v11454_v16  ;;  %v6166_v53 = vpop.f32.mrb[6].mxu1 }
 0x91c   : > { %v6842_v44 = vmax.f32 %v6163_v40, 0.0  ;;  %v6167_v18 = vadd.f32 %v6166_v53, %v11450_v19  ;;  %v6168_v8 = vpop.f32.mrb[7].mxu1 }
 0x91d   : > { %v6843_v30 = vmax.f32 %v6165_v27, 0.0  ;;  %v6169_v51 = vadd.f32 %v6168_v8, %v11454_v16 }
 0x91e   : > { %7290 = vst [vmem:[%s10821_s22 + $0x790] sm:$0xff] %v6842_v44  ;;  %v6849_v15 = vmax.f32 %v6167_v18, 0.0 }
 0x91f   : > { %7291 = vst [vmem:[%s10821_s22 + $0x798] sm:$0xff] %v6843_v30  ;;  %v6850_v23 = vmax.f32 %v6169_v51, 0.0 }
 0x920   : > { %7297 = vst [vmem:[%s10821_s22 + $0x7c8] sm:$0xff] %v6849_v15 }
 0x921   : > { %7298 = vst [vmem:[%s10821_s22 + $0x7d0] sm:$0xff] %v6850_v23  ;;  %v6172_v43 = vpop.f32.mrb[8].mxu1 }
 0x922   : > { %v6173_v37 = vadd.f32 %v6172_v43, %v11450_v19  ;;  %v6174_v46 = vpop.f32.mrb[9].mxu1 }
 0x923   : > { %v6175_v14 = vadd.f32 %v6174_v46, %v11454_v16  ;;  %v6176_v57 = vpop.f32.mrb[10].mxu1 }
 0x924   : > { %v6856_v21 = vmax.f32 %v6173_v37, 0.0  ;;  %v6177_v42 = vadd.f32 %v6176_v57, %v11450_v19  ;;  %v6178_v60 = vpop.f32.mrb[11].mxu1 }
 0x925   : > { %v6857_v62 = vmax.f32 %v6175_v14, 0.0  ;;  %v6179_v34 = vadd.f32 %v6178_v60, %v11454_v16 }
 0x926   : > { %7304 = vst [vmem:[%s10821_s22 + $0x800] sm:$0xff] %v6856_v21  ;;  %v6863_v32 = vmax.f32 %v6177_v42, 0.0 }
 0x927   : > { %7305 = vst [vmem:[%s10821_s22 + $0x808] sm:$0xff] %v6857_v62  ;;  %v6864_v17 = vmax.f32 %v6179_v34, 0.0 }
 0x928   : > { %7311 = vst [vmem:[%s10821_s22 + $0x838] sm:$0xff] %v6863_v32 }
 0x929   : > { %7312 = vst [vmem:[%s10821_s22 + $0x840] sm:$0xff] %v6864_v17  ;;  %v6182_v25 = vpop.f32.mrb[12].mxu1 }
 0x92a   : > { %v6183_v54 = vadd.f32 %v6182_v25, %v11450_v19  ;;  %v6184_v45 = vpop.f32.mrb[13].mxu1 }
 0x92b   : > { %v6185_v50 = vadd.f32 %v6184_v45, %v11454_v16  ;;  %v6186_v12 = vpop.f32.mrb[14].mxu1 }
 0x92c   : > { %v6870_v33 = vmax.f32 %v6183_v54, 0.0  ;;  %v6187_v9 = vadd.f32 %v6186_v12, %v11450_v19  ;;  %v6188_v5 = vpop.f32.mrb[15].mxu1 }
 0x92d   : > { %v6871_v39 = vmax.f32 %v6185_v50, 0.0  ;;  %v6189_v56 = vadd.f32 %v6188_v5, %v11454_v16 }
 0x92e   : > { %7318 = vst [vmem:[%s10821_s22 + $0x870] sm:$0xff] %v6870_v33  ;;  %v6877_v36 = vmax.f32 %v6187_v9, 0.0 }
 0x92f   : > { %7319 = vst [vmem:[%s10821_s22 + $0x878] sm:$0xff] %v6871_v39  ;;  %v6878_v47 = vmax.f32 %v6189_v56, 0.0 }
 0x930   : > { %7325 = vst [vmem:[%s10821_s22 + $0x8a8] sm:$0xff] %v6877_v36 }
 0x931   : > { %7326 = vst [vmem:[%s10821_s22 + $0x8b0] sm:$0xff] %v6878_v47  ;;  %v6192_v20 = vpop.f32.mrb[16].mxu1 }
 0x932   : > { %v6193_v13 = vadd.f32 %v6192_v20, %v11450_v19  ;;  %v6194_v2 = vpop.f32.mrb[17].mxu1 }
 0x933   : > { %v6195_v55 = vadd.f32 %v6194_v2, %v11454_v16  ;;  %v6196_v49 = vpop.f32.mrb[18].mxu1 }
 0x934   : > { %v6884_v22 = vmax.f32 %v6193_v13, 0.0  ;;  %v6197_v29 = vadd.f32 %v6196_v49, %v11450_v19  ;;  %v6198_v3 = vpop.f32.mrb[19].mxu1 }
 0x935   : > { %v6885_v24 = vmax.f32 %v6195_v55, 0.0  ;;  %v6199_v35 = vadd.f32 %v6198_v3, %v11454_v16 }
 0x936   : > { %7332 = vst [vmem:[%s10821_s22 + $0x8e0] sm:$0xff] %v6884_v22  ;;  %v6891_v28 = vmax.f32 %v6197_v29, 0.0 }
 0x937   : > { %7333 = vst [vmem:[%s10821_s22 + $0x8e8] sm:$0xff] %v6885_v24  ;;  %v6892_v1 = vmax.f32 %v6199_v35, 0.0 }
 0x938   : > { %7339 = vst [vmem:[%s10821_s22 + $0x918] sm:$0xff] %v6891_v28 }
 0x939   : > { %7340 = vst [vmem:[%s10821_s22 + $0x920] sm:$0xff] %v6892_v1  ;;  %v6202_v48 = vpop.f32.mrb[20].mxu1 }
 0x93a   : > { %v6203_v4 = vadd.f32 %v6202_v48, %v11450_v19  ;;  %v6204_v31 = vpop.f32.mrb[21].mxu1 }
 0x93b   : > { %v6205_v63 = vadd.f32 %v6204_v31, %v11454_v16  ;;  %v6206_v26 = vpop.f32.mrb[22].mxu1 }
 0x93c   : > { %v6898_v6 = vmax.f32 %v6203_v4, 0.0  ;;  %v6207_v52 = vadd.f32 %v6206_v26, %v11450_v19  ;;  %v6208_v11 = vpop.f32.mrb[23].mxu1 }
 0x93d   : > { %v6899_v41 = vmax.f32 %v6205_v63, 0.0  ;;  %v6209_v10 = vadd.f32 %v6208_v11, %v11454_v16 }
 0x93e   : > { %7346 = vst [vmem:[%s10821_s22 + $0x950] sm:$0xff] %v6898_v6  ;;  %v6905_v0 = vmax.f32 %v6207_v52, 0.0 }
 0x93f   : > { %7347 = vst [vmem:[%s10821_s22 + $0x958] sm:$0xff] %v6899_v41  ;;  %v6906_v58 = vmax.f32 %v6209_v10, 0.0 }
 0x940   : > { %7353 = vst [vmem:[%s10821_s22 + $0x988] sm:$0xff] %v6905_v0 }
 0x941   : > { %7354 = vst [vmem:[%s10821_s22 + $0x990] sm:$0xff] %v6906_v58  ;;  %v6212_v38 = vpop.f32.mrb[24].mxu1 }
 0x942   : > { %v6213_v7 = vadd.f32 %v6212_v38, %v11450_v19  ;;  %v6214_v40 = vpop.f32.mrb[25].mxu1 }
 0x943   : > { %v6215_v61 = vadd.f32 %v6214_v40, %v11454_v16  ;;  %v6216_v27 = vpop.f32.mrb[26].mxu1 }
 0x944   : > { %v6912_v53 = vmax.f32 %v6213_v7, 0.0  ;;  %v6217_v44 = vadd.f32 %v6216_v27, %v11450_v19  ;;  %v6218_v18 = vpop.f32.mrb[27].mxu1 }
 0x945   : > { %v6913_v8 = vmax.f32 %v6215_v61, 0.0  ;;  %v6219_v30 = vadd.f32 %v6218_v18, %v11454_v16 }
 0x946   : > { %7360 = vst [vmem:[%s10821_s22 + $0x9c0] sm:$0xff] %v6912_v53  ;;  %v6919_v51 = vmax.f32 %v6217_v44, 0.0 }
 0x947   : > { %7361 = vst [vmem:[%s10821_s22 + $0x9c8] sm:$0xff] %v6913_v8  ;;  %v6920_v15 = vmax.f32 %v6219_v30, 0.0 }
 0x948   : > { %7367 = vst [vmem:[%s10821_s22 + $0x9f8] sm:$0xff] %v6919_v51 }
 0x949   : > { %7368 = vst [vmem:[%s10821_s22 + $0xa00] sm:$0xff] %v6920_v15  ;;  %v6222_v23 = vpop.f32.mrb[28].mxu1 }
 0x94a   : > { %v6223_v43 = vadd.f32 %v6222_v23, %v11450_v19  ;;  %v6224_v37 = vpop.f32.mrb[29].mxu1 }
 0x94b   : > { %v6225_v46 = vadd.f32 %v6224_v37, %v11454_v16  ;;  %v6226_v14 = vpop.f32.mrb[30].mxu1 }
 0x94c   : > { %v6926_v57 = vmax.f32 %v6223_v43, 0.0  ;;  %v6227_v21 = vadd.f32 %v6226_v14, %v11450_v19  ;;  %v6228_v42 = vpop.f32.mrb[31].mxu1 }
 0x94d   : > { %v6927_v60 = vmax.f32 %v6225_v46, 0.0  ;;  %v6229_v62 = vadd.f32 %v6228_v42, %v11454_v16 }
 0x94e   : > { %7374 = vst [vmem:[%s10821_s22 + $0xa30] sm:$0xff] %v6926_v57  ;;  %v6933_v34 = vmax.f32 %v6227_v21, 0.0 }
 0x94f   : > { %7375 = vst [vmem:[%s10821_s22 + $0xa38] sm:$0xff] %v6927_v60  ;;  %v6934_v32 = vmax.f32 %v6229_v62, 0.0 }
 0x950   : > { %7381 = vst [vmem:[%s10821_s22 + $0xa68] sm:$0xff] %v6933_v34 }
 0x951   : > { %7382 = vst [vmem:[%s10821_s22 + $0xa70] sm:$0xff] %v6934_v32  ;;  %v6232_v17 = vpop.f32.mrb[32].mxu1 }
 0x952   : > { %v6233_v25 = vadd.f32 %v6232_v17, %v11450_v19  ;;  %v6234_v54 = vpop.f32.mrb[33].mxu1 }
 0x953   : > { %v6235_v45 = vadd.f32 %v6234_v54, %v11454_v16  ;;  %v6236_v50 = vpop.f32.mrb[34].mxu1 }
 0x954   : > { %v6940_v12 = vmax.f32 %v6233_v25, 0.0  ;;  %v6237_v33 = vadd.f32 %v6236_v50, %v11450_v19  ;;  %v6238_v9 = vpop.f32.mrb[35].mxu1 }
 0x955   : > { %v6941_v5 = vmax.f32 %v6235_v45, 0.0  ;;  %v6239_v39 = vadd.f32 %v6238_v9, %v11454_v16 }
 0x956   : > { %7388 = vst [vmem:[%s10821_s22 + $0xaa0] sm:$0xff] %v6940_v12  ;;  %v6947_v56 = vmax.f32 %v6237_v33, 0.0 }
 0x957   : > { %7389 = vst [vmem:[%s10821_s22 + $0xaa8] sm:$0xff] %v6941_v5  ;;  %v6948_v36 = vmax.f32 %v6239_v39, 0.0 }
 0x958   : > { %7395 = vst [vmem:[%s10821_s22 + $0xad8] sm:$0xff] %v6947_v56 }
 0x959   : > { %7396 = vst [vmem:[%s10821_s22 + $0xae0] sm:$0xff] %v6948_v36  ;;  %v6242_v47 = vpop.f32.mrb[36].mxu1 }
 0x95a   : > { %v6243_v20 = vadd.f32 %v6242_v47, %v11450_v19  ;;  %v6244_v13 = vpop.f32.mrb[37].mxu1 }
 0x95b   : > { %v6245_v2 = vadd.f32 %v6244_v13, %v11454_v16  ;;  %v6246_v55 = vpop.f32.mrb[38].mxu1 }
 0x95c   : > { %v6954_v49 = vmax.f32 %v6243_v20, 0.0  ;;  %v6247_v22 = vadd.f32 %v6246_v55, %v11450_v19  ;;  %v6248_v29 = vpop.f32.mrb[39].mxu1 }
 0x95d   : > { %v6955_v3 = vmax.f32 %v6245_v2, 0.0  ;;  %v6249_v24 = vadd.f32 %v6248_v29, %v11454_v16 }
 0x95e   : > { %7402 = vst [vmem:[%s10821_s22 + $0xb10] sm:$0xff] %v6954_v49  ;;  %v6961_v35 = vmax.f32 %v6247_v22, 0.0 }
 0x95f   : > { %7403 = vst [vmem:[%s10821_s22 + $0xb18] sm:$0xff] %v6955_v3  ;;  %v6962_v28 = vmax.f32 %v6249_v24, 0.0 }
 0x960   : > { %7409 = vst [vmem:[%s10821_s22 + $0xb48] sm:$0xff] %v6961_v35 }
 0x961   : > { %7410 = vst [vmem:[%s10821_s22 + $0xb50] sm:$0xff] %v6962_v28  ;;  %v6252_v1 = vpop.f32.mrb[40].mxu1 }
 0x962   : > { %v6253_v48 = vadd.f32 %v6252_v1, %v11450_v19  ;;  %v6254_v4 = vpop.f32.mrb[41].mxu1 }
 0x963   : > { %v6255_v31 = vadd.f32 %v6254_v4, %v11454_v16  ;;  %v6256_v63 = vpop.f32.mrb[42].mxu1 }
 0x964   : > { %v6968_v26 = vmax.f32 %v6253_v48, 0.0  ;;  %v6257_v6 = vadd.f32 %v6256_v63, %v11450_v19  ;;  %v6258_v52 = vpop.f32.mrb[43].mxu1 }
 0x965   : > { %v6969_v11 = vmax.f32 %v6255_v31, 0.0  ;;  %v6259_v41 = vadd.f32 %v6258_v52, %v11454_v16 }
 0x966   : > { %7416 = vst [vmem:[%s10821_s22 + $0xb80] sm:$0xff] %v6968_v26  ;;  %v6975_v10 = vmax.f32 %v6257_v6, 0.0 }
 0x967   : > { %7417 = vst [vmem:[%s10821_s22 + $0xb88] sm:$0xff] %v6969_v11  ;;  %v6976_v0 = vmax.f32 %v6259_v41, 0.0 }
 0x968   : > { %7423 = vst [vmem:[%s10821_s22 + $0xbb8] sm:$0xff] %v6975_v10 }
 0x969   : > { %7424 = vst [vmem:[%s10821_s22 + $0xbc0] sm:$0xff] %v6976_v0  ;;  %v6262_v58 = vpop.f32.mrb[44].mxu1 }
 0x96a   : > { %v6263_v38 = vadd.f32 %v6262_v58, %v11450_v19  ;;  %v6264_v7 = vpop.f32.mrb[45].mxu1 }
 0x96b   : > { %v6265_v40 = vadd.f32 %v6264_v7, %v11454_v16  ;;  %v6266_v61 = vpop.f32.mrb[46].mxu1 }
 0x96c   : > { %v6982_v27 = vmax.f32 %v6263_v38, 0.0  ;;  %v6267_v53 = vadd.f32 %v6266_v61, %v11450_v19  ;;  %v6268_v44 = vpop.f32.mrb[47].mxu1 }
 0x96d   : > { %v6983_v18 = vmax.f32 %v6265_v40, 0.0  ;;  %v6269_v8 = vadd.f32 %v6268_v44, %v11454_v16 }
 0x96e   : > { %7430 = vst [vmem:[%s10821_s22 + $0xbf0] sm:$0xff] %v6982_v27  ;;  %v6989_v30 = vmax.f32 %v6267_v53, 0.0 }
 0x96f   : > { %7431 = vst [vmem:[%s10821_s22 + $0xbf8] sm:$0xff] %v6983_v18  ;;  %v6990_v51 = vmax.f32 %v6269_v8, 0.0 }
 0x970   : > { %7437 = vst [vmem:[%s10821_s22 + $0xc28] sm:$0xff] %v6989_v30 }
 0x971   : > { %7438 = vst [vmem:[%s10821_s22 + $0xc30] sm:$0xff] %v6990_v51  ;;  %v6272_v15 = vpop.f32.mrb[48].mxu1 }
 0x972   : > { %v6273_v23 = vadd.f32 %v6272_v15, %v11450_v19  ;;  %v6274_v43 = vpop.f32.mrb[49].mxu1 }
 0x973   : > { %v6275_v37 = vadd.f32 %v6274_v43, %v11454_v16  ;;  %v6276_v46 = vpop.f32.mrb[50].mxu1 }
 0x974   : > { %v6996_v14 = vmax.f32 %v6273_v23, 0.0  ;;  %v6277_v57 = vadd.f32 %v6276_v46, %v11450_v19  ;;  %v6278_v21 = vpop.f32.mrb[51].mxu1 }
 0x975   : > { %v6997_v42 = vmax.f32 %v6275_v37, 0.0  ;;  %v6279_v60 = vadd.f32 %v6278_v21, %v11454_v16 }
 0x976   : > { %7444 = vst [vmem:[%s10821_s22 + $0xc60] sm:$0xff] %v6996_v14  ;;  %v7003_v62 = vmax.f32 %v6277_v57, 0.0 }
 0x977   : > { %7445 = vst [vmem:[%s10821_s22 + $0xc68] sm:$0xff] %v6997_v42  ;;  %v7004_v34 = vmax.f32 %v6279_v60, 0.0 }
 0x978   : > { %7451 = vst [vmem:[%s10821_s22 + $0xc98] sm:$0xff] %v7003_v62 }
 0x979   : > { %7452 = vst [vmem:[%s10821_s22 + $0xca0] sm:$0xff] %v7004_v34  ;;  %v6282_v32 = vpop.f32.mrb[52].mxu1 }
 0x97a   : > { %v6283_v17 = vadd.f32 %v6282_v32, %v11450_v19  ;;  %v6284_v25 = vpop.f32.mrb[53].mxu1 }
 0x97b   : > { %v6285_v54 = vadd.f32 %v6284_v25, %v11454_v16  ;;  %v6286_v45 = vpop.f32.mrb[54].mxu1 }
 0x97c   : > { %v7010_v50 = vmax.f32 %v6283_v17, 0.0  ;;  %v6287_v12 = vadd.f32 %v6286_v45, %v11450_v19  ;;  %v6288_v33 = vpop.f32.mrb[55].mxu1 }
 0x97d   : > { %v7011_v9 = vmax.f32 %v6285_v54, 0.0  ;;  %v6289_v5 = vadd.f32 %v6288_v33, %v11454_v16 }
 0x97e   : > { %7458 = vst [vmem:[%s10821_s22 + $0xcd0] sm:$0xff] %v7010_v50  ;;  %v7017_v39 = vmax.f32 %v6287_v12, 0.0 }
 0x97f   : > { %7459 = vst [vmem:[%s10821_s22 + $0xcd8] sm:$0xff] %v7011_v9  ;;  %v7018_v56 = vmax.f32 %v6289_v5, 0.0 }
 0x980   : > { %7465 = vst [vmem:[%s10821_s22 + $0xd08] sm:$0xff] %v7017_v39 }
 0x981   : > { %7466 = vst [vmem:[%s10821_s22 + $0xd10] sm:$0xff] %v7018_v56  ;;  %v6292_v36 = vpop.f32.mrb[56].mxu1 }
 0x982   : > { %v6293_v47 = vadd.f32 %v6292_v36, %v11450_v19  ;;  %v6294_v20 = vpop.f32.mrb[57].mxu1 }
 0x983   : > { %v6295_v13 = vadd.f32 %v6294_v20, %v11454_v16  ;;  %v6296_v2 = vpop.f32.mrb[58].mxu1 }
 0x984   : > { %v7024_v55 = vmax.f32 %v6293_v47, 0.0  ;;  %v6297_v49 = vadd.f32 %v6296_v2, %v11450_v19  ;;  %v6298_v22 = vpop.f32.mrb[59].mxu1 }
 0x985   : > { %v7025_v29 = vmax.f32 %v6295_v13, 0.0  ;;  %v6299_v3 = vadd.f32 %v6298_v22, %v11454_v16 }
 0x986   : > { %7472 = vst [vmem:[%s10821_s22 + $0xd40] sm:$0xff] %v7024_v55  ;;  %v7031_v24 = vmax.f32 %v6297_v49, 0.0 }
 0x987   : > { %7473 = vst [vmem:[%s10821_s22 + $0xd48] sm:$0xff] %v7025_v29  ;;  %v7032_v35 = vmax.f32 %v6299_v3, 0.0 }
 0x988   : > { %7479 = vst [vmem:[%s10821_s22 + $0xd78] sm:$0xff] %v7031_v24 }
 0x989   : > { %7480 = vst [vmem:[%s10821_s22 + $0xd80] sm:$0xff] %v7032_v35  ;;  %v6302_v28 = vpop.f32.mrb[60].mxu1 }
 0x98a   : > { %v6303_v1 = vadd.f32 %v6302_v28, %v11450_v19  ;;  %v6304_v48 = vpop.f32.mrb[61].mxu1 }
 0x98b   : > { %v6305_v4 = vadd.f32 %v6304_v48, %v11454_v16  ;;  %v6306_v31 = vpop.f32.mrb[62].mxu1 }
 0x98c   : > { %v7038_v63 = vmax.f32 %v6303_v1, 0.0  ;;  %v6307_v26 = vadd.f32 %v6306_v31, %v11450_v19  ;;  %v6308_v6 = vpop.f32.mrb[63].mxu1 }
 0x98d   : > { %v7039_v52 = vmax.f32 %v6305_v4, 0.0  ;;  %v6309_v11 = vadd.f32 %v6308_v6, %v11454_v16 }
 0x98e   : > { %7486 = vst [vmem:[%s10821_s22 + $0xdb0] sm:$0xff] %v7038_v63  ;;  %v7045_v41 = vmax.f32 %v6307_v26, 0.0 }
 0x98f   : > { %7487 = vst [vmem:[%s10821_s22 + $0xdb8] sm:$0xff] %v7039_v52  ;;  %v7046_v10 = vmax.f32 %v6309_v11, 0.0 }
 0x990   : > { %7493 = vst [vmem:[%s10821_s22 + $0xde8] sm:$0xff] %v7045_v41 }
 0x991   : > { %7494 = vst [vmem:[%s10821_s22 + $0xdf0] sm:$0xff] %v7046_v10  ;;  %v8464_v0 = vpop.f32.mrb[64].mxu1 }
 0x992   : > { %v6562_v58 = vadd.f32 %v8464_v0, %v11445_v59  ;;  %v6553_v38 = vpop.f32.mrb[65].mxu1 }
 0x993   : > { %v6554_v19 = vadd.f32 %v6553_v38, %v11445_v59  ;;  %v8465_v7 = vpop.f32.mrb[66].mxu1 }
 0x994   : > { %v6984_v40 = vmax.f32 %v6562_v58, 0.0  ;;  %v6565_v16 = vadd.f32 %v8465_v7, %v11445_v59  ;;  %v6556_v61 = vpop.f32.mrb[67].mxu1 }
 0x995   : > { %v6970_v27 = vmax.f32 %v6554_v19, 0.0  ;;  %v6557_v53 = vadd.f32 %v6556_v61, %v11445_v59 }
 0x996   : > { %7432 = vst.msk [vmem:[%s10821_s22 + $0xc00] sm:$0xff] %vm1521_vm0, %v6984_v40  ;;  %v6991_v44 = vmax.f32 %v6565_v16, 0.0 }
 0x997   : > { %7418 = vst.msk [vmem:[%s10821_s22 + $0xb90] sm:$0xff] %vm1521_vm0, %v6970_v27  ;;  %v6977_v18 = vmax.f32 %v6557_v53, 0.0 }
 0x998   : > { %7439 = vst.msk [vmem:[%s10821_s22 + $0xc38] sm:$0xff] %vm1521_vm0, %v6991_v44 }
 0x999   : > { %7425 = vst.msk [vmem:[%s10821_s22 + $0xbc8] sm:$0xff] %vm1521_vm0, %v6977_v18  ;;  %v8468_v8 = vpop.f32.mrb[68].mxu1 }
 0x99a   : > { %v6578_v30 = vadd.f32 %v8468_v8, %v11445_v59  ;;  %v6569_v51 = vpop.f32.mrb[69].mxu1 }
 0x99b   : > { %v6570_v15 = vadd.f32 %v6569_v51, %v11445_v59  ;;  %v8469_v23 = vpop.f32.mrb[70].mxu1 }
 0x99c   : > { %v7012_v43 = vmax.f32 %v6578_v30, 0.0  ;;  %v6581_v37 = vadd.f32 %v8469_v23, %v11445_v59  ;;  %v6572_v46 = vpop.f32.mrb[71].mxu1 }
 0x99d   : > { %v6998_v14 = vmax.f32 %v6570_v15, 0.0  ;;  %v6573_v57 = vadd.f32 %v6572_v46, %v11445_v59 }
 0x99e   : > { %7460 = vst.msk [vmem:[%s10821_s22 + $0xce0] sm:$0xff] %vm1521_vm0, %v7012_v43  ;;  %v7019_v21 = vmax.f32 %v6581_v37, 0.0 }
 0x99f   : > { %7446 = vst.msk [vmem:[%s10821_s22 + $0xc70] sm:$0xff] %vm1521_vm0, %v6998_v14  ;;  %v7005_v42 = vmax.f32 %v6573_v57, 0.0 }
 0x9a0   : > { %7467 = vst.msk [vmem:[%s10821_s22 + $0xd18] sm:$0xff] %vm1521_vm0, %v7019_v21 }
 0x9a1   : > { %7453 = vst.msk [vmem:[%s10821_s22 + $0xca8] sm:$0xff] %vm1521_vm0, %v7005_v42  ;;  %v8472_v60 = vpop.f32.mrb[72].mxu1 }
 0x9a2   : > { %v6594_v62 = vadd.f32 %v8472_v60, %v11445_v59  ;;  %v6585_v34 = vpop.f32.mrb[73].mxu1 }
 0x9a3   : > { %v6586_v32 = vadd.f32 %v6585_v34, %v11445_v59  ;;  %v8473_v17 = vpop.f32.mrb[74].mxu1 }
 0x9a4   : > { %v7040_v25 = vmax.f32 %v6594_v62, 0.0  ;;  %v6597_v54 = vadd.f32 %v8473_v17, %v11445_v59  ;;  %v6588_v45 = vpop.f32.mrb[75].mxu1 }
 0x9a5   : > { %v7026_v50 = vmax.f32 %v6586_v32, 0.0  ;;  %v6589_v12 = vadd.f32 %v6588_v45, %v11445_v59 }
 0x9a6   : > { %7488 = vst.msk [vmem:[%s10821_s22 + $0xdc0] sm:$0xff] %vm1521_vm0, %v7040_v25  ;;  %v7047_v33 = vmax.f32 %v6597_v54, 0.0 }
 0x9a7   : > { %7474 = vst.msk [vmem:[%s10821_s22 + $0xd50] sm:$0xff] %vm1521_vm0, %v7026_v50  ;;  %v7033_v9 = vmax.f32 %v6589_v12, 0.0 }
 0x9a8   : > { %7495 = vst.msk [vmem:[%s10821_s22 + $0xdf8] sm:$0xff] %vm1521_vm0, %v7047_v33 }
 0x9a9   : > { %7481 = vst.msk [vmem:[%s10821_s22 + $0xd88] sm:$0xff] %vm1521_vm0, %v7033_v9 }
 0x9aa PF: > { %s23_s25 = sadd.s32 1, %s8973_s25  }
 0x9ab   : > { %p20_p4 = scmp.ge.s32.totalorder %s23_s25, 4  }
 0x9ad   :  { %22 = sbr.rel (!%p20_p4) target bundleno = 1 (0x1), region = 102 }

</bundles_post_ra>
